<compile_context>
chip_gen: v7x
topology: tpu7x:2x2x1
jax: 0.10.0
libtpu: 0.0.40
codegen_flags: <defaults>
</compile_context>

<pallas_src>
import numpy as np
import jax
import jax.numpy as jnp
from jax import lax
from jax.experimental import pallas as pl
from jax.experimental.pallas import tpu as pltpu


# ----------------------------------------------------------------------------
# The fused encoder kernel (single invocation, everything VMEM-resident)
# ----------------------------------------------------------------------------
def _encoder_kernel(x_ref,
                    d1m_ref, d1b_ref, d2m_ref, d2b_ref,
                    d3m_ref, d3b_ref, d4m_ref, d4b_ref,
                    m1s_ref, b1s_ref, m2s_ref, b2s_ref, m3s_ref, b3s_ref,
                    x1_ref, x2_ref, x3_ref, out_ref):
    def mm(a_bf16, w_bf16, b_f32):
        return jnp.dot(a_bf16, w_bf16,
                       preferred_element_type=jnp.float32) + b_f32

    def relu_bf16(v):
        return jnp.maximum(v, 0.0).astype(jnp.bfloat16)

    # --- four downsampling convs as dense GEMMs (ReLU fused into consumer) ---
    x1 = mm(x_ref[...], d1m_ref[...], d1b_ref[...])          # (N, C1*H1*W1)
    x1_ref[...] = x1
    x2 = mm(relu_bf16(x1), d2m_ref[...], d2b_ref[...])        # (N, C2*H2*W2)
    x2_ref[...] = x2
    x3 = mm(relu_bf16(x2), d3m_ref[...], d3b_ref[...])        # (N, C3*H3*W3)
    x3_ref[...] = x3
    x4 = mm(relu_bf16(x3), d4m_ref[...], d4b_ref[...])        # (N, C4*H4*W4)

    # --- 16 ResBlocks, fully unrolled, h carried as a loop value ------------
    def res_block(i, h):
        t = jnp.maximum(mm(h.astype(jnp.bfloat16), m1s_ref[i], b1s_ref[i]), 0.0)
        t = jnp.maximum(mm(t.astype(jnp.bfloat16), m2s_ref[i], b2s_ref[i]), 0.0)
        t = mm(t.astype(jnp.bfloat16), m3s_ref[i], b3s_ref[i])
        return h + t                                          # res_scale = 1

    h = jnp.maximum(x4, 0.0)                                  # body input
    h = lax.fori_loop(0, m1s_ref.shape[0], res_block, h, unroll=True)

    out_ref[...] = h + x4                                     # outer residual


# ----------------------------------------------------------------------------
# Host-side parameter preparation (runs once, outside jit)
# ----------------------------------------------------------------------------
def _conv_as_dense_nchw(w_hwio, h_in, w_in, stride, pad):
    """Lower a conv (HWIO weights) on a fixed h_in x w_in map to a dense
    (Cin*Hin*Win, Cout*Hout*Wout) matrix acting on NCHW-flattened activations."""
    w = np.asarray(w_hwio, np.float32)
    kh, kw, ci, co = w.shape
    h_out = (h_in + 2 * pad - kh) // stride + 1
    w_out = (w_in + 2 * pad - kw) // stride + 1
    m = np.zeros((ci * h_in * w_in, co * h_out * w_out), np.float32)
    for oy in range(h_out):
        for ox in range(w_out):
            osp = oy * w_out + ox
            for dy in range(kh):
                for dx in range(kw):
                    iy = oy * stride + dy - pad
                    ix = ox * stride + dx - pad
                    if 0 <= iy < h_in and 0 <= ix < w_in:
                        isp = iy * w_in + ix
                        m[isp::h_in * w_in, osp::h_out * w_out] += w[dy, dx]
    return m, h_out, w_out


def prepare_params(params, h_in, w_in):
    prep = {}
    shapes = []
    h, w = h_in, w_in
    for name, stride, pad in (("d1", 1, 3), ("d2", 2, 1),
                              ("d3", 2, 1), ("d4", 2, 1)):
        wgt = np.asarray(params[name + "_w"], np.float32)
        co = wgt.shape[-1]
        m, h, w = _conv_as_dense_nchw(wgt, h, w, stride, pad)
        prep[name + "_m"] = jnp.asarray(m).astype(jnp.bfloat16)
        prep[name + "_b"] = jnp.asarray(
            np.repeat(np.asarray(params[name + "_b"], np.float32), h * w)[None, :])
        shapes.append((co, h, w))

    m1s, b1s, m2s, b2s, m3s, b3s = [], [], [], [], [], []
    for p in params["body"]:
        m1, _, _ = _conv_as_dense_nchw(p["w1"], h, w, 1, 0)
        m2, _, _ = _conv_as_dense_nchw(p["w2"], h, w, 1, 1)
        m3, _, _ = _conv_as_dense_nchw(p["w3"], h, w, 1, 0)
        m1s.append(m1)
        m2s.append(m2)
        m3s.append(m3)
        b1s.append(np.repeat(np.asarray(p["b1"], np.float32), h * w))
        b2s.append(np.repeat(np.asarray(p["b2"], np.float32), h * w))
        b3s.append(np.repeat(np.asarray(p["b3"], np.float32), h * w))
    prep["m1s"] = jnp.asarray(np.stack(m1s)).astype(jnp.bfloat16)   # (16, F, G)
    prep["m2s"] = jnp.asarray(np.stack(m2s)).astype(jnp.bfloat16)   # (16, G, G)
    prep["m3s"] = jnp.asarray(np.stack(m3s)).astype(jnp.bfloat16)   # (16, G, F)
    prep["b1s"] = jnp.asarray(np.stack(b1s))[:, None, :]            # (16, 1, G)
    prep["b2s"] = jnp.asarray(np.stack(b2s))[:, None, :]
    prep["b3s"] = jnp.asarray(np.stack(b3s))[:, None, :]            # (16, 1, F)
    return prep, tuple(shapes)


# ----------------------------------------------------------------------------
# Encoder_Semi forward (Pallas path): exactly ONE pallas_call per forward.
# ----------------------------------------------------------------------------
def encoder_semi_forward(x_nchw, prep, shapes):
    n, ci, h, w = x_nchw.shape
    assert ci * h * w == prep["d1_m"].shape[0], \
        "input shape does not match the shape the dense weights were built for"
    x_flat = x_nchw.reshape(n, ci * h * w).astype(jnp.bfloat16)
    out_shape = tuple(jax.ShapeDtypeStruct((n, c * hh * ww), jnp.float32)
                      for c, hh, ww in shapes)
    flats = pl.pallas_call(
        _encoder_kernel,
        out_shape=out_shape,
        compiler_params=pltpu.CompilerParams(vmem_limit_bytes=32 * 1024 * 1024),
    )(x_flat,
      prep["d1_m"], prep["d1_b"], prep["d2_m"], prep["d2_b"],
      prep["d3_m"], prep["d3_b"], prep["d4_m"], prep["d4_b"],
      prep["m1s"], prep["b1s"], prep["m2s"], prep["b2s"],
      prep["m3s"], prep["b3s"])
    # NCHW-flat layout -> reshape straight back to NCHW (no transposes).
    return [f.reshape(n, c, hh, ww) for f, (c, hh, ww) in zip(flats, shapes)]


# ----------------------------------------------------------------------------
# Pure-JAX reference (lax.conv, same bf16-input / f32-accumulate arithmetic)
# ----------------------------------------------------------------------------
def _ref_conv(x, w, b, stride, pad, relu_in=False):
    if relu_in:
        x = jnp.maximum(x, 0.0)
    y = lax.conv_general_dilated(
        x.astype(jnp.bfloat16), w.astype(jnp.bfloat16),
        (stride, stride), [(pad, pad), (pad, pad)],
        dimension_numbers=("NHWC", "HWIO", "NHWC"),
        preferred_element_type=jnp.float32)
    return y + b


def encoder_semi_ref(x_nchw, params):
    x = jnp.transpose(x_nchw, (0, 2, 3, 1))
    x1 = _ref_conv(x, params["d1_w"], params["d1_b"], 1, 3)
    x2 = _ref_conv(x1, params["d2_w"], params["d2_b"], 2, 1, relu_in=True)
    x3 = _ref_conv(x2, params["d3_w"], params["d3_b"], 2, 1, relu_in=True)
    x4 = _ref_conv(x3, params["d4_w"], params["d4_b"], 2, 1, relu_in=True)
    h = jnp.maximum(x4, 0.0)
    for p in params["body"]:
        r = _ref_conv(h, p["w1"], p["b1"], 1, 0)
        r = _ref_conv(r, p["w2"], p["b2"], 1, 1, relu_in=True)
        r = _ref_conv(r, p["w3"], p["b3"], 1, 0, relu_in=True)
        h = r + h
    out = h + x4
    to_nchw = lambda t: jnp.transpose(t, (0, 3, 1, 2))
    return [to_nchw(x1), to_nchw(x2), to_nchw(x3), to_nchw(out)]


# ----------------------------------------------------------------------------
# Deterministic parameter init (shapes from Encoder_Semi.__init__)
# ----------------------------------------------------------------------------
def init_params(key, channel=4, in_ch=3, res_blocks=16):
    def conv_init(k, kh, kw, cin, cout):
        kw_, kb_ = jax.random.split(k)
        scale = 1.0 / jnp.sqrt(jnp.float32(kh * kw * cin))
        w = jax.random.normal(kw_, (kh, kw, cin, cout), jnp.float32) * scale
        b = jax.random.normal(kb_, (cout,), jnp.float32) * 0.1
        return w, b

    keys = jax.random.split(key, 4 + 3 * res_blocks)
    c = channel
    params = {}
    params["d1_w"], params["d1_b"] = conv_init(keys[0], 7, 7, in_ch, c)
    params["d2_w"], params["d2_b"] = conv_init(keys[1], 4, 4, c, 2 * c)
    params["d3_w"], params["d3_b"] = conv_init(keys[2], 4, 4, 2 * c, 4 * c)
    params["d4_w"], params["d4_b"] = conv_init(keys[3], 4, 4, 4 * c, 8 * c)
    nf = 8 * c
    body = []
    for i in range(res_blocks):
        w1, b1 = conv_init(keys[4 + 3 * i], 1, 1, nf, nf // 4)
        w2, b2 = conv_init(keys[5 + 3 * i], 3, 3, nf // 4, nf // 4)
        w3, b3 = conv_init(keys[6 + 3 * i], 1, 1, nf // 4, nf)
        body.append({"w1": w1, "b1": b1, "w2": w2, "b2": b2,
                     "w3": w3, "b3": b3})
    params["body"] = body
    return params


if __name__ == "__main__":
    key = jax.random.PRNGKey(0)
    k_param, k_x = jax.random.split(key)

    channel = 4          # Encoder_Semi(channel=4), 3 input channels
    params = init_params(k_param, channel=channel, in_ch=3, res_blocks=16)

    # PyTorch-style NCHW input
    x = jax.random.normal(k_x, (2, 3, 16, 16), jnp.float32)
    h_in, w_in = x.shape[2], x.shape[3]
    assert h_in % 8 == 0 and w_in % 8 == 0, \
        "three stride-2 convs require H, W divisible by 8"

    prep, shapes = prepare_params(params, h_in, w_in)

    fwd = jax.jit(encoder_semi_forward, static_argnames="shapes")
    outs = jax.block_until_ready(fwd(x, prep, shapes=shapes))

    # Sanity-check against a pure-JAX lax.conv reference (same bf16 arithmetic).
    refs = jax.block_until_ready(jax.jit(encoder_semi_ref)(x, params))
    expected_shapes = [(2, channel, 16, 16), (2, 2 * channel, 8, 8),
                       (2, 4 * channel, 4, 4), (2, 8 * channel, 2, 2)]
    for o, r, s in zip(outs, refs, expected_shapes):
        assert o.shape == s, (o.shape, s)
        assert jnp.allclose(o, r, rtol=1e-2, atol=1e-2), \
            ("mismatch vs reference", float(jnp.max(jnp.abs(o - r))))

    print("KERNEL_OK")
</pallas_src>

<mosaic_0001>
module attributes {stable_mosaic.version = 11 : i64} {
  func.func @_encoder_kernel(%arg0: memref<2x768xbf16, #tpu.memory_space<vmem>>, %arg1: memref<768x1024xbf16, #tpu.memory_space<vmem>>, %arg2: memref<1x1024xf32, #tpu.memory_space<vmem>>, %arg3: memref<1024x512xbf16, #tpu.memory_space<vmem>>, %arg4: memref<1x512xf32, #tpu.memory_space<vmem>>, %arg5: memref<512x256xbf16, #tpu.memory_space<vmem>>, %arg6: memref<1x256xf32, #tpu.memory_space<vmem>>, %arg7: memref<256x128xbf16, #tpu.memory_space<vmem>>, %arg8: memref<1x128xf32, #tpu.memory_space<vmem>>, %arg9: memref<16x128x32xbf16, #tpu.memory_space<vmem>>, %arg10: memref<16x1x32xf32, #tpu.memory_space<vmem>>, %arg11: memref<16x32x32xbf16, #tpu.memory_space<vmem>>, %arg12: memref<16x1x32xf32, #tpu.memory_space<vmem>>, %arg13: memref<16x32x128xbf16, #tpu.memory_space<vmem>>, %arg14: memref<16x1x128xf32, #tpu.memory_space<vmem>>, %arg15: memref<2x1024xf32, #tpu.memory_space<vmem>>, %arg16: memref<2x512xf32, #tpu.memory_space<vmem>>, %arg17: memref<2x256xf32, #tpu.memory_space<vmem>>, %arg18: memref<2x128xf32, #tpu.memory_space<vmem>>) attributes {dimension_semantics = [], scalar_prefetch = 0 : i64, scratch_operands = 0 : i64, tpu.core_type = #tpu.core_type<tc>} {
    %c0 = arith.constant 0 : index
    %c0_0 = arith.constant 0 : index
    %0 = vector.load %arg0[%c0, %c0_0] : memref<2x768xbf16, #tpu.memory_space<vmem>>, vector<2x768xbf16>
    %c0_1 = arith.constant 0 : index
    %c0_2 = arith.constant 0 : index
    %1 = vector.load %arg1[%c0_1, %c0_2] : memref<768x1024xbf16, #tpu.memory_space<vmem>>, vector<768x1024xbf16>
    %c0_3 = arith.constant 0 : index
    %c0_4 = arith.constant 0 : index
    %2 = vector.load %arg2[%c0_3, %c0_4] : memref<1x1024xf32, #tpu.memory_space<vmem>>, vector<1x1024xf32>
    %cst = arith.constant dense<0.000000e+00> : vector<2x1024xf32>
    %3 = tpu.matmul %0, %1, %cst {dimension_numbers = #tpu.dot_dimension_numbers<[1], [0], [0], [1], [0, 0, 1, 1], [], []>} : vector<2x768xbf16>, vector<768x1024xbf16>, vector<2x1024xf32> -> vector<2x1024xf32>
    %4 = vector.broadcast %2 : vector<1x1024xf32> to vector<2x1024xf32>
    %5 = arith.addf %3, %4 : vector<2x1024xf32>
    %c0_5 = arith.constant 0 : index
    %c0_6 = arith.constant 0 : index
    %6 = vector.load %arg15[%c0_5, %c0_6] : memref<2x1024xf32, #tpu.memory_space<vmem>>, vector<2x1024xf32>
    tpu.vector_store %arg15[%c0_5, %c0_6], %5 {strides = array<i32>} : memref<2x1024xf32, #tpu.memory_space<vmem>>, vector<2x1024xf32>,
    %cst_7 = arith.constant 0.000000e+00 : f32
    %7 = vector.broadcast %cst_7 : f32 to vector<2x1024xf32>
    %8 = arith.maximumf %5, %7 : vector<2x1024xf32>
    %9 = arith.truncf %8 : vector<2x1024xf32> to vector<2x1024xbf16>
    %c0_8 = arith.constant 0 : index
    %c0_9 = arith.constant 0 : index
    %10 = vector.load %arg3[%c0_8, %c0_9] : memref<1024x512xbf16, #tpu.memory_space<vmem>>, vector<1024x512xbf16>
    %c0_10 = arith.constant 0 : index
    %c0_11 = arith.constant 0 : index
    %11 = vector.load %arg4[%c0_10, %c0_11] : memref<1x512xf32, #tpu.memory_space<vmem>>, vector<1x512xf32>
    %cst_12 = arith.constant dense<0.000000e+00> : vector<2x512xf32>
    %12 = tpu.matmul %9, %10, %cst_12 {dimension_numbers = #tpu.dot_dimension_numbers<[1], [0], [0], [1], [0, 0, 1, 1], [], []>} : vector<2x1024xbf16>, vector<1024x512xbf16>, vector<2x512xf32> -> vector<2x512xf32>
    %13 = vector.broadcast %11 : vector<1x512xf32> to vector<2x512xf32>
    %14 = arith.addf %12, %13 : vector<2x512xf32>
    %c0_13 = arith.constant 0 : index
    %c0_14 = arith.constant 0 : index
    %15 = vector.load %arg16[%c0_13, %c0_14] : memref<2x512xf32, #tpu.memory_space<vmem>>, vector<2x512xf32>
    tpu.vector_store %arg16[%c0_13, %c0_14], %14 {strides = array<i32>} : memref<2x512xf32, #tpu.memory_space<vmem>>, vector<2x512xf32>,
    %cst_15 = arith.constant 0.000000e+00 : f32
    %16 = vector.broadcast %cst_15 : f32 to vector<2x512xf32>
    %17 = arith.maximumf %14, %16 : vector<2x512xf32>
    %18 = arith.truncf %17 : vector<2x512xf32> to vector<2x512xbf16>
    %c0_16 = arith.constant 0 : index
    %c0_17 = arith.constant 0 : index
    %19 = vector.load %arg5[%c0_16, %c0_17] : memref<512x256xbf16, #tpu.memory_space<vmem>>, vector<512x256xbf16>
    %c0_18 = arith.constant 0 : index
    %c0_19 = arith.constant 0 : index
    %20 = vector.load %arg6[%c0_18, %c0_19] : memref<1x256xf32, #tpu.memory_space<vmem>>, vector<1x256xf32>
    %cst_20 = arith.constant dense<0.000000e+00> : vector<2x256xf32>
    %21 = tpu.matmul %18, %19, %cst_20 {dimension_numbers = #tpu.dot_dimension_numbers<[1], [0], [0], [1], [0, 0, 1, 1], [], []>} : vector<2x512xbf16>, vector<512x256xbf16>, vector<2x256xf32> -> vector<2x256xf32>
    %22 = vector.broadcast %20 : vector<1x256xf32> to vector<2x256xf32>
    %23 = arith.addf %21, %22 : vector<2x256xf32>
    %c0_21 = arith.constant 0 : index
    %c0_22 = arith.constant 0 : index
    %24 = vector.load %arg17[%c0_21, %c0_22] : memref<2x256xf32, #tpu.memory_space<vmem>>, vector<2x256xf32>
    tpu.vector_store %arg17[%c0_21, %c0_22], %23 {strides = array<i32>} : memref<2x256xf32, #tpu.memory_space<vmem>>, vector<2x256xf32>,
    %cst_23 = arith.constant 0.000000e+00 : f32
    %25 = vector.broadcast %cst_23 : f32 to vector<2x256xf32>
    %26 = arith.maximumf %23, %25 : vector<2x256xf32>
    %27 = arith.truncf %26 : vector<2x256xf32> to vector<2x256xbf16>
    %c0_24 = arith.constant 0 : index
    %c0_25 = arith.constant 0 : index
    %28 = vector.load %arg7[%c0_24, %c0_25] : memref<256x128xbf16, #tpu.memory_space<vmem>>, vector<256x128xbf16>
    %c0_26 = arith.constant 0 : index
    %c0_27 = arith.constant 0 : index
    %29 = vector.load %arg8[%c0_26, %c0_27] : memref<1x128xf32, #tpu.memory_space<vmem>>, vector<1x128xf32>
    %cst_28 = arith.constant dense<0.000000e+00> : vector<2x128xf32>
    %30 = tpu.matmul %27, %28, %cst_28 {dimension_numbers = #tpu.dot_dimension_numbers<[1], [0], [0], [1], [0, 0, 1, 1], [], []>} : vector<2x256xbf16>, vector<256x128xbf16>, vector<2x128xf32> -> vector<2x128xf32>
    %31 = vector.broadcast %29 : vector<1x128xf32> to vector<2x128xf32>
    %32 = arith.addf %30, %31 : vector<2x128xf32>
    %cst_29 = arith.constant 0.000000e+00 : f32
    %33 = vector.broadcast %cst_29 : f32 to vector<2x128xf32>
    %34 = arith.maximumf %32, %33 : vector<2x128xf32>
    %c0_i32 = arith.constant 0 : i32
    %35 = arith.truncf %34 : vector<2x128xf32> to vector<2x128xbf16>
    %36 = arith.index_cast %c0_i32 : i32 to index
    %c0_30 = arith.constant 0 : index
    %c0_31 = arith.constant 0 : index
    %37 = vector.load %arg9[%36, %c0_30, %c0_31] : memref<16x128x32xbf16, #tpu.memory_space<vmem>>, vector<1x128x32xbf16>
    %38 = vector.shape_cast %37 : vector<1x128x32xbf16> to vector<128x32xbf16>
    %39 = arith.index_cast %c0_i32 : i32 to index
    %c0_32 = arith.constant 0 : index
    %c0_33 = arith.constant 0 : index
    %40 = vector.load %arg10[%39, %c0_32, %c0_33] : memref<16x1x32xf32, #tpu.memory_space<vmem>>, vector<1x1x32xf32>
    %41 = vector.shape_cast %40 : vector<1x1x32xf32> to vector<1x32xf32>
    %cst_34 = arith.constant dense<0.000000e+00> : vector<2x32xf32>
    %42 = tpu.matmul %35, %38, %cst_34 {dimension_numbers = #tpu.dot_dimension_numbers<[1], [0], [0], [1], [0, 0, 1, 1], [], []>} : vector<2x128xbf16>, vector<128x32xbf16>, vector<2x32xf32> -> vector<2x32xf32>
    %43 = vector.broadcast %41 : vector<1x32xf32> to vector<2x32xf32>
    %44 = arith.addf %42, %43 : vector<2x32xf32>
    %cst_35 = arith.constant 0.000000e+00 : f32
    %45 = vector.broadcast %cst_35 : f32 to vector<2x32xf32>
    %46 = arith.maximumf %44, %45 : vector<2x32xf32>
    %47 = arith.truncf %46 : vector<2x32xf32> to vector<2x32xbf16>
    %48 = arith.index_cast %c0_i32 : i32 to index
    %c0_36 = arith.constant 0 : index
    %c0_37 = arith.constant 0 : index
    %49 = vector.load %arg11[%48, %c0_36, %c0_37] : memref<16x32x32xbf16, #tpu.memory_space<vmem>>, vector<1x32x32xbf16>
    %50 = vector.shape_cast %49 : vector<1x32x32xbf16> to vector<32x32xbf16>
    %51 = arith.index_cast %c0_i32 : i32 to index
    %c0_38 = arith.constant 0 : index
    %c0_39 = arith.constant 0 : index
    %52 = vector.load %arg12[%51, %c0_38, %c0_39] : memref<16x1x32xf32, #tpu.memory_space<vmem>>, vector<1x1x32xf32>
    %53 = vector.shape_cast %52 : vector<1x1x32xf32> to vector<1x32xf32>
    %cst_40 = arith.constant dense<0.000000e+00> : vector<2x32xf32>
    %54 = tpu.matmul %47, %50, %cst_40 {dimension_numbers = #tpu.dot_dimension_numbers<[1], [0], [0], [1], [0, 0, 1, 1], [], []>} : vector<2x32xbf16>, vector<32x32xbf16>, vector<2x32xf32> -> vector<2x32xf32>
    %55 = vector.broadcast %53 : vector<1x32xf32> to vector<2x32xf32>
    %56 = arith.addf %54, %55 : vector<2x32xf32>
    %cst_41 = arith.constant 0.000000e+00 : f32
    %57 = vector.broadcast %cst_41 : f32 to vector<2x32xf32>
    %58 = arith.maximumf %56, %57 : vector<2x32xf32>
    %59 = arith.truncf %58 : vector<2x32xf32> to vector<2x32xbf16>
    %60 = arith.index_cast %c0_i32 : i32 to index
    %c0_42 = arith.constant 0 : index
    %c0_43 = arith.constant 0 : index
    %61 = vector.load %arg13[%60, %c0_42, %c0_43] : memref<16x32x128xbf16, #tpu.memory_space<vmem>>, vector<1x32x128xbf16>
    %62 = vector.shape_cast %61 : vector<1x32x128xbf16> to vector<32x128xbf16>
    %63 = arith.index_cast %c0_i32 : i32 to index
    %c0_44 = arith.constant 0 : index
    %c0_45 = arith.constant 0 : index
    %64 = vector.load %arg14[%63, %c0_44, %c0_45] : memref<16x1x128xf32, #tpu.memory_space<vmem>>, vector<1x1x128xf32>
    %65 = vector.shape_cast %64 : vector<1x1x128xf32> to vector<1x128xf32>
    %cst_46 = arith.constant dense<0.000000e+00> : vector<2x128xf32>
    %66 = tpu.matmul %59, %62, %cst_46 {dimension_numbers = #tpu.dot_dimension_numbers<[1], [0], [0], [1], [0, 0, 1, 1], [], []>} : vector<2x32xbf16>, vector<32x128xbf16>, vector<2x128xf32> -> vector<2x128xf32>
    %67 = vector.broadcast %65 : vector<1x128xf32> to vector<2x128xf32>
    %68 = arith.addf %66, %67 : vector<2x128xf32>
    %69 = arith.addf %34, %68 : vector<2x128xf32>
    %c1_i32 = arith.constant 1 : i32
    %70 = arith.truncf %69 : vector<2x128xf32> to vector<2x128xbf16>
    %71 = arith.index_cast %c1_i32 : i32 to index
    %c0_47 = arith.constant 0 : index
    %c0_48 = arith.constant 0 : index
    %72 = vector.load %arg9[%71, %c0_47, %c0_48] : memref<16x128x32xbf16, #tpu.memory_space<vmem>>, vector<1x128x32xbf16>
    %73 = vector.shape_cast %72 : vector<1x128x32xbf16> to vector<128x32xbf16>
    %74 = arith.index_cast %c1_i32 : i32 to index
    %c0_49 = arith.constant 0 : index
    %c0_50 = arith.constant 0 : index
    %75 = vector.load %arg10[%74, %c0_49, %c0_50] : memref<16x1x32xf32, #tpu.memory_space<vmem>>, vector<1x1x32xf32>
    %76 = vector.shape_cast %75 : vector<1x1x32xf32> to vector<1x32xf32>
    %cst_51 = arith.constant dense<0.000000e+00> : vector<2x32xf32>
    %77 = tpu.matmul %70, %73, %cst_51 {dimension_numbers = #tpu.dot_dimension_numbers<[1], [0], [0], [1], [0, 0, 1, 1], [], []>} : vector<2x128xbf16>, vector<128x32xbf16>, vector<2x32xf32> -> vector<2x32xf32>
    %78 = vector.broadcast %76 : vector<1x32xf32> to vector<2x32xf32>
    %79 = arith.addf %77, %78 : vector<2x32xf32>
    %cst_52 = arith.constant 0.000000e+00 : f32
    %80 = vector.broadcast %cst_52 : f32 to vector<2x32xf32>
    %81 = arith.maximumf %79, %80 : vector<2x32xf32>
    %82 = arith.truncf %81 : vector<2x32xf32> to vector<2x32xbf16>
    %83 = arith.index_cast %c1_i32 : i32 to index
    %c0_53 = arith.constant 0 : index
    %c0_54 = arith.constant 0 : index
    %84 = vector.load %arg11[%83, %c0_53, %c0_54] : memref<16x32x32xbf16, #tpu.memory_space<vmem>>, vector<1x32x32xbf16>
    %85 = vector.shape_cast %84 : vector<1x32x32xbf16> to vector<32x32xbf16>
    %86 = arith.index_cast %c1_i32 : i32 to index
    %c0_55 = arith.constant 0 : index
    %c0_56 = arith.constant 0 : index
    %87 = vector.load %arg12[%86, %c0_55, %c0_56] : memref<16x1x32xf32, #tpu.memory_space<vmem>>, vector<1x1x32xf32>
    %88 = vector.shape_cast %87 : vector<1x1x32xf32> to vector<1x32xf32>
    %cst_57 = arith.constant dense<0.000000e+00> : vector<2x32xf32>
    %89 = tpu.matmul %82, %85, %cst_57 {dimension_numbers = #tpu.dot_dimension_numbers<[1], [0], [0], [1], [0, 0, 1, 1], [], []>} : vector<2x32xbf16>, vector<32x32xbf16>, vector<2x32xf32> -> vector<2x32xf32>
    %90 = vector.broadcast %88 : vector<1x32xf32> to vector<2x32xf32>
    %91 = arith.addf %89, %90 : vector<2x32xf32>
    %cst_58 = arith.constant 0.000000e+00 : f32
    %92 = vector.broadcast %cst_58 : f32 to vector<2x32xf32>
    %93 = arith.maximumf %91, %92 : vector<2x32xf32>
    %94 = arith.truncf %93 : vector<2x32xf32> to vector<2x32xbf16>
    %95 = arith.index_cast %c1_i32 : i32 to index
    %c0_59 = arith.constant 0 : index
    %c0_60 = arith.constant 0 : index
    %96 = vector.load %arg13[%95, %c0_59, %c0_60] : memref<16x32x128xbf16, #tpu.memory_space<vmem>>, vector<1x32x128xbf16>
    %97 = vector.shape_cast %96 : vector<1x32x128xbf16> to vector<32x128xbf16>
    %98 = arith.index_cast %c1_i32 : i32 to index
    %c0_61 = arith.constant 0 : index
    %c0_62 = arith.constant 0 : index
    %99 = vector.load %arg14[%98, %c0_61, %c0_62] : memref<16x1x128xf32, #tpu.memory_space<vmem>>, vector<1x1x128xf32>
    %100 = vector.shape_cast %99 : vector<1x1x128xf32> to vector<1x128xf32>
    %cst_63 = arith.constant dense<0.000000e+00> : vector<2x128xf32>
    %101 = tpu.matmul %94, %97, %cst_63 {dimension_numbers = #tpu.dot_dimension_numbers<[1], [0], [0], [1], [0, 0, 1, 1], [], []>} : vector<2x32xbf16>, vector<32x128xbf16>, vector<2x128xf32> -> vector<2x128xf32>
    %102 = vector.broadcast %100 : vector<1x128xf32> to vector<2x128xf32>
    %103 = arith.addf %101, %102 : vector<2x128xf32>
    %104 = arith.addf %69, %103 : vector<2x128xf32>
    %c2_i32 = arith.constant 2 : i32
    %105 = arith.truncf %104 : vector<2x128xf32> to vector<2x128xbf16>
    %106 = arith.index_cast %c2_i32 : i32 to index
    %c0_64 = arith.constant 0 : index
    %c0_65 = arith.constant 0 : index
    %107 = vector.load %arg9[%106, %c0_64, %c0_65] : memref<16x128x32xbf16, #tpu.memory_space<vmem>>, vector<1x128x32xbf16>
    %108 = vector.shape_cast %107 : vector<1x128x32xbf16> to vector<128x32xbf16>
    %109 = arith.index_cast %c2_i32 : i32 to index
    %c0_66 = arith.constant 0 : index
    %c0_67 = arith.constant 0 : index
    %110 = vector.load %arg10[%109, %c0_66, %c0_67] : memref<16x1x32xf32, #tpu.memory_space<vmem>>, vector<1x1x32xf32>
    %111 = vector.shape_cast %110 : vector<1x1x32xf32> to vector<1x32xf32>
    %cst_68 = arith.constant dense<0.000000e+00> : vector<2x32xf32>
    %112 = tpu.matmul %105, %108, %cst_68 {dimension_numbers = #tpu.dot_dimension_numbers<[1], [0], [0], [1], [0, 0, 1, 1], [], []>} : vector<2x128xbf16>, vector<128x32xbf16>, vector<2x32xf32> -> vector<2x32xf32>
    %113 = vector.broadcast %111 : vector<1x32xf32> to vector<2x32xf32>
    %114 = arith.addf %112, %113 : vector<2x32xf32>
    %cst_69 = arith.constant 0.000000e+00 : f32
    %115 = vector.broadcast %cst_69 : f32 to vector<2x32xf32>
    %116 = arith.maximumf %114, %115 : vector<2x32xf32>
    %117 = arith.truncf %116 : vector<2x32xf32> to vector<2x32xbf16>
    %118 = arith.index_cast %c2_i32 : i32 to index
    %c0_70 = arith.constant 0 : index
    %c0_71 = arith.constant 0 : index
    %119 = vector.load %arg11[%118, %c0_70, %c0_71] : memref<16x32x32xbf16, #tpu.memory_space<vmem>>, vector<1x32x32xbf16>
    %120 = vector.shape_cast %119 : vector<1x32x32xbf16> to vector<32x32xbf16>
    %121 = arith.index_cast %c2_i32 : i32 to index
    %c0_72 = arith.constant 0 : index
    %c0_73 = arith.constant 0 : index
    %122 = vector.load %arg12[%121, %c0_72, %c0_73] : memref<16x1x32xf32, #tpu.memory_space<vmem>>, vector<1x1x32xf32>
    %123 = vector.shape_cast %122 : vector<1x1x32xf32> to vector<1x32xf32>
    %cst_74 = arith.constant dense<0.000000e+00> : vector<2x32xf32>
    %124 = tpu.matmul %117, %120, %cst_74 {dimension_numbers = #tpu.dot_dimension_numbers<[1], [0], [0], [1], [0, 0, 1, 1], [], []>} : vector<2x32xbf16>, vector<32x32xbf16>, vector<2x32xf32> -> vector<2x32xf32>
    %125 = vector.broadcast %123 : vector<1x32xf32> to vector<2x32xf32>
    %126 = arith.addf %124, %125 : vector<2x32xf32>
    %cst_75 = arith.constant 0.000000e+00 : f32
    %127 = vector.broadcast %cst_75 : f32 to vector<2x32xf32>
    %128 = arith.maximumf %126, %127 : vector<2x32xf32>
    %129 = arith.truncf %128 : vector<2x32xf32> to vector<2x32xbf16>
    %130 = arith.index_cast %c2_i32 : i32 to index
    %c0_76 = arith.constant 0 : index
    %c0_77 = arith.constant 0 : index
    %131 = vector.load %arg13[%130, %c0_76, %c0_77] : memref<16x32x128xbf16, #tpu.memory_space<vmem>>, vector<1x32x128xbf16>
    %132 = vector.shape_cast %131 : vector<1x32x128xbf16> to vector<32x128xbf16>
    %133 = arith.index_cast %c2_i32 : i32 to index
    %c0_78 = arith.constant 0 : index
    %c0_79 = arith.constant 0 : index
    %134 = vector.load %arg14[%133, %c0_78, %c0_79] : memref<16x1x128xf32, #tpu.memory_space<vmem>>, vector<1x1x128xf32>
    %135 = vector.shape_cast %134 : vector<1x1x128xf32> to vector<1x128xf32>
    %cst_80 = arith.constant dense<0.000000e+00> : vector<2x128xf32>
    %136 = tpu.matmul %129, %132, %cst_80 {dimension_numbers = #tpu.dot_dimension_numbers<[1], [0], [0], [1], [0, 0, 1, 1], [], []>} : vector<2x32xbf16>, vector<32x128xbf16>, vector<2x128xf32> -> vector<2x128xf32>
    %137 = vector.broadcast %135 : vector<1x128xf32> to vector<2x128xf32>
    %138 = arith.addf %136, %137 : vector<2x128xf32>
    %139 = arith.addf %104, %138 : vector<2x128xf32>
    %c3_i32 = arith.constant 3 : i32
    %140 = arith.truncf %139 : vector<2x128xf32> to vector<2x128xbf16>
    %141 = arith.index_cast %c3_i32 : i32 to index
    %c0_81 = arith.constant 0 : index
    %c0_82 = arith.constant 0 : index
    %142 = vector.load %arg9[%141, %c0_81, %c0_82] : memref<16x128x32xbf16, #tpu.memory_space<vmem>>, vector<1x128x32xbf16>
    %143 = vector.shape_cast %142 : vector<1x128x32xbf16> to vector<128x32xbf16>
    %144 = arith.index_cast %c3_i32 : i32 to index
    %c0_83 = arith.constant 0 : index
    %c0_84 = arith.constant 0 : index
    %145 = vector.load %arg10[%144, %c0_83, %c0_84] : memref<16x1x32xf32, #tpu.memory_space<vmem>>, vector<1x1x32xf32>
    %146 = vector.shape_cast %145 : vector<1x1x32xf32> to vector<1x32xf32>
    %cst_85 = arith.constant dense<0.000000e+00> : vector<2x32xf32>
    %147 = tpu.matmul %140, %143, %cst_85 {dimension_numbers = #tpu.dot_dimension_numbers<[1], [0], [0], [1], [0, 0, 1, 1], [], []>} : vector<2x128xbf16>, vector<128x32xbf16>, vector<2x32xf32> -> vector<2x32xf32>
    %148 = vector.broadcast %146 : vector<1x32xf32> to vector<2x32xf32>
    %149 = arith.addf %147, %148 : vector<2x32xf32>
    %cst_86 = arith.constant 0.000000e+00 : f32
    %150 = vector.broadcast %cst_86 : f32 to vector<2x32xf32>
    %151 = arith.maximumf %149, %150 : vector<2x32xf32>
    %152 = arith.truncf %151 : vector<2x32xf32> to vector<2x32xbf16>
    %153 = arith.index_cast %c3_i32 : i32 to index
    %c0_87 = arith.constant 0 : index
    %c0_88 = arith.constant 0 : index
    %154 = vector.load %arg11[%153, %c0_87, %c0_88] : memref<16x32x32xbf16, #tpu.memory_space<vmem>>, vector<1x32x32xbf16>
    %155 = vector.shape_cast %154 : vector<1x32x32xbf16> to vector<32x32xbf16>
    %156 = arith.index_cast %c3_i32 : i32 to index
    %c0_89 = arith.constant 0 : index
    %c0_90 = arith.constant 0 : index
    %157 = vector.load %arg12[%156, %c0_89, %c0_90] : memref<16x1x32xf32, #tpu.memory_space<vmem>>, vector<1x1x32xf32>
    %158 = vector.shape_cast %157 : vector<1x1x32xf32> to vector<1x32xf32>
    %cst_91 = arith.constant dense<0.000000e+00> : vector<2x32xf32>
    %159 = tpu.matmul %152, %155, %cst_91 {dimension_numbers = #tpu.dot_dimension_numbers<[1], [0], [0], [1], [0, 0, 1, 1], [], []>} : vector<2x32xbf16>, vector<32x32xbf16>, vector<2x32xf32> -> vector<2x32xf32>
    %160 = vector.broadcast %158 : vector<1x32xf32> to vector<2x32xf32>
    %161 = arith.addf %159, %160 : vector<2x32xf32>
    %cst_92 = arith.constant 0.000000e+00 : f32
    %162 = vector.broadcast %cst_92 : f32 to vector<2x32xf32>
    %163 = arith.maximumf %161, %162 : vector<2x32xf32>
    %164 = arith.truncf %163 : vector<2x32xf32> to vector<2x32xbf16>
    %165 = arith.index_cast %c3_i32 : i32 to index
    %c0_93 = arith.constant 0 : index
    %c0_94 = arith.constant 0 : index
    %166 = vector.load %arg13[%165, %c0_93, %c0_94] : memref<16x32x128xbf16, #tpu.memory_space<vmem>>, vector<1x32x128xbf16>
    %167 = vector.shape_cast %166 : vector<1x32x128xbf16> to vector<32x128xbf16>
    %168 = arith.index_cast %c3_i32 : i32 to index
    %c0_95 = arith.constant 0 : index
    %c0_96 = arith.constant 0 : index
    %169 = vector.load %arg14[%168, %c0_95, %c0_96] : memref<16x1x128xf32, #tpu.memory_space<vmem>>, vector<1x1x128xf32>
    %170 = vector.shape_cast %169 : vector<1x1x128xf32> to vector<1x128xf32>
    %cst_97 = arith.constant dense<0.000000e+00> : vector<2x128xf32>
    %171 = tpu.matmul %164, %167, %cst_97 {dimension_numbers = #tpu.dot_dimension_numbers<[1], [0], [0], [1], [0, 0, 1, 1], [], []>} : vector<2x32xbf16>, vector<32x128xbf16>, vector<2x128xf32> -> vector<2x128xf32>
    %172 = vector.broadcast %170 : vector<1x128xf32> to vector<2x128xf32>
    %173 = arith.addf %171, %172 : vector<2x128xf32>
    %174 = arith.addf %139, %173 : vector<2x128xf32>
    %c4_i32 = arith.constant 4 : i32
    %175 = arith.truncf %174 : vector<2x128xf32> to vector<2x128xbf16>
    %176 = arith.index_cast %c4_i32 : i32 to index
    %c0_98 = arith.constant 0 : index
    %c0_99 = arith.constant 0 : index
    %177 = vector.load %arg9[%176, %c0_98, %c0_99] : memref<16x128x32xbf16, #tpu.memory_space<vmem>>, vector<1x128x32xbf16>
    %178 = vector.shape_cast %177 : vector<1x128x32xbf16> to vector<128x32xbf16>
    %179 = arith.index_cast %c4_i32 : i32 to index
    %c0_100 = arith.constant 0 : index
    %c0_101 = arith.constant 0 : index
    %180 = vector.load %arg10[%179, %c0_100, %c0_101] : memref<16x1x32xf32, #tpu.memory_space<vmem>>, vector<1x1x32xf32>
    %181 = vector.shape_cast %180 : vector<1x1x32xf32> to vector<1x32xf32>
    %cst_102 = arith.constant dense<0.000000e+00> : vector<2x32xf32>
    %182 = tpu.matmul %175, %178, %cst_102 {dimension_numbers = #tpu.dot_dimension_numbers<[1], [0], [0], [1], [0, 0, 1, 1], [], []>} : vector<2x128xbf16>, vector<128x32xbf16>, vector<2x32xf32> -> vector<2x32xf32>
    %183 = vector.broadcast %181 : vector<1x32xf32> to vector<2x32xf32>
    %184 = arith.addf %182, %183 : vector<2x32xf32>
    %cst_103 = arith.constant 0.000000e+00 : f32
    %185 = vector.broadcast %cst_103 : f32 to vector<2x32xf32>
    %186 = arith.maximumf %184, %185 : vector<2x32xf32>
    %187 = arith.truncf %186 : vector<2x32xf32> to vector<2x32xbf16>
    %188 = arith.index_cast %c4_i32 : i32 to index
    %c0_104 = arith.constant 0 : index
    %c0_105 = arith.constant 0 : index
    %189 = vector.load %arg11[%188, %c0_104, %c0_105] : memref<16x32x32xbf16, #tpu.memory_space<vmem>>, vector<1x32x32xbf16>
    %190 = vector.shape_cast %189 : vector<1x32x32xbf16> to vector<32x32xbf16>
    %191 = arith.index_cast %c4_i32 : i32 to index
    %c0_106 = arith.constant 0 : index
    %c0_107 = arith.constant 0 : index
    %192 = vector.load %arg12[%191, %c0_106, %c0_107] : memref<16x1x32xf32, #tpu.memory_space<vmem>>, vector<1x1x32xf32>
    %193 = vector.shape_cast %192 : vector<1x1x32xf32> to vector<1x32xf32>
    %cst_108 = arith.constant dense<0.000000e+00> : vector<2x32xf32>
    %194 = tpu.matmul %187, %190, %cst_108 {dimension_numbers = #tpu.dot_dimension_numbers<[1], [0], [0], [1], [0, 0, 1, 1], [], []>} : vector<2x32xbf16>, vector<32x32xbf16>, vector<2x32xf32> -> vector<2x32xf32>
    %195 = vector.broadcast %193 : vector<1x32xf32> to vector<2x32xf32>
    %196 = arith.addf %194, %195 : vector<2x32xf32>
    %cst_109 = arith.constant 0.000000e+00 : f32
    %197 = vector.broadcast %cst_109 : f32 to vector<2x32xf32>
    %198 = arith.maximumf %196, %197 : vector<2x32xf32>
    %199 = arith.truncf %198 : vector<2x32xf32> to vector<2x32xbf16>
    %200 = arith.index_cast %c4_i32 : i32 to index
    %c0_110 = arith.constant 0 : index
    %c0_111 = arith.constant 0 : index
    %201 = vector.load %arg13[%200, %c0_110, %c0_111] : memref<16x32x128xbf16, #tpu.memory_space<vmem>>, vector<1x32x128xbf16>
    %202 = vector.shape_cast %201 : vector<1x32x128xbf16> to vector<32x128xbf16>
    %203 = arith.index_cast %c4_i32 : i32 to index
    %c0_112 = arith.constant 0 : index
    %c0_113 = arith.constant 0 : index
    %204 = vector.load %arg14[%203, %c0_112, %c0_113] : memref<16x1x128xf32, #tpu.memory_space<vmem>>, vector<1x1x128xf32>
    %205 = vector.shape_cast %204 : vector<1x1x128xf32> to vector<1x128xf32>
    %cst_114 = arith.constant dense<0.000000e+00> : vector<2x128xf32>
    %206 = tpu.matmul %199, %202, %cst_114 {dimension_numbers = #tpu.dot_dimension_numbers<[1], [0], [0], [1], [0, 0, 1, 1], [], []>} : vector<2x32xbf16>, vector<32x128xbf16>, vector<2x128xf32> -> vector<2x128xf32>
    %207 = vector.broadcast %205 : vector<1x128xf32> to vector<2x128xf32>
    %208 = arith.addf %206, %207 : vector<2x128xf32>
    %209 = arith.addf %174, %208 : vector<2x128xf32>
    %c5_i32 = arith.constant 5 : i32
    %210 = arith.truncf %209 : vector<2x128xf32> to vector<2x128xbf16>
    %211 = arith.index_cast %c5_i32 : i32 to index
    %c0_115 = arith.constant 0 : index
    %c0_116 = arith.constant 0 : index
    %212 = vector.load %arg9[%211, %c0_115, %c0_116] : memref<16x128x32xbf16, #tpu.memory_space<vmem>>, vector<1x128x32xbf16>
    %213 = vector.shape_cast %212 : vector<1x128x32xbf16> to vector<128x32xbf16>
    %214 = arith.index_cast %c5_i32 : i32 to index
    %c0_117 = arith.constant 0 : index
    %c0_118 = arith.constant 0 : index
    %215 = vector.load %arg10[%214, %c0_117, %c0_118] : memref<16x1x32xf32, #tpu.memory_space<vmem>>, vector<1x1x32xf32>
    %216 = vector.shape_cast %215 : vector<1x1x32xf32> to vector<1x32xf32>
    %cst_119 = arith.constant dense<0.000000e+00> : vector<2x32xf32>
    %217 = tpu.matmul %210, %213, %cst_119 {dimension_numbers = #tpu.dot_dimension_numbers<[1], [0], [0], [1], [0, 0, 1, 1], [], []>} : vector<2x128xbf16>, vector<128x32xbf16>, vector<2x32xf32> -> vector<2x32xf32>
    %218 = vector.broadcast %216 : vector<1x32xf32> to vector<2x32xf32>
    %219 = arith.addf %217, %218 : vector<2x32xf32>
    %cst_120 = arith.constant 0.000000e+00 : f32
    %220 = vector.broadcast %cst_120 : f32 to vector<2x32xf32>
    %221 = arith.maximumf %219, %220 : vector<2x32xf32>
    %222 = arith.truncf %221 : vector<2x32xf32> to vector<2x32xbf16>
    %223 = arith.index_cast %c5_i32 : i32 to index
    %c0_121 = arith.constant 0 : index
    %c0_122 = arith.constant 0 : index
    %224 = vector.load %arg11[%223, %c0_121, %c0_122] : memref<16x32x32xbf16, #tpu.memory_space<vmem>>, vector<1x32x32xbf16>
    %225 = vector.shape_cast %224 : vector<1x32x32xbf16> to vector<32x32xbf16>
    %226 = arith.index_cast %c5_i32 : i32 to index
    %c0_123 = arith.constant 0 : index
    %c0_124 = arith.constant 0 : index
    %227 = vector.load %arg12[%226, %c0_123, %c0_124] : memref<16x1x32xf32, #tpu.memory_space<vmem>>, vector<1x1x32xf32>
    %228 = vector.shape_cast %227 : vector<1x1x32xf32> to vector<1x32xf32>
    %cst_125 = arith.constant dense<0.000000e+00> : vector<2x32xf32>
    %229 = tpu.matmul %222, %225, %cst_125 {dimension_numbers = #tpu.dot_dimension_numbers<[1], [0], [0], [1], [0, 0, 1, 1], [], []>} : vector<2x32xbf16>, vector<32x32xbf16>, vector<2x32xf32> -> vector<2x32xf32>
    %230 = vector.broadcast %228 : vector<1x32xf32> to vector<2x32xf32>
    %231 = arith.addf %229, %230 : vector<2x32xf32>
    %cst_126 = arith.constant 0.000000e+00 : f32
    %232 = vector.broadcast %cst_126 : f32 to vector<2x32xf32>
    %233 = arith.maximumf %231, %232 : vector<2x32xf32>
    %234 = arith.truncf %233 : vector<2x32xf32> to vector<2x32xbf16>
    %235 = arith.index_cast %c5_i32 : i32 to index
    %c0_127 = arith.constant 0 : index
    %c0_128 = arith.constant 0 : index
    %236 = vector.load %arg13[%235, %c0_127, %c0_128] : memref<16x32x128xbf16, #tpu.memory_space<vmem>>, vector<1x32x128xbf16>
    %237 = vector.shape_cast %236 : vector<1x32x128xbf16> to vector<32x128xbf16>
    %238 = arith.index_cast %c5_i32 : i32 to index
    %c0_129 = arith.constant 0 : index
    %c0_130 = arith.constant 0 : index
    %239 = vector.load %arg14[%238, %c0_129, %c0_130] : memref<16x1x128xf32, #tpu.memory_space<vmem>>, vector<1x1x128xf32>
    %240 = vector.shape_cast %239 : vector<1x1x128xf32> to vector<1x128xf32>
    %cst_131 = arith.constant dense<0.000000e+00> : vector<2x128xf32>
    %241 = tpu.matmul %234, %237, %cst_131 {dimension_numbers = #tpu.dot_dimension_numbers<[1], [0], [0], [1], [0, 0, 1, 1], [], []>} : vector<2x32xbf16>, vector<32x128xbf16>, vector<2x128xf32> -> vector<2x128xf32>
    %242 = vector.broadcast %240 : vector<1x128xf32> to vector<2x128xf32>
    %243 = arith.addf %241, %242 : vector<2x128xf32>
    %244 = arith.addf %209, %243 : vector<2x128xf32>
    %c6_i32 = arith.constant 6 : i32
    %245 = arith.truncf %244 : vector<2x128xf32> to vector<2x128xbf16>
    %246 = arith.index_cast %c6_i32 : i32 to index
    %c0_132 = arith.constant 0 : index
    %c0_133 = arith.constant 0 : index
    %247 = vector.load %arg9[%246, %c0_132, %c0_133] : memref<16x128x32xbf16, #tpu.memory_space<vmem>>, vector<1x128x32xbf16>
    %248 = vector.shape_cast %247 : vector<1x128x32xbf16> to vector<128x32xbf16>
    %249 = arith.index_cast %c6_i32 : i32 to index
    %c0_134 = arith.constant 0 : index
    %c0_135 = arith.constant 0 : index
    %250 = vector.load %arg10[%249, %c0_134, %c0_135] : memref<16x1x32xf32, #tpu.memory_space<vmem>>, vector<1x1x32xf32>
    %251 = vector.shape_cast %250 : vector<1x1x32xf32> to vector<1x32xf32>
    %cst_136 = arith.constant dense<0.000000e+00> : vector<2x32xf32>
    %252 = tpu.matmul %245, %248, %cst_136 {dimension_numbers = #tpu.dot_dimension_numbers<[1], [0], [0], [1], [0, 0, 1, 1], [], []>} : vector<2x128xbf16>, vector<128x32xbf16>, vector<2x32xf32> -> vector<2x32xf32>
    %253 = vector.broadcast %251 : vector<1x32xf32> to vector<2x32xf32>
    %254 = arith.addf %252, %253 : vector<2x32xf32>
    %cst_137 = arith.constant 0.000000e+00 : f32
    %255 = vector.broadcast %cst_137 : f32 to vector<2x32xf32>
    %256 = arith.maximumf %254, %255 : vector<2x32xf32>
    %257 = arith.truncf %256 : vector<2x32xf32> to vector<2x32xbf16>
    %258 = arith.index_cast %c6_i32 : i32 to index
    %c0_138 = arith.constant 0 : index
    %c0_139 = arith.constant 0 : index
    %259 = vector.load %arg11[%258, %c0_138, %c0_139] : memref<16x32x32xbf16, #tpu.memory_space<vmem>>, vector<1x32x32xbf16>
    %260 = vector.shape_cast %259 : vector<1x32x32xbf16> to vector<32x32xbf16>
    %261 = arith.index_cast %c6_i32 : i32 to index
    %c0_140 = arith.constant 0 : index
    %c0_141 = arith.constant 0 : index
    %262 = vector.load %arg12[%261, %c0_140, %c0_141] : memref<16x1x32xf32, #tpu.memory_space<vmem>>, vector<1x1x32xf32>
    %263 = vector.shape_cast %262 : vector<1x1x32xf32> to vector<1x32xf32>
    %cst_142 = arith.constant dense<0.000000e+00> : vector<2x32xf32>
    %264 = tpu.matmul %257, %260, %cst_142 {dimension_numbers = #tpu.dot_dimension_numbers<[1], [0], [0], [1], [0, 0, 1, 1], [], []>} : vector<2x32xbf16>, vector<32x32xbf16>, vector<2x32xf32> -> vector<2x32xf32>
    %265 = vector.broadcast %263 : vector<1x32xf32> to vector<2x32xf32>
    %266 = arith.addf %264, %265 : vector<2x32xf32>
    %cst_143 = arith.constant 0.000000e+00 : f32
    %267 = vector.broadcast %cst_143 : f32 to vector<2x32xf32>
    %268 = arith.maximumf %266, %267 : vector<2x32xf32>
    %269 = arith.truncf %268 : vector<2x32xf32> to vector<2x32xbf16>
    %270 = arith.index_cast %c6_i32 : i32 to index
    %c0_144 = arith.constant 0 : index
    %c0_145 = arith.constant 0 : index
    %271 = vector.load %arg13[%270, %c0_144, %c0_145] : memref<16x32x128xbf16, #tpu.memory_space<vmem>>, vector<1x32x128xbf16>
    %272 = vector.shape_cast %271 : vector<1x32x128xbf16> to vector<32x128xbf16>
    %273 = arith.index_cast %c6_i32 : i32 to index
    %c0_146 = arith.constant 0 : index
    %c0_147 = arith.constant 0 : index
    %274 = vector.load %arg14[%273, %c0_146, %c0_147] : memref<16x1x128xf32, #tpu.memory_space<vmem>>, vector<1x1x128xf32>
    %275 = vector.shape_cast %274 : vector<1x1x128xf32> to vector<1x128xf32>
    %cst_148 = arith.constant dense<0.000000e+00> : vector<2x128xf32>
    %276 = tpu.matmul %269, %272, %cst_148 {dimension_numbers = #tpu.dot_dimension_numbers<[1], [0], [0], [1], [0, 0, 1, 1], [], []>} : vector<2x32xbf16>, vector<32x128xbf16>, vector<2x128xf32> -> vector<2x128xf32>
    %277 = vector.broadcast %275 : vector<1x128xf32> to vector<2x128xf32>
    %278 = arith.addf %276, %277 : vector<2x128xf32>
    %279 = arith.addf %244, %278 : vector<2x128xf32>
    %c7_i32 = arith.constant 7 : i32
    %280 = arith.truncf %279 : vector<2x128xf32> to vector<2x128xbf16>
    %281 = arith.index_cast %c7_i32 : i32 to index
    %c0_149 = arith.constant 0 : index
    %c0_150 = arith.constant 0 : index
    %282 = vector.load %arg9[%281, %c0_149, %c0_150] : memref<16x128x32xbf16, #tpu.memory_space<vmem>>, vector<1x128x32xbf16>
    %283 = vector.shape_cast %282 : vector<1x128x32xbf16> to vector<128x32xbf16>
    %284 = arith.index_cast %c7_i32 : i32 to index
    %c0_151 = arith.constant 0 : index
    %c0_152 = arith.constant 0 : index
    %285 = vector.load %arg10[%284, %c0_151, %c0_152] : memref<16x1x32xf32, #tpu.memory_space<vmem>>, vector<1x1x32xf32>
    %286 = vector.shape_cast %285 : vector<1x1x32xf32> to vector<1x32xf32>
    %cst_153 = arith.constant dense<0.000000e+00> : vector<2x32xf32>
    %287 = tpu.matmul %280, %283, %cst_153 {dimension_numbers = #tpu.dot_dimension_numbers<[1], [0], [0], [1], [0, 0, 1, 1], [], []>} : vector<2x128xbf16>, vector<128x32xbf16>, vector<2x32xf32> -> vector<2x32xf32>
    %288 = vector.broadcast %286 : vector<1x32xf32> to vector<2x32xf32>
    %289 = arith.addf %287, %288 : vector<2x32xf32>
    %cst_154 = arith.constant 0.000000e+00 : f32
    %290 = vector.broadcast %cst_154 : f32 to vector<2x32xf32>
    %291 = arith.maximumf %289, %290 : vector<2x32xf32>
    %292 = arith.truncf %291 : vector<2x32xf32> to vector<2x32xbf16>
    %293 = arith.index_cast %c7_i32 : i32 to index
    %c0_155 = arith.constant 0 : index
    %c0_156 = arith.constant 0 : index
    %294 = vector.load %arg11[%293, %c0_155, %c0_156] : memref<16x32x32xbf16, #tpu.memory_space<vmem>>, vector<1x32x32xbf16>
    %295 = vector.shape_cast %294 : vector<1x32x32xbf16> to vector<32x32xbf16>
    %296 = arith.index_cast %c7_i32 : i32 to index
    %c0_157 = arith.constant 0 : index
    %c0_158 = arith.constant 0 : index
    %297 = vector.load %arg12[%296, %c0_157, %c0_158] : memref<16x1x32xf32, #tpu.memory_space<vmem>>, vector<1x1x32xf32>
    %298 = vector.shape_cast %297 : vector<1x1x32xf32> to vector<1x32xf32>
    %cst_159 = arith.constant dense<0.000000e+00> : vector<2x32xf32>
    %299 = tpu.matmul %292, %295, %cst_159 {dimension_numbers = #tpu.dot_dimension_numbers<[1], [0], [0], [1], [0, 0, 1, 1], [], []>} : vector<2x32xbf16>, vector<32x32xbf16>, vector<2x32xf32> -> vector<2x32xf32>
    %300 = vector.broadcast %298 : vector<1x32xf32> to vector<2x32xf32>
    %301 = arith.addf %299, %300 : vector<2x32xf32>
    %cst_160 = arith.constant 0.000000e+00 : f32
    %302 = vector.broadcast %cst_160 : f32 to vector<2x32xf32>
    %303 = arith.maximumf %301, %302 : vector<2x32xf32>
    %304 = arith.truncf %303 : vector<2x32xf32> to vector<2x32xbf16>
    %305 = arith.index_cast %c7_i32 : i32 to index
    %c0_161 = arith.constant 0 : index
    %c0_162 = arith.constant 0 : index
    %306 = vector.load %arg13[%305, %c0_161, %c0_162] : memref<16x32x128xbf16, #tpu.memory_space<vmem>>, vector<1x32x128xbf16>
    %307 = vector.shape_cast %306 : vector<1x32x128xbf16> to vector<32x128xbf16>
    %308 = arith.index_cast %c7_i32 : i32 to index
    %c0_163 = arith.constant 0 : index
    %c0_164 = arith.constant 0 : index
    %309 = vector.load %arg14[%308, %c0_163, %c0_164] : memref<16x1x128xf32, #tpu.memory_space<vmem>>, vector<1x1x128xf32>
    %310 = vector.shape_cast %309 : vector<1x1x128xf32> to vector<1x128xf32>
    %cst_165 = arith.constant dense<0.000000e+00> : vector<2x128xf32>
    %311 = tpu.matmul %304, %307, %cst_165 {dimension_numbers = #tpu.dot_dimension_numbers<[1], [0], [0], [1], [0, 0, 1, 1], [], []>} : vector<2x32xbf16>, vector<32x128xbf16>, vector<2x128xf32> -> vector<2x128xf32>
    %312 = vector.broadcast %310 : vector<1x128xf32> to vector<2x128xf32>
    %313 = arith.addf %311, %312 : vector<2x128xf32>
    %314 = arith.addf %279, %313 : vector<2x128xf32>
    %c8_i32 = arith.constant 8 : i32
    %315 = arith.truncf %314 : vector<2x128xf32> to vector<2x128xbf16>
    %316 = arith.index_cast %c8_i32 : i32 to index
    %c0_166 = arith.constant 0 : index
    %c0_167 = arith.constant 0 : index
    %317 = vector.load %arg9[%316, %c0_166, %c0_167] : memref<16x128x32xbf16, #tpu.memory_space<vmem>>, vector<1x128x32xbf16>
    %318 = vector.shape_cast %317 : vector<1x128x32xbf16> to vector<128x32xbf16>
    %319 = arith.index_cast %c8_i32 : i32 to index
    %c0_168 = arith.constant 0 : index
    %c0_169 = arith.constant 0 : index
    %320 = vector.load %arg10[%319, %c0_168, %c0_169] : memref<16x1x32xf32, #tpu.memory_space<vmem>>, vector<1x1x32xf32>
    %321 = vector.shape_cast %320 : vector<1x1x32xf32> to vector<1x32xf32>
    %cst_170 = arith.constant dense<0.000000e+00> : vector<2x32xf32>
    %322 = tpu.matmul %315, %318, %cst_170 {dimension_numbers = #tpu.dot_dimension_numbers<[1], [0], [0], [1], [0, 0, 1, 1], [], []>} : vector<2x128xbf16>, vector<128x32xbf16>, vector<2x32xf32> -> vector<2x32xf32>
    %323 = vector.broadcast %321 : vector<1x32xf32> to vector<2x32xf32>
    %324 = arith.addf %322, %323 : vector<2x32xf32>
    %cst_171 = arith.constant 0.000000e+00 : f32
    %325 = vector.broadcast %cst_171 : f32 to vector<2x32xf32>
    %326 = arith.maximumf %324, %325 : vector<2x32xf32>
    %327 = arith.truncf %326 : vector<2x32xf32> to vector<2x32xbf16>
    %328 = arith.index_cast %c8_i32 : i32 to index
    %c0_172 = arith.constant 0 : index
    %c0_173 = arith.constant 0 : index
    %329 = vector.load %arg11[%328, %c0_172, %c0_173] : memref<16x32x32xbf16, #tpu.memory_space<vmem>>, vector<1x32x32xbf16>
    %330 = vector.shape_cast %329 : vector<1x32x32xbf16> to vector<32x32xbf16>
    %331 = arith.index_cast %c8_i32 : i32 to index
    %c0_174 = arith.constant 0 : index
    %c0_175 = arith.constant 0 : index
    %332 = vector.load %arg12[%331, %c0_174, %c0_175] : memref<16x1x32xf32, #tpu.memory_space<vmem>>, vector<1x1x32xf32>
    %333 = vector.shape_cast %332 : vector<1x1x32xf32> to vector<1x32xf32>
    %cst_176 = arith.constant dense<0.000000e+00> : vector<2x32xf32>
    %334 = tpu.matmul %327, %330, %cst_176 {dimension_numbers = #tpu.dot_dimension_numbers<[1], [0], [0], [1], [0, 0, 1, 1], [], []>} : vector<2x32xbf16>, vector<32x32xbf16>, vector<2x32xf32> -> vector<2x32xf32>
    %335 = vector.broadcast %333 : vector<1x32xf32> to vector<2x32xf32>
    %336 = arith.addf %334, %335 : vector<2x32xf32>
    %cst_177 = arith.constant 0.000000e+00 : f32
    %337 = vector.broadcast %cst_177 : f32 to vector<2x32xf32>
    %338 = arith.maximumf %336, %337 : vector<2x32xf32>
    %339 = arith.truncf %338 : vector<2x32xf32> to vector<2x32xbf16>
    %340 = arith.index_cast %c8_i32 : i32 to index
    %c0_178 = arith.constant 0 : index
    %c0_179 = arith.constant 0 : index
    %341 = vector.load %arg13[%340, %c0_178, %c0_179] : memref<16x32x128xbf16, #tpu.memory_space<vmem>>, vector<1x32x128xbf16>
    %342 = vector.shape_cast %341 : vector<1x32x128xbf16> to vector<32x128xbf16>
    %343 = arith.index_cast %c8_i32 : i32 to index
    %c0_180 = arith.constant 0 : index
    %c0_181 = arith.constant 0 : index
    %344 = vector.load %arg14[%343, %c0_180, %c0_181] : memref<16x1x128xf32, #tpu.memory_space<vmem>>, vector<1x1x128xf32>
    %345 = vector.shape_cast %344 : vector<1x1x128xf32> to vector<1x128xf32>
    %cst_182 = arith.constant dense<0.000000e+00> : vector<2x128xf32>
    %346 = tpu.matmul %339, %342, %cst_182 {dimension_numbers = #tpu.dot_dimension_numbers<[1], [0], [0], [1], [0, 0, 1, 1], [], []>} : vector<2x32xbf16>, vector<32x128xbf16>, vector<2x128xf32> -> vector<2x128xf32>
    %347 = vector.broadcast %345 : vector<1x128xf32> to vector<2x128xf32>
    %348 = arith.addf %346, %347 : vector<2x128xf32>
    %349 = arith.addf %314, %348 : vector<2x128xf32>
    %c9_i32 = arith.constant 9 : i32
    %350 = arith.truncf %349 : vector<2x128xf32> to vector<2x128xbf16>
    %351 = arith.index_cast %c9_i32 : i32 to index
    %c0_183 = arith.constant 0 : index
    %c0_184 = arith.constant 0 : index
    %352 = vector.load %arg9[%351, %c0_183, %c0_184] : memref<16x128x32xbf16, #tpu.memory_space<vmem>>, vector<1x128x32xbf16>
    %353 = vector.shape_cast %352 : vector<1x128x32xbf16> to vector<128x32xbf16>
    %354 = arith.index_cast %c9_i32 : i32 to index
    %c0_185 = arith.constant 0 : index
    %c0_186 = arith.constant 0 : index
    %355 = vector.load %arg10[%354, %c0_185, %c0_186] : memref<16x1x32xf32, #tpu.memory_space<vmem>>, vector<1x1x32xf32>
    %356 = vector.shape_cast %355 : vector<1x1x32xf32> to vector<1x32xf32>
    %cst_187 = arith.constant dense<0.000000e+00> : vector<2x32xf32>
    %357 = tpu.matmul %350, %353, %cst_187 {dimension_numbers = #tpu.dot_dimension_numbers<[1], [0], [0], [1], [0, 0, 1, 1], [], []>} : vector<2x128xbf16>, vector<128x32xbf16>, vector<2x32xf32> -> vector<2x32xf32>
    %358 = vector.broadcast %356 : vector<1x32xf32> to vector<2x32xf32>
    %359 = arith.addf %357, %358 : vector<2x32xf32>
    %cst_188 = arith.constant 0.000000e+00 : f32
    %360 = vector.broadcast %cst_188 : f32 to vector<2x32xf32>
    %361 = arith.maximumf %359, %360 : vector<2x32xf32>
    %362 = arith.truncf %361 : vector<2x32xf32> to vector<2x32xbf16>
    %363 = arith.index_cast %c9_i32 : i32 to index
    %c0_189 = arith.constant 0 : index
    %c0_190 = arith.constant 0 : index
    %364 = vector.load %arg11[%363, %c0_189, %c0_190] : memref<16x32x32xbf16, #tpu.memory_space<vmem>>, vector<1x32x32xbf16>
    %365 = vector.shape_cast %364 : vector<1x32x32xbf16> to vector<32x32xbf16>
    %366 = arith.index_cast %c9_i32 : i32 to index
    %c0_191 = arith.constant 0 : index
    %c0_192 = arith.constant 0 : index
    %367 = vector.load %arg12[%366, %c0_191, %c0_192] : memref<16x1x32xf32, #tpu.memory_space<vmem>>, vector<1x1x32xf32>
    %368 = vector.shape_cast %367 : vector<1x1x32xf32> to vector<1x32xf32>
    %cst_193 = arith.constant dense<0.000000e+00> : vector<2x32xf32>
    %369 = tpu.matmul %362, %365, %cst_193 {dimension_numbers = #tpu.dot_dimension_numbers<[1], [0], [0], [1], [0, 0, 1, 1], [], []>} : vector<2x32xbf16>, vector<32x32xbf16>, vector<2x32xf32> -> vector<2x32xf32>
    %370 = vector.broadcast %368 : vector<1x32xf32> to vector<2x32xf32>
    %371 = arith.addf %369, %370 : vector<2x32xf32>
    %cst_194 = arith.constant 0.000000e+00 : f32
    %372 = vector.broadcast %cst_194 : f32 to vector<2x32xf32>
    %373 = arith.maximumf %371, %372 : vector<2x32xf32>
    %374 = arith.truncf %373 : vector<2x32xf32> to vector<2x32xbf16>
    %375 = arith.index_cast %c9_i32 : i32 to index
    %c0_195 = arith.constant 0 : index
    %c0_196 = arith.constant 0 : index
    %376 = vector.load %arg13[%375, %c0_195, %c0_196] : memref<16x32x128xbf16, #tpu.memory_space<vmem>>, vector<1x32x128xbf16>
    %377 = vector.shape_cast %376 : vector<1x32x128xbf16> to vector<32x128xbf16>
    %378 = arith.index_cast %c9_i32 : i32 to index
    %c0_197 = arith.constant 0 : index
    %c0_198 = arith.constant 0 : index
    %379 = vector.load %arg14[%378, %c0_197, %c0_198] : memref<16x1x128xf32, #tpu.memory_space<vmem>>, vector<1x1x128xf32>
    %380 = vector.shape_cast %379 : vector<1x1x128xf32> to vector<1x128xf32>
    %cst_199 = arith.constant dense<0.000000e+00> : vector<2x128xf32>
    %381 = tpu.matmul %374, %377, %cst_199 {dimension_numbers = #tpu.dot_dimension_numbers<[1], [0], [0], [1], [0, 0, 1, 1], [], []>} : vector<2x32xbf16>, vector<32x128xbf16>, vector<2x128xf32> -> vector<2x128xf32>
    %382 = vector.broadcast %380 : vector<1x128xf32> to vector<2x128xf32>
    %383 = arith.addf %381, %382 : vector<2x128xf32>
    %384 = arith.addf %349, %383 : vector<2x128xf32>
    %c10_i32 = arith.constant 10 : i32
    %385 = arith.truncf %384 : vector<2x128xf32> to vector<2x128xbf16>
    %386 = arith.index_cast %c10_i32 : i32 to index
    %c0_200 = arith.constant 0 : index
    %c0_201 = arith.constant 0 : index
    %387 = vector.load %arg9[%386, %c0_200, %c0_201] : memref<16x128x32xbf16, #tpu.memory_space<vmem>>, vector<1x128x32xbf16>
    %388 = vector.shape_cast %387 : vector<1x128x32xbf16> to vector<128x32xbf16>
    %389 = arith.index_cast %c10_i32 : i32 to index
    %c0_202 = arith.constant 0 : index
    %c0_203 = arith.constant 0 : index
    %390 = vector.load %arg10[%389, %c0_202, %c0_203] : memref<16x1x32xf32, #tpu.memory_space<vmem>>, vector<1x1x32xf32>
    %391 = vector.shape_cast %390 : vector<1x1x32xf32> to vector<1x32xf32>
    %cst_204 = arith.constant dense<0.000000e+00> : vector<2x32xf32>
    %392 = tpu.matmul %385, %388, %cst_204 {dimension_numbers = #tpu.dot_dimension_numbers<[1], [0], [0], [1], [0, 0, 1, 1], [], []>} : vector<2x128xbf16>, vector<128x32xbf16>, vector<2x32xf32> -> vector<2x32xf32>
    %393 = vector.broadcast %391 : vector<1x32xf32> to vector<2x32xf32>
    %394 = arith.addf %392, %393 : vector<2x32xf32>
    %cst_205 = arith.constant 0.000000e+00 : f32
    %395 = vector.broadcast %cst_205 : f32 to vector<2x32xf32>
    %396 = arith.maximumf %394, %395 : vector<2x32xf32>
    %397 = arith.truncf %396 : vector<2x32xf32> to vector<2x32xbf16>
    %398 = arith.index_cast %c10_i32 : i32 to index
    %c0_206 = arith.constant 0 : index
    %c0_207 = arith.constant 0 : index
    %399 = vector.load %arg11[%398, %c0_206, %c0_207] : memref<16x32x32xbf16, #tpu.memory_space<vmem>>, vector<1x32x32xbf16>
    %400 = vector.shape_cast %399 : vector<1x32x32xbf16> to vector<32x32xbf16>
    %401 = arith.index_cast %c10_i32 : i32 to index
    %c0_208 = arith.constant 0 : index
    %c0_209 = arith.constant 0 : index
    %402 = vector.load %arg12[%401, %c0_208, %c0_209] : memref<16x1x32xf32, #tpu.memory_space<vmem>>, vector<1x1x32xf32>
    %403 = vector.shape_cast %402 : vector<1x1x32xf32> to vector<1x32xf32>
    %cst_210 = arith.constant dense<0.000000e+00> : vector<2x32xf32>
    %404 = tpu.matmul %397, %400, %cst_210 {dimension_numbers = #tpu.dot_dimension_numbers<[1], [0], [0], [1], [0, 0, 1, 1], [], []>} : vector<2x32xbf16>, vector<32x32xbf16>, vector<2x32xf32> -> vector<2x32xf32>
    %405 = vector.broadcast %403 : vector<1x32xf32> to vector<2x32xf32>
    %406 = arith.addf %404, %405 : vector<2x32xf32>
    %cst_211 = arith.constant 0.000000e+00 : f32
    %407 = vector.broadcast %cst_211 : f32 to vector<2x32xf32>
    %408 = arith.maximumf %406, %407 : vector<2x32xf32>
    %409 = arith.truncf %408 : vector<2x32xf32> to vector<2x32xbf16>
    %410 = arith.index_cast %c10_i32 : i32 to index
    %c0_212 = arith.constant 0 : index
    %c0_213 = arith.constant 0 : index
    %411 = vector.load %arg13[%410, %c0_212, %c0_213] : memref<16x32x128xbf16, #tpu.memory_space<vmem>>, vector<1x32x128xbf16>
    %412 = vector.shape_cast %411 : vector<1x32x128xbf16> to vector<32x128xbf16>
    %413 = arith.index_cast %c10_i32 : i32 to index
    %c0_214 = arith.constant 0 : index
    %c0_215 = arith.constant 0 : index
    %414 = vector.load %arg14[%413, %c0_214, %c0_215] : memref<16x1x128xf32, #tpu.memory_space<vmem>>, vector<1x1x128xf32>
    %415 = vector.shape_cast %414 : vector<1x1x128xf32> to vector<1x128xf32>
    %cst_216 = arith.constant dense<0.000000e+00> : vector<2x128xf32>
    %416 = tpu.matmul %409, %412, %cst_216 {dimension_numbers = #tpu.dot_dimension_numbers<[1], [0], [0], [1], [0, 0, 1, 1], [], []>} : vector<2x32xbf16>, vector<32x128xbf16>, vector<2x128xf32> -> vector<2x128xf32>
    %417 = vector.broadcast %415 : vector<1x128xf32> to vector<2x128xf32>
    %418 = arith.addf %416, %417 : vector<2x128xf32>
    %419 = arith.addf %384, %418 : vector<2x128xf32>
    %c11_i32 = arith.constant 11 : i32
    %420 = arith.truncf %419 : vector<2x128xf32> to vector<2x128xbf16>
    %421 = arith.index_cast %c11_i32 : i32 to index
    %c0_217 = arith.constant 0 : index
    %c0_218 = arith.constant 0 : index
    %422 = vector.load %arg9[%421, %c0_217, %c0_218] : memref<16x128x32xbf16, #tpu.memory_space<vmem>>, vector<1x128x32xbf16>
    %423 = vector.shape_cast %422 : vector<1x128x32xbf16> to vector<128x32xbf16>
    %424 = arith.index_cast %c11_i32 : i32 to index
    %c0_219 = arith.constant 0 : index
    %c0_220 = arith.constant 0 : index
    %425 = vector.load %arg10[%424, %c0_219, %c0_220] : memref<16x1x32xf32, #tpu.memory_space<vmem>>, vector<1x1x32xf32>
    %426 = vector.shape_cast %425 : vector<1x1x32xf32> to vector<1x32xf32>
    %cst_221 = arith.constant dense<0.000000e+00> : vector<2x32xf32>
    %427 = tpu.matmul %420, %423, %cst_221 {dimension_numbers = #tpu.dot_dimension_numbers<[1], [0], [0], [1], [0, 0, 1, 1], [], []>} : vector<2x128xbf16>, vector<128x32xbf16>, vector<2x32xf32> -> vector<2x32xf32>
    %428 = vector.broadcast %426 : vector<1x32xf32> to vector<2x32xf32>
    %429 = arith.addf %427, %428 : vector<2x32xf32>
    %cst_222 = arith.constant 0.000000e+00 : f32
    %430 = vector.broadcast %cst_222 : f32 to vector<2x32xf32>
    %431 = arith.maximumf %429, %430 : vector<2x32xf32>
    %432 = arith.truncf %431 : vector<2x32xf32> to vector<2x32xbf16>
    %433 = arith.index_cast %c11_i32 : i32 to index
    %c0_223 = arith.constant 0 : index
    %c0_224 = arith.constant 0 : index
    %434 = vector.load %arg11[%433, %c0_223, %c0_224] : memref<16x32x32xbf16, #tpu.memory_space<vmem>>, vector<1x32x32xbf16>
    %435 = vector.shape_cast %434 : vector<1x32x32xbf16> to vector<32x32xbf16>
    %436 = arith.index_cast %c11_i32 : i32 to index
    %c0_225 = arith.constant 0 : index
    %c0_226 = arith.constant 0 : index
    %437 = vector.load %arg12[%436, %c0_225, %c0_226] : memref<16x1x32xf32, #tpu.memory_space<vmem>>, vector<1x1x32xf32>
    %438 = vector.shape_cast %437 : vector<1x1x32xf32> to vector<1x32xf32>
    %cst_227 = arith.constant dense<0.000000e+00> : vector<2x32xf32>
    %439 = tpu.matmul %432, %435, %cst_227 {dimension_numbers = #tpu.dot_dimension_numbers<[1], [0], [0], [1], [0, 0, 1, 1], [], []>} : vector<2x32xbf16>, vector<32x32xbf16>, vector<2x32xf32> -> vector<2x32xf32>
    %440 = vector.broadcast %438 : vector<1x32xf32> to vector<2x32xf32>
    %441 = arith.addf %439, %440 : vector<2x32xf32>
    %cst_228 = arith.constant 0.000000e+00 : f32
    %442 = vector.broadcast %cst_228 : f32 to vector<2x32xf32>
    %443 = arith.maximumf %441, %442 : vector<2x32xf32>
    %444 = arith.truncf %443 : vector<2x32xf32> to vector<2x32xbf16>
    %445 = arith.index_cast %c11_i32 : i32 to index
    %c0_229 = arith.constant 0 : index
    %c0_230 = arith.constant 0 : index
    %446 = vector.load %arg13[%445, %c0_229, %c0_230] : memref<16x32x128xbf16, #tpu.memory_space<vmem>>, vector<1x32x128xbf16>
    %447 = vector.shape_cast %446 : vector<1x32x128xbf16> to vector<32x128xbf16>
    %448 = arith.index_cast %c11_i32 : i32 to index
    %c0_231 = arith.constant 0 : index
    %c0_232 = arith.constant 0 : index
    %449 = vector.load %arg14[%448, %c0_231, %c0_232] : memref<16x1x128xf32, #tpu.memory_space<vmem>>, vector<1x1x128xf32>
    %450 = vector.shape_cast %449 : vector<1x1x128xf32> to vector<1x128xf32>
    %cst_233 = arith.constant dense<0.000000e+00> : vector<2x128xf32>
    %451 = tpu.matmul %444, %447, %cst_233 {dimension_numbers = #tpu.dot_dimension_numbers<[1], [0], [0], [1], [0, 0, 1, 1], [], []>} : vector<2x32xbf16>, vector<32x128xbf16>, vector<2x128xf32> -> vector<2x128xf32>
    %452 = vector.broadcast %450 : vector<1x128xf32> to vector<2x128xf32>
    %453 = arith.addf %451, %452 : vector<2x128xf32>
    %454 = arith.addf %419, %453 : vector<2x128xf32>
    %c12_i32 = arith.constant 12 : i32
    %455 = arith.truncf %454 : vector<2x128xf32> to vector<2x128xbf16>
    %456 = arith.index_cast %c12_i32 : i32 to index
    %c0_234 = arith.constant 0 : index
    %c0_235 = arith.constant 0 : index
    %457 = vector.load %arg9[%456, %c0_234, %c0_235] : memref<16x128x32xbf16, #tpu.memory_space<vmem>>, vector<1x128x32xbf16>
    %458 = vector.shape_cast %457 : vector<1x128x32xbf16> to vector<128x32xbf16>
    %459 = arith.index_cast %c12_i32 : i32 to index
    %c0_236 = arith.constant 0 : index
    %c0_237 = arith.constant 0 : index
    %460 = vector.load %arg10[%459, %c0_236, %c0_237] : memref<16x1x32xf32, #tpu.memory_space<vmem>>, vector<1x1x32xf32>
    %461 = vector.shape_cast %460 : vector<1x1x32xf32> to vector<1x32xf32>
    %cst_238 = arith.constant dense<0.000000e+00> : vector<2x32xf32>
    %462 = tpu.matmul %455, %458, %cst_238 {dimension_numbers = #tpu.dot_dimension_numbers<[1], [0], [0], [1], [0, 0, 1, 1], [], []>} : vector<2x128xbf16>, vector<128x32xbf16>, vector<2x32xf32> -> vector<2x32xf32>
    %463 = vector.broadcast %461 : vector<1x32xf32> to vector<2x32xf32>
    %464 = arith.addf %462, %463 : vector<2x32xf32>
    %cst_239 = arith.constant 0.000000e+00 : f32
    %465 = vector.broadcast %cst_239 : f32 to vector<2x32xf32>
    %466 = arith.maximumf %464, %465 : vector<2x32xf32>
    %467 = arith.truncf %466 : vector<2x32xf32> to vector<2x32xbf16>
    %468 = arith.index_cast %c12_i32 : i32 to index
    %c0_240 = arith.constant 0 : index
    %c0_241 = arith.constant 0 : index
    %469 = vector.load %arg11[%468, %c0_240, %c0_241] : memref<16x32x32xbf16, #tpu.memory_space<vmem>>, vector<1x32x32xbf16>
    %470 = vector.shape_cast %469 : vector<1x32x32xbf16> to vector<32x32xbf16>
    %471 = arith.index_cast %c12_i32 : i32 to index
    %c0_242 = arith.constant 0 : index
    %c0_243 = arith.constant 0 : index
    %472 = vector.load %arg12[%471, %c0_242, %c0_243] : memref<16x1x32xf32, #tpu.memory_space<vmem>>, vector<1x1x32xf32>
    %473 = vector.shape_cast %472 : vector<1x1x32xf32> to vector<1x32xf32>
    %cst_244 = arith.constant dense<0.000000e+00> : vector<2x32xf32>
    %474 = tpu.matmul %467, %470, %cst_244 {dimension_numbers = #tpu.dot_dimension_numbers<[1], [0], [0], [1], [0, 0, 1, 1], [], []>} : vector<2x32xbf16>, vector<32x32xbf16>, vector<2x32xf32> -> vector<2x32xf32>
    %475 = vector.broadcast %473 : vector<1x32xf32> to vector<2x32xf32>
    %476 = arith.addf %474, %475 : vector<2x32xf32>
    %cst_245 = arith.constant 0.000000e+00 : f32
    %477 = vector.broadcast %cst_245 : f32 to vector<2x32xf32>
    %478 = arith.maximumf %476, %477 : vector<2x32xf32>
    %479 = arith.truncf %478 : vector<2x32xf32> to vector<2x32xbf16>
    %480 = arith.index_cast %c12_i32 : i32 to index
    %c0_246 = arith.constant 0 : index
    %c0_247 = arith.constant 0 : index
    %481 = vector.load %arg13[%480, %c0_246, %c0_247] : memref<16x32x128xbf16, #tpu.memory_space<vmem>>, vector<1x32x128xbf16>
    %482 = vector.shape_cast %481 : vector<1x32x128xbf16> to vector<32x128xbf16>
    %483 = arith.index_cast %c12_i32 : i32 to index
    %c0_248 = arith.constant 0 : index
    %c0_249 = arith.constant 0 : index
    %484 = vector.load %arg14[%483, %c0_248, %c0_249] : memref<16x1x128xf32, #tpu.memory_space<vmem>>, vector<1x1x128xf32>
    %485 = vector.shape_cast %484 : vector<1x1x128xf32> to vector<1x128xf32>
    %cst_250 = arith.constant dense<0.000000e+00> : vector<2x128xf32>
    %486 = tpu.matmul %479, %482, %cst_250 {dimension_numbers = #tpu.dot_dimension_numbers<[1], [0], [0], [1], [0, 0, 1, 1], [], []>} : vector<2x32xbf16>, vector<32x128xbf16>, vector<2x128xf32> -> vector<2x128xf32>
    %487 = vector.broadcast %485 : vector<1x128xf32> to vector<2x128xf32>
    %488 = arith.addf %486, %487 : vector<2x128xf32>
    %489 = arith.addf %454, %488 : vector<2x128xf32>
    %c13_i32 = arith.constant 13 : i32
    %490 = arith.truncf %489 : vector<2x128xf32> to vector<2x128xbf16>
    %491 = arith.index_cast %c13_i32 : i32 to index
    %c0_251 = arith.constant 0 : index
    %c0_252 = arith.constant 0 : index
    %492 = vector.load %arg9[%491, %c0_251, %c0_252] : memref<16x128x32xbf16, #tpu.memory_space<vmem>>, vector<1x128x32xbf16>
    %493 = vector.shape_cast %492 : vector<1x128x32xbf16> to vector<128x32xbf16>
    %494 = arith.index_cast %c13_i32 : i32 to index
    %c0_253 = arith.constant 0 : index
    %c0_254 = arith.constant 0 : index
    %495 = vector.load %arg10[%494, %c0_253, %c0_254] : memref<16x1x32xf32, #tpu.memory_space<vmem>>, vector<1x1x32xf32>
    %496 = vector.shape_cast %495 : vector<1x1x32xf32> to vector<1x32xf32>
    %cst_255 = arith.constant dense<0.000000e+00> : vector<2x32xf32>
    %497 = tpu.matmul %490, %493, %cst_255 {dimension_numbers = #tpu.dot_dimension_numbers<[1], [0], [0], [1], [0, 0, 1, 1], [], []>} : vector<2x128xbf16>, vector<128x32xbf16>, vector<2x32xf32> -> vector<2x32xf32>
    %498 = vector.broadcast %496 : vector<1x32xf32> to vector<2x32xf32>
    %499 = arith.addf %497, %498 : vector<2x32xf32>
    %cst_256 = arith.constant 0.000000e+00 : f32
    %500 = vector.broadcast %cst_256 : f32 to vector<2x32xf32>
    %501 = arith.maximumf %499, %500 : vector<2x32xf32>
    %502 = arith.truncf %501 : vector<2x32xf32> to vector<2x32xbf16>
    %503 = arith.index_cast %c13_i32 : i32 to index
    %c0_257 = arith.constant 0 : index
    %c0_258 = arith.constant 0 : index
    %504 = vector.load %arg11[%503, %c0_257, %c0_258] : memref<16x32x32xbf16, #tpu.memory_space<vmem>>, vector<1x32x32xbf16>
    %505 = vector.shape_cast %504 : vector<1x32x32xbf16> to vector<32x32xbf16>
    %506 = arith.index_cast %c13_i32 : i32 to index
    %c0_259 = arith.constant 0 : index
    %c0_260 = arith.constant 0 : index
    %507 = vector.load %arg12[%506, %c0_259, %c0_260] : memref<16x1x32xf32, #tpu.memory_space<vmem>>, vector<1x1x32xf32>
    %508 = vector.shape_cast %507 : vector<1x1x32xf32> to vector<1x32xf32>
    %cst_261 = arith.constant dense<0.000000e+00> : vector<2x32xf32>
    %509 = tpu.matmul %502, %505, %cst_261 {dimension_numbers = #tpu.dot_dimension_numbers<[1], [0], [0], [1], [0, 0, 1, 1], [], []>} : vector<2x32xbf16>, vector<32x32xbf16>, vector<2x32xf32> -> vector<2x32xf32>
    %510 = vector.broadcast %508 : vector<1x32xf32> to vector<2x32xf32>
    %511 = arith.addf %509, %510 : vector<2x32xf32>
    %cst_262 = arith.constant 0.000000e+00 : f32
    %512 = vector.broadcast %cst_262 : f32 to vector<2x32xf32>
    %513 = arith.maximumf %511, %512 : vector<2x32xf32>
    %514 = arith.truncf %513 : vector<2x32xf32> to vector<2x32xbf16>
    %515 = arith.index_cast %c13_i32 : i32 to index
    %c0_263 = arith.constant 0 : index
    %c0_264 = arith.constant 0 : index
    %516 = vector.load %arg13[%515, %c0_263, %c0_264] : memref<16x32x128xbf16, #tpu.memory_space<vmem>>, vector<1x32x128xbf16>
    %517 = vector.shape_cast %516 : vector<1x32x128xbf16> to vector<32x128xbf16>
    %518 = arith.index_cast %c13_i32 : i32 to index
    %c0_265 = arith.constant 0 : index
    %c0_266 = arith.constant 0 : index
    %519 = vector.load %arg14[%518, %c0_265, %c0_266] : memref<16x1x128xf32, #tpu.memory_space<vmem>>, vector<1x1x128xf32>
    %520 = vector.shape_cast %519 : vector<1x1x128xf32> to vector<1x128xf32>
    %cst_267 = arith.constant dense<0.000000e+00> : vector<2x128xf32>
    %521 = tpu.matmul %514, %517, %cst_267 {dimension_numbers = #tpu.dot_dimension_numbers<[1], [0], [0], [1], [0, 0, 1, 1], [], []>} : vector<2x32xbf16>, vector<32x128xbf16>, vector<2x128xf32> -> vector<2x128xf32>
    %522 = vector.broadcast %520 : vector<1x128xf32> to vector<2x128xf32>
    %523 = arith.addf %521, %522 : vector<2x128xf32>
    %524 = arith.addf %489, %523 : vector<2x128xf32>
    %c14_i32 = arith.constant 14 : i32
    %525 = arith.truncf %524 : vector<2x128xf32> to vector<2x128xbf16>
    %526 = arith.index_cast %c14_i32 : i32 to index
    %c0_268 = arith.constant 0 : index
    %c0_269 = arith.constant 0 : index
    %527 = vector.load %arg9[%526, %c0_268, %c0_269] : memref<16x128x32xbf16, #tpu.memory_space<vmem>>, vector<1x128x32xbf16>
    %528 = vector.shape_cast %527 : vector<1x128x32xbf16> to vector<128x32xbf16>
    %529 = arith.index_cast %c14_i32 : i32 to index
    %c0_270 = arith.constant 0 : index
    %c0_271 = arith.constant 0 : index
    %530 = vector.load %arg10[%529, %c0_270, %c0_271] : memref<16x1x32xf32, #tpu.memory_space<vmem>>, vector<1x1x32xf32>
    %531 = vector.shape_cast %530 : vector<1x1x32xf32> to vector<1x32xf32>
    %cst_272 = arith.constant dense<0.000000e+00> : vector<2x32xf32>
    %532 = tpu.matmul %525, %528, %cst_272 {dimension_numbers = #tpu.dot_dimension_numbers<[1], [0], [0], [1], [0, 0, 1, 1], [], []>} : vector<2x128xbf16>, vector<128x32xbf16>, vector<2x32xf32> -> vector<2x32xf32>
    %533 = vector.broadcast %531 : vector<1x32xf32> to vector<2x32xf32>
    %534 = arith.addf %532, %533 : vector<2x32xf32>
    %cst_273 = arith.constant 0.000000e+00 : f32
    %535 = vector.broadcast %cst_273 : f32 to vector<2x32xf32>
    %536 = arith.maximumf %534, %535 : vector<2x32xf32>
    %537 = arith.truncf %536 : vector<2x32xf32> to vector<2x32xbf16>
    %538 = arith.index_cast %c14_i32 : i32 to index
    %c0_274 = arith.constant 0 : index
    %c0_275 = arith.constant 0 : index
    %539 = vector.load %arg11[%538, %c0_274, %c0_275] : memref<16x32x32xbf16, #tpu.memory_space<vmem>>, vector<1x32x32xbf16>
    %540 = vector.shape_cast %539 : vector<1x32x32xbf16> to vector<32x32xbf16>
    %541 = arith.index_cast %c14_i32 : i32 to index
    %c0_276 = arith.constant 0 : index
    %c0_277 = arith.constant 0 : index
    %542 = vector.load %arg12[%541, %c0_276, %c0_277] : memref<16x1x32xf32, #tpu.memory_space<vmem>>, vector<1x1x32xf32>
    %543 = vector.shape_cast %542 : vector<1x1x32xf32> to vector<1x32xf32>
    %cst_278 = arith.constant dense<0.000000e+00> : vector<2x32xf32>
    %544 = tpu.matmul %537, %540, %cst_278 {dimension_numbers = #tpu.dot_dimension_numbers<[1], [0], [0], [1], [0, 0, 1, 1], [], []>} : vector<2x32xbf16>, vector<32x32xbf16>, vector<2x32xf32> -> vector<2x32xf32>
    %545 = vector.broadcast %543 : vector<1x32xf32> to vector<2x32xf32>
    %546 = arith.addf %544, %545 : vector<2x32xf32>
    %cst_279 = arith.constant 0.000000e+00 : f32
    %547 = vector.broadcast %cst_279 : f32 to vector<2x32xf32>
    %548 = arith.maximumf %546, %547 : vector<2x32xf32>
    %549 = arith.truncf %548 : vector<2x32xf32> to vector<2x32xbf16>
    %550 = arith.index_cast %c14_i32 : i32 to index
    %c0_280 = arith.constant 0 : index
    %c0_281 = arith.constant 0 : index
    %551 = vector.load %arg13[%550, %c0_280, %c0_281] : memref<16x32x128xbf16, #tpu.memory_space<vmem>>, vector<1x32x128xbf16>
    %552 = vector.shape_cast %551 : vector<1x32x128xbf16> to vector<32x128xbf16>
    %553 = arith.index_cast %c14_i32 : i32 to index
    %c0_282 = arith.constant 0 : index
    %c0_283 = arith.constant 0 : index
    %554 = vector.load %arg14[%553, %c0_282, %c0_283] : memref<16x1x128xf32, #tpu.memory_space<vmem>>, vector<1x1x128xf32>
    %555 = vector.shape_cast %554 : vector<1x1x128xf32> to vector<1x128xf32>
    %cst_284 = arith.constant dense<0.000000e+00> : vector<2x128xf32>
    %556 = tpu.matmul %549, %552, %cst_284 {dimension_numbers = #tpu.dot_dimension_numbers<[1], [0], [0], [1], [0, 0, 1, 1], [], []>} : vector<2x32xbf16>, vector<32x128xbf16>, vector<2x128xf32> -> vector<2x128xf32>
    %557 = vector.broadcast %555 : vector<1x128xf32> to vector<2x128xf32>
    %558 = arith.addf %556, %557 : vector<2x128xf32>
    %559 = arith.addf %524, %558 : vector<2x128xf32>
    %c15_i32 = arith.constant 15 : i32
    %560 = arith.truncf %559 : vector<2x128xf32> to vector<2x128xbf16>
    %561 = arith.index_cast %c15_i32 : i32 to index
    %c0_285 = arith.constant 0 : index
    %c0_286 = arith.constant 0 : index
    %562 = vector.load %arg9[%561, %c0_285, %c0_286] : memref<16x128x32xbf16, #tpu.memory_space<vmem>>, vector<1x128x32xbf16>
    %563 = vector.shape_cast %562 : vector<1x128x32xbf16> to vector<128x32xbf16>
    %564 = arith.index_cast %c15_i32 : i32 to index
    %c0_287 = arith.constant 0 : index
    %c0_288 = arith.constant 0 : index
    %565 = vector.load %arg10[%564, %c0_287, %c0_288] : memref<16x1x32xf32, #tpu.memory_space<vmem>>, vector<1x1x32xf32>
    %566 = vector.shape_cast %565 : vector<1x1x32xf32> to vector<1x32xf32>
    %cst_289 = arith.constant dense<0.000000e+00> : vector<2x32xf32>
    %567 = tpu.matmul %560, %563, %cst_289 {dimension_numbers = #tpu.dot_dimension_numbers<[1], [0], [0], [1], [0, 0, 1, 1], [], []>} : vector<2x128xbf16>, vector<128x32xbf16>, vector<2x32xf32> -> vector<2x32xf32>
    %568 = vector.broadcast %566 : vector<1x32xf32> to vector<2x32xf32>
    %569 = arith.addf %567, %568 : vector<2x32xf32>
    %cst_290 = arith.constant 0.000000e+00 : f32
    %570 = vector.broadcast %cst_290 : f32 to vector<2x32xf32>
    %571 = arith.maximumf %569, %570 : vector<2x32xf32>
    %572 = arith.truncf %571 : vector<2x32xf32> to vector<2x32xbf16>
    %573 = arith.index_cast %c15_i32 : i32 to index
    %c0_291 = arith.constant 0 : index
    %c0_292 = arith.constant 0 : index
    %574 = vector.load %arg11[%573, %c0_291, %c0_292] : memref<16x32x32xbf16, #tpu.memory_space<vmem>>, vector<1x32x32xbf16>
    %575 = vector.shape_cast %574 : vector<1x32x32xbf16> to vector<32x32xbf16>
    %576 = arith.index_cast %c15_i32 : i32 to index
    %c0_293 = arith.constant 0 : index
    %c0_294 = arith.constant 0 : index
    %577 = vector.load %arg12[%576, %c0_293, %c0_294] : memref<16x1x32xf32, #tpu.memory_space<vmem>>, vector<1x1x32xf32>
    %578 = vector.shape_cast %577 : vector<1x1x32xf32> to vector<1x32xf32>
    %cst_295 = arith.constant dense<0.000000e+00> : vector<2x32xf32>
    %579 = tpu.matmul %572, %575, %cst_295 {dimension_numbers = #tpu.dot_dimension_numbers<[1], [0], [0], [1], [0, 0, 1, 1], [], []>} : vector<2x32xbf16>, vector<32x32xbf16>, vector<2x32xf32> -> vector<2x32xf32>
    %580 = vector.broadcast %578 : vector<1x32xf32> to vector<2x32xf32>
    %581 = arith.addf %579, %580 : vector<2x32xf32>
    %cst_296 = arith.constant 0.000000e+00 : f32
    %582 = vector.broadcast %cst_296 : f32 to vector<2x32xf32>
    %583 = arith.maximumf %581, %582 : vector<2x32xf32>
    %584 = arith.truncf %583 : vector<2x32xf32> to vector<2x32xbf16>
    %585 = arith.index_cast %c15_i32 : i32 to index
    %c0_297 = arith.constant 0 : index
    %c0_298 = arith.constant 0 : index
    %586 = vector.load %arg13[%585, %c0_297, %c0_298] : memref<16x32x128xbf16, #tpu.memory_space<vmem>>, vector<1x32x128xbf16>
    %587 = vector.shape_cast %586 : vector<1x32x128xbf16> to vector<32x128xbf16>
    %588 = arith.index_cast %c15_i32 : i32 to index
    %c0_299 = arith.constant 0 : index
    %c0_300 = arith.constant 0 : index
    %589 = vector.load %arg14[%588, %c0_299, %c0_300] : memref<16x1x128xf32, #tpu.memory_space<vmem>>, vector<1x1x128xf32>
    %590 = vector.shape_cast %589 : vector<1x1x128xf32> to vector<1x128xf32>
    %cst_301 = arith.constant dense<0.000000e+00> : vector<2x128xf32>
    %591 = tpu.matmul %584, %587, %cst_301 {dimension_numbers = #tpu.dot_dimension_numbers<[1], [0], [0], [1], [0, 0, 1, 1], [], []>} : vector<2x32xbf16>, vector<32x128xbf16>, vector<2x128xf32> -> vector<2x128xf32>
    %592 = vector.broadcast %590 : vector<1x128xf32> to vector<2x128xf32>
    %593 = arith.addf %591, %592 : vector<2x128xf32>
    %594 = arith.addf %559, %593 : vector<2x128xf32>
    %c16_i32 = arith.constant 16 : i32
    %595 = arith.addf %594, %32 : vector<2x128xf32>
    %c0_302 = arith.constant 0 : index
    %c0_303 = arith.constant 0 : index
    %596 = vector.load %arg18[%c0_302, %c0_303] : memref<2x128xf32, #tpu.memory_space<vmem>>, vector<2x128xf32>
    tpu.vector_store %arg18[%c0_302, %c0_303], %595 {strides = array<i32>} : memref<2x128xf32, #tpu.memory_space<vmem>>, vector<2x128xf32>,
    return
  }
}

</mosaic_0001>

<bundles_post_ra>
// kernel: encoder_semi_forward.1
= control target key start
LH: loop header
LB: loop body
LE: loop exit
PB: predicated region body
PF: predicated region fallthrough
CT: control target
= control target key end

     0   :  { %s14263_s0 = inlined_call_operand.vmem [shape: bf16[2,768], index: 0, kind: input, shape index: {}]   ;;  %s14264_s1 = inlined_call_operand.hbm [shape: bf16[768,1024], index: 1, kind: input, shape index: {}]   ;;  %s14265_s2 = inlined_call_operand.hbm [shape: f32[1,1024], index: 2, kind: input, shape index: {}]   ;;  %s14266_s3 = inlined_call_operand.hbm [shape: bf16[1024,512], index: 3, kind: input, shape index: {}]   ;;  %s14267_s4 = inlined_call_operand.hbm [shape: f32[1,512], index: 4, kind: input, shape index: {}]   ;;  %s14268_s5 = inlined_call_operand.hbm [shape: bf16[512,256], index: 5, kind: input, shape index: {}]   ;;  %s14269_s6 = inlined_call_operand.hbm [shape: f32[1,256], index: 6, kind: input, shape index: {}]   ;;  %s14270_s7 = inlined_call_operand.hbm [shape: bf16[256,128], index: 7, kind: input, shape index: {}]   ;;  %s14271_s8 = inlined_call_operand.hbm [shape: f32[1,128], index: 8, kind: input, shape index: {}]   ;;  %s14272_s9 = inlined_call_operand.vmem [shape: bf16[16,128,32], index: 9, kind: input, shape index: {}]   ;;  %s14273_s10 = inlined_call_operand.hbm [shape: f32[16,1,32], index: 10, kind: input, shape index: {}]   ;;  %s14274_s11 = inlined_call_operand.hbm [shape: bf16[16,32,32], index: 11, kind: input, shape index: {}]   ;;  %s14275_s12 = inlined_call_operand.hbm [shape: f32[16,1,32], index: 12, kind: input, shape index: {}]   ;;  %s14276_s13 = inlined_call_operand.hbm [shape: bf16[16,32,128], index: 13, kind: input, shape index: {}]   ;;  %s14277_s14 = inlined_call_operand.hbm [shape: f32[16,1,128], index: 14, kind: input, shape index: {}]   ;;  %s14278_s15 = inlined_call_operand.vmem [shape: f32[2,1024], index: 15, kind: output, shape index: {0}]   ;;  %s14279_s16 = inlined_call_operand.vmem [shape: f32[2,512], index: 16, kind: output, shape index: {1}]   ;;  %s14280_s17 = inlined_call_operand.vmem [shape: f32[2,256], index: 17, kind: output, shape index: {2}]   ;;  %s14281_s18 = inlined_call_operand.vmem [shape: f32[2,128], index: 18, kind: output, shape index: {3}]  }
   0x1   :  { %14284 = sst [smem:[#allocation29_spill]] %s14263_s0 }
   0x2   :  { %14285 = sst [smem:[#allocation30_spill]] %s14264_s1 }
   0x3   :  { %14286 = sst [smem:[#allocation31_spill]] %s14265_s2 }
   0x4   :  { %24 = vsyncpa [#allocation3], 0 }
   0x5   :  { %25 = vsyncpa [#allocation5], 0 }
   0x6   :  { %26 = vsyncpa [#allocation8], 0 }
   0x7   :  { %27 = vsyncpa [#allocation11], 0 }
   0x8   :  { %28 = vsyncpa [#allocation14], 0 }
   0x9   :  { %29 = vsyncpa [#allocation17], 0 }
   0xa   :  { %30 = vsyncpa [#allocation20], 0  ;;  %s13026_s27 = smov [#allocation4]   ;;  %s13027_s29 = smov [#allocation7]  }
   0xb   :  { %s51_s28 = sshll.u32 %s13026_s27, 4  ;;  %s73_s30 = sshll.u32 %s13027_s29, 4  ;;  %s52_s28 = int_to_ptr.vmem [resolvable:$true] %s51_s28  ;;  %s74_s30 = int_to_ptr.vmem [resolvable:$true] %s73_s30 }
   0xc   :  { %s14287_s1 = sld [smem:[#allocation31_spill]] }
  0x12   :  { %s12726_s20 = scalar_lea.hbm %s14287_s1, 128 }
  0x13   :  { %p12727_p0 = scmp.ne.s32.totalorder %s14287_s1, %s12726_s20  ;;  %p12730_p1 = scmp.lt.u32.totalorder %s12726_s20, %s14287_s1 }
  0x15   :  { %p12732_p2 = pnand %p12730_p1, %p12727_p0 }
  0x17   :  { %12735 = shalt.err (!%p12732_p2)
}
  0x18   :  { %s12736_s24 = scalar_lea.vmem %s52_s28, 128  ;;  %p12741_p4 = scmp.lt.s32.totalorder %s52_s28, %s52_s28 }
  0x19   :  { %p12737_p3 = scmp.ne.s32.totalorder %s52_s28, %s12736_s24  ;;  %p12742_p5 = scmp.lt.s32.totalorder %s12736_s24, %s12736_s24 }
  0x1b   :  { %p12743_p6 = por %p12742_p5, %p12741_p4 }
  0x1d   :  { %p12744_p7 = pnand %p12743_p6, %p12737_p3 }
  0x1f   :  { %12747 = shalt.err (!%p12744_p7)
}
  0x20   :  { %54 = dma.hbm_to_vmem [thread:$0]  %s14287_s1, 128, %s52_s28, [#allocation5]  }
  0x21   :  { %s12748_s0 = scalar_lea.hbm %s14267_s4, 64 }
  0x22   :  { %p12749_p8 = scmp.ne.s32.totalorder %s14267_s4, %s12748_s0  ;;  %p12752_p9 = scmp.lt.u32.totalorder %s12748_s0, %s14267_s4 }
  0x24   :  { %p12754_p10 = pnand %p12752_p9, %p12749_p8 }
  0x26   :  { %12757 = shalt.err (!%p12754_p10)
}
  0x27   :  { %s12758_s2 = scalar_lea.vmem %s74_s30, 64  ;;  %p12763_p12 = scmp.lt.s32.totalorder %s74_s30, %s74_s30 }
  0x28   :  { %p12759_p11 = scmp.ne.s32.totalorder %s74_s30, %s12758_s2  ;;  %p12764_p13 = scmp.lt.s32.totalorder %s12758_s2, %s12758_s2 }
  0x2a   :  { %p12765_p0 = por %p12764_p13, %p12763_p12 }
  0x2c   :  { %p12766_p1 = pnand %p12765_p0, %p12759_p11 }
  0x2e   :  { %12769 = shalt.err (!%p12766_p1)
}
  0x2f   :  { %76 = dma.hbm_to_vmem [thread:$0]  %s14267_s4, 64, %s74_s30, [#allocation8]  }
  0x30   :  { %s13028_s23 = smov [#allocation10]   ;;  %s13029_s25 = smov [#allocation13]  }
  0x31   :  { %s95_s24 = sshll.u32 %s13028_s23, 4  ;;  %s117_s26 = sshll.u32 %s13029_s25, 4  ;;  %s96_s24 = int_to_ptr.vmem [resolvable:$true] %s95_s24  ;;  %s118_s26 = int_to_ptr.vmem [resolvable:$true] %s117_s26 }
  0x32   :  { %s12770_s0 = scalar_lea.hbm %s14269_s6, 32 }
  0x33   :  { %p12771_p2 = scmp.ne.s32.totalorder %s14269_s6, %s12770_s0  ;;  %p12774_p3 = scmp.lt.u32.totalorder %s12770_s0, %s14269_s6 }
  0x35   :  { %p12776_p4 = pnand %p12774_p3, %p12771_p2 }
  0x37   :  { %12779 = shalt.err (!%p12776_p4)
}
  0x38   :  { %s12780_s4 = scalar_lea.vmem %s96_s24, 32  ;;  %p12785_p6 = scmp.lt.s32.totalorder %s96_s24, %s96_s24 }
  0x39   :  { %p12781_p5 = scmp.ne.s32.totalorder %s96_s24, %s12780_s4  ;;  %p12786_p7 = scmp.lt.s32.totalorder %s12780_s4, %s12780_s4 }
  0x3b   :  { %p12787_p8 = por %p12786_p7, %p12785_p6 }
  0x3d   :  { %p12788_p9 = pnand %p12787_p8, %p12781_p5 }
  0x3f   :  { %12791 = shalt.err (!%p12788_p9)
}
  0x40   :  { %98 = dma.hbm_to_vmem [thread:$0]  %s14269_s6, 32, %s96_s24, [#allocation11]  }
  0x41   :  { %s12792_s23 = scalar_lea.hbm %s14271_s8, 16 }
  0x42   :  { %p12793_p10 = scmp.ne.s32.totalorder %s14271_s8, %s12792_s23  ;;  %p12796_p11 = scmp.lt.u32.totalorder %s12792_s23, %s14271_s8 }
  0x44   :  { %p12798_p12 = pnand %p12796_p11, %p12793_p10 }
  0x46   :  { %12801 = shalt.err (!%p12798_p12)
}
  0x47   :  { %s12802_s19 = scalar_lea.vmem %s118_s26, 16  ;;  %s12806_s21 = scalar_lea.vmem %s118_s26, 32 }
  0x48   :  { %p12803_p13 = scmp.ne.s32.totalorder %s118_s26, %s12802_s19  ;;  %p12807_p0 = scmp.lt.s32.totalorder %s118_s26, %s118_s26 }
  0x49   :  { %p12808_p1 = scmp.lt.s32.totalorder %s12806_s21, %s12802_s19 }
  0x4b   :  { %p12809_p2 = por %p12808_p1, %p12807_p0 }
  0x4d   :  { %p12810_p3 = pnand %p12809_p2, %p12803_p13 }
  0x4f   :  { %12813 = shalt.err (!%p12810_p3)
}
  0x50   :  { %120 = dma.hbm_to_vmem [thread:$0]  %s14271_s8, 16, %s118_s26, [#allocation14]  }
  0x51   :  { %s13030_s20 = smov [#allocation16]   ;;  %s13031_s4 = smov [#allocation19]  }
  0x52   :  { %s140_s22 = sshll.u32 %s13030_s20, 4  ;;  %s164_s30 = sshll.u32 %s13031_s4, 4  ;;  %s141_s22 = int_to_ptr.vmem [resolvable:$true] %s140_s22  ;;  %s13195_s30 = int_to_ptr.vmem [resolvable:$true] %s164_s30 }
  0x53   :  { %s12814_s1 = scalar_lea.hbm %s14274_s11, 4096 }
  0x54   :  { %p12815_p4 = scmp.ne.s32.totalorder %s14274_s11, %s12814_s1  ;;  %p12818_p5 = scmp.lt.u32.totalorder %s12814_s1, %s14274_s11 }
  0x56   :  { %p12820_p6 = pnand %p12818_p5, %p12815_p4 }
  0x58   :  { %12823 = shalt.err (!%p12820_p6)
}
  0x59   :  { %s12824_s8 = scalar_lea.vmem %s141_s22, 4096  ;;  %p12829_p8 = scmp.lt.s32.totalorder %s141_s22, %s141_s22 }
  0x5a   :  { %p12825_p7 = scmp.ne.s32.totalorder %s141_s22, %s12824_s8  ;;  %p12830_p9 = scmp.lt.s32.totalorder %s12824_s8, %s12824_s8 }
  0x5c   :  { %p12831_p10 = por %p12830_p9, %p12829_p8 }
  0x5e   :  { %p12832_p11 = pnand %p12831_p10, %p12825_p7 }
  0x60   :  { %12835 = shalt.err (!%p12832_p11)
}
  0x61   :  { %s13032_s26 = smov 64   ;;  %s13033_s0 = smov 4  }
  0x62   :  { %146 = dma.hbm_to_vmem [thread:$0]  %s14274_s11, 4096, %s141_s22, [#allocation17], %s13032_s26, %s13032_s26, %s13033_s0  }
  0x63   :  { %s12836_s20 = scalar_lea.hbm %s14276_s13, 4096 }
  0x64   :  { %p12837_p12 = scmp.ne.s32.totalorder %s14276_s13, %s12836_s20  ;;  %p12840_p13 = scmp.lt.u32.totalorder %s12836_s20, %s14276_s13 }
  0x66   :  { %p12842_p0 = pnand %p12840_p13, %p12837_p12 }
  0x68   :  { %12845 = shalt.err (!%p12842_p0)
}
  0x69   :  { %s12846_s23 = scalar_lea.vmem %s13195_s30, 4096  ;;  %p12851_p2 = scmp.lt.s32.totalorder %s13195_s30, %s13195_s30 }
  0x6a   :  { %p12847_p1 = scmp.ne.s32.totalorder %s13195_s30, %s12846_s23  ;;  %p12852_p3 = scmp.lt.s32.totalorder %s12846_s23, %s12846_s23 }
  0x6c   :  { %p12853_p4 = por %p12852_p3, %p12851_p2 }
  0x6e   :  { %p12854_p5 = pnand %p12853_p4, %p12847_p1 }
  0x70   :  { %12857 = shalt.err (!%p12854_p5)
}
  0x71   :  { %170 = dma.hbm_to_vmem [thread:$0]  %s14276_s13, 4096, %s13195_s30, [#allocation20], %s13032_s26, %s13032_s26, %s13033_s0  }
  0x72   :  { %s13034_s25 = smov [#allocation2]   ;;  %s14288_s19 = sld [smem:[#allocation30_spill]] }
  0x73   :  { %s38_s27 = sshll.u32 %s13034_s25, 4  ;;  %s39_s27 = int_to_ptr.vmem [resolvable:$true] %s38_s27 }
  0x78   :  { %s12858_s21 = scalar_lea.hbm %s14288_s19, 49152 }
  0x79   :  { %p12859_p6 = scmp.ne.s32.totalorder %s14288_s19, %s12858_s21  ;;  %p12862_p7 = scmp.lt.u32.totalorder %s12858_s21, %s14288_s19 }
  0x7b   :  { %p12864_p8 = pnand %p12862_p7, %p12859_p6 }
  0x7d   :  { %12867 = shalt.err (!%p12864_p8)
}
  0x7e   :  { %s12868_s2 = scalar_lea.vmem %s39_s27, 49152  ;;  %p12873_p10 = scmp.lt.s32.totalorder %s39_s27, %s39_s27 }
  0x7f   :  { %p12869_p9 = scmp.ne.s32.totalorder %s39_s27, %s12868_s2  ;;  %p12874_p11 = scmp.lt.s32.totalorder %s12868_s2, %s12868_s2 }
  0x81   :  { %p12875_p12 = por %p12874_p11, %p12873_p10 }
  0x83   :  { %p12876_p13 = pnand %p12875_p12, %p12869_p9 }
  0x85   :  { %12879 = shalt.err (!%p12876_p13)
}
  0x86   :  { %s13035_s13 = smov 512   ;;  %s13036_s30 = smov 32  }
  0x87   :  { %44 = dma.hbm_to_vmem [thread:$0]  %s14288_s19, 49152, %s39_s27, [#allocation3], %s13035_s13, %s13035_s13, %s13036_s30  }
  0x88   :  { %s13037_s23 = smov [#allocation6]   ;;  %s12880_s29 = scalar_lea.hbm %s14266_s3, 32768 }
  0x89   :  { %s60_s11 = sshll.u32 %s13037_s23, 4  ;;  %p12881_p0 = scmp.ne.s32.totalorder %s14266_s3, %s12880_s29  ;;  %s61_s11 = int_to_ptr.vmem [resolvable:$true] %s60_s11 }
  0x8a   :  { %p12884_p1 = scmp.lt.u32.totalorder %s12880_s29, %s14266_s3 }
  0x8c   :  { %p12886_p2 = pnand %p12884_p1, %p12881_p0 }
  0x8e   :  { %12889 = shalt.err (!%p12886_p2)
}
  0x8f   :  { %s12890_s20 = scalar_lea.vmem %s61_s11, 32768  ;;  %p12895_p4 = scmp.lt.s32.totalorder %s61_s11, %s61_s11 }
  0x90   :  { %p12891_p3 = scmp.ne.s32.totalorder %s61_s11, %s12890_s20  ;;  %p12896_p5 = scmp.lt.s32.totalorder %s12890_s20, %s12890_s20 }
  0x92   :  { %p12897_p6 = por %p12896_p5, %p12895_p4 }
  0x94   :  { %p12898_p7 = pnand %p12897_p6, %p12891_p3 }
  0x96   :  { %12901 = shalt.err (!%p12898_p7)
}
  0x97   :  { %s13038_s27 = smov 256   ;;  %s13039_s19 = smov 16  }
  0x98   :  { %66 = dma.hbm_to_vmem [thread:$0]  %s14266_s3, 32768, %s61_s11, [#allocation5], %s13038_s27, %s13038_s27, %s13039_s19  }
  0x99   :  { %s13040_s13 = smov [#allocation9]   ;;  %s12902_s23 = scalar_lea.hbm %s14268_s5, 8192 }
  0x9a   :  { %s82_s30 = sshll.u32 %s13040_s13, 4  ;;  %p12903_p8 = scmp.ne.s32.totalorder %s14268_s5, %s12902_s23  ;;  %s83_s30 = int_to_ptr.vmem [resolvable:$true] %s82_s30 }
  0x9b   :  { %p12906_p9 = scmp.lt.u32.totalorder %s12902_s23, %s14268_s5 }
  0x9d   :  { %p12908_p10 = pnand %p12906_p9, %p12903_p8 }
  0x9f   :  { %12911 = shalt.err (!%p12908_p10)
}
  0xa0   :  { %s12912_s21 = scalar_lea.vmem %s83_s30, 8192  ;;  %p12917_p12 = scmp.lt.s32.totalorder %s83_s30, %s83_s30 }
  0xa1   :  { %p12913_p11 = scmp.ne.s32.totalorder %s83_s30, %s12912_s21  ;;  %p12918_p13 = scmp.lt.s32.totalorder %s12912_s21, %s12912_s21 }
  0xa3   :  { %p12919_p0 = por %p12918_p13, %p12917_p12 }
  0xa5   :  { %p12920_p1 = pnand %p12919_p0, %p12913_p11 }
  0xa7   :  { %12923 = shalt.err (!%p12920_p1)
}
  0xa8   :  { %s13041_s3 = smov 128   ;;  %s13042_s11 = smov 8  }
  0xa9   :  { %88 = dma.hbm_to_vmem [thread:$0]  %s14268_s5, 8192, %s83_s30, [#allocation8], %s13041_s3, %s13041_s3, %s13042_s11  }
  0xaa   :  { %s13043_s20 = smov [#allocation12]   ;;  %s13044_s4 = smov [#allocation15]  }
  0xab   :  { %s104_s27 = sshll.u32 %s13043_s20, 4  ;;  %s128_s2 = sshll.u32 %s13044_s4, 4  ;;  %s105_s27 = int_to_ptr.vmem [resolvable:$true] %s104_s27  ;;  %s129_s2 = int_to_ptr.vmem [resolvable:$true] %s128_s2 }
  0xac   :  { %s12924_s1 = scalar_lea.hbm %s14270_s7, 2048 }
  0xad   :  { %p12925_p2 = scmp.ne.s32.totalorder %s14270_s7, %s12924_s1  ;;  %p12928_p3 = scmp.lt.u32.totalorder %s12924_s1, %s14270_s7 }
  0xaf   :  { %p12930_p4 = pnand %p12928_p3, %p12925_p2 }
  0xb1   :  { %12933 = shalt.err (!%p12930_p4)
}
  0xb2   :  { %s12934_s5 = scalar_lea.vmem %s105_s27, 2048  ;;  %p12939_p6 = scmp.lt.s32.totalorder %s105_s27, %s105_s27 }
  0xb3   :  { %p12935_p5 = scmp.ne.s32.totalorder %s105_s27, %s12934_s5  ;;  %p12940_p7 = scmp.lt.s32.totalorder %s12934_s5, %s12934_s5 }
  0xb5   :  { %p12941_p8 = por %p12940_p7, %p12939_p6 }
  0xb7   :  { %p12942_p9 = pnand %p12941_p8, %p12935_p5 }
  0xb9   :  { %12945 = shalt.err (!%p12942_p9)
}
  0xba   :  { %110 = dma.hbm_to_vmem [thread:$0]  %s14270_s7, 2048, %s105_s27, [#allocation11], %s13032_s26, %s13032_s26, %s13033_s0  }
  0xbb   :  { %s12946_s11 = scalar_lea.hbm %s14273_s10, 256 }
  0xbc   :  { %p12947_p10 = scmp.ne.s32.totalorder %s14273_s10, %s12946_s11  ;;  %p12950_p11 = scmp.lt.u32.totalorder %s12946_s11, %s14273_s10 }
  0xbe   :  { %p12952_p12 = pnand %p12950_p11, %p12947_p10 }
  0xc0   :  { %12955 = shalt.err (!%p12952_p12)
}
  0xc1   :  { %s12956_s13 = scalar_lea.vmem %s129_s2, 256  ;;  %p12961_p0 = scmp.lt.s32.totalorder %s129_s2, %s129_s2 }
  0xc2   :  { %p12957_p13 = scmp.ne.s32.totalorder %s129_s2, %s12956_s13  ;;  %p12962_p1 = scmp.lt.s32.totalorder %s12956_s13, %s12956_s13 }
  0xc4   :  { %p12963_p2 = por %p12962_p1, %p12961_p0 }
  0xc6   :  { %p12964_p3 = pnand %p12963_p2, %p12957_p13 }
  0xc8   :  { %12967 = shalt.err (!%p12964_p3)
}
  0xc9   :  { %s13045_s7 = smov 1   ;;  %s13046_s27 = smov [#allocation18]  }
  0xca   :  { %134 = dma.hbm_to_vmem [thread:$0]  %s14273_s10, 256, %s129_s2, [#allocation14], %s13039_s19, %s13039_s19, %s13045_s7  }
  0xcb   :  { %s152_s28 = sshll.u32 %s13046_s27, 4  ;;  %s13047_s1 = smov [#allocation21]   ;;  %s153_s28 = int_to_ptr.vmem [resolvable:$true] %s152_s28 }
  0xcc   :  { %s176_s23 = sshll.u32 %s13047_s1, 4  ;;  %s12968_s29 = scalar_lea.hbm %s14275_s12, 256  ;;  %s13299_s23 = int_to_ptr.vmem [resolvable:$true] %s176_s23 }
  0xcd   :  { %p12969_p4 = scmp.ne.s32.totalorder %s14275_s12, %s12968_s29  ;;  %p12972_p5 = scmp.lt.u32.totalorder %s12968_s29, %s14275_s12 }
  0xcf   :  { %p12974_p6 = pnand %p12972_p5, %p12969_p4 }
  0xd1   :  { %12977 = shalt.err (!%p12974_p6)
}
  0xd2   :  { %s12978_s10 = scalar_lea.vmem %s153_s28, 256  ;;  %p12983_p8 = scmp.lt.s32.totalorder %s153_s28, %s153_s28 }
  0xd3   :  { %p12979_p7 = scmp.ne.s32.totalorder %s153_s28, %s12978_s10  ;;  %p12984_p9 = scmp.lt.s32.totalorder %s12978_s10, %s12978_s10 }
  0xd5   :  { %p12985_p10 = por %p12984_p9, %p12983_p8 }
  0xd7   :  { %p12986_p11 = pnand %p12985_p10, %p12979_p7 }
  0xd9   :  { %12989 = shalt.err (!%p12986_p11)
}
  0xda   :  { %158 = dma.hbm_to_vmem [thread:$0]  %s14275_s12, 256, %s153_s28, [#allocation17], %s13039_s19, %s13039_s19, %s13045_s7  }
  0xdb   :  { %s12990_s24 = scalar_lea.hbm %s14277_s14, 256 }
  0xdc   :  { %p12991_p12 = scmp.ne.s32.totalorder %s14277_s14, %s12990_s24  ;;  %p12994_p13 = scmp.lt.u32.totalorder %s12990_s24, %s14277_s14 }
  0xde   :  { %p12996_p0 = pnand %p12994_p13, %p12991_p12 }
  0xe0   :  { %12999 = shalt.err (!%p12996_p0)
}
  0xe1   :  { %s13000_s0 = scalar_lea.vmem %s13299_s23, 256  ;;  %p13005_p2 = scmp.lt.s32.totalorder %s13299_s23, %s13299_s23 }
  0xe2   :  { %p13001_p1 = scmp.ne.s32.totalorder %s13299_s23, %s13000_s0  ;;  %p13006_p3 = scmp.lt.s32.totalorder %s13000_s0, %s13000_s0 }
  0xe4   :  { %p13007_p4 = por %p13006_p3, %p13005_p2 }
  0xe6   :  { %p13008_p5 = pnand %p13007_p4, %p13001_p1 }
  0xe8   :  { %13011 = shalt.err (!%p13008_p5)
}
  0xe9   :  { %182 = dma.hbm_to_vmem [thread:$0]  %s14277_s14, 256, %s13299_s23, [#allocation20], %s13039_s19, %s13039_s19, %s13045_s7  }
  0xea   :  { %13012 = dma.done.wait [#allocation3], 49152  }
  0xeb   :  { %13013 = vsyncadd [#allocation3], 4294918144 }
  0xec   :  { %13014 = dma.done.wait [#allocation5], 32896  }
  0xed   :  { %13015 = vsyncadd [#allocation5], 4294934400 }
  0xee   :  { %13016 = dma.done.wait [#allocation8], 8256  }
  0xef   :  { %13017 = vsyncadd [#allocation8], 4294959040 }
  0xf0   :  { %13018 = dma.done.wait [#allocation11], 2080  }
  0xf1   :  { %13019 = vsyncadd [#allocation11], 4294965216 }
  0xf2   :  { %13020 = dma.done.wait [#allocation14], 272  }
  0xf3   :  { %13021 = vsyncadd [#allocation14], 4294967024 }
  0xf4   :  { %13022 = dma.done.wait [#allocation17], 4352  }
  0xf5   :  { %13023 = vsyncadd [#allocation17], 4294962944 }
  0xf6   :  { %13024 = dma.done.wait [#allocation20], 4352  }
  0xf7   :  { %13025 = vsyncadd [#allocation20], 4294962944  ;;  %v224_v0 = vld [vmem:[#allocation2] sm:$0xff]  ;;  %v225_v2 = vld [vmem:[#allocation2 + $0x8] sm:$0xff]  ;;  %v610_v32 = vlaneseq  ;;  %v13048_v33 = vmov 1966171168  }
  0xf8   :  { %v228_v1 = vld [vmem:[#allocation2 + $0x20] sm:$0xff]  ;;  %v229_v4 = vld [vmem:[#allocation2 + $0x28] sm:$0xff]  ;;  %v653_v34 = vunpack.c.l.s4 %v13048_v33  ;;  %s14289_s7 = sld [smem:[#allocation29_spill]]  ;;  %vm13051_vm0 = vmmov 0   ;;  %vm5902_vm1 = vcmask 261120  }
  0xf9   :  { %v9866_v3 = vcombine.high %v224_v0, %v228_v1  ;;  %v9865_v5 = vcombine.low %v224_v0, %v228_v1  ;;  %v232_v6 = vld [vmem:[#allocation2 + $0x40] sm:$0xff]  ;;  %v9868_v8 = vcombine.high %v225_v2, %v229_v4  ;;  %v9867_v9 = vcombine.low %v225_v2, %v229_v4  ;;  %v233_v11 = vld [vmem:[#allocation2 + $0x48] sm:$0xff] }
  0xfa   :  { %v236_v7 = vld [vmem:[#allocation2 + $0x60] sm:$0xff]  ;;  %v237_v12 = vld [vmem:[#allocation2 + $0x68] sm:$0xff]  ;;  %v13336_v43 = vshrl.u32 %v610_v32, 7  ;;  %v654_v44 = vunpack.c.0.s8 %v653_v34 }
  0xfb   :  { %v9874_v10 = vcombine.high %v232_v6, %v236_v7  ;;  %v240_v13 = vld [vmem:[#allocation2 + $0x80] sm:$0xff]  ;;  %2624 = vmatprep.subr.bf16.mxu0 %v9866_v3  ;;  %v9876_v14 = vcombine.high %v233_v11, %v237_v12  ;;  %v241_v16 = vld [vmem:[#allocation2 + $0x88] sm:$0xff]  ;;  %2747 = vmatprep.subr.bf16.mxu1 %v9868_v8  ;;  %v9873_v18 = vcombine.low %v232_v6, %v236_v7 }
  0xfc   :  { %v244_v15 = vld [vmem:[#allocation2 + $0xa0] sm:$0xff]  ;;  %v245_v17 = vld [vmem:[#allocation2 + $0xa8] sm:$0xff]  ;;  %2625 = vmatpush1.bf16.msra.mxu0 %v9865_v5  ;;  %2748 = vmatpush1.bf16.msra.mxu1 %v9867_v9  ;;  %v9875_v19 = vcombine.low %v233_v11, %v237_v12  ;;  %v13339_v53 = vsub.s32 %v654_v44, %v13336_v43 }
  0xfd   :  { %2626 = vmatprep.subr.bf16.mxu0 %v9874_v10  ;;  %v9882_v20 = vcombine.high %v240_v13, %v244_v15  ;;  %2749 = vmatprep.subr.bf16.mxu1 %v9876_v14  ;;  %v9884_v21 = vcombine.high %v241_v16, %v245_v17  ;;  %v248_v22 = vld [vmem:[#allocation2 + $0xc0] sm:$0xff]  ;;  %v249_v24 = vld [vmem:[#allocation2 + $0xc8] sm:$0xff]  ;;  %v9881_v26 = vcombine.low %v240_v13, %v244_v15 }
  0xfe   :  { %v252_v23 = vld [vmem:[#allocation2 + $0xe0] sm:$0xff]  ;;  %v253_v25 = vld [vmem:[#allocation2 + $0xe8] sm:$0xff]  ;;  %v9883_v27 = vcombine.low %v241_v16, %v245_v17 }
  0xff   :  { %v9890_v28 = vcombine.high %v248_v22, %v252_v23  ;;  %v9892_v29 = vcombine.high %v249_v24, %v253_v25  ;;  %v256_v30 = vld [vmem:[#allocation2 + $0x100] sm:$0xff]  ;;  %v257_v35 = vld [vmem:[#allocation2 + $0x108] sm:$0xff]  ;;  %v9889_v37 = vcombine.low %v248_v22, %v252_v23  ;;  %v9891_v38 = vcombine.low %v249_v24, %v253_v25 }
 0x100   :  { %2627 = vmatpush1.bf16.msra.mxu0 %v9873_v18  ;;  %2750 = vmatpush1.bf16.msra.mxu1 %v9875_v19  ;;  %v260_v31 = vld [vmem:[#allocation2 + $0x120] sm:$0xff]  ;;  %v261_v36 = vld [vmem:[#allocation2 + $0x128] sm:$0xff] }
 0x101   :  { %2628 = vmatprep.subr.bf16.mxu0 %v9882_v20  ;;  %2751 = vmatprep.subr.bf16.mxu1 %v9884_v21  ;;  %v9898_v39 = vcombine.high %v256_v30, %v260_v31  ;;  %v9900_v40 = vcombine.high %v257_v35, %v261_v36  ;;  %v264_v41 = vld [vmem:[#allocation2 + $0x140] sm:$0xff]  ;;  %v265_v45 = vld [vmem:[#allocation2 + $0x148] sm:$0xff]  ;;  %v9897_v47 = vcombine.low %v256_v30, %v260_v31 }
 0x102   :  { %v268_v42 = vld [vmem:[#allocation2 + $0x160] sm:$0xff]  ;;  %v269_v46 = vld [vmem:[#allocation2 + $0x168] sm:$0xff]  ;;  %v9899_v48 = vcombine.low %v257_v35, %v261_v36 }
 0x103   :  { %v9906_v49 = vcombine.high %v264_v41, %v268_v42  ;;  %v9908_v50 = vcombine.high %v265_v45, %v269_v46  ;;  %v272_v51 = vld [vmem:[#allocation2 + $0x180] sm:$0xff]  ;;  %v273_v54 = vld [vmem:[#allocation2 + $0x188] sm:$0xff]  ;;  %v9905_v56 = vcombine.low %v264_v41, %v268_v42  ;;  %v9907_v57 = vcombine.low %v265_v45, %v269_v46 }
 0x104   :  { %2629 = vmatpush1.bf16.msra.mxu0 %v9881_v26  ;;  %2752 = vmatpush1.bf16.msra.mxu1 %v9883_v27  ;;  %v276_v52 = vld [vmem:[#allocation2 + $0x1a0] sm:$0xff]  ;;  %v277_v55 = vld [vmem:[#allocation2 + $0x1a8] sm:$0xff] }
 0x105   :  { %2630 = vmatprep.subr.bf16.mxu0 %v9890_v28  ;;  %2753 = vmatprep.subr.bf16.mxu1 %v9892_v29  ;;  %v9914_v58 = vcombine.high %v272_v51, %v276_v52  ;;  %v13344_v59 = vld [vmem:[%s14289_s7] sm:$0x3f]  ;;  %v9916_v60 = vcombine.high %v273_v54, %v277_v55  ;;  %v281_v0 = vld [vmem:[#allocation2 + $0x1c8] sm:$0xff]  ;;  %v9913_v2 = vcombine.low %v272_v51, %v276_v52 }
 0x106   :  { %v280_v61 = vld [vmem:[#allocation2 + $0x1c0] sm:$0xff]  ;;  %v13348_v63 = vrot.slane %v13344_v59, %v13339_v53  ;;  %v285_v1 = vld [vmem:[#allocation2 + $0x1e8] sm:$0xff]  ;;  %v9915_v4 = vcombine.low %v273_v54, %v277_v55 }
 0x107   :  { %v284_v62 = vld [vmem:[#allocation2 + $0x1e0] sm:$0xff]  ;;  %v9924_v6 = vcombine.high %v281_v0, %v285_v1  ;;  %v289_v10 = vld [vmem:[#allocation2 + $0x208] sm:$0xff]  ;;  %v9923_v13 = vcombine.low %v281_v0, %v285_v1 }
 0x108   :  { %2631 = vmatpush1.bf16.msra.mxu0 %v9889_v37  ;;  %2754 = vmatpush1.bf16.msra.mxu1 %v9891_v38  ;;  %v666_v3 = vcombine.high %v13348_v63, %v13348_v63  ;;  %v9922_v5 = vcombine.high %v280_v61, %v284_v62  ;;  %v288_v7 = vld [vmem:[#allocation2 + $0x200] sm:$0xff]  ;;  %v293_v11 = vld [vmem:[#allocation2 + $0x228] sm:$0xff]  ;;  %v9921_v12 = vcombine.low %v280_v61, %v284_v62 }
 0x109   :  { %2632 = vmatprep.subr.bf16.mxu0 %v9898_v39  ;;  %2755 = vmatprep.subr.bf16.mxu1 %v9900_v40  ;;  %v292_v8 = vld [vmem:[#allocation2 + $0x220] sm:$0xff]  ;;  %v9932_v15 = vcombine.high %v289_v10, %v293_v11  ;;  %v297_v18 = vld [vmem:[#allocation2 + $0x248] sm:$0xff]  ;;  %v9931_v21 = vcombine.low %v289_v10, %v293_v11 }
 0x10a   :  { %v13353_v9 = vrot.slane %v666_v3, %v13339_v53  ;;  %v9930_v14 = vcombine.high %v288_v7, %v292_v8  ;;  %v296_v16 = vld [vmem:[#allocation2 + $0x240] sm:$0xff]  ;;  %v301_v19 = vld [vmem:[#allocation2 + $0x268] sm:$0xff]  ;;  %v9929_v20 = vcombine.low %v288_v7, %v292_v8 }
 0x10b   :  { %v300_v17 = vld [vmem:[#allocation2 + $0x260] sm:$0xff]  ;;  %v9940_v23 = vcombine.high %v297_v18, %v301_v19  ;;  %v305_v26 = vld [vmem:[#allocation2 + $0x288] sm:$0xff]  ;;  %v9939_v29 = vcombine.low %v297_v18, %v301_v19  ;;  %v651_v18 = vcombine.high %v13344_v59, %v13344_v59 }
 0x10c   :  { %2633 = vmatpush1.bf16.msra.mxu0 %v9897_v47  ;;  %2756 = vmatpush1.bf16.msra.mxu1 %v9899_v48  ;;  %v9938_v22 = vcombine.high %v296_v16, %v300_v17  ;;  %v304_v24 = vld [vmem:[#allocation2 + $0x280] sm:$0xff]  ;;  %v309_v27 = vld [vmem:[#allocation2 + $0x2a8] sm:$0xff]  ;;  %v9937_v28 = vcombine.low %v296_v16, %v300_v17 }
 0x10d   :  { %2634 = vmatprep.subr.bf16.mxu0 %v9906_v49  ;;  %2757 = vmatprep.subr.bf16.mxu1 %v9908_v50  ;;  %v308_v25 = vld [vmem:[#allocation2 + $0x2a0] sm:$0xff]  ;;  %v9948_v31 = vcombine.high %v305_v26, %v309_v27  ;;  %v313_v34 = vld [vmem:[#allocation2 + $0x2c8] sm:$0xff]  ;;  %v9947_v37 = vcombine.low %v305_v26, %v309_v27 }
 0x10e   :  { %2656 = vmatprep.mubr.bf16.mxu0 %v13353_v9  ;;  %2779 = vmatprep.mubr.bf16.mxu1 %v13353_v9  ;;  %v9946_v30 = vcombine.high %v304_v24, %v308_v25  ;;  %v312_v32 = vld [vmem:[#allocation2 + $0x2c0] sm:$0xff]  ;;  %v317_v35 = vld [vmem:[#allocation2 + $0x2e8] sm:$0xff]  ;;  %v9945_v36 = vcombine.low %v304_v24, %v308_v25  ;;  %v665_v24 = vrot.slane %v651_v18, %v13339_v53 }
 0x10f   :  { %v316_v33 = vld [vmem:[#allocation2 + $0x2e0] sm:$0xff]  ;;  %v9956_v39 = vcombine.high %v313_v34, %v317_v35  ;;  %v321_v42 = vld [vmem:[#allocation2 + $0x308] sm:$0xff]  ;;  %v9955_v46 = vcombine.low %v313_v34, %v317_v35  ;;  %v13362_v25 = vrot.slane %v13348_v63, %v13339_v53  ;;  %v13369_v63 = vcombine.high %v13353_v9, %v13353_v9 }
 0x110   :  { %2635 = vmatpush1.bf16.msra.mxu0 %v9905_v56  ;;  %2758 = vmatpush1.bf16.msra.mxu1 %v9907_v57  ;;  %v9954_v38 = vcombine.high %v312_v32, %v316_v33  ;;  %v320_v40 = vld [vmem:[#allocation2 + $0x300] sm:$0xff]  ;;  %v325_v44 = vld [vmem:[#allocation2 + $0x328] sm:$0xff]  ;;  %v9953_v45 = vcombine.low %v312_v32, %v316_v33  ;;  %v13365_v34 = vrot.slane %v665_v24, %v13339_v53 }
 0x111   :  { %2636 = vmatprep.subr.bf16.mxu0 %v9914_v58  ;;  %2759 = vmatprep.subr.bf16.mxu1 %v9916_v60  ;;  %v324_v41 = vld [vmem:[#allocation2 + $0x320] sm:$0xff]  ;;  %v9964_v48 = vcombine.high %v321_v42, %v325_v44  ;;  %v329_v51 = vld [vmem:[#allocation2 + $0x348] sm:$0xff]  ;;  %v9963_v55 = vcombine.low %v321_v42, %v325_v44 }
 0x112   :  { %v9962_v47 = vcombine.high %v320_v40, %v324_v41  ;;  %v328_v49 = vld [vmem:[#allocation2 + $0x340] sm:$0xff]  ;;  %v333_v52 = vld [vmem:[#allocation2 + $0x368] sm:$0xff]  ;;  %v9961_v54 = vcombine.low %v320_v40, %v324_v41 }
 0x113   :  { %v332_v50 = vld [vmem:[#allocation2 + $0x360] sm:$0xff]  ;;  %v9972_v57 = vcombine.high %v329_v51, %v333_v52  ;;  %v337_v61 = vld [vmem:[#allocation2 + $0x388] sm:$0xff]  ;;  %v9971_v1 = vcombine.low %v329_v51, %v333_v52 }
 0x114   :  { %2637 = vmatpush1.bf16.msra.mxu0 %v9913_v2  ;;  %2760 = vmatpush1.bf16.msra.mxu1 %v9915_v4  ;;  %v9970_v56 = vcombine.high %v328_v49, %v332_v50  ;;  %v336_v58 = vld [vmem:[#allocation2 + $0x380] sm:$0xff]  ;;  %v341_v62 = vld [vmem:[#allocation2 + $0x3a8] sm:$0xff]  ;;  %v9969_v0 = vcombine.low %v328_v49, %v332_v50 }
 0x115   :  { %2638 = vmatprep.subr.bf16.mxu0 %v9922_v5  ;;  %2761 = vmatprep.subr.bf16.mxu1 %v9924_v6  ;;  %v340_v60 = vld [vmem:[#allocation2 + $0x3a0] sm:$0xff]  ;;  %v9980_v3 = vcombine.high %v337_v61, %v341_v62  ;;  %v345_v6 = vld [vmem:[#allocation2 + $0x3c8] sm:$0xff]  ;;  %v9979_v10 = vcombine.low %v337_v61, %v341_v62 }
 0x116   :  { %v9978_v2 = vcombine.high %v336_v58, %v340_v60  ;;  %v344_v4 = vld [vmem:[#allocation2 + $0x3c0] sm:$0xff]  ;;  %v349_v7 = vld [vmem:[#allocation2 + $0x3e8] sm:$0xff]  ;;  %v9977_v8 = vcombine.low %v336_v58, %v340_v60 }
 0x117   :  { %v348_v5 = vld [vmem:[#allocation2 + $0x3e0] sm:$0xff]  ;;  %v357_v16 = vld [vmem:[#allocation2 + $0x428] sm:$0xff]  ;;  %v9987_v19 = vcombine.low %v345_v6, %v349_v7 }
 0x118   :  { %2639 = vmatpush1.bf16.msra.mxu0 %v9921_v12  ;;  %2762 = vmatpush1.bf16.msra.mxu1 %v9923_v13  ;;  %v9986_v11 = vcombine.high %v344_v4, %v348_v5  ;;  %v9988_v12 = vcombine.high %v345_v6, %v349_v7  ;;  %v352_v13 = vld [vmem:[#allocation2 + $0x400] sm:$0xff]  ;;  %v9985_v17 = vcombine.low %v344_v4, %v348_v5  ;;  %v361_v26 = vld [vmem:[#allocation2 + $0x448] sm:$0xff] }
 0x119   :  { %2640 = vmatprep.subr.bf16.mxu0 %v9930_v14  ;;  %2763 = vmatprep.subr.bf16.mxu1 %v9932_v15  ;;  %v356_v14 = vld [vmem:[#allocation2 + $0x420] sm:$0xff]  ;;  %v353_v15 = vld [vmem:[#allocation2 + $0x408] sm:$0xff] }
 0x11a   :  { %v365_v27 = vld [vmem:[#allocation2 + $0x468] sm:$0xff]  ;;  %v9995_v59 = vcombine.low %v353_v15, %v357_v16  ;;  %v372_v32 = vld [vmem:[#allocation2 + $0x4a0] sm:$0xff] }
 0x11b   :  { %v369_v33 = vld [vmem:[#allocation2 + $0x488] sm:$0xff]  ;;  %v10004_v35 = vcombine.high %v361_v26, %v365_v27  ;;  %v376_v41 = vld [vmem:[#allocation2 + $0x4c0] sm:$0xff] }
 0x11c   :  { %2641 = vmatpush1.bf16.msra.mxu0 %v9929_v20  ;;  %2764 = vmatpush1.bf16.msra.mxu1 %v9931_v21  ;;  %v9994_v20 = vcombine.high %v352_v13, %v356_v14  ;;  %v9996_v21 = vcombine.high %v353_v15, %v357_v16  ;;  %v380_v42 = vld [vmem:[#allocation2 + $0x4e0] sm:$0xff]  ;;  %v377_v44 = vld [vmem:[#allocation2 + $0x4c8] sm:$0xff] }
 0x11d   :  { %2642 = vmatprep.subr.bf16.mxu0 %v9938_v22  ;;  %2765 = vmatprep.subr.bf16.mxu1 %v9940_v23  ;;  %v360_v22 = vld [vmem:[#allocation2 + $0x440] sm:$0xff]  ;;  %v385_v51 = vld [vmem:[#allocation2 + $0x508] sm:$0xff] }
 0x11e   :  { %v364_v23 = vld [vmem:[#allocation2 + $0x460] sm:$0xff]  ;;  %v393_v61 = vld [vmem:[#allocation2 + $0x548] sm:$0xff] }
 0x11f   :  { %v384_v49 = vld [vmem:[#allocation2 + $0x500] sm:$0xff]  ;;  %v401_v6 = vld [vmem:[#allocation2 + $0x588] sm:$0xff] }
 0x120   :  { %2643 = vmatpush1.bf16.msra.mxu0 %v9937_v28  ;;  %2766 = vmatpush1.bf16.msra.mxu1 %v9939_v29  ;;  %v9993_v28 = vcombine.low %v352_v13, %v356_v14  ;;  %v667_v29 = vcombine.high %v665_v24, %v665_v24  ;;  %v388_v50 = vld [vmem:[#allocation2 + $0x520] sm:$0xff]  ;;  %v409_v15 = vld [vmem:[#allocation2 + $0x5c8] sm:$0xff] }
 0x121   :  { %2644 = vmatprep.subr.bf16.mxu0 %v9946_v30  ;;  %2767 = vmatprep.subr.bf16.mxu1 %v9948_v31  ;;  %v10002_v30 = vcombine.high %v360_v22, %v364_v23  ;;  %v368_v31 = vld [vmem:[#allocation2 + $0x480] sm:$0xff] }
 0x122   :  { %v10010_v40 = vcombine.high %v368_v31, %v372_v32  ;;  %v392_v58 = vld [vmem:[#allocation2 + $0x540] sm:$0xff] }
 0x123   :  { %v396_v60 = vld [vmem:[#allocation2 + $0x560] sm:$0xff] }
 0x124   :  { %2645 = vmatpush1.bf16.msra.mxu0 %v9945_v36  ;;  %2768 = vmatpush1.bf16.msra.mxu1 %v9947_v37  ;;  %v373_v36 = vld [vmem:[#allocation2 + $0x4a8] sm:$0xff]  ;;  %v13372_v37 = vrot.slane %v667_v29, %v13339_v53  ;;  %v10009_v53 = vcombine.low %v368_v31, %v372_v32  ;;  %v400_v4 = vld [vmem:[#allocation2 + $0x580] sm:$0xff] }
 0x125   :  { %2646 = vmatprep.subr.bf16.mxu0 %v9954_v38  ;;  %2769 = vmatprep.subr.bf16.mxu1 %v9956_v39  ;;  %v10001_v38 = vcombine.low %v360_v22, %v364_v23  ;;  %v10003_v39 = vcombine.low %v361_v26, %v365_v27  ;;  %v404_v5 = vld [vmem:[#allocation2 + $0x5a0] sm:$0xff]  ;;  %v417_v23 = vld [vmem:[#allocation2 + $0x608] sm:$0xff] }
 0x126   :  { %v408_v13 = vld [vmem:[#allocation2 + $0x5c0] sm:$0xff]  ;;  %v10041_v18 = vcombine.low %v400_v4, %v404_v5  ;;  %v421_v26 = vld [vmem:[#allocation2 + $0x628] sm:$0xff] }
 0x127   :  { %v412_v14 = vld [vmem:[#allocation2 + $0x5e0] sm:$0xff]  ;;  %v425_v31 = vld [vmem:[#allocation2 + $0x648] sm:$0xff]  ;;  %v10060_v32 = vcombine.high %v417_v23, %v421_v26 }
 0x128   :  { %2647 = vmatpush1.bf16.msra.mxu0 %v9953_v45  ;;  %2770 = vmatpush1.bf16.msra.mxu1 %v9955_v46  ;;  %v10012_v45 = vcombine.high %v369_v33, %v373_v36  ;;  %v381_v46 = vld [vmem:[#allocation2 + $0x4e8] sm:$0xff]  ;;  %v420_v22 = vld [vmem:[#allocation2 + $0x620] sm:$0xff]  ;;  %v10049_v27 = vcombine.low %v408_v13, %v412_v14 }
 0x129   :  { %2648 = vmatprep.subr.bf16.mxu0 %v9962_v47  ;;  %2771 = vmatprep.subr.bf16.mxu1 %v9964_v48  ;;  %v10011_v47 = vcombine.low %v369_v33, %v373_v36  ;;  %v10018_v48 = vcombine.high %v376_v41, %v380_v42  ;;  %v10020_v52 = vcombine.high %v377_v44, %v381_v46  ;;  %v429_v33 = vld [vmem:[#allocation2 + $0x668] sm:$0xff] }
 0x12a   :  { %v10059_v36 = vcombine.low %v417_v23, %v421_v26  ;;  %v477_v23 = vld [vmem:[#allocation2 + $0x7e8] sm:$0xff] }
 0x12c   :  { %2649 = vmatpush1.bf16.msra.mxu0 %v9961_v54  ;;  %2772 = vmatpush1.bf16.msra.mxu1 %v9963_v55  ;;  %v389_v54 = vld [vmem:[#allocation2 + $0x528] sm:$0xff]  ;;  %v10017_v55 = vcombine.low %v376_v41, %v380_v42  ;;  %v10068_v42 = vcombine.high %v425_v31, %v429_v33 }
 0x12d   :  { %2650 = vmatprep.subr.bf16.mxu0 %v9970_v56  ;;  %2773 = vmatprep.subr.bf16.mxu1 %v9972_v57  ;;  %v10019_v56 = vcombine.low %v377_v44, %v381_v46  ;;  %v10026_v57 = vcombine.high %v384_v49, %v388_v50  ;;  %v10028_v62 = vcombine.high %v385_v51, %v389_v54  ;;  %v433_v41 = vld [vmem:[#allocation2 + $0x688] sm:$0xff] }
 0x12e   :  { %v437_v44 = vld [vmem:[#allocation2 + $0x6a8] sm:$0xff]  ;;  %v10067_v46 = vcombine.low %v425_v31, %v429_v33 }
 0x12f   :  { %v485_v31 = vld [vmem:[#allocation2 + $0x828] sm:$0xff] }
 0x130   :  { %2651 = vmatpush1.bf16.msra.mxu0 %v9969_v0  ;;  %2774 = vmatpush1.bf16.msra.mxu1 %v9971_v1  ;;  %v397_v0 = vld [vmem:[#allocation2 + $0x568] sm:$0xff]  ;;  %v10025_v1 = vcombine.low %v384_v49, %v388_v50  ;;  %v10076_v50 = vcombine.high %v433_v41, %v437_v44 }
 0x131   :  { %2652 = vmatprep.subr.bf16.mxu0 %v9978_v2  ;;  %2775 = vmatprep.subr.bf16.mxu1 %v9980_v3  ;;  %v10027_v2 = vcombine.low %v385_v51, %v389_v54  ;;  %v10034_v3 = vcombine.high %v392_v58, %v396_v60  ;;  %v10036_v7 = vcombine.high %v393_v61, %v397_v0  ;;  %v441_v49 = vld [vmem:[#allocation2 + $0x6c8] sm:$0xff] }
 0x132   :  { %v445_v51 = vld [vmem:[#allocation2 + $0x6e8] sm:$0xff]  ;;  %v10075_v54 = vcombine.low %v433_v41, %v437_v44 }
 0x133   :  { %v493_v41 = vld [vmem:[#allocation2 + $0x868] sm:$0xff] }
 0x134   :  { %2653 = vmatpush1.bf16.msra.mxu0 %v9977_v8  ;;  %2776 = vmatpush1.bf16.msra.mxu1 %v9979_v10  ;;  %v405_v8 = vld [vmem:[#allocation2 + $0x5a8] sm:$0xff]  ;;  %v10033_v10 = vcombine.low %v392_v58, %v396_v60  ;;  %v10084_v60 = vcombine.high %v441_v49, %v445_v51 }
 0x135   :  { %2654 = vmatprep.subr.bf16.mxu0 %v9986_v11  ;;  %2777 = vmatprep.subr.bf16.mxu1 %v9988_v12  ;;  %v10035_v11 = vcombine.low %v393_v61, %v397_v0  ;;  %v10042_v12 = vcombine.high %v400_v4, %v404_v5  ;;  %v10044_v16 = vcombine.high %v401_v6, %v405_v8  ;;  %v449_v58 = vld [vmem:[#allocation2 + $0x708] sm:$0xff] }
 0x136   :  { %v453_v61 = vld [vmem:[#allocation2 + $0x728] sm:$0xff]  ;;  %v10083_v0 = vcombine.low %v441_v49, %v445_v51 }
 0x137   :  { %v457_v4 = vld [vmem:[#allocation2 + $0x748] sm:$0xff]  ;;  %v10092_v5 = vcombine.high %v449_v58, %v453_v61 }
 0x138   :  { %2655 = vmatpush1.bf16.msra.mxu0 %v9985_v17  ;;  %2778 = vmatpush1.bf16.msra.mxu1 %v9987_v19  ;;  %v413_v17 = vld [vmem:[#allocation2 + $0x5e8] sm:$0xff]  ;;  %v10043_v19 = vcombine.low %v401_v6, %v405_v8  ;;  %v10091_v8 = vcombine.low %v449_v58, %v453_v61 }
 0x139   :  { %2665 = vmatprep.subr.bf16.mxu0 %v9994_v20  ;;  %2788 = vmatprep.subr.bf16.mxu1 %v9996_v21  ;;  %v10050_v20 = vcombine.high %v408_v13, %v412_v14  ;;  %v416_v21 = vld [vmem:[#allocation2 + $0x600] sm:$0xff]  ;;  %v10052_v24 = vcombine.high %v409_v15, %v413_v17  ;;  %v461_v6 = vld [vmem:[#allocation2 + $0x768] sm:$0xff] }
 0x13a   :  { %v10058_v29 = vcombine.high %v416_v21, %v420_v22  ;;  %v465_v13 = vld [vmem:[#allocation2 + $0x788] sm:$0xff]  ;;  %v10100_v14 = vcombine.high %v457_v4, %v461_v6 }
 0x13b   :  { %2657 = vmatmul.mubr.bf16.vlgmr.msra.gmra.mrb[0].mxu0 %v13362_v25  ;;  %2780 = vmatmul.mubr.bf16.vlgmr.msra.gmra.mrb[0].mxu1 %v13362_v25 }
 0x13c   :  { %2666 = vmatpush1.bf16.msra.mxu0 %v9993_v28  ;;  %2789 = vmatpush1.bf16.msra.mxu1 %v9995_v59  ;;  %v10051_v28 = vcombine.low %v409_v15, %v413_v17  ;;  %v424_v59 = vld [vmem:[#allocation2 + $0x640] sm:$0xff]  ;;  %v469_v15 = vld [vmem:[#allocation2 + $0x7a8] sm:$0xff]  ;;  %v10099_v17 = vcombine.low %v457_v4, %v461_v6 }
 0x13d   :  { %2667 = vmatprep.subr.bf16.mxu0 %v10002_v30  ;;  %2790 = vmatprep.subr.bf16.mxu1 %v10004_v35  ;;  %v428_v30 = vld [vmem:[#allocation2 + $0x660] sm:$0xff]  ;;  %v10057_v35 = vcombine.low %v416_v21, %v420_v22  ;;  %v473_v21 = vld [vmem:[#allocation2 + $0x7c8] sm:$0xff]  ;;  %v10108_v22 = vcombine.high %v465_v13, %v469_v15  ;;  %v10107_v26 = vcombine.low %v465_v13, %v469_v15 }
 0x13e   :  { %2697 = vmatprep.mubr.bf16.mxu0 %v13369_v63  ;;  %2820 = vmatprep.mubr.bf16.mxu1 %v13369_v63  ;;  %v10115_v33 = vcombine.low %v473_v21, %v477_v23 }
 0x140   :  { %2668 = vmatpush1.bf16.msra.mxu0 %v10001_v38  ;;  %2791 = vmatpush1.bf16.msra.mxu1 %v10003_v39  ;;  %v10066_v38 = vcombine.high %v424_v59, %v428_v30  ;;  %v432_v39 = vld [vmem:[#allocation2 + $0x680] sm:$0xff] }
 0x141   :  { %2669 = vmatprep.subr.bf16.mxu0 %v10010_v40  ;;  %2792 = vmatprep.subr.bf16.mxu1 %v10012_v45  ;;  %v436_v40 = vld [vmem:[#allocation2 + $0x6a0] sm:$0xff]  ;;  %v10065_v45 = vcombine.low %v424_v59, %v428_v30  ;;  %v481_v59 = vld [vmem:[#allocation2 + $0x808] sm:$0xff]  ;;  %v10116_v30 = vcombine.high %v473_v21, %v477_v23 }
 0x144   :  { %2670 = vmatpush1.bf16.msra.mxu0 %v10009_v53  ;;  %2793 = vmatpush1.bf16.msra.mxu1 %v10011_v47  ;;  %v10074_v53 = vcombine.high %v432_v39, %v436_v40  ;;  %v440_v47 = vld [vmem:[#allocation2 + $0x6c0] sm:$0xff] }
 0x145   :  { %2671 = vmatprep.subr.bf16.mxu0 %v10018_v48  ;;  %2794 = vmatprep.subr.bf16.mxu1 %v10020_v52  ;;  %v444_v48 = vld [vmem:[#allocation2 + $0x6e0] sm:$0xff]  ;;  %v10073_v52 = vcombine.low %v432_v39, %v436_v40  ;;  %v489_v39 = vld [vmem:[#allocation2 + $0x848] sm:$0xff]  ;;  %v10124_v40 = vcombine.high %v481_v59, %v485_v31 }
 0x146   :  { %v10132_v49 = vcombine.high %v489_v39, %v493_v41 }
 0x148   :  { %2672 = vmatpush1.bf16.msra.mxu0 %v10017_v55  ;;  %2795 = vmatpush1.bf16.msra.mxu1 %v10019_v56  ;;  %v10082_v55 = vcombine.high %v440_v47, %v444_v48  ;;  %v448_v56 = vld [vmem:[#allocation2 + $0x700] sm:$0xff] }
 0x149   :  { %2673 = vmatprep.subr.bf16.mxu0 %v10026_v57  ;;  %2796 = vmatprep.subr.bf16.mxu1 %v10028_v62  ;;  %v452_v57 = vld [vmem:[#allocation2 + $0x720] sm:$0xff]  ;;  %v10081_v62 = vcombine.low %v440_v47, %v444_v48  ;;  %v497_v48 = vld [vmem:[#allocation2 + $0x888] sm:$0xff] }
 0x14a   :  { %v500_v47 = vld [vmem:[#allocation2 + $0x8a0] sm:$0xff] }
 0x14c   :  { %2674 = vmatpush1.bf16.msra.mxu0 %v10025_v1  ;;  %2797 = vmatpush1.bf16.msra.mxu1 %v10027_v2  ;;  %v10090_v1 = vcombine.high %v448_v56, %v452_v57  ;;  %v456_v2 = vld [vmem:[#allocation2 + $0x740] sm:$0xff] }
 0x14d   :  { %2675 = vmatprep.subr.bf16.mxu0 %v10034_v3  ;;  %2798 = vmatprep.subr.bf16.mxu1 %v10036_v7  ;;  %v460_v3 = vld [vmem:[#allocation2 + $0x760] sm:$0xff]  ;;  %v10089_v7 = vcombine.low %v448_v56, %v452_v57  ;;  %v505_v57 = vld [vmem:[#allocation2 + $0x8c8] sm:$0xff] }
 0x14e   :  { %v508_v56 = vld [vmem:[#allocation2 + $0x8e0] sm:$0xff] }
 0x150   :  { %2676 = vmatpush1.bf16.msra.mxu0 %v10033_v10  ;;  %2799 = vmatpush1.bf16.msra.mxu1 %v10035_v11  ;;  %v10098_v10 = vcombine.high %v456_v2, %v460_v3  ;;  %v464_v11 = vld [vmem:[#allocation2 + $0x780] sm:$0xff] }
 0x151   :  { %2677 = vmatprep.subr.bf16.mxu0 %v10042_v12  ;;  %2800 = vmatprep.subr.bf16.mxu1 %v10044_v16  ;;  %v468_v12 = vld [vmem:[#allocation2 + $0x7a0] sm:$0xff]  ;;  %v10097_v16 = vcombine.low %v456_v2, %v460_v3  ;;  %v513_v3 = vld [vmem:[#allocation2 + $0x908] sm:$0xff] }
 0x152   :  { %v516_v2 = vld [vmem:[#allocation2 + $0x920] sm:$0xff] }
 0x154   :  { %2678 = vmatpush1.bf16.msra.mxu0 %v10041_v18  ;;  %2801 = vmatpush1.bf16.msra.mxu1 %v10043_v19  ;;  %v10106_v18 = vcombine.high %v464_v11, %v468_v12  ;;  %v472_v19 = vld [vmem:[#allocation2 + $0x7c0] sm:$0xff] }
 0x155   :  { %2679 = vmatprep.subr.bf16.mxu0 %v10050_v20  ;;  %2802 = vmatprep.subr.bf16.mxu1 %v10052_v24  ;;  %v476_v20 = vld [vmem:[#allocation2 + $0x7e0] sm:$0xff]  ;;  %v10105_v24 = vcombine.low %v464_v11, %v468_v12  ;;  %v521_v12 = vld [vmem:[#allocation2 + $0x948] sm:$0xff] }
 0x156   :  { %v524_v11 = vld [vmem:[#allocation2 + $0x960] sm:$0xff] }
 0x158   :  { %2680 = vmatpush1.bf16.msra.mxu0 %v10049_v27  ;;  %2803 = vmatpush1.bf16.msra.mxu1 %v10051_v28  ;;  %v10114_v27 = vcombine.high %v472_v19, %v476_v20  ;;  %v480_v28 = vld [vmem:[#allocation2 + $0x800] sm:$0xff] }
 0x159   :  { %2681 = vmatprep.subr.bf16.mxu0 %v10058_v29  ;;  %2804 = vmatprep.subr.bf16.mxu1 %v10060_v32  ;;  %v484_v29 = vld [vmem:[#allocation2 + $0x820] sm:$0xff]  ;;  %v10113_v32 = vcombine.low %v472_v19, %v476_v20  ;;  %v529_v20 = vld [vmem:[#allocation2 + $0x988] sm:$0xff] }
 0x15a   :  { %v10121_v44 = vcombine.low %v480_v28, %v484_v29  ;;  %v532_v19 = vld [vmem:[#allocation2 + $0x9a0] sm:$0xff] }
 0x15c   :  { %2682 = vmatpush1.bf16.msra.mxu0 %v10057_v35  ;;  %2805 = vmatpush1.bf16.msra.mxu1 %v10059_v36  ;;  %v10122_v35 = vcombine.high %v480_v28, %v484_v29  ;;  %v488_v36 = vld [vmem:[#allocation2 + $0x840] sm:$0xff]  ;;  %v537_v29 = vld [vmem:[#allocation2 + $0x9c8] sm:$0xff] }
 0x15d   :  { %2683 = vmatprep.subr.bf16.mxu0 %v10066_v38  ;;  %2806 = vmatprep.subr.bf16.mxu1 %v10068_v42  ;;  %v492_v38 = vld [vmem:[#allocation2 + $0x860] sm:$0xff]  ;;  %v13380_v42 = vcombine.high %v13362_v25, %v13362_v25 }
 0x15e   :  { %v10129_v51 = vcombine.low %v488_v36, %v492_v38  ;;  %v540_v28 = vld [vmem:[#allocation2 + $0x9e0] sm:$0xff] }
 0x160   :  { %2684 = vmatpush1.bf16.msra.mxu0 %v10065_v45  ;;  %2807 = vmatpush1.bf16.msra.mxu1 %v10067_v46  ;;  %v10123_v45 = vcombine.low %v481_v59, %v485_v31  ;;  %v10130_v46 = vcombine.high %v488_v36, %v492_v38  ;;  %v548_v36 = vld [vmem:[#allocation2 + $0xa20] sm:$0xff]  ;;  %v545_v38 = vld [vmem:[#allocation2 + $0xa08] sm:$0xff] }
 0x161   :  { %2685 = vmatprep.subr.bf16.mxu0 %v10074_v53  ;;  %2808 = vmatprep.subr.bf16.mxu1 %v10076_v50  ;;  %v496_v53 = vld [vmem:[#allocation2 + $0x880] sm:$0xff]  ;;  %v501_v50 = vld [vmem:[#allocation2 + $0x8a8] sm:$0xff] }
 0x162   :  { %v10140_v58 = vcombine.high %v497_v48, %v501_v50  ;;  %v10137_v61 = vcombine.low %v496_v53, %v500_v47 }
 0x164   :  { %2686 = vmatpush1.bf16.msra.mxu0 %v10073_v52  ;;  %2809 = vmatpush1.bf16.msra.mxu1 %v10075_v54  ;;  %v10131_v52 = vcombine.low %v489_v39, %v493_v41  ;;  %v10138_v54 = vcombine.high %v496_v53, %v500_v47  ;;  %v556_v53 = vld [vmem:[#allocation2 + $0xa60] sm:$0xff]  ;;  %v553_v47 = vld [vmem:[#allocation2 + $0xa48] sm:$0xff] }
 0x165   :  { %2687 = vmatprep.subr.bf16.mxu0 %v10082_v55  ;;  %2810 = vmatprep.subr.bf16.mxu1 %v10084_v60  ;;  %v504_v55 = vld [vmem:[#allocation2 + $0x8c0] sm:$0xff]  ;;  %v509_v60 = vld [vmem:[#allocation2 + $0x8e8] sm:$0xff] }
 0x166   :  { %v10148_v4 = vcombine.high %v505_v57, %v509_v60  ;;  %v10145_v6 = vcombine.low %v504_v55, %v508_v56 }
 0x168   :  { %2688 = vmatpush1.bf16.msra.mxu0 %v10081_v62  ;;  %2811 = vmatpush1.bf16.msra.mxu1 %v10083_v0  ;;  %v10139_v62 = vcombine.low %v497_v48, %v501_v50  ;;  %v10146_v0 = vcombine.high %v504_v55, %v508_v56  ;;  %v564_v55 = vld [vmem:[#allocation2 + $0xaa0] sm:$0xff]  ;;  %v561_v56 = vld [vmem:[#allocation2 + $0xa88] sm:$0xff] }
 0x169   :  { %2689 = vmatprep.subr.bf16.mxu0 %v10090_v1  ;;  %2812 = vmatprep.subr.bf16.mxu1 %v10092_v5  ;;  %v512_v1 = vld [vmem:[#allocation2 + $0x900] sm:$0xff]  ;;  %v517_v5 = vld [vmem:[#allocation2 + $0x928] sm:$0xff] }
 0x16a   :  { %v10156_v13 = vcombine.high %v513_v3, %v517_v5  ;;  %v10153_v15 = vcombine.low %v512_v1, %v516_v2 }
 0x16c   :  { %2690 = vmatpush1.bf16.msra.mxu0 %v10089_v7  ;;  %2813 = vmatpush1.bf16.msra.mxu1 %v10091_v8  ;;  %v10147_v7 = vcombine.low %v505_v57, %v509_v60  ;;  %v10154_v8 = vcombine.high %v512_v1, %v516_v2  ;;  %v572_v1 = vld [vmem:[#allocation2 + $0xae0] sm:$0xff]  ;;  %v569_v2 = vld [vmem:[#allocation2 + $0xac8] sm:$0xff] }
 0x16d   :  { %2691 = vmatprep.subr.bf16.mxu0 %v10098_v10  ;;  %2814 = vmatprep.subr.bf16.mxu1 %v10100_v14  ;;  %v520_v10 = vld [vmem:[#allocation2 + $0x940] sm:$0xff]  ;;  %v525_v14 = vld [vmem:[#allocation2 + $0x968] sm:$0xff] }
 0x16e   :  { %v10164_v21 = vcombine.high %v521_v12, %v525_v14  ;;  %v10161_v23 = vcombine.low %v520_v10, %v524_v11 }
 0x170   :  { %2692 = vmatpush1.bf16.msra.mxu0 %v10097_v16  ;;  %2815 = vmatpush1.bf16.msra.mxu1 %v10099_v17  ;;  %v10155_v16 = vcombine.low %v513_v3, %v517_v5  ;;  %v10162_v17 = vcombine.high %v520_v10, %v524_v11  ;;  %v580_v10 = vld [vmem:[#allocation2 + $0xb20] sm:$0xff]  ;;  %v577_v11 = vld [vmem:[#allocation2 + $0xb08] sm:$0xff] }
 0x171   :  { %2693 = vmatprep.subr.bf16.mxu0 %v10106_v18  ;;  %2816 = vmatprep.subr.bf16.mxu1 %v10108_v22  ;;  %v528_v18 = vld [vmem:[#allocation2 + $0x980] sm:$0xff]  ;;  %v533_v22 = vld [vmem:[#allocation2 + $0x9a8] sm:$0xff] }
 0x172   :  { %v10172_v59 = vcombine.high %v529_v20, %v533_v22  ;;  %v10169_v31 = vcombine.low %v528_v18, %v532_v19 }
 0x174   :  { %2694 = vmatpush1.bf16.msra.mxu0 %v10105_v24  ;;  %2817 = vmatpush1.bf16.msra.mxu1 %v10107_v26  ;;  %v10163_v24 = vcombine.low %v521_v12, %v525_v14  ;;  %v10170_v26 = vcombine.high %v528_v18, %v532_v19  ;;  %v588_v18 = vld [vmem:[#allocation2 + $0xb60] sm:$0xff]  ;;  %v585_v19 = vld [vmem:[#allocation2 + $0xb48] sm:$0xff] }
 0x175   :  { %2695 = vmatprep.subr.bf16.mxu0 %v10114_v27  ;;  %2818 = vmatprep.subr.bf16.mxu1 %v10116_v30  ;;  %v536_v27 = vld [vmem:[#allocation2 + $0x9c0] sm:$0xff]  ;;  %v541_v30 = vld [vmem:[#allocation2 + $0x9e8] sm:$0xff] }
 0x176   :  { %v10180_v39 = vcombine.high %v537_v29, %v541_v30  ;;  %v10177_v41 = vcombine.low %v536_v27, %v540_v28 }
 0x178   :  { %2696 = vmatpush1.bf16.msra.mxu0 %v10113_v32  ;;  %2819 = vmatpush1.bf16.msra.mxu1 %v10115_v33  ;;  %v10171_v32 = vcombine.low %v529_v20, %v533_v22  ;;  %v10178_v33 = vcombine.high %v536_v27, %v540_v28  ;;  %v596_v27 = vld [vmem:[#allocation2 + $0xba0] sm:$0xff]  ;;  %v593_v28 = vld [vmem:[#allocation2 + $0xb88] sm:$0xff] }
 0x179   :  { %2706 = vmatprep.subr.bf16.mxu0 %v10122_v35  ;;  %2829 = vmatprep.subr.bf16.mxu1 %v10124_v40  ;;  %v544_v35 = vld [vmem:[#allocation2 + $0xa00] sm:$0xff]  ;;  %v549_v40 = vld [vmem:[#allocation2 + $0xa28] sm:$0xff] }
 0x17a   :  { %v10188_v48 = vcombine.high %v545_v38, %v549_v40  ;;  %v10185_v50 = vcombine.low %v544_v35, %v548_v36 }
 0x17b   :  { %2698 = vmatmul.mubr.bf16.vlgmr.msra.gmra.mrb[0].mxu0 %v13380_v42  ;;  %2821 = vmatmul.mubr.bf16.vlgmr.msra.gmra.mrb[0].mxu1 %v13380_v42 }
 0x17c   :  { %2707 = vmatpush1.bf16.msra.mxu0 %v10121_v44  ;;  %2830 = vmatpush1.bf16.msra.mxu1 %v10123_v45  ;;  %v10179_v44 = vcombine.low %v537_v29, %v541_v30  ;;  %v10186_v45 = vcombine.high %v544_v35, %v548_v36  ;;  %v604_v35 = vld [vmem:[#allocation2 + $0xbe0] sm:$0xff]  ;;  %v601_v36 = vld [vmem:[#allocation2 + $0xbc8] sm:$0xff] }
 0x17d   :  { %2708 = vmatprep.subr.bf16.mxu0 %v10130_v46  ;;  %2831 = vmatprep.subr.bf16.mxu1 %v10132_v49  ;;  %v552_v46 = vld [vmem:[#allocation2 + $0xa40] sm:$0xff]  ;;  %v557_v49 = vld [vmem:[#allocation2 + $0xa68] sm:$0xff] }
 0x17e   :  { %2738 = vmatprep.mubr.bf16.mxu0 %v13372_v37  ;;  %2861 = vmatprep.mubr.bf16.mxu1 %v13372_v37  ;;  %v10196_v57 = vcombine.high %v553_v47, %v557_v49  ;;  %v10193_v60 = vcombine.low %v552_v46, %v556_v53 }
 0x180   :  { %2709 = vmatpush1.bf16.msra.mxu0 %v10129_v51  ;;  %2832 = vmatpush1.bf16.msra.mxu1 %v10131_v52  ;;  %v10187_v51 = vcombine.low %v545_v38, %v549_v40  ;;  %v10194_v52 = vcombine.high %v552_v46, %v556_v53  ;;  %v230_v46 = vld [vmem:[#allocation2 + $0x30] sm:$0xff]  ;;  %v227_v53 = vld [vmem:[#allocation2 + $0x18] sm:$0xff] }
 0x181   :  { %2710 = vmatprep.subr.bf16.mxu0 %v10138_v54  ;;  %2833 = vmatprep.subr.bf16.mxu1 %v10140_v58  ;;  %v560_v54 = vld [vmem:[#allocation2 + $0xa80] sm:$0xff]  ;;  %v565_v58 = vld [vmem:[#allocation2 + $0xaa8] sm:$0xff] }
 0x182   :  { %v10204_v3 = vcombine.high %v561_v56, %v565_v58  ;;  %v10201_v5 = vcombine.low %v560_v54, %v564_v55 }
 0x184   :  { %2711 = vmatpush1.bf16.msra.mxu0 %v10137_v61  ;;  %2834 = vmatpush1.bf16.msra.mxu1 %v10139_v62  ;;  %v10195_v61 = vcombine.low %v553_v47, %v557_v49  ;;  %v10202_v62 = vcombine.high %v560_v54, %v564_v55  ;;  %v238_v54 = vld [vmem:[#allocation2 + $0x70] sm:$0xff]  ;;  %v235_v55 = vld [vmem:[#allocation2 + $0x58] sm:$0xff] }
 0x185   :  { %2712 = vmatprep.subr.bf16.mxu0 %v10146_v0  ;;  %2835 = vmatprep.subr.bf16.mxu1 %v10148_v4  ;;  %v568_v0 = vld [vmem:[#allocation2 + $0xac0] sm:$0xff]  ;;  %v573_v4 = vld [vmem:[#allocation2 + $0xae8] sm:$0xff] }
 0x186   :  { %v10212_v12 = vcombine.high %v569_v2, %v573_v4  ;;  %v10209_v14 = vcombine.low %v568_v0, %v572_v1 }
 0x188   :  { %2713 = vmatpush1.bf16.msra.mxu0 %v10145_v6  ;;  %2836 = vmatpush1.bf16.msra.mxu1 %v10147_v7  ;;  %v10203_v6 = vcombine.low %v561_v56, %v565_v58  ;;  %v10210_v7 = vcombine.high %v568_v0, %v572_v1  ;;  %v246_v0 = vld [vmem:[#allocation2 + $0xb0] sm:$0xff]  ;;  %v243_v1 = vld [vmem:[#allocation2 + $0x98] sm:$0xff] }
 0x189   :  { %2714 = vmatprep.subr.bf16.mxu0 %v10154_v8  ;;  %2837 = vmatprep.subr.bf16.mxu1 %v10156_v13  ;;  %v576_v8 = vld [vmem:[#allocation2 + $0xb00] sm:$0xff]  ;;  %v581_v13 = vld [vmem:[#allocation2 + $0xb28] sm:$0xff] }
 0x18a   :  { %v10220_v20 = vcombine.high %v577_v11, %v581_v13  ;;  %v10217_v22 = vcombine.low %v576_v8, %v580_v10 }
 0x18c   :  { %2715 = vmatpush1.bf16.msra.mxu0 %v10153_v15  ;;  %2838 = vmatpush1.bf16.msra.mxu1 %v10155_v16  ;;  %v10211_v15 = vcombine.low %v569_v2, %v573_v4  ;;  %v10218_v16 = vcombine.high %v576_v8, %v580_v10  ;;  %v254_v8 = vld [vmem:[#allocation2 + $0xf0] sm:$0xff]  ;;  %v251_v10 = vld [vmem:[#allocation2 + $0xd8] sm:$0xff] }
 0x18d   :  { %2716 = vmatprep.subr.bf16.mxu0 %v10162_v17  ;;  %2839 = vmatprep.subr.bf16.mxu1 %v10164_v21  ;;  %v584_v17 = vld [vmem:[#allocation2 + $0xb40] sm:$0xff]  ;;  %v589_v21 = vld [vmem:[#allocation2 + $0xb68] sm:$0xff] }
 0x18e   :  { %v10228_v29 = vcombine.high %v585_v19, %v589_v21  ;;  %v10225_v30 = vcombine.low %v584_v17, %v588_v18 }
 0x190   :  { %2717 = vmatpush1.bf16.msra.mxu0 %v10161_v23  ;;  %2840 = vmatpush1.bf16.msra.mxu1 %v10163_v24  ;;  %v10219_v23 = vcombine.low %v577_v11, %v581_v13  ;;  %v10226_v24 = vcombine.high %v584_v17, %v588_v18  ;;  %v262_v17 = vld [vmem:[#allocation2 + $0x130] sm:$0xff]  ;;  %v259_v18 = vld [vmem:[#allocation2 + $0x118] sm:$0xff] }
 0x191   :  { %2718 = vmatprep.subr.bf16.mxu0 %v10170_v26  ;;  %2841 = vmatprep.subr.bf16.mxu1 %v10172_v59  ;;  %v592_v26 = vld [vmem:[#allocation2 + $0xb80] sm:$0xff]  ;;  %v597_v59 = vld [vmem:[#allocation2 + $0xba8] sm:$0xff] }
 0x192   :  { %v10236_v38 = vcombine.high %v593_v28, %v597_v59  ;;  %v10233_v40 = vcombine.low %v592_v26, %v596_v27 }
 0x194   :  { %2719 = vmatpush1.bf16.msra.mxu0 %v10169_v31  ;;  %2842 = vmatpush1.bf16.msra.mxu1 %v10171_v32  ;;  %v10227_v31 = vcombine.low %v585_v19, %v589_v21  ;;  %v10234_v32 = vcombine.high %v592_v26, %v596_v27  ;;  %v267_v26 = vld [vmem:[#allocation2 + $0x158] sm:$0xff] }
 0x195   :  { %2720 = vmatprep.subr.bf16.mxu0 %v10178_v33  ;;  %2843 = vmatprep.subr.bf16.mxu1 %v10180_v39  ;;  %v600_v33 = vld [vmem:[#allocation2 + $0xbc0] sm:$0xff]  ;;  %v605_v39 = vld [vmem:[#allocation2 + $0xbe8] sm:$0xff] }
 0x196   :  { %v10244_v47 = vcombine.high %v601_v36, %v605_v39  ;;  %v10241_v49 = vcombine.low %v600_v33, %v604_v35 }
 0x198   :  { %2721 = vmatpush1.bf16.msra.mxu0 %v10177_v41  ;;  %2844 = vmatpush1.bf16.msra.mxu1 %v10179_v44  ;;  %v10235_v41 = vcombine.low %v593_v28, %v597_v59  ;;  %v10242_v44 = vcombine.high %v600_v33, %v604_v35  ;;  %v271_v28 = vld [vmem:[#allocation2 + $0x178] sm:$0xff] }
 0x199   :  { %2722 = vmatprep.subr.bf16.mxu0 %v10186_v45  ;;  %2845 = vmatprep.subr.bf16.mxu1 %v10188_v48  ;;  %v226_v45 = vld [vmem:[#allocation2 + $0x10] sm:$0xff]  ;;  %v231_v48 = vld [vmem:[#allocation2 + $0x38] sm:$0xff]  ;;  %v9912_v35 = vcombine.high %v267_v26, %v271_v28 }
 0x19a   :  { %v9872_v56 = vcombine.high %v227_v53, %v231_v48  ;;  %v9869_v58 = vcombine.low %v226_v45, %v230_v46  ;;  %v275_v33 = vld [vmem:[#allocation2 + $0x198] sm:$0xff] }
 0x19c   :  { %2723 = vmatpush1.bf16.msra.mxu0 %v10185_v50  ;;  %2846 = vmatpush1.bf16.msra.mxu1 %v10187_v51  ;;  %v10243_v50 = vcombine.low %v601_v36, %v605_v39  ;;  %v9870_v51 = vcombine.high %v226_v45, %v230_v46  ;;  %v279_v36 = vld [vmem:[#allocation2 + $0x1b8] sm:$0xff]  ;;  %v9911_v39 = vcombine.low %v267_v26, %v271_v28 }
 0x19d   :  { %2724 = vmatprep.subr.bf16.mxu0 %v10194_v52  ;;  %2847 = vmatprep.subr.bf16.mxu1 %v10196_v57  ;;  %v234_v52 = vld [vmem:[#allocation2 + $0x50] sm:$0xff]  ;;  %v239_v57 = vld [vmem:[#allocation2 + $0x78] sm:$0xff]  ;;  %v9920_v46 = vcombine.high %v275_v33, %v279_v36 }
 0x19e   :  { %v9880_v2 = vcombine.high %v235_v55, %v239_v57  ;;  %v9877_v4 = vcombine.low %v234_v52, %v238_v54  ;;  %v283_v45 = vld [vmem:[#allocation2 + $0x1d8] sm:$0xff] }
 0x19f   :  { %v327_v26 = vld [vmem:[#allocation2 + $0x338] sm:$0xff] }
 0x1a0   :  { %2725 = vmatpush1.bf16.msra.mxu0 %v10193_v60  ;;  %2848 = vmatpush1.bf16.msra.mxu1 %v10195_v61  ;;  %v9871_v60 = vcombine.low %v227_v53, %v231_v48  ;;  %v9878_v61 = vcombine.high %v234_v52, %v238_v54  ;;  %v287_v53 = vld [vmem:[#allocation2 + $0x1f8] sm:$0xff]  ;;  %v9919_v48 = vcombine.low %v275_v33, %v279_v36 }
 0x1a1   :  { %2726 = vmatprep.subr.bf16.mxu0 %v10202_v62  ;;  %2849 = vmatprep.subr.bf16.mxu1 %v10204_v3  ;;  %v242_v62 = vld [vmem:[#allocation2 + $0x90] sm:$0xff]  ;;  %v247_v3 = vld [vmem:[#allocation2 + $0xb8] sm:$0xff]  ;;  %v9928_v54 = vcombine.high %v283_v45, %v287_v53 }
 0x1a2   :  { %v9888_v11 = vcombine.high %v243_v1, %v247_v3  ;;  %v9885_v13 = vcombine.low %v242_v62, %v246_v0  ;;  %v291_v52 = vld [vmem:[#allocation2 + $0x218] sm:$0xff] }
 0x1a3   :  { %v335_v33 = vld [vmem:[#allocation2 + $0x378] sm:$0xff] }
 0x1a4   :  { %2727 = vmatpush1.bf16.msra.mxu0 %v10201_v5  ;;  %2850 = vmatpush1.bf16.msra.mxu1 %v10203_v6  ;;  %v9879_v5 = vcombine.low %v235_v55, %v239_v57  ;;  %v9886_v6 = vcombine.high %v242_v62, %v246_v0  ;;  %v295_v55 = vld [vmem:[#allocation2 + $0x238] sm:$0xff]  ;;  %v9927_v57 = vcombine.low %v283_v45, %v287_v53 }
 0x1a5   :  { %2728 = vmatprep.subr.bf16.mxu0 %v10210_v7  ;;  %2851 = vmatprep.subr.bf16.mxu1 %v10212_v12  ;;  %v250_v7 = vld [vmem:[#allocation2 + $0xd0] sm:$0xff]  ;;  %v255_v12 = vld [vmem:[#allocation2 + $0xf8] sm:$0xff]  ;;  %v9936_v0 = vcombine.high %v291_v52, %v295_v55 }
 0x1a6   :  { %v9896_v19 = vcombine.high %v251_v10, %v255_v12  ;;  %v9893_v21 = vcombine.low %v250_v7, %v254_v8  ;;  %v299_v62 = vld [vmem:[#allocation2 + $0x258] sm:$0xff] }
 0x1a7   :  { %v343_v45 = vld [vmem:[#allocation2 + $0x3b8] sm:$0xff] }
 0x1a8   :  { %2729 = vmatpush1.bf16.msra.mxu0 %v10209_v14  ;;  %2852 = vmatpush1.bf16.msra.mxu1 %v10211_v15  ;;  %v9887_v14 = vcombine.low %v243_v1, %v247_v3  ;;  %v9894_v15 = vcombine.high %v250_v7, %v254_v8  ;;  %v303_v1 = vld [vmem:[#allocation2 + $0x278] sm:$0xff]  ;;  %v9935_v3 = vcombine.low %v291_v52, %v295_v55 }
 0x1a9   :  { %2730 = vmatprep.subr.bf16.mxu0 %v10218_v16  ;;  %2853 = vmatprep.subr.bf16.mxu1 %v10220_v20  ;;  %v258_v16 = vld [vmem:[#allocation2 + $0x110] sm:$0xff]  ;;  %v263_v20 = vld [vmem:[#allocation2 + $0x138] sm:$0xff]  ;;  %v9944_v8 = vcombine.high %v299_v62, %v303_v1 }
 0x1aa   :  { %v9904_v27 = vcombine.high %v259_v18, %v263_v20  ;;  %v9903_v59 = vcombine.low %v259_v18, %v263_v20  ;;  %v307_v7 = vld [vmem:[#allocation2 + $0x298] sm:$0xff] }
 0x1ab   :  { %v319_v18 = vld [vmem:[#allocation2 + $0x2f8] sm:$0xff] }
 0x1ac   :  { %2731 = vmatpush1.bf16.msra.mxu0 %v10217_v22  ;;  %2854 = vmatpush1.bf16.msra.mxu1 %v10219_v23  ;;  %v9895_v22 = vcombine.low %v251_v10, %v255_v12  ;;  %v9902_v23 = vcombine.high %v258_v16, %v262_v17  ;;  %v311_v10 = vld [vmem:[#allocation2 + $0x2b8] sm:$0xff]  ;;  %v9943_v12 = vcombine.low %v299_v62, %v303_v1 }
 0x1ad   :  { %2732 = vmatprep.subr.bf16.mxu0 %v10226_v24  ;;  %2855 = vmatprep.subr.bf16.mxu1 %v10228_v29  ;;  %v266_v24 = vld [vmem:[#allocation2 + $0x150] sm:$0xff]  ;;  %v9901_v29 = vcombine.low %v258_v16, %v262_v17  ;;  %v315_v16 = vld [vmem:[#allocation2 + $0x2d8] sm:$0xff]  ;;  %v9952_v17 = vcombine.high %v307_v7, %v311_v10  ;;  %v9951_v20 = vcombine.low %v307_v7, %v311_v10 }
 0x1ae   :  { %v9959_v28 = vcombine.low %v315_v16, %v319_v18  ;;  %v351_v52 = vld [vmem:[#allocation2 + $0x3f8] sm:$0xff] }
 0x1af   :  { %v359_v62 = vld [vmem:[#allocation2 + $0x438] sm:$0xff] }
 0x1b0   :  { %2733 = vmatpush1.bf16.msra.mxu0 %v10225_v30  ;;  %2856 = vmatpush1.bf16.msra.mxu1 %v10227_v31  ;;  %v274_v31 = vld [vmem:[#allocation2 + $0x190] sm:$0xff]  ;;  %v367_v7 = vld [vmem:[#allocation2 + $0x478] sm:$0xff] }
 0x1b1   :  { %2734 = vmatprep.subr.bf16.mxu0 %v10234_v32  ;;  %2857 = vmatprep.subr.bf16.mxu1 %v10236_v38  ;;  %v278_v32 = vld [vmem:[#allocation2 + $0x1b0] sm:$0xff] }
 0x1b4   :  { %2735 = vmatpush1.bf16.msra.mxu0 %v10233_v40  ;;  %2858 = vmatpush1.bf16.msra.mxu1 %v10235_v41  ;;  %v9918_v40 = vcombine.high %v274_v31, %v278_v32  ;;  %v282_v41 = vld [vmem:[#allocation2 + $0x1d0] sm:$0xff] }
 0x1b5   :  { %2736 = vmatprep.subr.bf16.mxu0 %v10242_v44  ;;  %2859 = vmatprep.subr.bf16.mxu1 %v10244_v47  ;;  %v286_v44 = vld [vmem:[#allocation2 + $0x1f0] sm:$0xff]  ;;  %v9917_v47 = vcombine.low %v274_v31, %v278_v32  ;;  %v331_v31 = vld [vmem:[#allocation2 + $0x358] sm:$0xff] }
 0x1b6   :  { %v9975_v53 = vcombine.low %v331_v31, %v335_v33 }
 0x1b8   :  { %2737 = vmatpush1.bf16.msra.mxu0 %v10241_v49  ;;  %2860 = vmatpush1.bf16.msra.mxu1 %v10243_v50  ;;  %v9926_v49 = vcombine.high %v282_v41, %v286_v44  ;;  %v290_v50 = vld [vmem:[#allocation2 + $0x210] sm:$0xff] }
 0x1b9   :  { %2870 = vmatprep.subr.bf16.mxu0 %v9870_v51  ;;  %2993 = vmatprep.subr.bf16.mxu1 %v9872_v56  ;;  %v294_v51 = vld [vmem:[#allocation2 + $0x230] sm:$0xff]  ;;  %v9925_v56 = vcombine.low %v282_v41, %v286_v44  ;;  %v339_v41 = vld [vmem:[#allocation2 + $0x398] sm:$0xff]  ;;  %v9976_v44 = vcombine.high %v331_v31, %v335_v33 }
 0x1ba   :  { %v9983_v55 = vcombine.low %v339_v41, %v343_v45 }
 0x1bb   :  { %2739 = vmatmul.mubr.bf16.vlgmr.msra.gmra.mrb[0].mxu0 %v13365_v34  ;;  %2862 = vmatmul.mubr.bf16.vlgmr.msra.gmra.mrb[0].mxu1 %v13365_v34 }
 0x1bc   :  { %2871 = vmatpush1.bf16.msra.mxu0 %v9869_v58  ;;  %2994 = vmatpush1.bf16.msra.mxu1 %v9871_v60  ;;  %v9934_v58 = vcombine.high %v290_v50, %v294_v51  ;;  %v298_v60 = vld [vmem:[#allocation2 + $0x250] sm:$0xff] }
 0x1bd   :  { %2872 = vmatprep.subr.bf16.mxu0 %v9878_v61  ;;  %2995 = vmatprep.subr.bf16.mxu1 %v9880_v2  ;;  %v302_v61 = vld [vmem:[#allocation2 + $0x270] sm:$0xff]  ;;  %v9933_v2 = vcombine.low %v290_v50, %v294_v51  ;;  %v347_v50 = vld [vmem:[#allocation2 + $0x3d8] sm:$0xff]  ;;  %v9984_v51 = vcombine.high %v339_v41, %v343_v45 }
 0x1be   :  { %2902 = vmatprep.mubr.bf16.mxu0 %v13353_v9  ;;  %3025 = vmatprep.mubr.bf16.mxu1 %v13353_v9  ;;  %v270_v9 = vld [vmem:[#allocation2 + $0x170] sm:$0xff]  ;;  %v9991_v1 = vcombine.low %v347_v50, %v351_v52 }
 0x1bf   :  { %v9910_v30 = vcombine.high %v266_v24, %v270_v9  ;;  %v9909_v38 = vcombine.low %v266_v24, %v270_v9  ;;  %v323_v24 = vld [vmem:[#allocation2 + $0x318] sm:$0xff]  ;;  %v9960_v9 = vcombine.high %v315_v16, %v319_v18  ;;  %v402_v45 = vld [vmem:[#allocation2 + $0x590] sm:$0xff] }
 0x1c0   :  { %2873 = vmatpush1.bf16.msra.mxu0 %v9877_v4  ;;  %2996 = vmatpush1.bf16.msra.mxu1 %v9879_v5  ;;  %v9942_v4 = vcombine.high %v298_v60, %v302_v61  ;;  %v306_v5 = vld [vmem:[#allocation2 + $0x290] sm:$0xff]  ;;  %v9968_v32 = vcombine.high %v323_v24, %v327_v26  ;;  %v9967_v36 = vcombine.low %v323_v24, %v327_v26  ;;  %v375_v16 = vld [vmem:[#allocation2 + $0x4b8] sm:$0xff] }
 0x1c1   :  { %2874 = vmatprep.subr.bf16.mxu0 %v9886_v6  ;;  %2997 = vmatprep.subr.bf16.mxu1 %v9888_v11  ;;  %v310_v6 = vld [vmem:[#allocation2 + $0x2b0] sm:$0xff]  ;;  %v9941_v11 = vcombine.low %v298_v60, %v302_v61  ;;  %v355_v60 = vld [vmem:[#allocation2 + $0x418] sm:$0xff]  ;;  %v9992_v61 = vcombine.high %v347_v50, %v351_v52 }
 0x1c2   :  { %v9999_v10 = vcombine.low %v355_v60, %v359_v62  ;;  %v383_v24 = vld [vmem:[#allocation2 + $0x4f8] sm:$0xff] }
 0x1c4   :  { %2875 = vmatpush1.bf16.msra.mxu0 %v9885_v13  ;;  %2998 = vmatpush1.bf16.msra.mxu1 %v9887_v14  ;;  %v9950_v13 = vcombine.high %v306_v5, %v310_v6  ;;  %v314_v14 = vld [vmem:[#allocation2 + $0x2d0] sm:$0xff] }
 0x1c5   :  { %2876 = vmatprep.subr.bf16.mxu0 %v9894_v15  ;;  %2999 = vmatprep.subr.bf16.mxu1 %v9896_v19  ;;  %v318_v15 = vld [vmem:[#allocation2 + $0x2f0] sm:$0xff]  ;;  %v9949_v19 = vcombine.low %v306_v5, %v310_v6  ;;  %v363_v5 = vld [vmem:[#allocation2 + $0x458] sm:$0xff]  ;;  %v10000_v6 = vcombine.high %v355_v60, %v359_v62 }
 0x1c6   :  { %v10007_v18 = vcombine.low %v363_v5, %v367_v7 }
 0x1c8   :  { %2877 = vmatpush1.bf16.msra.mxu0 %v9893_v21  ;;  %3000 = vmatpush1.bf16.msra.mxu1 %v9895_v22  ;;  %v9958_v21 = vcombine.high %v314_v14, %v318_v15  ;;  %v322_v22 = vld [vmem:[#allocation2 + $0x310] sm:$0xff] }
 0x1c9   :  { %2878 = vmatprep.subr.bf16.mxu0 %v9902_v23  ;;  %3001 = vmatprep.subr.bf16.mxu1 %v9904_v27  ;;  %v326_v23 = vld [vmem:[#allocation2 + $0x330] sm:$0xff]  ;;  %v9957_v27 = vcombine.low %v314_v14, %v318_v15  ;;  %v371_v15 = vld [vmem:[#allocation2 + $0x498] sm:$0xff] }
 0x1ca   :  { %v374_v14 = vld [vmem:[#allocation2 + $0x4b0] sm:$0xff] }
 0x1cc   :  { %2879 = vmatpush1.bf16.msra.mxu0 %v9901_v29  ;;  %3002 = vmatpush1.bf16.msra.mxu1 %v9903_v59  ;;  %v9966_v29 = vcombine.high %v322_v22, %v326_v23  ;;  %v330_v59 = vld [vmem:[#allocation2 + $0x350] sm:$0xff] }
 0x1cd   :  { %2880 = vmatprep.subr.bf16.mxu0 %v9910_v30  ;;  %3003 = vmatprep.subr.bf16.mxu1 %v9912_v35  ;;  %v334_v30 = vld [vmem:[#allocation2 + $0x370] sm:$0xff]  ;;  %v9965_v35 = vcombine.low %v322_v22, %v326_v23  ;;  %v379_v22 = vld [vmem:[#allocation2 + $0x4d8] sm:$0xff]  ;;  %v10016_v23 = vcombine.high %v371_v15, %v375_v16 }
 0x1d0   :  { %2881 = vmatpush1.bf16.msra.mxu0 %v9909_v38  ;;  %3004 = vmatpush1.bf16.msra.mxu1 %v9911_v39  ;;  %v9974_v38 = vcombine.high %v330_v59, %v334_v30  ;;  %v338_v39 = vld [vmem:[#allocation2 + $0x390] sm:$0xff] }
 0x1d1   :  { %2882 = vmatprep.subr.bf16.mxu0 %v9918_v40  ;;  %3005 = vmatprep.subr.bf16.mxu1 %v9920_v46  ;;  %v342_v40 = vld [vmem:[#allocation2 + $0x3b0] sm:$0xff]  ;;  %v9973_v46 = vcombine.low %v330_v59, %v334_v30  ;;  %v10024_v59 = vcombine.high %v379_v22, %v383_v24  ;;  %v391_v30 = vld [vmem:[#allocation2 + $0x538] sm:$0xff] }
 0x1d4   :  { %2883 = vmatpush1.bf16.msra.mxu0 %v9917_v47  ;;  %3006 = vmatpush1.bf16.msra.mxu1 %v9919_v48  ;;  %v9982_v47 = vcombine.high %v338_v39, %v342_v40  ;;  %v346_v48 = vld [vmem:[#allocation2 + $0x3d0] sm:$0xff] }
 0x1d5   :  { %2884 = vmatprep.subr.bf16.mxu0 %v9926_v49  ;;  %3007 = vmatprep.subr.bf16.mxu1 %v9928_v54  ;;  %v350_v49 = vld [vmem:[#allocation2 + $0x3f0] sm:$0xff]  ;;  %v9981_v54 = vcombine.low %v338_v39, %v342_v40  ;;  %v399_v39 = vld [vmem:[#allocation2 + $0x578] sm:$0xff] }
 0x1d8   :  { %2885 = vmatpush1.bf16.msra.mxu0 %v9925_v56  ;;  %3008 = vmatpush1.bf16.msra.mxu1 %v9927_v57  ;;  %v9990_v56 = vcombine.high %v346_v48, %v350_v49  ;;  %v354_v57 = vld [vmem:[#allocation2 + $0x410] sm:$0xff] }
 0x1d9   :  { %2886 = vmatprep.subr.bf16.mxu0 %v9934_v58  ;;  %3009 = vmatprep.subr.bf16.mxu1 %v9936_v0  ;;  %v358_v58 = vld [vmem:[#allocation2 + $0x430] sm:$0xff]  ;;  %v9989_v0 = vcombine.low %v346_v48, %v350_v49  ;;  %v407_v48 = vld [vmem:[#allocation2 + $0x5b8] sm:$0xff] }
 0x1dc   :  { %2887 = vmatpush1.bf16.msra.mxu0 %v9933_v2  ;;  %3010 = vmatpush1.bf16.msra.mxu1 %v9935_v3  ;;  %v9998_v2 = vcombine.high %v354_v57, %v358_v58  ;;  %v362_v3 = vld [vmem:[#allocation2 + $0x450] sm:$0xff] }
 0x1dd   :  { %2888 = vmatprep.subr.bf16.mxu0 %v9942_v4  ;;  %3011 = vmatprep.subr.bf16.mxu1 %v9944_v8  ;;  %v366_v4 = vld [vmem:[#allocation2 + $0x470] sm:$0xff]  ;;  %v9997_v8 = vcombine.low %v354_v57, %v358_v58  ;;  %v415_v57 = vld [vmem:[#allocation2 + $0x5f8] sm:$0xff] }
 0x1e0   :  { %2889 = vmatpush1.bf16.msra.mxu0 %v9941_v11  ;;  %3012 = vmatpush1.bf16.msra.mxu1 %v9943_v12  ;;  %v10006_v11 = vcombine.high %v362_v3, %v366_v4  ;;  %v10008_v12 = vcombine.high %v363_v5, %v367_v7 }
 0x1e1   :  { %2890 = vmatprep.subr.bf16.mxu0 %v9950_v13  ;;  %3013 = vmatprep.subr.bf16.mxu1 %v9952_v17  ;;  %v370_v13 = vld [vmem:[#allocation2 + $0x490] sm:$0xff]  ;;  %v10005_v17 = vcombine.low %v362_v3, %v366_v4  ;;  %v423_v3 = vld [vmem:[#allocation2 + $0x638] sm:$0xff] }
 0x1e4   :  { %2891 = vmatpush1.bf16.msra.mxu0 %v9949_v19  ;;  %3014 = vmatpush1.bf16.msra.mxu1 %v9951_v20  ;;  %v10014_v19 = vcombine.high %v370_v13, %v374_v14  ;;  %v378_v20 = vld [vmem:[#allocation2 + $0x4d0] sm:$0xff] }
 0x1e5   :  { %2892 = vmatprep.subr.bf16.mxu0 %v9958_v21  ;;  %3015 = vmatprep.subr.bf16.mxu1 %v9960_v9  ;;  %v382_v21 = vld [vmem:[#allocation2 + $0x4f0] sm:$0xff]  ;;  %v10013_v9 = vcombine.low %v370_v13, %v374_v14 }
 0x1e6   :  { %v10022_v26 = vcombine.high %v378_v20, %v382_v21  ;;  %v10021_v31 = vcombine.low %v378_v20, %v382_v21  ;;  %v439_v20 = vld [vmem:[#allocation2 + $0x6b8] sm:$0xff] }
 0x1e8   :  { %2893 = vmatpush1.bf16.msra.mxu0 %v9957_v27  ;;  %3016 = vmatpush1.bf16.msra.mxu1 %v9959_v28  ;;  %v386_v27 = vld [vmem:[#allocation2 + $0x510] sm:$0xff] }
 0x1e9   :  { %2894 = vmatprep.subr.bf16.mxu0 %v9966_v29  ;;  %3017 = vmatprep.subr.bf16.mxu1 %v9968_v32  ;;  %v390_v28 = vld [vmem:[#allocation2 + $0x530] sm:$0xff]  ;;  %v387_v29 = vld [vmem:[#allocation2 + $0x518] sm:$0xff]  ;;  %v10023_v32 = vcombine.low %v379_v22, %v383_v24 }
 0x1ea   :  { %v10030_v33 = vcombine.high %v386_v27, %v390_v28  ;;  %v10029_v40 = vcombine.low %v386_v27, %v390_v28  ;;  %v10031_v41 = vcombine.low %v387_v29, %v391_v30  ;;  %v442_v24 = vld [vmem:[#allocation2 + $0x6d0] sm:$0xff]  ;;  %v447_v27 = vld [vmem:[#allocation2 + $0x6f8] sm:$0xff] }
 0x1ec   :  { %2895 = vmatpush1.bf16.msra.mxu0 %v9965_v35  ;;  %3018 = vmatpush1.bf16.msra.mxu1 %v9967_v36  ;;  %v394_v35 = vld [vmem:[#allocation2 + $0x550] sm:$0xff]  ;;  %v395_v36 = vld [vmem:[#allocation2 + $0x558] sm:$0xff] }
 0x1ed   :  { %2896 = vmatprep.subr.bf16.mxu0 %v9974_v38  ;;  %3019 = vmatprep.subr.bf16.mxu1 %v9976_v44  ;;  %v10032_v38 = vcombine.high %v387_v29, %v391_v30  ;;  %v10039_v50 = vcombine.low %v395_v36, %v399_v39  ;;  %v450_v30 = vld [vmem:[#allocation2 + $0x710] sm:$0xff] }
 0x1f0   :  { %2897 = vmatpush1.bf16.msra.mxu0 %v9973_v46  ;;  %3020 = vmatpush1.bf16.msra.mxu1 %v9975_v53  ;;  %v406_v46 = vld [vmem:[#allocation2 + $0x5b0] sm:$0xff]  ;;  %v403_v53 = vld [vmem:[#allocation2 + $0x598] sm:$0xff] }
 0x1f1   :  { %2898 = vmatprep.subr.bf16.mxu0 %v9982_v47  ;;  %3021 = vmatprep.subr.bf16.mxu1 %v9984_v51  ;;  %v10040_v47 = vcombine.high %v395_v36, %v399_v39  ;;  %v10046_v51 = vcombine.high %v402_v45, %v406_v46  ;;  %v10048_v52 = vcombine.high %v403_v53, %v407_v48  ;;  %v458_v39 = vld [vmem:[#allocation2 + $0x750] sm:$0xff] }
 0x1f2   :  { %v10045_v58 = vcombine.low %v402_v45, %v406_v46  ;;  %v10047_v60 = vcombine.low %v403_v53, %v407_v48  ;;  %v463_v45 = vld [vmem:[#allocation2 + $0x778] sm:$0xff]  ;;  %v466_v48 = vld [vmem:[#allocation2 + $0x790] sm:$0xff] }
 0x1f4   :  { %2899 = vmatpush1.bf16.msra.mxu0 %v9981_v54  ;;  %3022 = vmatpush1.bf16.msra.mxu1 %v9983_v55  ;;  %v410_v54 = vld [vmem:[#allocation2 + $0x5d0] sm:$0xff] }
 0x1f5   :  { %2900 = vmatprep.subr.bf16.mxu0 %v9990_v56  ;;  %3023 = vmatprep.subr.bf16.mxu1 %v9992_v61  ;;  %v414_v55 = vld [vmem:[#allocation2 + $0x5f0] sm:$0xff]  ;;  %v411_v56 = vld [vmem:[#allocation2 + $0x5d8] sm:$0xff] }
 0x1f6   :  { %v10054_v61 = vcombine.high %v410_v54, %v414_v55  ;;  %v10056_v62 = vcombine.high %v411_v56, %v415_v57  ;;  %v10053_v4 = vcombine.low %v410_v54, %v414_v55  ;;  %v10055_v5 = vcombine.low %v411_v56, %v415_v57  ;;  %v474_v57 = vld [vmem:[#allocation2 + $0x7d0] sm:$0xff] }
 0x1f8   :  { %2901 = vmatpush1.bf16.msra.mxu0 %v9989_v0  ;;  %3024 = vmatpush1.bf16.msra.mxu1 %v9991_v1  ;;  %v418_v0 = vld [vmem:[#allocation2 + $0x610] sm:$0xff] }
 0x1f9   :  { %2911 = vmatprep.subr.bf16.mxu0 %v9998_v2  ;;  %3034 = vmatprep.subr.bf16.mxu1 %v10000_v6  ;;  %v422_v1 = vld [vmem:[#allocation2 + $0x630] sm:$0xff]  ;;  %v419_v2 = vld [vmem:[#allocation2 + $0x618] sm:$0xff] }
 0x1fa   :  { %v10062_v6 = vcombine.high %v418_v0, %v422_v1  ;;  %v10064_v7 = vcombine.high %v419_v2, %v423_v3  ;;  %v10061_v13 = vcombine.low %v418_v0, %v422_v1  ;;  %v10063_v14 = vcombine.low %v419_v2, %v423_v3  ;;  %v482_v3 = vld [vmem:[#allocation2 + $0x810] sm:$0xff] }
 0x1fb   :  { %2903 = vmatmul.mubr.bf16.vlgmr.msra.gmra.mrb[4].mxu0 %v13362_v25  ;;  %3026 = vmatmul.mubr.bf16.vlgmr.msra.gmra.mrb[4].mxu1 %v13362_v25  ;;  %v10015_v25 = vcombine.low %v371_v15, %v375_v16  ;;  %v434_v16 = vld [vmem:[#allocation2 + $0x690] sm:$0xff] }
 0x1fc   :  { %2912 = vmatpush1.bf16.msra.mxu0 %v9997_v8  ;;  %3035 = vmatpush1.bf16.msra.mxu1 %v9999_v10  ;;  %v426_v8 = vld [vmem:[#allocation2 + $0x650] sm:$0xff] }
 0x1fd   :  { %2913 = vmatprep.subr.bf16.mxu0 %v10006_v11  ;;  %3036 = vmatprep.subr.bf16.mxu1 %v10008_v12  ;;  %v430_v10 = vld [vmem:[#allocation2 + $0x670] sm:$0xff]  ;;  %v427_v11 = vld [vmem:[#allocation2 + $0x658] sm:$0xff] }
 0x1fe   :  { %2943 = vmatprep.mubr.bf16.mxu0 %v13369_v63  ;;  %3066 = vmatprep.mubr.bf16.mxu1 %v13369_v63  ;;  %v398_v63 = vld [vmem:[#allocation2 + $0x570] sm:$0xff]  ;;  %v431_v12 = vld [vmem:[#allocation2 + $0x678] sm:$0xff]  ;;  %v10070_v15 = vcombine.high %v426_v8, %v430_v10  ;;  %v10069_v21 = vcombine.low %v426_v8, %v430_v10 }
 0x1ff   :  { %v10038_v44 = vcombine.high %v394_v35, %v398_v63  ;;  %v10037_v49 = vcombine.low %v394_v35, %v398_v63  ;;  %v10071_v22 = vcombine.low %v427_v11, %v431_v12  ;;  %v455_v35 = vld [vmem:[#allocation2 + $0x738] sm:$0xff] }
 0x200   :  { %2914 = vmatpush1.bf16.msra.mxu0 %v10005_v17  ;;  %3037 = vmatpush1.bf16.msra.mxu1 %v10007_v18  ;;  %v438_v17 = vld [vmem:[#allocation2 + $0x6b0] sm:$0xff]  ;;  %v435_v18 = vld [vmem:[#allocation2 + $0x698] sm:$0xff] }
 0x201   :  { %2915 = vmatprep.subr.bf16.mxu0 %v10014_v19  ;;  %3038 = vmatprep.subr.bf16.mxu1 %v10016_v23  ;;  %v10072_v19 = vcombine.high %v427_v11, %v431_v12  ;;  %v10078_v23 = vcombine.high %v434_v16, %v438_v17  ;;  %v10077_v28 = vcombine.low %v434_v16, %v438_v17  ;;  %v490_v12 = vld [vmem:[#allocation2 + $0x850] sm:$0xff]  ;;  %v495_v16 = vld [vmem:[#allocation2 + $0x878] sm:$0xff] }
 0x202   :  { %v10079_v29 = vcombine.low %v435_v18, %v439_v20 }
 0x204   :  { %2916 = vmatpush1.bf16.msra.mxu0 %v10013_v9  ;;  %3039 = vmatpush1.bf16.msra.mxu1 %v10015_v25  ;;  %v446_v9 = vld [vmem:[#allocation2 + $0x6f0] sm:$0xff]  ;;  %v443_v25 = vld [vmem:[#allocation2 + $0x6d8] sm:$0xff] }
 0x205   :  { %2917 = vmatprep.subr.bf16.mxu0 %v10022_v26  ;;  %3040 = vmatprep.subr.bf16.mxu1 %v10024_v59  ;;  %v10080_v26 = vcombine.high %v435_v18, %v439_v20  ;;  %v10086_v59 = vcombine.high %v442_v24, %v446_v9  ;;  %v10085_v63 = vcombine.low %v442_v24, %v446_v9  ;;  %v503_v24 = vld [vmem:[#allocation2 + $0x8b8] sm:$0xff] }
 0x206   :  { %v10087_v36 = vcombine.low %v443_v25, %v447_v27 }
 0x208   :  { %2918 = vmatpush1.bf16.msra.mxu0 %v10021_v31  ;;  %3041 = vmatpush1.bf16.msra.mxu1 %v10023_v32  ;;  %v454_v31 = vld [vmem:[#allocation2 + $0x730] sm:$0xff]  ;;  %v451_v32 = vld [vmem:[#allocation2 + $0x718] sm:$0xff] }
 0x209   :  { %2919 = vmatprep.subr.bf16.mxu0 %v10030_v33  ;;  %3042 = vmatprep.subr.bf16.mxu1 %v10032_v38  ;;  %v10088_v33 = vcombine.high %v443_v25, %v447_v27  ;;  %v10094_v38 = vcombine.high %v450_v30, %v454_v31  ;;  %v10093_v46 = vcombine.low %v450_v30, %v454_v31  ;;  %v511_v30 = vld [vmem:[#allocation2 + $0x8f8] sm:$0xff] }
 0x20a   :  { %v10095_v53 = vcombine.low %v451_v32, %v455_v35 }
 0x20c   :  { %2920 = vmatpush1.bf16.msra.mxu0 %v10029_v40  ;;  %3043 = vmatpush1.bf16.msra.mxu1 %v10031_v41  ;;  %v462_v40 = vld [vmem:[#allocation2 + $0x770] sm:$0xff]  ;;  %v459_v41 = vld [vmem:[#allocation2 + $0x758] sm:$0xff] }
 0x20d   :  { %2921 = vmatprep.subr.bf16.mxu0 %v10038_v44  ;;  %3044 = vmatprep.subr.bf16.mxu1 %v10040_v47  ;;  %v10096_v44 = vcombine.high %v451_v32, %v455_v35  ;;  %v10102_v47 = vcombine.high %v458_v39, %v462_v40  ;;  %v10101_v54 = vcombine.low %v458_v39, %v462_v40  ;;  %v518_v35 = vld [vmem:[#allocation2 + $0x930] sm:$0xff] }
 0x20e   :  { %v10103_v55 = vcombine.low %v459_v41, %v463_v45 }
 0x210   :  { %2922 = vmatpush1.bf16.msra.mxu0 %v10037_v49  ;;  %3045 = vmatpush1.bf16.msra.mxu1 %v10039_v50  ;;  %v470_v49 = vld [vmem:[#allocation2 + $0x7b0] sm:$0xff]  ;;  %v467_v50 = vld [vmem:[#allocation2 + $0x798] sm:$0xff] }
 0x211   :  { %2923 = vmatprep.subr.bf16.mxu0 %v10046_v51  ;;  %3046 = vmatprep.subr.bf16.mxu1 %v10048_v52  ;;  %v10104_v51 = vcombine.high %v459_v41, %v463_v45  ;;  %v471_v52 = vld [vmem:[#allocation2 + $0x7b8] sm:$0xff]  ;;  %v10110_v56 = vcombine.high %v466_v48, %v470_v49  ;;  %v10109_v0 = vcombine.low %v466_v48, %v470_v49 }
 0x212   :  { %v10111_v1 = vcombine.low %v467_v50, %v471_v52  ;;  %v523_v45 = vld [vmem:[#allocation2 + $0x958] sm:$0xff] }
 0x214   :  { %2924 = vmatpush1.bf16.msra.mxu0 %v10045_v58  ;;  %3047 = vmatpush1.bf16.msra.mxu1 %v10047_v60  ;;  %v478_v58 = vld [vmem:[#allocation2 + $0x7f0] sm:$0xff]  ;;  %v475_v60 = vld [vmem:[#allocation2 + $0x7d8] sm:$0xff] }
 0x215   :  { %2925 = vmatprep.subr.bf16.mxu0 %v10054_v61  ;;  %3048 = vmatprep.subr.bf16.mxu1 %v10056_v62  ;;  %v10112_v61 = vcombine.high %v467_v50, %v471_v52  ;;  %v479_v62 = vld [vmem:[#allocation2 + $0x7f8] sm:$0xff]  ;;  %v10118_v2 = vcombine.high %v474_v57, %v478_v58  ;;  %v10117_v8 = vcombine.low %v474_v57, %v478_v58  ;;  %v530_v50 = vld [vmem:[#allocation2 + $0x990] sm:$0xff] }
 0x216   :  { %v10119_v10 = vcombine.low %v475_v60, %v479_v62  ;;  %v531_v52 = vld [vmem:[#allocation2 + $0x998] sm:$0xff] }
 0x218   :  { %2926 = vmatpush1.bf16.msra.mxu0 %v10053_v4  ;;  %3049 = vmatpush1.bf16.msra.mxu1 %v10055_v5  ;;  %v486_v4 = vld [vmem:[#allocation2 + $0x830] sm:$0xff]  ;;  %v483_v5 = vld [vmem:[#allocation2 + $0x818] sm:$0xff] }
 0x219   :  { %2927 = vmatprep.subr.bf16.mxu0 %v10062_v6  ;;  %3050 = vmatprep.subr.bf16.mxu1 %v10064_v7  ;;  %v10120_v6 = vcombine.high %v475_v60, %v479_v62  ;;  %v487_v7 = vld [vmem:[#allocation2 + $0x838] sm:$0xff]  ;;  %v10126_v11 = vcombine.high %v482_v3, %v486_v4  ;;  %v10125_v17 = vcombine.low %v482_v3, %v486_v4  ;;  %v538_v60 = vld [vmem:[#allocation2 + $0x9d0] sm:$0xff] }
 0x21a   :  { %v10127_v18 = vcombine.low %v483_v5, %v487_v7  ;;  %v539_v62 = vld [vmem:[#allocation2 + $0x9d8] sm:$0xff] }
 0x21c   :  { %2928 = vmatpush1.bf16.msra.mxu0 %v10061_v13  ;;  %3051 = vmatpush1.bf16.msra.mxu1 %v10063_v14  ;;  %v494_v13 = vld [vmem:[#allocation2 + $0x870] sm:$0xff]  ;;  %v491_v14 = vld [vmem:[#allocation2 + $0x858] sm:$0xff] }
 0x21d   :  { %2929 = vmatprep.subr.bf16.mxu0 %v10070_v15  ;;  %3052 = vmatprep.subr.bf16.mxu1 %v10072_v19  ;;  %v10128_v15 = vcombine.high %v483_v5, %v487_v7  ;;  %v10134_v19 = vcombine.high %v490_v12, %v494_v13  ;;  %v10136_v20 = vcombine.high %v491_v14, %v495_v16  ;;  %v546_v5 = vld [vmem:[#allocation2 + $0xa10] sm:$0xff]  ;;  %v547_v7 = vld [vmem:[#allocation2 + $0xa18] sm:$0xff] }
 0x21e   :  { %v10133_v9 = vcombine.low %v490_v12, %v494_v13  ;;  %v10135_v25 = vcombine.low %v491_v14, %v495_v16  ;;  %v554_v14 = vld [vmem:[#allocation2 + $0xa50] sm:$0xff]  ;;  %v555_v16 = vld [vmem:[#allocation2 + $0xa58] sm:$0xff] }
 0x220   :  { %2930 = vmatpush1.bf16.msra.mxu0 %v10069_v21  ;;  %3053 = vmatpush1.bf16.msra.mxu1 %v10071_v22  ;;  %v498_v21 = vld [vmem:[#allocation2 + $0x890] sm:$0xff] }
 0x221   :  { %2931 = vmatprep.subr.bf16.mxu0 %v10078_v23  ;;  %3054 = vmatprep.subr.bf16.mxu1 %v10080_v26  ;;  %v502_v22 = vld [vmem:[#allocation2 + $0x8b0] sm:$0xff]  ;;  %v499_v23 = vld [vmem:[#allocation2 + $0x898] sm:$0xff] }
 0x222   :  { %v10142_v26 = vcombine.high %v498_v21, %v502_v22  ;;  %v10144_v27 = vcombine.high %v499_v23, %v503_v24  ;;  %v10141_v31 = vcombine.low %v498_v21, %v502_v22  ;;  %v562_v22 = vld [vmem:[#allocation2 + $0xa90] sm:$0xff] }
 0x224   :  { %2932 = vmatpush1.bf16.msra.mxu0 %v10077_v28  ;;  %3055 = vmatpush1.bf16.msra.mxu1 %v10079_v29  ;;  %v506_v28 = vld [vmem:[#allocation2 + $0x8d0] sm:$0xff] }
 0x225   :  { %2933 = vmatprep.subr.bf16.mxu0 %v10086_v59  ;;  %3056 = vmatprep.subr.bf16.mxu1 %v10088_v33  ;;  %v510_v29 = vld [vmem:[#allocation2 + $0x8f0] sm:$0xff]  ;;  %v507_v59 = vld [vmem:[#allocation2 + $0x8d8] sm:$0xff] }
 0x226   :  { %v10150_v32 = vcombine.high %v506_v28, %v510_v29  ;;  %v514_v33 = vld [vmem:[#allocation2 + $0x910] sm:$0xff]  ;;  %v10149_v39 = vcombine.low %v506_v28, %v510_v29  ;;  %v10151_v40 = vcombine.low %v507_v59, %v511_v30 }
 0x227   :  { %v10158_v41 = vcombine.high %v514_v33, %v518_v35  ;;  %v570_v29 = vld [vmem:[#allocation2 + $0xad0] sm:$0xff] }
 0x228   :  { %2934 = vmatpush1.bf16.msra.mxu0 %v10085_v63  ;;  %3057 = vmatpush1.bf16.msra.mxu1 %v10087_v36  ;;  %v515_v63 = vld [vmem:[#allocation2 + $0x918] sm:$0xff]  ;;  %v10152_v36 = vcombine.high %v507_v59, %v511_v30  ;;  %v574_v59 = vld [vmem:[#allocation2 + $0xaf0] sm:$0xff] }
 0x229   :  { %2935 = vmatprep.subr.bf16.mxu0 %v10094_v38  ;;  %3058 = vmatprep.subr.bf16.mxu1 %v10096_v44  ;;  %v519_v38 = vld [vmem:[#allocation2 + $0x938] sm:$0xff]  ;;  %v522_v44 = vld [vmem:[#allocation2 + $0x950] sm:$0xff] }
 0x22a   :  { %v10159_v48 = vcombine.low %v515_v63, %v519_v38  ;;  %v571_v30 = vld [vmem:[#allocation2 + $0xad8] sm:$0xff] }
 0x22c   :  { %2936 = vmatpush1.bf16.msra.mxu0 %v10093_v46  ;;  %3059 = vmatpush1.bf16.msra.mxu1 %v10095_v53  ;;  %v10160_v46 = vcombine.high %v515_v63, %v519_v38  ;;  %v527_v53 = vld [vmem:[#allocation2 + $0x978] sm:$0xff]  ;;  %v578_v63 = vld [vmem:[#allocation2 + $0xb10] sm:$0xff] }
 0x22d   :  { %2937 = vmatprep.subr.bf16.mxu0 %v10102_v47  ;;  %3060 = vmatprep.subr.bf16.mxu1 %v10104_v51  ;;  %v10157_v47 = vcombine.low %v514_v33, %v518_v35  ;;  %v534_v51 = vld [vmem:[#allocation2 + $0x9b0] sm:$0xff]  ;;  %v10167_v57 = vcombine.low %v523_v45, %v527_v53  ;;  %v10214_v35 = vcombine.high %v570_v29, %v574_v59  ;;  %v579_v38 = vld [vmem:[#allocation2 + $0xb18] sm:$0xff] }
 0x22e   :  { %v10174_v58 = vcombine.high %v530_v50, %v534_v51 }
 0x230   :  { %2938 = vmatpush1.bf16.msra.mxu0 %v10101_v54  ;;  %3061 = vmatpush1.bf16.msra.mxu1 %v10103_v55  ;;  %v10168_v54 = vcombine.high %v523_v45, %v527_v53  ;;  %v535_v55 = vld [vmem:[#allocation2 + $0x9b8] sm:$0xff]  ;;  %v586_v45 = vld [vmem:[#allocation2 + $0xb50] sm:$0xff] }
 0x231   :  { %2939 = vmatprep.subr.bf16.mxu0 %v10110_v56  ;;  %3062 = vmatprep.subr.bf16.mxu1 %v10112_v61  ;;  %v542_v61 = vld [vmem:[#allocation2 + $0x9f0] sm:$0xff]  ;;  %v10175_v3 = vcombine.low %v531_v52, %v535_v55  ;;  %v587_v53 = vld [vmem:[#allocation2 + $0xb58] sm:$0xff] }
 0x232   :  { %v10182_v4 = vcombine.high %v538_v60, %v542_v61 }
 0x234   :  { %2940 = vmatpush1.bf16.msra.mxu0 %v10109_v0  ;;  %3063 = vmatpush1.bf16.msra.mxu1 %v10111_v1  ;;  %v10176_v0 = vcombine.high %v531_v52, %v535_v55  ;;  %v543_v1 = vld [vmem:[#allocation2 + $0x9f8] sm:$0xff]  ;;  %v594_v52 = vld [vmem:[#allocation2 + $0xb90] sm:$0xff] }
 0x235   :  { %2941 = vmatprep.subr.bf16.mxu0 %v10118_v2  ;;  %3064 = vmatprep.subr.bf16.mxu1 %v10120_v6  ;;  %v10173_v2 = vcombine.low %v530_v50, %v534_v51  ;;  %v550_v6 = vld [vmem:[#allocation2 + $0xa30] sm:$0xff]  ;;  %v10183_v12 = vcombine.low %v539_v62, %v543_v1  ;;  %v595_v55 = vld [vmem:[#allocation2 + $0xb98] sm:$0xff] }
 0x236   :  { %v10190_v13 = vcombine.high %v546_v5, %v550_v6 }
 0x238   :  { %2942 = vmatpush1.bf16.msra.mxu0 %v10117_v8  ;;  %3065 = vmatpush1.bf16.msra.mxu1 %v10119_v10  ;;  %v10184_v8 = vcombine.high %v539_v62, %v543_v1  ;;  %v551_v10 = vld [vmem:[#allocation2 + $0xa38] sm:$0xff]  ;;  %v602_v62 = vld [vmem:[#allocation2 + $0xbd0] sm:$0xff] }
 0x239   :  { %2952 = vmatprep.subr.bf16.mxu0 %v10126_v11  ;;  %3075 = vmatprep.subr.bf16.mxu1 %v10128_v15  ;;  %v10181_v11 = vcombine.low %v538_v60, %v542_v61  ;;  %v558_v15 = vld [vmem:[#allocation2 + $0xa70] sm:$0xff]  ;;  %v603_v1 = vld [vmem:[#allocation2 + $0xbd8] sm:$0xff] }
 0x23a   :  { %v10198_v21 = vcombine.high %v554_v14, %v558_v15 }
 0x23b   :  { %2944 = vmatmul.mubr.bf16.vlgmr.msra.gmra.mrb[4].mxu0 %v13380_v42  ;;  %3067 = vmatmul.mubr.bf16.vlgmr.msra.gmra.mrb[4].mxu1 %v13380_v42  ;;  %v10143_v42 = vcombine.low %v499_v23, %v503_v24  ;;  %v566_v23 = vld [vmem:[#allocation2 + $0xab0] sm:$0xff]  ;;  %v563_v24 = vld [vmem:[#allocation2 + $0xa98] sm:$0xff] }
 0x23c   :  { %2953 = vmatpush1.bf16.msra.mxu0 %v10125_v17  ;;  %3076 = vmatpush1.bf16.msra.mxu1 %v10127_v18  ;;  %v10192_v17 = vcombine.high %v547_v7, %v551_v10  ;;  %v559_v18 = vld [vmem:[#allocation2 + $0xa78] sm:$0xff]  ;;  %v10206_v28 = vcombine.high %v562_v22, %v566_v23 }
 0x23d   :  { %2954 = vmatprep.subr.bf16.mxu0 %v10134_v19  ;;  %3077 = vmatprep.subr.bf16.mxu1 %v10136_v20  ;;  %v10189_v19 = vcombine.low %v546_v5, %v550_v6  ;;  %v10191_v20 = vcombine.low %v547_v7, %v551_v10 }
 0x23e   :  { %2984 = vmatprep.mubr.bf16.mxu0 %v13372_v37  ;;  %3107 = vmatprep.mubr.bf16.mxu1 %v13372_v37  ;;  %v526_v37 = vld [vmem:[#allocation2 + $0x970] sm:$0xff] }
 0x23f   :  { %v10166_v49 = vcombine.high %v522_v44, %v526_v37  ;;  %v10165_v56 = vcombine.low %v522_v44, %v526_v37 }
 0x240   :  { %2955 = vmatpush1.bf16.msra.mxu0 %v10133_v9  ;;  %3078 = vmatpush1.bf16.msra.mxu1 %v10135_v25  ;;  %v10200_v9 = vcombine.high %v555_v16, %v559_v18  ;;  %v567_v25 = vld [vmem:[#allocation2 + $0xab8] sm:$0xff] }
 0x241   :  { %2956 = vmatprep.subr.bf16.mxu0 %v10142_v26  ;;  %3079 = vmatprep.subr.bf16.mxu1 %v10144_v27  ;;  %v10197_v26 = vcombine.low %v554_v14, %v558_v15  ;;  %v10199_v27 = vcombine.low %v555_v16, %v559_v18  ;;  %v10207_v33 = vcombine.low %v563_v24, %v567_v25  ;;  %v12041_v14 = vld [vmem:[#allocation6 + $0x8] ss:$16 sps:$4 sm:$0xff]   ;;  %v12046_v15 = vld [vmem:[#allocation6 + $0x24] ss:$16 sps:$4 sm:$0xff]   ;;  %v12049_v16 = vld [vmem:[#allocation6 + $0x2c] ss:$16 sps:$4 sm:$0xff]  }
 0x242   :  { %v12047_v18 = vld [vmem:[#allocation6 + $0x28] ss:$16 sps:$4 sm:$0xff]  }
 0x244   :  { %2957 = vmatpush1.bf16.msra.mxu0 %v10141_v31  ;;  %3080 = vmatpush1.bf16.msra.mxu1 %v10143_v42  ;;  %v10208_v31 = vcombine.high %v563_v24, %v567_v25  ;;  %v575_v42 = vld [vmem:[#allocation2 + $0xaf8] sm:$0xff]  ;;  %v12059_v25 = vld [vmem:[#allocation6 + $0x68] ss:$16 sps:$4 sm:$0xff]  }
 0x245   :  { %2958 = vmatprep.subr.bf16.mxu0 %v10150_v32  ;;  %3081 = vmatprep.subr.bf16.mxu1 %v10152_v36  ;;  %v10205_v32 = vcombine.low %v562_v22, %v566_v23  ;;  %v582_v36 = vld [vmem:[#allocation2 + $0xb30] sm:$0xff]  ;;  %v10215_v44 = vcombine.low %v571_v30, %v575_v42  ;;  %v12058_v23 = vld [vmem:[#allocation6 + $0x64] ss:$16 sps:$4 sm:$0xff]   ;;  %v12056_v24 = vld [vmem:[#allocation6 + $0x60] ss:$16 sps:$4 sm:$0xff]  }
 0x246   :  { %v10222_v37 = vcombine.high %v578_v63, %v582_v36  ;;  %v12053_v22 = vld [vmem:[#allocation6 + $0x48] ss:$16 sps:$4 sm:$0xff]  }
 0x248   :  { %2959 = vmatpush1.bf16.msra.mxu0 %v10149_v39  ;;  %3082 = vmatpush1.bf16.msra.mxu1 %v10151_v40  ;;  %v10216_v39 = vcombine.high %v571_v30, %v575_v42  ;;  %v583_v40 = vld [vmem:[#allocation2 + $0xb38] sm:$0xff]  ;;  %v13407_v30 = vsub.s32 1, %v13336_v43  ;;  %v13049_v42 = vmov 1983009808  }
 0x249   :  { %2960 = vmatprep.subr.bf16.mxu0 %v10158_v41  ;;  %3083 = vmatprep.subr.bf16.mxu1 %v10160_v46  ;;  %v10213_v41 = vcombine.low %v570_v29, %v574_v59  ;;  %v590_v46 = vld [vmem:[#allocation2 + $0xb70] sm:$0xff]  ;;  %v10223_v50 = vcombine.low %v579_v38, %v583_v40  ;;  %v12062_v29 = vld [vmem:[#allocation6 + $0x80] ss:$16 sps:$4 sm:$0xff]   ;;  %v13404_v59 = vld [vmem:[#allocation4] sm:$0xff] }
 0x24a   :  { %v10230_v51 = vcombine.high %v586_v45, %v590_v46 }
 0x24c   :  { %2961 = vmatpush1.bf16.msra.mxu0 %v10157_v47  ;;  %3084 = vmatpush1.bf16.msra.mxu1 %v10159_v48  ;;  %v10224_v47 = vcombine.high %v579_v38, %v583_v40  ;;  %v591_v48 = vld [vmem:[#allocation2 + $0xb78] sm:$0xff]  ;;  %v617_v40 = vrot.slane %v13404_v59, %v13407_v30 }
 0x24d   :  { %2962 = vmatprep.subr.bf16.mxu0 %v10166_v49  ;;  %3085 = vmatprep.subr.bf16.mxu1 %v10168_v54  ;;  %v10221_v49 = vcombine.low %v578_v63, %v582_v36  ;;  %v598_v54 = vld [vmem:[#allocation2 + $0xbb0] sm:$0xff]  ;;  %v10231_v60 = vcombine.low %v587_v53, %v591_v48  ;;  %v12068_v36 = vld [vmem:[#allocation6 + $0xa0] ss:$16 sps:$4 sm:$0xff]  }
 0x24e   :  { %v10238_v61 = vcombine.high %v594_v52, %v598_v54  ;;  %v12073_v63 = vld [vmem:[#allocation6 + $0xac] ss:$16 sps:$4 sm:$0xff]  }
 0x250   :  { %2963 = vmatpush1.bf16.msra.mxu0 %v10165_v56  ;;  %3086 = vmatpush1.bf16.msra.mxu1 %v10167_v57  ;;  %v10232_v56 = vcombine.high %v587_v53, %v591_v48  ;;  %v599_v57 = vld [vmem:[#allocation2 + $0xbb8] sm:$0xff] }
 0x251   :  { %2964 = vmatprep.subr.bf16.mxu0 %v10174_v58  ;;  %3087 = vmatprep.subr.bf16.mxu1 %v10176_v0  ;;  %v10229_v58 = vcombine.low %v586_v45, %v590_v46  ;;  %v606_v0 = vld [vmem:[#allocation2 + $0xbf0] sm:$0xff]  ;;  %v10239_v5 = vcombine.low %v595_v55, %v599_v57  ;;  %v12076_v45 = vld [vmem:[#allocation6 + $0xc4] ss:$16 sps:$4 sm:$0xff]  }
 0x252   :  { %v10246_v6 = vcombine.high %v602_v62, %v606_v0  ;;  %v12079_v46 = vld [vmem:[#allocation6 + $0xcc] ss:$16 sps:$4 sm:$0xff]  }
 0x254   :  { %2965 = vmatpush1.bf16.msra.mxu0 %v10173_v2  ;;  %3088 = vmatpush1.bf16.msra.mxu1 %v10175_v3  ;;  %v10240_v2 = vcombine.high %v595_v55, %v599_v57  ;;  %v607_v3 = vld [vmem:[#allocation2 + $0xbf8] sm:$0xff] }
 0x255   :  { %2966 = vmatprep.subr.bf16.mxu0 %v10182_v4  ;;  %3089 = vmatprep.subr.bf16.mxu1 %v10184_v8  ;;  %v10237_v4 = vcombine.low %v594_v52, %v598_v54  ;;  %v10248_v7 = vcombine.high %v603_v1, %v607_v3  ;;  %v10245_v8 = vcombine.low %v602_v62, %v606_v0  ;;  %v12082_v62 = vld [vmem:[#allocation6 + $0xe4] ss:$16 sps:$4 sm:$0xff]  }
 0x256   :  { %v10247_v10 = vcombine.low %v603_v1, %v607_v3 }
 0x258   :  { %2967 = vmatpush1.bf16.msra.mxu0 %v10181_v11  ;;  %3090 = vmatpush1.bf16.msra.mxu1 %v10183_v12  ;;  %v12040_v11 = vld [vmem:[#allocation6 + $0x4] ss:$16 sps:$4 sm:$0xff]   ;;  %v12043_v12 = vld [vmem:[#allocation6 + $0xc] ss:$16 sps:$4 sm:$0xff]  }
 0x259   :  { %2968 = vmatprep.subr.bf16.mxu0 %v10190_v13  ;;  %3091 = vmatprep.subr.bf16.mxu1 %v10192_v17  ;;  %v12038_v13 = vld [vmem:[#allocation6] ss:$16 sps:$4 sm:$0xff]  }
 0x25a   :  { %v12044_v17 = vld [vmem:[#allocation6 + $0x20] ss:$16 sps:$4 sm:$0xff]  }
 0x25c   :  { %2969 = vmatpush1.bf16.msra.mxu0 %v10189_v19  ;;  %3092 = vmatpush1.bf16.msra.mxu1 %v10191_v20  ;;  %v12052_v19 = vld [vmem:[#allocation6 + $0x44] ss:$16 sps:$4 sm:$0xff]   ;;  %v12050_v20 = vld [vmem:[#allocation6 + $0x40] ss:$16 sps:$4 sm:$0xff]  }
 0x25d   :  { %2970 = vmatprep.subr.bf16.mxu0 %v10198_v21  ;;  %3093 = vmatprep.subr.bf16.mxu1 %v10200_v9  ;;  %v12055_v21 = vld [vmem:[#allocation6 + $0x4c] ss:$16 sps:$4 sm:$0xff]  }
 0x25e   :  { %v12061_v9 = vld [vmem:[#allocation6 + $0x6c] ss:$16 sps:$4 sm:$0xff]  }
 0x260   :  { %2971 = vmatpush1.bf16.msra.mxu0 %v10197_v26  ;;  %3094 = vmatpush1.bf16.msra.mxu1 %v10199_v27  ;;  %v12064_v26 = vld [vmem:[#allocation6 + $0x84] ss:$16 sps:$4 sm:$0xff]   ;;  %v13401_v27 = vsub.s32 0, %v13336_v43 }
 0x261   :  { %2972 = vmatprep.subr.bf16.mxu0 %v10206_v28  ;;  %3095 = vmatprep.subr.bf16.mxu1 %v10208_v31  ;;  %v620_v28 = vsub.s32 2, %v13336_v43  ;;  %v12065_v31 = vld [vmem:[#allocation6 + $0x88] ss:$16 sps:$4 sm:$0xff]  }
 0x262   :  { %v613_v38 = vrot.slane %v13404_v59, %v13401_v27 }
 0x264   :  { %2973 = vmatpush1.bf16.msra.mxu0 %v10205_v32  ;;  %3096 = vmatpush1.bf16.msra.mxu1 %v10207_v33  ;;  %v3127_v32 = vunpack.c.l.s4 %v13049_v42  ;;  %v624_v33 = vsub.s32 3, %v13336_v43  ;;  %v12113_v42 = vld [vmem:[#allocation6 + $0x188] ss:$16 sps:$4 sm:$0xff]  }
 0x265   :  { %2974 = vmatprep.subr.bf16.mxu0 %v10214_v35  ;;  %3097 = vmatprep.subr.bf16.mxu1 %v10216_v39  ;;  %v12070_v35 = vld [vmem:[#allocation6 + $0xa4] ss:$16 sps:$4 sm:$0xff]   ;;  %v621_v39 = vrot.slane %v13404_v59, %v620_v28 }
 0x268   :  { %2975 = vmatpush1.bf16.msra.mxu0 %v10213_v41  ;;  %3098 = vmatpush1.bf16.msra.mxu1 %v10215_v44  ;;  %v3128_v41 = vunpack.c.0.s8 %v3127_v32  ;;  %v625_v44 = vrot.slane %v13404_v59, %v624_v33  ;;  %v12118_v32 = vld [vmem:[#allocation6 + $0x1a4] ss:$16 sps:$4 sm:$0xff]  }
 0x269   :  { %2976 = vmatprep.subr.bf16.mxu0 %v10222_v37  ;;  %3099 = vmatprep.subr.bf16.mxu1 %v10224_v47  ;;  %v12071_v37 = vld [vmem:[#allocation6 + $0xa8] ss:$16 sps:$4 sm:$0xff]   ;;  %v12074_v47 = vld [vmem:[#allocation6 + $0xc0] ss:$16 sps:$4 sm:$0xff]  }
 0x26a   :  { %v13425_v54 = vsub.s32 %v3128_v41, %v13336_v43  ;;  %v12125_v41 = vld [vmem:[#allocation6 + $0x1c8] ss:$16 sps:$4 sm:$0xff]  }
 0x26c   :  { %2977 = vmatpush1.bf16.msra.mxu0 %v10221_v49  ;;  %3100 = vmatpush1.bf16.msra.mxu1 %v10223_v50 }
 0x26d   :  { %2978 = vmatprep.subr.bf16.mxu0 %v10230_v51  ;;  %3101 = vmatprep.subr.bf16.mxu1 %v10232_v56 }
 0x270   :  { %2979 = vmatpush1.bf16.msra.mxu0 %v10229_v58  ;;  %3102 = vmatpush1.bf16.msra.mxu1 %v10231_v60 }
 0x271   :  { %2980 = vmatprep.subr.bf16.mxu0 %v10238_v61  ;;  %3103 = vmatprep.subr.bf16.mxu1 %v10240_v2  ;;  %v12077_v61 = vld [vmem:[#allocation6 + $0xc8] ss:$16 sps:$4 sm:$0xff]  }
 0x274   :  { %2981 = vmatpush1.bf16.msra.mxu0 %v10237_v4  ;;  %3104 = vmatpush1.bf16.msra.mxu1 %v10239_v5  ;;  %v12080_v4 = vld [vmem:[#allocation6 + $0xe0] ss:$16 sps:$4 sm:$0xff]   ;;  %v12085_v5 = vld [vmem:[#allocation6 + $0xec] ss:$16 sps:$4 sm:$0xff]  }
 0x275   :  { %2982 = vmatprep.subr.bf16.mxu0 %v10246_v6  ;;  %3105 = vmatprep.subr.bf16.mxu1 %v10248_v7 }
 0x278   :  { %2983 = vmatpush1.bf16.msra.mxu0 %v10245_v8  ;;  %3106 = vmatpush1.bf16.msra.mxu1 %v10247_v10  ;;  %v12083_v10 = vld [vmem:[#allocation6 + $0xe8] ss:$16 sps:$4 sm:$0xff]  }
 0x279   :  { %4736 = vmatprep.subr.bf16.mxu0 %v12040_v11  ;;  %4900 = vmatprep.subr.bf16.mxu1 %v12043_v12  ;;  %v12088_v11 = vld [vmem:[#allocation6 + $0x104] ss:$16 sps:$4 sm:$0xff]   ;;  %v12086_v12 = vld [vmem:[#allocation6 + $0x100] ss:$16 sps:$4 sm:$0xff]  }
 0x27b   :  { %2985 = vmatmul.mubr.bf16.vlgmr.msra.gmra.mrb[4].mxu0 %v13365_v34  ;;  %3108 = vmatmul.mubr.bf16.vlgmr.msra.gmra.mrb[4].mxu1 %v13365_v34  ;;  %v12067_v34 = vld [vmem:[#allocation6 + $0x8c] ss:$16 sps:$4 sm:$0xff]  }
 0x27c   :  { %4737 = vmatpush1.bf16.msra.mxu0 %v12038_v13  ;;  %4901 = vmatpush1.bf16.msra.mxu1 %v12041_v14  ;;  %v12091_v13 = vld [vmem:[#allocation6 + $0x10c] ss:$16 sps:$4 sm:$0xff]  }
 0x27d   :  { %4738 = vmatprep.subr.bf16.mxu0 %v12046_v15  ;;  %4902 = vmatprep.subr.bf16.mxu1 %v12049_v16  ;;  %v12089_v15 = vld [vmem:[#allocation6 + $0x108] ss:$16 sps:$4 sm:$0xff]   ;;  %v12094_v16 = vld [vmem:[#allocation6 + $0x124] ss:$16 sps:$4 sm:$0xff]  }
 0x280   :  { %4739 = vmatpush1.bf16.msra.mxu0 %v12044_v17  ;;  %4903 = vmatpush1.bf16.msra.mxu1 %v12047_v18  ;;  %v12092_v17 = vld [vmem:[#allocation6 + $0x120] ss:$16 sps:$4 sm:$0xff]   ;;  %v12097_v18 = vld [vmem:[#allocation6 + $0x12c] ss:$16 sps:$4 sm:$0xff]  }
 0x281   :  { %4740 = vmatprep.subr.bf16.mxu0 %v12052_v19  ;;  %4904 = vmatprep.subr.bf16.mxu1 %v12055_v21  ;;  %v12095_v19 = vld [vmem:[#allocation6 + $0x128] ss:$16 sps:$4 sm:$0xff]   ;;  %v12098_v21 = vld [vmem:[#allocation6 + $0x140] ss:$16 sps:$4 sm:$0xff]  }
 0x284   :  { %4741 = vmatpush1.bf16.msra.mxu0 %v12050_v20  ;;  %4905 = vmatpush1.bf16.msra.mxu1 %v12053_v22  ;;  %v12100_v20 = vld [vmem:[#allocation6 + $0x144] ss:$16 sps:$4 sm:$0xff]   ;;  %v12103_v22 = vld [vmem:[#allocation6 + $0x14c] ss:$16 sps:$4 sm:$0xff]  }
 0x285   :  { %4742 = vmatprep.subr.bf16.mxu0 %v12058_v23  ;;  %4906 = vmatprep.subr.bf16.mxu1 %v12061_v9  ;;  %v12101_v23 = vld [vmem:[#allocation6 + $0x148] ss:$16 sps:$4 sm:$0xff]   ;;  %v12104_v9 = vld [vmem:[#allocation6 + $0x160] ss:$16 sps:$4 sm:$0xff]  }
 0x288   :  { %4743 = vmatpush1.bf16.msra.mxu0 %v12056_v24  ;;  %4907 = vmatpush1.bf16.msra.mxu1 %v12059_v25  ;;  %v12106_v24 = vld [vmem:[#allocation6 + $0x164] ss:$16 sps:$4 sm:$0xff]   ;;  %v12109_v25 = vld [vmem:[#allocation6 + $0x16c] ss:$16 sps:$4 sm:$0xff]  }
 0x289   :  { %4744 = vmatprep.subr.bf16.mxu0 %v12064_v26  ;;  %4908 = vmatprep.subr.bf16.mxu1 %v12067_v34  ;;  %v12107_v26 = vld [vmem:[#allocation6 + $0x168] ss:$16 sps:$4 sm:$0xff]   ;;  %v12112_v34 = vld [vmem:[#allocation6 + $0x184] ss:$16 sps:$4 sm:$0xff]  }
 0x28c   :  { %4745 = vmatpush1.bf16.msra.mxu0 %v12062_v29  ;;  %4909 = vmatpush1.bf16.msra.mxu1 %v12065_v31  ;;  %v12110_v29 = vld [vmem:[#allocation6 + $0x180] ss:$16 sps:$4 sm:$0xff]   ;;  %v12115_v31 = vld [vmem:[#allocation6 + $0x18c] ss:$16 sps:$4 sm:$0xff]  }
 0x28d   :  { %4746 = vmatprep.subr.bf16.mxu0 %v12070_v35  ;;  %4910 = vmatprep.subr.bf16.mxu1 %v12073_v63  ;;  %v12116_v35 = vld [vmem:[#allocation6 + $0x1a0] ss:$16 sps:$4 sm:$0xff]   ;;  %v12121_v63 = vld [vmem:[#allocation6 + $0x1ac] ss:$16 sps:$4 sm:$0xff]  }
 0x28e   :  { %v2740_v53 = vpop.f32.mrb[0].mxu0  ;;  %v2863_v49 = vpop.f32.mrb[0].mxu1 }
 0x28f   :  { %v13420_v48 = vadd.f32 %v2740_v53, %v613_v38  ;;  %v2742_v50 = vpop.f32.mrb[1].mxu0  ;;  %v13422_v51 = vadd.f32 %v2863_v49, %v621_v39  ;;  %v2865_v55 = vpop.f32.mrb[1].mxu1  ;;  %v12124_v38 = vld [vmem:[#allocation6 + $0x1c4] ss:$16 sps:$4 sm:$0xff]   ;;  %v12127_v39 = vld [vmem:[#allocation6 + $0x1cc] ss:$16 sps:$4 sm:$0xff]  }
 0x290   :  { %v11938_v52 = vadd.f32 %v2742_v50, %v617_v40  ;;  %v2744_v56 = vpop.f32.mrb[2].mxu0  ;;  %4747 = vmatpush1.bf16.msra.mxu0 %v12068_v36  ;;  %v13427_v57 = vadd.f32 %v2865_v55, %v625_v44  ;;  %v2867_v58 = vpop.f32.mrb[2].mxu1  ;;  %4911 = vmatpush1.bf16.msra.mxu1 %v12071_v37  ;;  %v12119_v36 = vld [vmem:[#allocation6 + $0x1a8] ss:$16 sps:$4 sm:$0xff]   ;;  %v12122_v40 = vld [vmem:[#allocation6 + $0x1c0] ss:$16 sps:$4 sm:$0xff]  }
 0x291   :  { %v2745_v60 = vpop.f32.mrb[3].mxu0  ;;  %4748 = vmatprep.subr.bf16.mxu0 %v12076_v45  ;;  %v2868_v2 = vpop.f32.mrb[3].mxu1  ;;  %4912 = vmatprep.subr.bf16.mxu1 %v12079_v46  ;;  %v12130_v44 = vld [vmem:[#allocation6 + $0x1e4] ss:$16 sps:$4 sm:$0xff]   ;;  %v12133_v37 = vld [vmem:[#allocation6 + $0x1ec] ss:$16 sps:$4 sm:$0xff]  }
 0x292   :  { %v3124_v0 = vcombine.low %v13420_v48, %v11938_v52  ;;  %v3163_v1 = vmax.f32 %v11938_v52, 0.0  ;;  %v3125_v3 = vcombine.low %v13422_v51, %v13427_v57  ;;  %v12128_v45 = vld [vmem:[#allocation6 + $0x1e0] ss:$16 sps:$4 sm:$0xff]   ;;  %v3162_v46 = vmax.f32 %v13420_v48, 0.0  ;;  %v12131_v53 = vld [vmem:[#allocation6 + $0x1e8] ss:$16 sps:$4 sm:$0xff]  }
 0x293   :  { %v12139_v49 = vld [vmem:[#allocation6 + $0x20c] ss:$16 sps:$4 sm:$0xff]   ;;  %v3165_v50 = vmax.f32 %v13427_v57, 0.0  ;;  %v12134_v52 = vld [vmem:[#allocation6 + $0x200] ss:$16 sps:$4 sm:$0xff]  }
 0x294   :  { %v3132_v6 = vrot.slane %v3124_v0, %v13425_v54  ;;  %v3171_v7 = vpack.c.bf16 %v3163_v1, %v3163_v1  ;;  %4749 = vmatpush1.bf16.msra.mxu0 %v12074_v47  ;;  %v3139_v8 = vrot.slane %v3125_v3, %v13425_v54  ;;  %4913 = vmatpush1.bf16.msra.mxu1 %v12077_v61  ;;  %v12136_v47 = vld [vmem:[#allocation6 + $0x204] ss:$16 sps:$4 sm:$0xff]   ;;  %v12137_v56 = vld [vmem:[#allocation6 + $0x208] ss:$16 sps:$4 sm:$0xff]   ;;  %v12145_v61 = vld [vmem:[#allocation6 + $0x22c] ss:$16 sps:$4 sm:$0xff]  }
 0x295   :  { %4750 = vmatprep.subr.bf16.mxu0 %v12082_v62  ;;  %4914 = vmatprep.subr.bf16.mxu1 %v12085_v5  ;;  %v3170_v55 = vpack.c.bf16 %v3162_v46, %v3162_v46  ;;  %v12142_v58 = vld [vmem:[#allocation6 + $0x224] ss:$16 sps:$4 sm:$0xff]   ;;  %v3173_v60 = vpack.c.bf16 %v3165_v50, %v3165_v50  ;;  %v12140_v48 = vld [vmem:[#allocation6 + $0x220] ss:$16 sps:$4 sm:$0xff]   ;;  %v12143_v62 = vld [vmem:[#allocation6 + $0x228] ss:$16 sps:$4 sm:$0xff]  }
 0x296   :  { %4768 = vmatprep.mubr.bf16.mxu0 %v3171_v7  ;;  %4932 = vmatprep.mubr.bf16.mxu1 %v3171_v7  ;;  %v3140_v14 = vcombine.low %v3132_v6, %v3139_v8  ;;  %v12148_v0 = vld [vmem:[#allocation6 + $0x244] ss:$16 sps:$4 sm:$0xff]   ;;  %v12151_v57 = vld [vmem:[#allocation6 + $0x24c] ss:$16 sps:$4 sm:$0xff]   ;;  %v12146_v1 = vld [vmem:[#allocation6 + $0x240] ss:$16 sps:$4 sm:$0xff]  }
 0x297   :  { %v12149_v2 = vld [vmem:[#allocation6 + $0x248] ss:$16 sps:$4 sm:$0xff]   ;;  %v12154_v3 = vld [vmem:[#allocation6 + $0x264] ss:$16 sps:$4 sm:$0xff]   ;;  %v12152_v5 = vld [vmem:[#allocation6 + $0x260] ss:$16 sps:$4 sm:$0xff]  }
 0x298   :  { %4751 = vmatpush1.bf16.msra.mxu0 %v12080_v4  ;;  %3160 = vst [vmem:[%s14278_s15] sm:$0xff] %v3140_v14  ;;  %4915 = vmatpush1.bf16.msra.mxu1 %v12083_v10  ;;  %v12157_v4 = vld [vmem:[#allocation6 + $0x26c] ss:$16 sps:$4 sm:$0xff]   ;;  %v12155_v6 = vld [vmem:[#allocation6 + $0x268] ss:$16 sps:$4 sm:$0xff]   ;;  %v12160_v7 = vld [vmem:[#allocation6 + $0x284] ss:$16 sps:$4 sm:$0xff]  }
 0x299   :  { %4752 = vmatprep.subr.bf16.mxu0 %v12088_v11  ;;  %4916 = vmatprep.subr.bf16.mxu1 %v12091_v13  ;;  %v12163_v8 = vld [vmem:[#allocation6 + $0x28c] ss:$16 sps:$4 sm:$0xff]   ;;  %v12158_v10 = vld [vmem:[#allocation6 + $0x280] ss:$16 sps:$4 sm:$0xff]   ;;  %v12161_v11 = vld [vmem:[#allocation6 + $0x288] ss:$16 sps:$4 sm:$0xff]  }
 0x29a   :  { %v12169_v13 = vld [vmem:[#allocation6 + $0x2ac] ss:$16 sps:$4 sm:$0xff]   ;;  %v12164_v14 = vld [vmem:[#allocation6 + $0x2a0] ss:$16 sps:$4 sm:$0xff]   ;;  %v12209_v46 = vld [vmem:[#allocation6 + $0x388] ss:$16 sps:$4 sm:$0xff]  }
 0x29b   :  { %v12215_v50 = vld [vmem:[#allocation6 + $0x3a8] ss:$16 sps:$4 sm:$0xff]  }
 0x29c   :  { %4753 = vmatpush1.bf16.msra.mxu0 %v12086_v12  ;;  %4917 = vmatpush1.bf16.msra.mxu1 %v12089_v15  ;;  %v12166_v12 = vld [vmem:[#allocation6 + $0x2a4] ss:$16 sps:$4 sm:$0xff]   ;;  %v12167_v15 = vld [vmem:[#allocation6 + $0x2a8] ss:$16 sps:$4 sm:$0xff]  }
 0x29d   :  { %4754 = vmatprep.subr.bf16.mxu0 %v12094_v16  ;;  %4918 = vmatprep.subr.bf16.mxu1 %v12097_v18  ;;  %v12172_v16 = vld [vmem:[#allocation6 + $0x2c4] ss:$16 sps:$4 sm:$0xff]   ;;  %v12170_v18 = vld [vmem:[#allocation6 + $0x2c0] ss:$16 sps:$4 sm:$0xff]  }
 0x2a0   :  { %4755 = vmatpush1.bf16.msra.mxu0 %v12092_v17  ;;  %4919 = vmatpush1.bf16.msra.mxu1 %v12095_v19  ;;  %v12175_v17 = vld [vmem:[#allocation6 + $0x2cc] ss:$16 sps:$4 sm:$0xff]   ;;  %v12173_v19 = vld [vmem:[#allocation6 + $0x2c8] ss:$16 sps:$4 sm:$0xff]  }
 0x2a1   :  { %4756 = vmatprep.subr.bf16.mxu0 %v12100_v20  ;;  %4920 = vmatprep.subr.bf16.mxu1 %v12103_v22  ;;  %v12178_v20 = vld [vmem:[#allocation6 + $0x2e4] ss:$16 sps:$4 sm:$0xff]   ;;  %v12176_v22 = vld [vmem:[#allocation6 + $0x2e0] ss:$16 sps:$4 sm:$0xff]  }
 0x2a4   :  { %4757 = vmatpush1.bf16.msra.mxu0 %v12098_v21  ;;  %4921 = vmatpush1.bf16.msra.mxu1 %v12101_v23  ;;  %v12181_v21 = vld [vmem:[#allocation6 + $0x2ec] ss:$16 sps:$4 sm:$0xff]   ;;  %v12179_v23 = vld [vmem:[#allocation6 + $0x2e8] ss:$16 sps:$4 sm:$0xff]  }
 0x2a5   :  { %4758 = vmatprep.subr.bf16.mxu0 %v12106_v24  ;;  %4922 = vmatprep.subr.bf16.mxu1 %v12109_v25  ;;  %v12184_v24 = vld [vmem:[#allocation6 + $0x304] ss:$16 sps:$4 sm:$0xff]   ;;  %v12182_v25 = vld [vmem:[#allocation6 + $0x300] ss:$16 sps:$4 sm:$0xff]  }
 0x2a8   :  { %4759 = vmatpush1.bf16.msra.mxu0 %v12104_v9  ;;  %4923 = vmatpush1.bf16.msra.mxu1 %v12107_v26  ;;  %v12187_v9 = vld [vmem:[#allocation6 + $0x30c] ss:$16 sps:$4 sm:$0xff]   ;;  %v12185_v26 = vld [vmem:[#allocation6 + $0x308] ss:$16 sps:$4 sm:$0xff]  }
 0x2a9   :  { %4760 = vmatprep.subr.bf16.mxu0 %v12112_v34  ;;  %4924 = vmatprep.subr.bf16.mxu1 %v12115_v31  ;;  %v12190_v34 = vld [vmem:[#allocation6 + $0x324] ss:$16 sps:$4 sm:$0xff]   ;;  %v12188_v31 = vld [vmem:[#allocation6 + $0x320] ss:$16 sps:$4 sm:$0xff]  }
 0x2ac   :  { %4761 = vmatpush1.bf16.msra.mxu0 %v12110_v29  ;;  %4925 = vmatpush1.bf16.msra.mxu1 %v12113_v42  ;;  %v12193_v29 = vld [vmem:[#allocation6 + $0x32c] ss:$16 sps:$4 sm:$0xff]   ;;  %v12191_v42 = vld [vmem:[#allocation6 + $0x328] ss:$16 sps:$4 sm:$0xff]  }
 0x2ad   :  { %4762 = vmatprep.subr.bf16.mxu0 %v12118_v32  ;;  %4926 = vmatprep.subr.bf16.mxu1 %v12121_v63  ;;  %v12196_v32 = vld [vmem:[#allocation6 + $0x344] ss:$16 sps:$4 sm:$0xff]   ;;  %v12194_v63 = vld [vmem:[#allocation6 + $0x340] ss:$16 sps:$4 sm:$0xff]  }
 0x2b0   :  { %4763 = vmatpush1.bf16.msra.mxu0 %v12116_v35  ;;  %4927 = vmatpush1.bf16.msra.mxu1 %v12119_v36  ;;  %v12199_v35 = vld [vmem:[#allocation6 + $0x34c] ss:$16 sps:$4 sm:$0xff]   ;;  %v12197_v36 = vld [vmem:[#allocation6 + $0x348] ss:$16 sps:$4 sm:$0xff]  }
 0x2b1   :  { %4764 = vmatprep.subr.bf16.mxu0 %v12124_v38  ;;  %4928 = vmatprep.subr.bf16.mxu1 %v12127_v39  ;;  %v12202_v38 = vld [vmem:[#allocation6 + $0x364] ss:$16 sps:$4 sm:$0xff]   ;;  %v12205_v39 = vld [vmem:[#allocation6 + $0x36c] ss:$16 sps:$4 sm:$0xff]  }
 0x2b4   :  { %4765 = vmatpush1.bf16.msra.mxu0 %v12122_v40  ;;  %4929 = vmatpush1.bf16.msra.mxu1 %v12125_v41  ;;  %v12200_v40 = vld [vmem:[#allocation6 + $0x360] ss:$16 sps:$4 sm:$0xff]   ;;  %v12203_v41 = vld [vmem:[#allocation6 + $0x368] ss:$16 sps:$4 sm:$0xff]  }
 0x2b5   :  { %4766 = vmatprep.subr.bf16.mxu0 %v12130_v44  ;;  %4930 = vmatprep.subr.bf16.mxu1 %v12133_v37  ;;  %v12208_v44 = vld [vmem:[#allocation6 + $0x384] ss:$16 sps:$4 sm:$0xff]   ;;  %v12211_v37 = vld [vmem:[#allocation6 + $0x38c] ss:$16 sps:$4 sm:$0xff]  }
 0x2b8   :  { %4767 = vmatpush1.bf16.msra.mxu0 %v12128_v45  ;;  %4931 = vmatpush1.bf16.msra.mxu1 %v12131_v53  ;;  %v12206_v45 = vld [vmem:[#allocation6 + $0x380] ss:$16 sps:$4 sm:$0xff]   ;;  %v12214_v53 = vld [vmem:[#allocation6 + $0x3a4] ss:$16 sps:$4 sm:$0xff]  }
 0x2b9   :  { %4777 = vmatprep.subr.bf16.mxu0 %v12136_v47  ;;  %4941 = vmatprep.subr.bf16.mxu1 %v12139_v49  ;;  %v12217_v47 = vld [vmem:[#allocation6 + $0x3ac] ss:$16 sps:$4 sm:$0xff]   ;;  %v12212_v49 = vld [vmem:[#allocation6 + $0x3a0] ss:$16 sps:$4 sm:$0xff]  }
 0x2bb   :  { %4769 = vmatmul.mubr.bf16.vlgmr.msra.gmra.mrb[8].mxu0 %v3170_v55  ;;  %4933 = vmatmul.mubr.bf16.vlgmr.msra.gmra.mrb[8].mxu1 %v3170_v55  ;;  %v12223_v55 = vld [vmem:[#allocation6 + $0x3cc] ss:$16 sps:$4 sm:$0xff]  }
 0x2bc   :  { %4778 = vmatpush1.bf16.msra.mxu0 %v12134_v52  ;;  %4809 = vmatprep.mubr.bf16.mxu0 %v3173_v60  ;;  %v12220_v52 = vld [vmem:[#allocation6 + $0x3c4] ss:$16 sps:$4 sm:$0xff]  }
 0x2bd   :  { %4942 = vmatpush1.bf16.msra.mxu1 %v12137_v56  ;;  %4973 = vmatprep.mubr.bf16.mxu1 %v3173_v60  ;;  %v12218_v56 = vld [vmem:[#allocation6 + $0x3c0] ss:$16 sps:$4 sm:$0xff]   ;;  %v12226_v60 = vld [vmem:[#allocation6 + $0x3e4] ss:$16 sps:$4 sm:$0xff]  }
 0x2be   :  { %4779 = vmatprep.subr.bf16.mxu0 %v12142_v58  ;;  %4943 = vmatprep.subr.bf16.mxu1 %v12145_v61  ;;  %v12221_v58 = vld [vmem:[#allocation6 + $0x3c8] ss:$16 sps:$4 sm:$0xff]   ;;  %v12229_v61 = vld [vmem:[#allocation6 + $0x3ec] ss:$16 sps:$4 sm:$0xff]  }
 0x2c0   :  { %4780 = vmatpush1.bf16.msra.mxu0 %v12140_v48  ;;  %v12224_v48 = vld [vmem:[#allocation6 + $0x3e0] ss:$16 sps:$4 sm:$0xff]  }
 0x2c1   :  { %4944 = vmatpush1.bf16.msra.mxu1 %v12143_v62  ;;  %4781 = vmatprep.subr.bf16.mxu0 %v12148_v0  ;;  %v3164_v62 = vmax.f32 %v13422_v51, 0.0  ;;  %v12227_v0 = vld [vmem:[#allocation6 + $0x3e8] ss:$16 sps:$4 sm:$0xff]  }
 0x2c2   :  { %4945 = vmatprep.subr.bf16.mxu1 %v12151_v57  ;;  %v12232_v57 = vld [vmem:[#allocation6 + $0x404] ss:$16 sps:$4 sm:$0xff]   ;;  %v12239_v51 = vld [vmem:[#allocation6 + $0x428] ss:$16 sps:$4 sm:$0xff]  }
 0x2c4   :  { %4782 = vmatpush1.bf16.msra.mxu0 %v12146_v1  ;;  %v12235_v1 = vld [vmem:[#allocation6 + $0x40c] ss:$16 sps:$4 sm:$0xff]  }
 0x2c5   :  { %4946 = vmatpush1.bf16.msra.mxu1 %v12149_v2  ;;  %4783 = vmatprep.subr.bf16.mxu0 %v12154_v3  ;;  %v12230_v2 = vld [vmem:[#allocation6 + $0x400] ss:$16 sps:$4 sm:$0xff]   ;;  %v3172_v3 = vpack.c.bf16 %v3164_v62, %v3164_v62 }
 0x2c6   :  { %4947 = vmatprep.subr.bf16.mxu1 %v12157_v4  ;;  %v12233_v4 = vld [vmem:[#allocation6 + $0x408] ss:$16 sps:$4 sm:$0xff]   ;;  %v12308_v62 = vld [vmem:[#allocation6 + $0x5a0] ss:$16 sps:$4 sm:$0xff]  }
 0x2c8   :  { %4784 = vmatpush1.bf16.msra.mxu0 %v12152_v5  ;;  %v12238_v5 = vld [vmem:[#allocation6 + $0x424] ss:$16 sps:$4 sm:$0xff]  }
 0x2c9   :  { %4948 = vmatpush1.bf16.msra.mxu1 %v12155_v6  ;;  %4785 = vmatprep.subr.bf16.mxu0 %v12160_v7  ;;  %v12241_v6 = vld [vmem:[#allocation6 + $0x42c] ss:$16 sps:$4 sm:$0xff]   ;;  %v12236_v7 = vld [vmem:[#allocation6 + $0x420] ss:$16 sps:$4 sm:$0xff]  }
 0x2ca   :  { %4949 = vmatprep.subr.bf16.mxu1 %v12163_v8  ;;  %v12244_v8 = vld [vmem:[#allocation6 + $0x444] ss:$16 sps:$4 sm:$0xff]  }
 0x2cc   :  { %4786 = vmatpush1.bf16.msra.mxu0 %v12158_v10  ;;  %v12247_v10 = vld [vmem:[#allocation6 + $0x44c] ss:$16 sps:$4 sm:$0xff]  }
 0x2cd   :  { %4950 = vmatpush1.bf16.msra.mxu1 %v12161_v11  ;;  %4787 = vmatprep.subr.bf16.mxu0 %v12166_v12  ;;  %v12242_v11 = vld [vmem:[#allocation6 + $0x440] ss:$16 sps:$4 sm:$0xff]   ;;  %v12245_v12 = vld [vmem:[#allocation6 + $0x448] ss:$16 sps:$4 sm:$0xff]  }
 0x2ce   :  { %4951 = vmatprep.subr.bf16.mxu1 %v12169_v13  ;;  %v12250_v13 = vld [vmem:[#allocation6 + $0x464] ss:$16 sps:$4 sm:$0xff]  }
 0x2d0   :  { %4788 = vmatpush1.bf16.msra.mxu0 %v12164_v14  ;;  %v12253_v14 = vld [vmem:[#allocation6 + $0x46c] ss:$16 sps:$4 sm:$0xff]  }
 0x2d1   :  { %4952 = vmatpush1.bf16.msra.mxu1 %v12167_v15  ;;  %4789 = vmatprep.subr.bf16.mxu0 %v12172_v16  ;;  %v12248_v15 = vld [vmem:[#allocation6 + $0x460] ss:$16 sps:$4 sm:$0xff]   ;;  %v12251_v16 = vld [vmem:[#allocation6 + $0x468] ss:$16 sps:$4 sm:$0xff]  }
 0x2d2   :  { %4953 = vmatprep.subr.bf16.mxu1 %v12175_v17  ;;  %v12256_v17 = vld [vmem:[#allocation6 + $0x484] ss:$16 sps:$4 sm:$0xff]  }
 0x2d4   :  { %4790 = vmatpush1.bf16.msra.mxu0 %v12170_v18  ;;  %v12259_v18 = vld [vmem:[#allocation6 + $0x48c] ss:$16 sps:$4 sm:$0xff]  }
 0x2d5   :  { %4954 = vmatpush1.bf16.msra.mxu1 %v12173_v19  ;;  %4791 = vmatprep.subr.bf16.mxu0 %v12178_v20  ;;  %v12254_v19 = vld [vmem:[#allocation6 + $0x480] ss:$16 sps:$4 sm:$0xff]   ;;  %v12257_v20 = vld [vmem:[#allocation6 + $0x488] ss:$16 sps:$4 sm:$0xff]  }
 0x2d6   :  { %4955 = vmatprep.subr.bf16.mxu1 %v12181_v21  ;;  %v12262_v21 = vld [vmem:[#allocation6 + $0x4a4] ss:$16 sps:$4 sm:$0xff]  }
 0x2d8   :  { %4792 = vmatpush1.bf16.msra.mxu0 %v12176_v22  ;;  %v12265_v22 = vld [vmem:[#allocation6 + $0x4ac] ss:$16 sps:$4 sm:$0xff]  }
 0x2d9   :  { %4956 = vmatpush1.bf16.msra.mxu1 %v12179_v23  ;;  %4793 = vmatprep.subr.bf16.mxu0 %v12184_v24  ;;  %v12260_v23 = vld [vmem:[#allocation6 + $0x4a0] ss:$16 sps:$4 sm:$0xff]   ;;  %v12263_v24 = vld [vmem:[#allocation6 + $0x4a8] ss:$16 sps:$4 sm:$0xff]  }
 0x2da   :  { %4957 = vmatprep.subr.bf16.mxu1 %v12187_v9  ;;  %v12268_v9 = vld [vmem:[#allocation6 + $0x4c4] ss:$16 sps:$4 sm:$0xff]  }
 0x2dc   :  { %4794 = vmatpush1.bf16.msra.mxu0 %v12182_v25  ;;  %v12271_v25 = vld [vmem:[#allocation6 + $0x4cc] ss:$16 sps:$4 sm:$0xff]  }
 0x2dd   :  { %4958 = vmatpush1.bf16.msra.mxu1 %v12185_v26  ;;  %4795 = vmatprep.subr.bf16.mxu0 %v12190_v34  ;;  %v12266_v26 = vld [vmem:[#allocation6 + $0x4c0] ss:$16 sps:$4 sm:$0xff]   ;;  %v12269_v34 = vld [vmem:[#allocation6 + $0x4c8] ss:$16 sps:$4 sm:$0xff]  }
 0x2de   :  { %4959 = vmatprep.subr.bf16.mxu1 %v12193_v29  ;;  %v12274_v29 = vld [vmem:[#allocation6 + $0x4e4] ss:$16 sps:$4 sm:$0xff]  }
 0x2e0   :  { %4796 = vmatpush1.bf16.msra.mxu0 %v12188_v31  ;;  %v12277_v31 = vld [vmem:[#allocation6 + $0x4ec] ss:$16 sps:$4 sm:$0xff]  }
 0x2e1   :  { %4960 = vmatpush1.bf16.msra.mxu1 %v12191_v42  ;;  %4797 = vmatprep.subr.bf16.mxu0 %v12196_v32  ;;  %v12272_v42 = vld [vmem:[#allocation6 + $0x4e0] ss:$16 sps:$4 sm:$0xff]   ;;  %v12275_v32 = vld [vmem:[#allocation6 + $0x4e8] ss:$16 sps:$4 sm:$0xff]  }
 0x2e2   :  { %4961 = vmatprep.subr.bf16.mxu1 %v12199_v35  ;;  %v12280_v35 = vld [vmem:[#allocation6 + $0x504] ss:$16 sps:$4 sm:$0xff]  }
 0x2e4   :  { %4798 = vmatpush1.bf16.msra.mxu0 %v12194_v63  ;;  %v12283_v63 = vld [vmem:[#allocation6 + $0x50c] ss:$16 sps:$4 sm:$0xff]  }
 0x2e5   :  { %4962 = vmatpush1.bf16.msra.mxu1 %v12197_v36  ;;  %4799 = vmatprep.subr.bf16.mxu0 %v12202_v38  ;;  %v12278_v36 = vld [vmem:[#allocation6 + $0x500] ss:$16 sps:$4 sm:$0xff]   ;;  %v12281_v38 = vld [vmem:[#allocation6 + $0x508] ss:$16 sps:$4 sm:$0xff]  }
 0x2e6   :  { %4963 = vmatprep.subr.bf16.mxu1 %v12205_v39  ;;  %v12286_v39 = vld [vmem:[#allocation6 + $0x524] ss:$16 sps:$4 sm:$0xff]  }
 0x2e8   :  { %4800 = vmatpush1.bf16.msra.mxu0 %v12200_v40  ;;  %v12289_v40 = vld [vmem:[#allocation6 + $0x52c] ss:$16 sps:$4 sm:$0xff]  }
 0x2e9   :  { %4964 = vmatpush1.bf16.msra.mxu1 %v12203_v41  ;;  %4801 = vmatprep.subr.bf16.mxu0 %v12208_v44  ;;  %v12284_v41 = vld [vmem:[#allocation6 + $0x520] ss:$16 sps:$4 sm:$0xff]   ;;  %v12287_v44 = vld [vmem:[#allocation6 + $0x528] ss:$16 sps:$4 sm:$0xff]  }
 0x2ea   :  { %4965 = vmatprep.subr.bf16.mxu1 %v12211_v37  ;;  %v12292_v37 = vld [vmem:[#allocation6 + $0x544] ss:$16 sps:$4 sm:$0xff]  }
 0x2ec   :  { %4802 = vmatpush1.bf16.msra.mxu0 %v12206_v45  ;;  %v12295_v45 = vld [vmem:[#allocation6 + $0x54c] ss:$16 sps:$4 sm:$0xff]  }
 0x2ed   :  { %4966 = vmatpush1.bf16.msra.mxu1 %v12209_v46  ;;  %4803 = vmatprep.subr.bf16.mxu0 %v12214_v53  ;;  %v12290_v46 = vld [vmem:[#allocation6 + $0x540] ss:$16 sps:$4 sm:$0xff]   ;;  %v12293_v53 = vld [vmem:[#allocation6 + $0x548] ss:$16 sps:$4 sm:$0xff]  }
 0x2ee   :  { %4967 = vmatprep.subr.bf16.mxu1 %v12217_v47  ;;  %v12298_v47 = vld [vmem:[#allocation6 + $0x564] ss:$16 sps:$4 sm:$0xff]  }
 0x2f0   :  { %4804 = vmatpush1.bf16.msra.mxu0 %v12212_v49  ;;  %v12301_v49 = vld [vmem:[#allocation6 + $0x56c] ss:$16 sps:$4 sm:$0xff]  }
 0x2f1   :  { %4968 = vmatpush1.bf16.msra.mxu1 %v12215_v50  ;;  %4805 = vmatprep.subr.bf16.mxu0 %v12220_v52  ;;  %v12296_v50 = vld [vmem:[#allocation6 + $0x560] ss:$16 sps:$4 sm:$0xff]   ;;  %v12299_v52 = vld [vmem:[#allocation6 + $0x568] ss:$16 sps:$4 sm:$0xff]  }
 0x2f2   :  { %4969 = vmatprep.subr.bf16.mxu1 %v12223_v55  ;;  %v12304_v55 = vld [vmem:[#allocation6 + $0x584] ss:$16 sps:$4 sm:$0xff]  }
 0x2f4   :  { %4806 = vmatpush1.bf16.msra.mxu0 %v12218_v56  ;;  %v12307_v56 = vld [vmem:[#allocation6 + $0x58c] ss:$16 sps:$4 sm:$0xff]  }
 0x2f5   :  { %4970 = vmatpush1.bf16.msra.mxu1 %v12221_v58  ;;  %4807 = vmatprep.subr.bf16.mxu0 %v12226_v60  ;;  %v12302_v58 = vld [vmem:[#allocation6 + $0x580] ss:$16 sps:$4 sm:$0xff]   ;;  %v12305_v60 = vld [vmem:[#allocation6 + $0x588] ss:$16 sps:$4 sm:$0xff]  }
 0x2f6   :  { %4971 = vmatprep.subr.bf16.mxu1 %v12229_v61  ;;  %v12310_v61 = vld [vmem:[#allocation6 + $0x5a4] ss:$16 sps:$4 sm:$0xff]  }
 0x2f8   :  { %4808 = vmatpush1.bf16.msra.mxu0 %v12224_v48  ;;  %v12313_v48 = vld [vmem:[#allocation6 + $0x5ac] ss:$16 sps:$4 sm:$0xff]  }
 0x2f9   :  { %4972 = vmatpush1.bf16.msra.mxu1 %v12227_v0  ;;  %4818 = vmatprep.subr.bf16.mxu0 %v12232_v57  ;;  %v12311_v0 = vld [vmem:[#allocation6 + $0x5a8] ss:$16 sps:$4 sm:$0xff]   ;;  %v12316_v57 = vld [vmem:[#allocation6 + $0x5c4] ss:$16 sps:$4 sm:$0xff]  }
 0x2fa   :  { %4982 = vmatprep.subr.bf16.mxu1 %v12235_v1  ;;  %v12319_v1 = vld [vmem:[#allocation6 + $0x5cc] ss:$16 sps:$4 sm:$0xff]  }
 0x2fb   :  { %4810 = vmatmul.mubr.bf16.vlgmr.msra.gmra.mrb[8].mxu0 %v3172_v3 }
 0x2fc   :  { %4974 = vmatmul.mubr.bf16.vlgmr.msra.gmra.mrb[8].mxu1 %v3172_v3  ;;  %4819 = vmatpush1.bf16.msra.mxu0 %v12230_v2  ;;  %v12314_v2 = vld [vmem:[#allocation6 + $0x5c0] ss:$16 sps:$4 sm:$0xff]   ;;  %v12317_v3 = vld [vmem:[#allocation6 + $0x5c8] ss:$16 sps:$4 sm:$0xff]  }
 0x2fd   :  { %4983 = vmatpush1.bf16.msra.mxu1 %v12233_v4  ;;  %4820 = vmatprep.subr.bf16.mxu0 %v12238_v5  ;;  %v12322_v4 = vld [vmem:[#allocation6 + $0x5e4] ss:$16 sps:$4 sm:$0xff]   ;;  %v12325_v5 = vld [vmem:[#allocation6 + $0x5ec] ss:$16 sps:$4 sm:$0xff]  }
 0x2fe   :  { %4984 = vmatprep.subr.bf16.mxu1 %v12241_v6  ;;  %v12320_v6 = vld [vmem:[#allocation6 + $0x5e0] ss:$16 sps:$4 sm:$0xff]  }
 0x300   :  { %4821 = vmatpush1.bf16.msra.mxu0 %v12236_v7  ;;  %v12323_v7 = vld [vmem:[#allocation6 + $0x5e8] ss:$16 sps:$4 sm:$0xff]  }
 0x301   :  { %4985 = vmatpush1.bf16.msra.mxu1 %v12239_v51  ;;  %4822 = vmatprep.subr.bf16.mxu0 %v12244_v8  ;;  %v12328_v51 = vld [vmem:[#allocation6 + $0x604] ss:$16 sps:$4 sm:$0xff]   ;;  %v12331_v8 = vld [vmem:[#allocation6 + $0x60c] ss:$16 sps:$4 sm:$0xff]  }
 0x302   :  { %4986 = vmatprep.subr.bf16.mxu1 %v12247_v10  ;;  %v628_v10 = vsub.s32 4, %v13336_v43 }
 0x304   :  { %4823 = vmatpush1.bf16.msra.mxu0 %v12242_v11  ;;  %v636_v11 = vsub.s32 6, %v13336_v43 }
 0x305   :  { %4987 = vmatpush1.bf16.msra.mxu1 %v12245_v12  ;;  %4824 = vmatprep.subr.bf16.mxu0 %v12250_v13  ;;  %v632_v12 = vsub.s32 5, %v13336_v43  ;;  %v640_v13 = vsub.s32 7, %v13336_v43 }
 0x306   :  { %4988 = vmatprep.subr.bf16.mxu1 %v12253_v14  ;;  %v629_v14 = vrot.slane %v13404_v59, %v628_v10  ;;  %v12373_v10 = vld [vmem:[#allocation6 + $0x6ec] ss:$16 sps:$4 sm:$0xff]  }
 0x308   :  { %4825 = vmatpush1.bf16.msra.mxu0 %v12248_v15  ;;  %v637_v15 = vrot.slane %v13404_v59, %v636_v11  ;;  %v12368_v11 = vld [vmem:[#allocation6 + $0x6e0] ss:$16 sps:$4 sm:$0xff]  }
 0x309   :  { %4989 = vmatpush1.bf16.msra.mxu1 %v12251_v16  ;;  %4826 = vmatprep.subr.bf16.mxu0 %v12256_v17  ;;  %v633_v16 = vrot.slane %v13404_v59, %v632_v12  ;;  %v641_v17 = vrot.slane %v13404_v59, %v640_v13  ;;  %v12371_v12 = vld [vmem:[#allocation6 + $0x6e8] ss:$16 sps:$4 sm:$0xff]   ;;  %v12376_v13 = vld [vmem:[#allocation6 + $0x704] ss:$16 sps:$4 sm:$0xff]  }
 0x30a   :  { %4990 = vmatprep.subr.bf16.mxu1 %v12259_v18 }
 0x30c   :  { %4827 = vmatpush1.bf16.msra.mxu0 %v12254_v19 }
 0x30d   :  { %4991 = vmatpush1.bf16.msra.mxu1 %v12257_v20  ;;  %4828 = vmatprep.subr.bf16.mxu0 %v12262_v21 }
 0x30e   :  { %4992 = vmatprep.subr.bf16.mxu1 %v12265_v22 }
 0x310   :  { %4829 = vmatpush1.bf16.msra.mxu0 %v12260_v23 }
 0x311   :  { %4993 = vmatpush1.bf16.msra.mxu1 %v12263_v24  ;;  %4830 = vmatprep.subr.bf16.mxu0 %v12268_v9 }
 0x312   :  { %4994 = vmatprep.subr.bf16.mxu1 %v12271_v25 }
 0x314   :  { %4831 = vmatpush1.bf16.msra.mxu0 %v12266_v26 }
 0x315   :  { %4995 = vmatpush1.bf16.msra.mxu1 %v12269_v34  ;;  %4832 = vmatprep.subr.bf16.mxu0 %v12274_v29 }
 0x316   :  { %4996 = vmatprep.subr.bf16.mxu1 %v12277_v31 }
 0x318   :  { %4833 = vmatpush1.bf16.msra.mxu0 %v12272_v42 }
 0x319   :  { %4997 = vmatpush1.bf16.msra.mxu1 %v12275_v32  ;;  %4834 = vmatprep.subr.bf16.mxu0 %v12280_v35 }
 0x31a   :  { %4998 = vmatprep.subr.bf16.mxu1 %v12283_v63 }
 0x31c   :  { %4835 = vmatpush1.bf16.msra.mxu0 %v12278_v36 }
 0x31d   :  { %4999 = vmatpush1.bf16.msra.mxu1 %v12281_v38  ;;  %4836 = vmatprep.subr.bf16.mxu0 %v12286_v39  ;;  %v12326_v38 = vld [vmem:[#allocation6 + $0x600] ss:$16 sps:$4 sm:$0xff]   ;;  %v12329_v39 = vld [vmem:[#allocation6 + $0x608] ss:$16 sps:$4 sm:$0xff]  }
 0x31e   :  { %5000 = vmatprep.subr.bf16.mxu1 %v12289_v40 }
 0x320   :  { %4837 = vmatpush1.bf16.msra.mxu0 %v12284_v41 }
 0x321   :  { %5001 = vmatpush1.bf16.msra.mxu1 %v12287_v44  ;;  %4838 = vmatprep.subr.bf16.mxu0 %v12292_v37  ;;  %v12334_v44 = vld [vmem:[#allocation6 + $0x624] ss:$16 sps:$4 sm:$0xff]   ;;  %v12337_v37 = vld [vmem:[#allocation6 + $0x62c] ss:$16 sps:$4 sm:$0xff]  }
 0x322   :  { %5002 = vmatprep.subr.bf16.mxu1 %v12295_v45 }
 0x324   :  { %4839 = vmatpush1.bf16.msra.mxu0 %v12290_v46 }
 0x325   :  { %5003 = vmatpush1.bf16.msra.mxu1 %v12293_v53  ;;  %4840 = vmatprep.subr.bf16.mxu0 %v12298_v47  ;;  %v12332_v53 = vld [vmem:[#allocation6 + $0x620] ss:$16 sps:$4 sm:$0xff]   ;;  %v12335_v47 = vld [vmem:[#allocation6 + $0x628] ss:$16 sps:$4 sm:$0xff]  }
 0x326   :  { %5004 = vmatprep.subr.bf16.mxu1 %v12301_v49  ;;  %v12340_v49 = vld [vmem:[#allocation6 + $0x644] ss:$16 sps:$4 sm:$0xff]  }
 0x328   :  { %4841 = vmatpush1.bf16.msra.mxu0 %v12296_v50  ;;  %v12343_v50 = vld [vmem:[#allocation6 + $0x64c] ss:$16 sps:$4 sm:$0xff]  }
 0x329   :  { %5005 = vmatpush1.bf16.msra.mxu1 %v12299_v52  ;;  %4842 = vmatprep.subr.bf16.mxu0 %v12304_v55  ;;  %v12338_v52 = vld [vmem:[#allocation6 + $0x640] ss:$16 sps:$4 sm:$0xff]   ;;  %v12341_v55 = vld [vmem:[#allocation6 + $0x648] ss:$16 sps:$4 sm:$0xff]  }
 0x32a   :  { %5006 = vmatprep.subr.bf16.mxu1 %v12307_v56  ;;  %v12346_v56 = vld [vmem:[#allocation6 + $0x664] ss:$16 sps:$4 sm:$0xff]  }
 0x32c   :  { %4843 = vmatpush1.bf16.msra.mxu0 %v12302_v58  ;;  %v12349_v58 = vld [vmem:[#allocation6 + $0x66c] ss:$16 sps:$4 sm:$0xff]  }
 0x32d   :  { %5007 = vmatpush1.bf16.msra.mxu1 %v12305_v60  ;;  %4844 = vmatprep.subr.bf16.mxu0 %v12310_v61  ;;  %v12344_v60 = vld [vmem:[#allocation6 + $0x660] ss:$16 sps:$4 sm:$0xff]   ;;  %v12347_v61 = vld [vmem:[#allocation6 + $0x668] ss:$16 sps:$4 sm:$0xff]  }
 0x32e   :  { %5008 = vmatprep.subr.bf16.mxu1 %v12313_v48  ;;  %v12352_v48 = vld [vmem:[#allocation6 + $0x684] ss:$16 sps:$4 sm:$0xff]  }
 0x330   :  { %4845 = vmatpush1.bf16.msra.mxu0 %v12308_v62  ;;  %v12355_v62 = vld [vmem:[#allocation6 + $0x68c] ss:$16 sps:$4 sm:$0xff]  }
 0x331   :  { %5009 = vmatpush1.bf16.msra.mxu1 %v12311_v0  ;;  %4846 = vmatprep.subr.bf16.mxu0 %v12316_v57  ;;  %v12350_v0 = vld [vmem:[#allocation6 + $0x680] ss:$16 sps:$4 sm:$0xff]   ;;  %v12353_v57 = vld [vmem:[#allocation6 + $0x688] ss:$16 sps:$4 sm:$0xff]  }
 0x332   :  { %5010 = vmatprep.subr.bf16.mxu1 %v12319_v1  ;;  %v12358_v1 = vld [vmem:[#allocation6 + $0x6a4] ss:$16 sps:$4 sm:$0xff]  }
 0x334   :  { %4847 = vmatpush1.bf16.msra.mxu0 %v12314_v2  ;;  %v12361_v2 = vld [vmem:[#allocation6 + $0x6ac] ss:$16 sps:$4 sm:$0xff]  }
 0x335   :  { %5011 = vmatpush1.bf16.msra.mxu1 %v12317_v3  ;;  %4848 = vmatprep.subr.bf16.mxu0 %v12322_v4  ;;  %v12356_v3 = vld [vmem:[#allocation6 + $0x6a0] ss:$16 sps:$4 sm:$0xff]   ;;  %v12359_v4 = vld [vmem:[#allocation6 + $0x6a8] ss:$16 sps:$4 sm:$0xff]  }
 0x336   :  { %5012 = vmatprep.subr.bf16.mxu1 %v12325_v5  ;;  %v12364_v5 = vld [vmem:[#allocation6 + $0x6c4] ss:$16 sps:$4 sm:$0xff]  }
 0x338   :  { %4849 = vmatpush1.bf16.msra.mxu0 %v12320_v6  ;;  %v12367_v6 = vld [vmem:[#allocation6 + $0x6cc] ss:$16 sps:$4 sm:$0xff]  }
 0x339   :  { %5013 = vmatpush1.bf16.msra.mxu1 %v12323_v7  ;;  %4859 = vmatprep.subr.bf16.mxu0 %v12328_v51  ;;  %v12362_v7 = vld [vmem:[#allocation6 + $0x6c0] ss:$16 sps:$4 sm:$0xff]   ;;  %v12365_v51 = vld [vmem:[#allocation6 + $0x6c8] ss:$16 sps:$4 sm:$0xff]  }
 0x33a   :  { %5023 = vmatprep.subr.bf16.mxu1 %v12331_v8  ;;  %v12370_v8 = vld [vmem:[#allocation6 + $0x6e4] ss:$16 sps:$4 sm:$0xff]  }
 0x34e   :  { %v2986_v18 = vpop.f32.mrb[4].mxu0  ;;  %v3109_v20 = vpop.f32.mrb[4].mxu1 }
 0x34f   :  { %v11941_v19 = vadd.f32 %v2986_v18, %v629_v14  ;;  %v2988_v21 = vpop.f32.mrb[5].mxu0  ;;  %v13448_v22 = vadd.f32 %v3109_v20, %v637_v15  ;;  %v3111_v24 = vpop.f32.mrb[5].mxu1  ;;  %v12379_v14 = vld [vmem:[#allocation6 + $0x70c] ss:$16 sps:$4 sm:$0xff]   ;;  %v12374_v15 = vld [vmem:[#allocation6 + $0x700] ss:$16 sps:$4 sm:$0xff]  }
 0x350   :  { %v11942_v23 = vadd.f32 %v2988_v21, %v633_v16  ;;  %v2990_v9 = vpop.f32.mrb[6].mxu0  ;;  %v11944_v26 = vadd.f32 %v3111_v24, %v641_v17  ;;  %v3113_v34 = vpop.f32.mrb[6].mxu1  ;;  %v12377_v16 = vld [vmem:[#allocation6 + $0x708] ss:$16 sps:$4 sm:$0xff]   ;;  %v12382_v17 = vld [vmem:[#allocation6 + $0x724] ss:$16 sps:$4 sm:$0xff]  }
 0x351   :  { %v3166_v25 = vmax.f32 %v11941_v19, 0.0  ;;  %v2991_v29 = vpop.f32.mrb[7].mxu0  ;;  %v3114_v32 = vpop.f32.mrb[7].mxu1  ;;  %v12385_v18 = vld [vmem:[#allocation6 + $0x72c] ss:$16 sps:$4 sm:$0xff]  }
 0x352   :  { %v3141_v31 = vcombine.low %v11941_v19, %v11942_v23  ;;  %v3167_v42 = vmax.f32 %v11942_v23, 0.0  ;;  %v3142_v35 = vcombine.low %v13448_v22, %v11944_v26  ;;  %v3169_v63 = vmax.f32 %v11944_v26, 0.0  ;;  %v12380_v19 = vld [vmem:[#allocation6 + $0x720] ss:$16 sps:$4 sm:$0xff]   ;;  %v12383_v20 = vld [vmem:[#allocation6 + $0x728] ss:$16 sps:$4 sm:$0xff]  }
 0x353   :  { %v3174_v40 = vpack.c.bf16 %v3166_v25, %v3166_v25  ;;  %v12388_v21 = vld [vmem:[#allocation6 + $0x744] ss:$16 sps:$4 sm:$0xff]   ;;  %v12391_v23 = vld [vmem:[#allocation6 + $0x74c] ss:$16 sps:$4 sm:$0xff]   ;;  %v12386_v24 = vld [vmem:[#allocation6 + $0x740] ss:$16 sps:$4 sm:$0xff]  }
 0x354   :  { %v3149_v59 = vrot.slane %v3141_v31, %v13425_v54  ;;  %v3175_v36 = vpack.c.bf16 %v3167_v42, %v3167_v42  ;;  %v3156_v41 = vrot.slane %v3142_v35, %v13425_v54  ;;  %v3177_v46 = vpack.c.bf16 %v3169_v63, %v3169_v63  ;;  %v12389_v9 = vld [vmem:[#allocation6 + $0x748] ss:$16 sps:$4 sm:$0xff]   ;;  %v12394_v25 = vld [vmem:[#allocation6 + $0x764] ss:$16 sps:$4 sm:$0xff]   ;;  %v12397_v26 = vld [vmem:[#allocation6 + $0x76c] ss:$16 sps:$4 sm:$0xff]  }
 0x355   :  { %v12392_v34 = vld [vmem:[#allocation6 + $0x760] ss:$16 sps:$4 sm:$0xff]   ;;  %v12395_v29 = vld [vmem:[#allocation6 + $0x768] ss:$16 sps:$4 sm:$0xff]   ;;  %v12400_v31 = vld [vmem:[#allocation6 + $0x784] ss:$16 sps:$4 sm:$0xff]  }
 0x356   :  { %4850 = vmatprep.mubr.bf16.mxu0 %v3175_v36  ;;  %5014 = vmatprep.mubr.bf16.mxu1 %v3175_v36  ;;  %v3157_v45 = vcombine.low %v3149_v59, %v3156_v41  ;;  %v12403_v42 = vld [vmem:[#allocation6 + $0x78c] ss:$16 sps:$4 sm:$0xff]   ;;  %v12398_v32 = vld [vmem:[#allocation6 + $0x780] ss:$16 sps:$4 sm:$0xff]   ;;  %v12401_v35 = vld [vmem:[#allocation6 + $0x788] ss:$16 sps:$4 sm:$0xff]  }
 0x357   :  { %4851 = vmatmul.mubr.bf16.vlgmr.msra.gmra.mrb[8].mxu0 %v3174_v40  ;;  %5015 = vmatmul.mubr.bf16.vlgmr.msra.gmra.mrb[8].mxu1 %v3174_v40  ;;  %v12406_v63 = vld [vmem:[#allocation6 + $0x7a4] ss:$16 sps:$4 sm:$0xff]   ;;  %v12409_v59 = vld [vmem:[#allocation6 + $0x7ac] ss:$16 sps:$4 sm:$0xff]   ;;  %v12404_v36 = vld [vmem:[#allocation6 + $0x7a0] ss:$16 sps:$4 sm:$0xff]  }
 0x358   :  { %4860 = vmatpush1.bf16.msra.mxu0 %v12326_v38  ;;  %5024 = vmatpush1.bf16.msra.mxu1 %v12329_v39  ;;  %3161 = vst [vmem:[%s14278_s15 + $0x8] sm:$0xff] %v3157_v45  ;;  %v12407_v38 = vld [vmem:[#allocation6 + $0x7a8] ss:$16 sps:$4 sm:$0xff]   ;;  %v12412_v39 = vld [vmem:[#allocation6 + $0x7c4] ss:$16 sps:$4 sm:$0xff]  }
 0x359   :  { %4891 = vmatprep.mubr.bf16.mxu0 %v3177_v46  ;;  %5055 = vmatprep.mubr.bf16.mxu1 %v3177_v46  ;;  %v12415_v40 = vld [vmem:[#allocation6 + $0x7cc] ss:$16 sps:$4 sm:$0xff]   ;;  %v12410_v41 = vld [vmem:[#allocation6 + $0x7c0] ss:$16 sps:$4 sm:$0xff]  }
 0x35a   :  { %4861 = vmatprep.subr.bf16.mxu0 %v12334_v44  ;;  %5025 = vmatprep.subr.bf16.mxu1 %v12337_v37  ;;  %v12413_v44 = vld [vmem:[#allocation6 + $0x7c8] ss:$16 sps:$4 sm:$0xff]   ;;  %v12418_v37 = vld [vmem:[#allocation6 + $0x7e4] ss:$16 sps:$4 sm:$0xff]   ;;  %v12421_v45 = vld [vmem:[#allocation6 + $0x7ec] ss:$16 sps:$4 sm:$0xff]  }
 0x35b   :  { %v12416_v46 = vld [vmem:[#allocation6 + $0x7e0] ss:$16 sps:$4 sm:$0xff]  }
 0x35c   :  { %4862 = vmatpush1.bf16.msra.mxu0 %v12332_v53  ;;  %5026 = vmatpush1.bf16.msra.mxu1 %v12335_v47  ;;  %v12419_v53 = vld [vmem:[#allocation6 + $0x7e8] ss:$16 sps:$4 sm:$0xff]   ;;  %v3168_v47 = vmax.f32 %v13448_v22, 0.0  ;;  %v12431_v22 = vld [vmem:[#allocation9 + $0x30] ss:$8 sps:$4 sm:$0xff]  }
 0x35d   :  { %4863 = vmatprep.subr.bf16.mxu0 %v12340_v49  ;;  %5027 = vmatprep.subr.bf16.mxu1 %v12343_v50  ;;  %v12424_v49 = vld [vmem:[#allocation9 + $0x4] ss:$8 sps:$4 sm:$0xff]   ;;  %v12422_v50 = vld [vmem:[#allocation9] ss:$8 sps:$4 sm:$0xff]  }
 0x360   :  { %4864 = vmatpush1.bf16.msra.mxu0 %v12338_v52  ;;  %5028 = vmatpush1.bf16.msra.mxu1 %v12341_v55  ;;  %v3176_v52 = vpack.c.bf16 %v3168_v47, %v3168_v47  ;;  %v12427_v55 = vld [vmem:[#allocation9 + $0x14] ss:$8 sps:$4 sm:$0xff]  }
 0x361   :  { %4865 = vmatprep.subr.bf16.mxu0 %v12346_v56  ;;  %5029 = vmatprep.subr.bf16.mxu1 %v12349_v58  ;;  %v12425_v56 = vld [vmem:[#allocation9 + $0x10] ss:$8 sps:$4 sm:$0xff]   ;;  %v12430_v58 = vld [vmem:[#allocation9 + $0x24] ss:$8 sps:$4 sm:$0xff]  }
 0x364   :  { %4866 = vmatpush1.bf16.msra.mxu0 %v12344_v60  ;;  %5030 = vmatpush1.bf16.msra.mxu1 %v12347_v61  ;;  %v12428_v60 = vld [vmem:[#allocation9 + $0x20] ss:$8 sps:$4 sm:$0xff]   ;;  %v12433_v61 = vld [vmem:[#allocation9 + $0x34] ss:$8 sps:$4 sm:$0xff]  }
 0x365   :  { %4867 = vmatprep.subr.bf16.mxu0 %v12352_v48  ;;  %5031 = vmatprep.subr.bf16.mxu1 %v12355_v62  ;;  %v12436_v48 = vld [vmem:[#allocation9 + $0x44] ss:$8 sps:$4 sm:$0xff]   ;;  %v12434_v62 = vld [vmem:[#allocation9 + $0x40] ss:$8 sps:$4 sm:$0xff]  }
 0x368   :  { %4868 = vmatpush1.bf16.msra.mxu0 %v12350_v0  ;;  %5032 = vmatpush1.bf16.msra.mxu1 %v12353_v57  ;;  %v12439_v0 = vld [vmem:[#allocation9 + $0x54] ss:$8 sps:$4 sm:$0xff]   ;;  %v12437_v57 = vld [vmem:[#allocation9 + $0x50] ss:$8 sps:$4 sm:$0xff]  }
 0x369   :  { %4869 = vmatprep.subr.bf16.mxu0 %v12358_v1  ;;  %5033 = vmatprep.subr.bf16.mxu1 %v12361_v2  ;;  %v12442_v1 = vld [vmem:[#allocation9 + $0x64] ss:$8 sps:$4 sm:$0xff]   ;;  %v12440_v2 = vld [vmem:[#allocation9 + $0x60] ss:$8 sps:$4 sm:$0xff]  }
 0x36c   :  { %4870 = vmatpush1.bf16.msra.mxu0 %v12356_v3  ;;  %5034 = vmatpush1.bf16.msra.mxu1 %v12359_v4  ;;  %v12445_v3 = vld [vmem:[#allocation9 + $0x74] ss:$8 sps:$4 sm:$0xff]   ;;  %v12443_v4 = vld [vmem:[#allocation9 + $0x70] ss:$8 sps:$4 sm:$0xff]  }
 0x36d   :  { %4871 = vmatprep.subr.bf16.mxu0 %v12364_v5  ;;  %5035 = vmatprep.subr.bf16.mxu1 %v12367_v6  ;;  %v12448_v5 = vld [vmem:[#allocation9 + $0x84] ss:$8 sps:$4 sm:$0xff]   ;;  %v12446_v6 = vld [vmem:[#allocation9 + $0x80] ss:$8 sps:$4 sm:$0xff]  }
 0x370   :  { %4872 = vmatpush1.bf16.msra.mxu0 %v12362_v7  ;;  %5036 = vmatpush1.bf16.msra.mxu1 %v12365_v51  ;;  %v12451_v7 = vld [vmem:[#allocation9 + $0x94] ss:$8 sps:$4 sm:$0xff]   ;;  %v12449_v51 = vld [vmem:[#allocation9 + $0x90] ss:$8 sps:$4 sm:$0xff]  }
 0x371   :  { %4873 = vmatprep.subr.bf16.mxu0 %v12370_v8  ;;  %5037 = vmatprep.subr.bf16.mxu1 %v12373_v10  ;;  %v12454_v8 = vld [vmem:[#allocation9 + $0xa4] ss:$8 sps:$4 sm:$0xff]   ;;  %v12452_v10 = vld [vmem:[#allocation9 + $0xa0] ss:$8 sps:$4 sm:$0xff]  }
 0x374   :  { %4874 = vmatpush1.bf16.msra.mxu0 %v12368_v11  ;;  %5038 = vmatpush1.bf16.msra.mxu1 %v12371_v12  ;;  %v12457_v11 = vld [vmem:[#allocation9 + $0xb4] ss:$8 sps:$4 sm:$0xff]   ;;  %v12455_v12 = vld [vmem:[#allocation9 + $0xb0] ss:$8 sps:$4 sm:$0xff]  }
 0x375   :  { %4875 = vmatprep.subr.bf16.mxu0 %v12376_v13  ;;  %5039 = vmatprep.subr.bf16.mxu1 %v12379_v14  ;;  %v12460_v13 = vld [vmem:[#allocation9 + $0xc4] ss:$8 sps:$4 sm:$0xff]   ;;  %v12458_v14 = vld [vmem:[#allocation9 + $0xc0] ss:$8 sps:$4 sm:$0xff]  }
 0x378   :  { %4876 = vmatpush1.bf16.msra.mxu0 %v12374_v15  ;;  %5040 = vmatpush1.bf16.msra.mxu1 %v12377_v16  ;;  %v12463_v15 = vld [vmem:[#allocation9 + $0xd4] ss:$8 sps:$4 sm:$0xff]   ;;  %v12461_v16 = vld [vmem:[#allocation9 + $0xd0] ss:$8 sps:$4 sm:$0xff]  }
 0x379   :  { %4877 = vmatprep.subr.bf16.mxu0 %v12382_v17  ;;  %5041 = vmatprep.subr.bf16.mxu1 %v12385_v18  ;;  %v12466_v17 = vld [vmem:[#allocation9 + $0xe4] ss:$8 sps:$4 sm:$0xff]   ;;  %v12464_v18 = vld [vmem:[#allocation9 + $0xe0] ss:$8 sps:$4 sm:$0xff]  }
 0x37c   :  { %4878 = vmatpush1.bf16.msra.mxu0 %v12380_v19  ;;  %5042 = vmatpush1.bf16.msra.mxu1 %v12383_v20  ;;  %v12469_v19 = vld [vmem:[#allocation9 + $0xf4] ss:$8 sps:$4 sm:$0xff]   ;;  %v12467_v20 = vld [vmem:[#allocation9 + $0xf0] ss:$8 sps:$4 sm:$0xff]  }
 0x37d   :  { %4879 = vmatprep.subr.bf16.mxu0 %v12388_v21  ;;  %5043 = vmatprep.subr.bf16.mxu1 %v12391_v23  ;;  %v12472_v21 = vld [vmem:[#allocation9 + $0x104] ss:$8 sps:$4 sm:$0xff]  }
 0x37e   :  { %v12518_v23 = vld [vmem:[#allocation12 + $0x40] sm:$0xff]  }
 0x380   :  { %4880 = vmatpush1.bf16.msra.mxu0 %v12386_v24  ;;  %5044 = vmatpush1.bf16.msra.mxu1 %v12389_v9  ;;  %v12519_v24 = vld [vmem:[#allocation12] sm:$0xff]   ;;  %v12520_v9 = vld [vmem:[#allocation12 + $0x48] sm:$0xff]  }
 0x381   :  { %4881 = vmatprep.subr.bf16.mxu0 %v12394_v25  ;;  %5045 = vmatprep.subr.bf16.mxu1 %v12397_v26  ;;  %v12521_v25 = vld [vmem:[#allocation12 + $0x8] sm:$0xff]   ;;  %v12522_v26 = vld [vmem:[#allocation12 + $0x50] sm:$0xff]  }
 0x384   :  { %4882 = vmatpush1.bf16.msra.mxu0 %v12392_v34  ;;  %5046 = vmatpush1.bf16.msra.mxu1 %v12395_v29  ;;  %v12523_v34 = vld [vmem:[#allocation12 + $0x10] sm:$0xff]   ;;  %v12524_v29 = vld [vmem:[#allocation12 + $0x58] sm:$0xff]  }
 0x385   :  { %4883 = vmatprep.subr.bf16.mxu0 %v12400_v31  ;;  %5047 = vmatprep.subr.bf16.mxu1 %v12403_v42  ;;  %v12525_v31 = vld [vmem:[#allocation12 + $0x18] sm:$0xff]   ;;  %v12526_v42 = vld [vmem:[#allocation12 + $0x60] sm:$0xff]  }
 0x388   :  { %4884 = vmatpush1.bf16.msra.mxu0 %v12398_v32  ;;  %5048 = vmatpush1.bf16.msra.mxu1 %v12401_v35  ;;  %v12527_v32 = vld [vmem:[#allocation12 + $0x20] sm:$0xff]   ;;  %v12528_v35 = vld [vmem:[#allocation12 + $0x68] sm:$0xff]  }
 0x389   :  { %4885 = vmatprep.subr.bf16.mxu0 %v12406_v63  ;;  %5049 = vmatprep.subr.bf16.mxu1 %v12409_v59  ;;  %v12529_v63 = vld [vmem:[#allocation12 + $0x28] sm:$0xff]   ;;  %v3434_v59 = vld [vmem:[#allocation7] sm:$0xf] }
 0x38c   :  { %4886 = vmatpush1.bf16.msra.mxu0 %v12404_v36  ;;  %5050 = vmatpush1.bf16.msra.mxu1 %v12407_v38  ;;  %v3439_v36 = vrot.slane %v3434_v59, %v13401_v27  ;;  %v3447_v38 = vrot.slane %v3434_v59, %v620_v28 }
 0x38d   :  { %4887 = vmatprep.subr.bf16.mxu0 %v12412_v39  ;;  %5051 = vmatprep.subr.bf16.mxu1 %v12415_v40  ;;  %v3443_v39 = vrot.slane %v3434_v59, %v13407_v30  ;;  %v3451_v40 = vrot.slane %v3434_v59, %v624_v33  ;;  %v12531_v59 = vld [vmem:[#allocation12 + $0x30] sm:$0xff]  }
 0x390   :  { %4888 = vmatpush1.bf16.msra.mxu0 %v12410_v41  ;;  %5052 = vmatpush1.bf16.msra.mxu1 %v12413_v44 }
 0x391   :  { %4889 = vmatprep.subr.bf16.mxu0 %v12418_v37  ;;  %5053 = vmatprep.subr.bf16.mxu1 %v12421_v45 }
 0x394   :  { %4890 = vmatpush1.bf16.msra.mxu0 %v12416_v46  ;;  %5054 = vmatpush1.bf16.msra.mxu1 %v12419_v53 }
 0x395   :  { %5491 = vmatprep.subr.bf16.mxu0 %v12424_v49  ;;  %11099 = vmatprep.subr.bf16.mxu1 %v12518_v23  ;;  %v12503_v23 = vld [vmem:[#allocation9 + $0x1b0] ss:$8 sps:$4 sm:$0xff]  }
 0x397   :  { %4892 = vmatmul.mubr.bf16.vlgmr.msra.gmra.mrb[8].mxu0 %v3176_v52  ;;  %5056 = vmatmul.mubr.bf16.vlgmr.msra.gmra.mrb[8].mxu1 %v3176_v52 }
 0x398   :  { %5492 = vmatpush1.bf16.msra.mxu0 %v12422_v50  ;;  %11100 = vmatpush3.bf16.msra.mxu1 %v12519_v24  ;;  %v12508_v24 = vld [vmem:[#allocation9 + $0x1c4] ss:$8 sps:$4 sm:$0xff]  }
 0x399   :  { %5493 = vmatprep.subr.bf16.mxu0 %v12427_v55  ;;  %11101 = vmatprep.subr.bf16.mxu1 %v12520_v9  ;;  %v12506_v9 = vld [vmem:[#allocation9 + $0x1c0] ss:$8 sps:$4 sm:$0xff]  }
 0x39c   :  { %5494 = vmatpush1.bf16.msra.mxu0 %v12425_v56  ;;  %11102 = vmatpush3.bf16.msra.mxu1 %v12521_v25  ;;  %v12511_v25 = vld [vmem:[#allocation9 + $0x1d4] ss:$8 sps:$4 sm:$0xff]  }
 0x39d   :  { %5495 = vmatprep.subr.bf16.mxu0 %v12430_v58  ;;  %11103 = vmatprep.subr.bf16.mxu1 %v12522_v26  ;;  %v12509_v26 = vld [vmem:[#allocation9 + $0x1d0] ss:$8 sps:$4 sm:$0xff]  }
 0x3a0   :  { %5496 = vmatpush1.bf16.msra.mxu0 %v12428_v60  ;;  %11104 = vmatpush3.bf16.msra.mxu1 %v12523_v34  ;;  %v12514_v34 = vld [vmem:[#allocation9 + $0x1e4] ss:$8 sps:$4 sm:$0xff]  }
 0x3a1   :  { %5497 = vmatprep.subr.bf16.mxu0 %v12433_v61  ;;  %11105 = vmatprep.subr.bf16.mxu1 %v12524_v29  ;;  %v12512_v29 = vld [vmem:[#allocation9 + $0x1e0] ss:$8 sps:$4 sm:$0xff]  }
 0x3a4   :  { %5498 = vmatpush1.bf16.msra.mxu0 %v12431_v22  ;;  %11106 = vmatpush3.bf16.msra.mxu1 %v12525_v31  ;;  %v12517_v31 = vld [vmem:[#allocation9 + $0x1f4] ss:$8 sps:$4 sm:$0xff]  }
 0x3a5   :  { %5499 = vmatprep.subr.bf16.mxu0 %v12436_v48  ;;  %11107 = vmatprep.subr.bf16.mxu1 %v12526_v42  ;;  %v12515_v42 = vld [vmem:[#allocation9 + $0x1f0] ss:$8 sps:$4 sm:$0xff]  }
 0x3a8   :  { %5500 = vmatpush1.bf16.msra.mxu0 %v12434_v62  ;;  %11108 = vmatpush3.bf16.msra.mxu1 %v12527_v32  ;;  %v12470_v62 = vld [vmem:[#allocation9 + $0x100] ss:$8 sps:$4 sm:$0xff]  }
 0x3a9   :  { %5501 = vmatprep.subr.bf16.mxu0 %v12439_v0  ;;  %11109 = vmatprep.subr.bf16.mxu1 %v12528_v35 }
 0x3ac   :  { %5502 = vmatpush1.bf16.msra.mxu0 %v12437_v57  ;;  %11110 = vmatpush3.bf16.msra.mxu1 %v12529_v63  ;;  %v12475_v57 = vld [vmem:[#allocation9 + $0x114] ss:$8 sps:$4 sm:$0xff]  }
 0x3ad   :  { %5503 = vmatprep.subr.bf16.mxu0 %v12442_v1  ;;  %v12530_v63 = vld [vmem:[#allocation12 + $0x70] sm:$0xff]  }
 0x3ae   :  { %11111 = vmatprep.subr.bf16.mxu1 %v12530_v63  ;;  %v10600_v63 = vld [vmem:[#allocation21] ss:$0 sm:$0xff] }
 0x3b0   :  { %5504 = vmatpush1.bf16.msra.mxu0 %v12440_v2  ;;  %11112 = vmatpush3.bf16.msra.mxu1 %v12531_v59 }
 0x3b1   :  { %5505 = vmatprep.subr.bf16.mxu0 %v12445_v3  ;;  %v12473_v3 = vld [vmem:[#allocation9 + $0x110] ss:$8 sps:$4 sm:$0xff]  }
 0x3b4   :  { %5506 = vmatpush1.bf16.msra.mxu0 %v12443_v4  ;;  %v12478_v4 = vld [vmem:[#allocation9 + $0x124] ss:$8 sps:$4 sm:$0xff]  }
 0x3b5   :  { %5507 = vmatprep.subr.bf16.mxu0 %v12448_v5  ;;  %v12476_v5 = vld [vmem:[#allocation9 + $0x120] ss:$8 sps:$4 sm:$0xff]  }
 0x3b8   :  { %5508 = vmatpush1.bf16.msra.mxu0 %v12446_v6  ;;  %v12479_v6 = vld [vmem:[#allocation9 + $0x130] ss:$8 sps:$4 sm:$0xff]  }
 0x3b9   :  { %5509 = vmatprep.subr.bf16.mxu0 %v12451_v7  ;;  %v12484_v7 = vld [vmem:[#allocation9 + $0x144] ss:$8 sps:$4 sm:$0xff]  }
 0x3bc   :  { %5510 = vmatpush1.bf16.msra.mxu0 %v12449_v51  ;;  %v12482_v51 = vld [vmem:[#allocation9 + $0x140] ss:$8 sps:$4 sm:$0xff]  }
 0x3bd   :  { %5511 = vmatprep.subr.bf16.mxu0 %v12454_v8  ;;  %v12487_v8 = vld [vmem:[#allocation9 + $0x154] ss:$8 sps:$4 sm:$0xff]  }
 0x3c0   :  { %5512 = vmatpush1.bf16.msra.mxu0 %v12452_v10  ;;  %v12485_v10 = vld [vmem:[#allocation9 + $0x150] ss:$8 sps:$4 sm:$0xff]  }
 0x3c1   :  { %5513 = vmatprep.subr.bf16.mxu0 %v12457_v11  ;;  %v12490_v11 = vld [vmem:[#allocation9 + $0x164] ss:$8 sps:$4 sm:$0xff]  }
 0x3c4   :  { %5514 = vmatpush1.bf16.msra.mxu0 %v12455_v12  ;;  %v12488_v12 = vld [vmem:[#allocation9 + $0x160] ss:$8 sps:$4 sm:$0xff]  }
 0x3c5   :  { %5515 = vmatprep.subr.bf16.mxu0 %v12460_v13  ;;  %v12493_v13 = vld [vmem:[#allocation9 + $0x174] ss:$8 sps:$4 sm:$0xff]  }
 0x3c8   :  { %5516 = vmatpush1.bf16.msra.mxu0 %v12458_v14  ;;  %v12491_v14 = vld [vmem:[#allocation9 + $0x170] ss:$8 sps:$4 sm:$0xff]  }
 0x3c9   :  { %5517 = vmatprep.subr.bf16.mxu0 %v12463_v15  ;;  %v12496_v15 = vld [vmem:[#allocation9 + $0x184] ss:$8 sps:$4 sm:$0xff]  }
 0x3cc   :  { %5518 = vmatpush1.bf16.msra.mxu0 %v12461_v16  ;;  %v12494_v16 = vld [vmem:[#allocation9 + $0x180] ss:$8 sps:$4 sm:$0xff]  }
 0x3cd   :  { %5519 = vmatprep.subr.bf16.mxu0 %v12466_v17  ;;  %v12499_v17 = vld [vmem:[#allocation9 + $0x194] ss:$8 sps:$4 sm:$0xff]  }
 0x3d0   :  { %5520 = vmatpush1.bf16.msra.mxu0 %v12464_v18  ;;  %v12497_v18 = vld [vmem:[#allocation9 + $0x190] ss:$8 sps:$4 sm:$0xff]  }
 0x3d1   :  { %5521 = vmatprep.subr.bf16.mxu0 %v12469_v19  ;;  %v12502_v19 = vld [vmem:[#allocation9 + $0x1a4] ss:$8 sps:$4 sm:$0xff]  }
 0x3d4   :  { %5522 = vmatpush1.bf16.msra.mxu0 %v12467_v20  ;;  %v12500_v20 = vld [vmem:[#allocation9 + $0x1a0] ss:$8 sps:$4 sm:$0xff]  }
 0x3d5   :  { %5532 = vmatprep.subr.bf16.mxu0 %v12472_v21  ;;  %v12505_v21 = vld [vmem:[#allocation9 + $0x1b4] ss:$8 sps:$4 sm:$0xff]  }
 0x46a   :  { %v4893_v41 = vpop.f32.mrb[8].mxu0  ;;  %v5057_v44 = vpop.f32.mrb[8].mxu1 }
 0x46b   :  { %v11945_v37 = vadd.f32 %v4893_v41, %v3439_v36  ;;  %v13463_v45 = vadd.f32 %v5057_v44, %v3447_v38  ;;  %v4895_v46 = vpop.f32.mrb[9].mxu0  ;;  %v5059_v53 = vpop.f32.mrb[9].mxu1  ;;  %v12532_v36 = vld [vmem:[#allocation12 + $0x78] sm:$0xff]  }
 0x46c   :  { %v11946_v47 = vadd.f32 %v4895_v46, %v3443_v39  ;;  %v11948_v49 = vadd.f32 %v5059_v53, %v3451_v40  ;;  %v4897_v50 = vpop.f32.mrb[10].mxu0  ;;  %v5061_v52 = vpop.f32.mrb[10].mxu1  ;;  %v12533_v38 = vld [vmem:[#allocation12 + $0x38] sm:$0xff]   ;;  %11113 = vmatprep.subr.bf16.mxu1 %v12532_v36  ;;  %v13050_v39 = vmov 0.0  }
 0x46d   :  { %v5087_v55 = vmax.f32 %v11945_v37, 0.0  ;;  %v4898_v56 = vpop.f32.mrb[11].mxu0  ;;  %v5062_v58 = vpop.f32.mrb[11].mxu1  ;;  %v5089_v32 = vmax.f32 %v13463_v45, 0.0  ;;  %11114 = vmatpush3.bf16.msra.mxu1 %v12533_v38  ;;  %v5159_v40 = vld [vmem:[#allocation10] sm:$0x3] }
 0x46e   :  { %v5068_v28 = vcombine.low %v11945_v37, %v11946_v47  ;;  %v5088_v60 = vmax.f32 %v11946_v47, 0.0  ;;  %v5069_v61 = vcombine.low %v13463_v45, %v11948_v49  ;;  %v5090_v43 = vmax.f32 %v11948_v49, 0.0  ;;  %11361 = vmatprep.subr.bf16.mxu1 %v13050_v39 }
 0x46f   :  { %v5091_v0 = vpack.c.bf16 %v5087_v55, %v5087_v55  ;;  %v5093_v35 = vpack.c.bf16 %v5089_v32, %v5089_v32  ;;  %v5164_v41 = vrot.slane %v5159_v40, %v13401_v27  ;;  %v5168_v44 = vrot.slane %v5159_v40, %v13407_v30  ;;  %v12534_v27 = vld [vmem:[%s14272_s9] sm:$0xff]   ;;  %v12535_v30 = vld [vmem:[%s14272_s9 + $0x8] sm:$0xff]   ;;  %v12552_v32 = vld [vmem:[%s14272_s9 + $0x70] sm:$0xff]  }
 0x470   :  { %v5076_v33 = vrot.slane %v5068_v28, %v13425_v54  ;;  %v5092_v22 = vpack.c.bf16 %v5088_v60, %v5088_v60  ;;  %v5083_v48 = vrot.slane %v5069_v61, %v13425_v54  ;;  %v5094_v2 = vpack.c.bf16 %v5090_v43, %v5090_v43  ;;  %v12481_v54 = vld [vmem:[#allocation9 + $0x134] ss:$8 sps:$4 sm:$0xff]   ;;  %v12536_v28 = vld [vmem:[%s14272_s9 + $0x10] sm:$0xff]   ;;  %v12537_v60 = vld [vmem:[%s14272_s9 + $0x18] sm:$0xff]  }
 0x471   :  { %v12538_v61 = vld [vmem:[%s14272_s9 + $0x20] sm:$0xff]   ;;  %v12539_v43 = vld [vmem:[%s14272_s9 + $0x28] sm:$0xff]  }
 0x472   :  { %v5084_v1 = vcombine.low %v5076_v33, %v5083_v48  ;;  %5523 = vmatprep.mubr.bf16.mxu0 %v5092_v22  ;;  %v12540_v33 = vld [vmem:[%s14272_s9 + $0x30] sm:$0xff]   ;;  %v12541_v22 = vld [vmem:[%s14272_s9 + $0x38] sm:$0xff]  }
 0x473   :  { %5524 = vmatmul.mubr.bf16.vlgmr.msra.gmra.mrb[12].mxu0 %v5091_v0 }
 0x474   :  { %5086 = vst [vmem:[%s14279_s16] sm:$0xff] %v5084_v1  ;;  %5533 = vmatpush1.bf16.msra.mxu0 %v12470_v62  ;;  %5564 = vmatprep.mubr.bf16.mxu0 %v5094_v2  ;;  %v10570_v62 = vld [vmem:[#allocation13] ss:$0 sm:$0xff] }
 0x475   :  { %5534 = vmatprep.subr.bf16.mxu0 %v12475_v57 }
 0x478   :  { %5535 = vmatpush1.bf16.msra.mxu0 %v12473_v3 }
 0x479   :  { %5536 = vmatprep.subr.bf16.mxu0 %v12478_v4 }
 0x47c   :  { %5537 = vmatpush1.bf16.msra.mxu0 %v12476_v5  ;;  %v12542_v5 = vld [vmem:[#allocation16] sm:$0xff]  }
 0x47d   :  { %5538 = vmatprep.subr.bf16.mxu0 %v12481_v54 }
 0x480   :  { %5539 = vmatpush1.bf16.msra.mxu0 %v12479_v6  ;;  %v12543_v6 = vld [vmem:[#allocation16 + $0x8] sm:$0xff]  }
 0x481   :  { %5540 = vmatprep.subr.bf16.mxu0 %v12484_v7  ;;  %v10587_v7 = vld [vmem:[#allocation15] ss:$0 sm:$0xff] }
 0x484   :  { %5541 = vmatpush1.bf16.msra.mxu0 %v12482_v51 }
 0x485   :  { %5542 = vmatprep.subr.bf16.mxu0 %v12487_v8 }
 0x488   :  { %5543 = vmatpush1.bf16.msra.mxu0 %v12485_v10 }
 0x489   :  { %5544 = vmatprep.subr.bf16.mxu0 %v12490_v11 }
 0x48c   :  { %5545 = vmatpush1.bf16.msra.mxu0 %v12488_v12 }
 0x48d   :  { %5546 = vmatprep.subr.bf16.mxu0 %v12493_v13 }
 0x490   :  { %5547 = vmatpush1.bf16.msra.mxu0 %v12491_v14  ;;  %v12544_v14 = vld [vmem:[#allocation19] sm:$0xff]  }
 0x491   :  { %5548 = vmatprep.subr.bf16.mxu0 %v12496_v15 }
 0x494   :  { %5549 = vmatpush1.bf16.msra.mxu0 %v12494_v16  ;;  %v12545_v16 = vld [vmem:[#allocation19 + $0x8] sm:$0xff]  }
 0x495   :  { %5550 = vmatprep.subr.bf16.mxu0 %v12499_v17  ;;  %v10596_v17 = vld [vmem:[#allocation18] ss:$0 sm:$0xff] }
 0x498   :  { %5551 = vmatpush1.bf16.msra.mxu0 %v12497_v18 }
 0x499   :  { %5552 = vmatprep.subr.bf16.mxu0 %v12502_v19 }
 0x49c   :  { %5553 = vmatpush1.bf16.msra.mxu0 %v12500_v20 }
 0x49d   :  { %5554 = vmatprep.subr.bf16.mxu0 %v12505_v21 }
 0x4a0   :  { %5555 = vmatpush1.bf16.msra.mxu0 %v12503_v23 }
 0x4a1   :  { %5556 = vmatprep.subr.bf16.mxu0 %v12508_v24 }
 0x4a4   :  { %5557 = vmatpush1.bf16.msra.mxu0 %v12506_v9  ;;  %v12546_v9 = vld [vmem:[%s14272_s9 + $0x40] sm:$0xff]  }
 0x4a5   :  { %5558 = vmatprep.subr.bf16.mxu0 %v12511_v25 }
 0x4a8   :  { %5559 = vmatpush1.bf16.msra.mxu0 %v12509_v26  ;;  %v12547_v26 = vld [vmem:[%s14272_s9 + $0x48] sm:$0xff]  }
 0x4a9   :  { %5560 = vmatprep.subr.bf16.mxu0 %v12514_v34  ;;  %v12548_v34 = vld [vmem:[%s14272_s9 + $0x50] sm:$0xff]  }
 0x4ac   :  { %5561 = vmatpush1.bf16.msra.mxu0 %v12512_v29  ;;  %v12549_v29 = vld [vmem:[%s14272_s9 + $0x58] sm:$0xff]  }
 0x4ad   :  { %5562 = vmatprep.subr.bf16.mxu0 %v12517_v31  ;;  %v12550_v31 = vld [vmem:[%s14272_s9 + $0x60] sm:$0xff]  }
 0x4b0   :  { %5563 = vmatpush1.bf16.msra.mxu0 %v12515_v42  ;;  %v12551_v42 = vld [vmem:[%s14272_s9 + $0x68] sm:$0xff]  }
 0x4b1   :  { %11433 = vmatprep.subr.bf16.mxu0 %v13050_v39 }
 0x4b3   :  { %5565 = vmatmul.mubr.bf16.vlgmr.msra.gmra.mrb[12].mxu0 %v5093_v35  ;;  %v12553_v35 = vld [vmem:[%s14272_s9 + $0x78] sm:$0xff]  }
 0x4b4   :  { %11449 = vmatprep.mubr.msk.bf16.mxu0 %vm13051_vm0, %v13050_v39 }
 0x586   :  { %v5566_v37 = vpop.f32.mrb[12].mxu0 }
 0x587   :  { %v11949_v45 = vadd.f32 %v5566_v37, %v5164_v41  ;;  %v5568_v46 = vpop.f32.mrb[13].mxu0  ;;  %v12554_v37 = vld [vmem:[#allocation16 + $0x10] sm:$0xff]  }
 0x588   :  { %v11950_v53 = vadd.f32 %v5568_v46, %v5168_v44  ;;  %v5570_v47 = vpop.f32.mrb[14].mxu0  ;;  %v12555_v46 = vld [vmem:[#allocation16 + $0x18] sm:$0xff]  }
 0x589   :  { %v5585_v49 = vmax.f32 %v11949_v45, 0.0  ;;  %v5571_v50 = vpop.f32.mrb[15].mxu0 }
 0x58a   :  { %v5575_v52 = vcombine.low %v11949_v45, %v11950_v53  ;;  %v5586_v55 = vmax.f32 %v11950_v53, 0.0  ;;  %v10620_v53 = vld [vmem:[#allocation15 + $0x1] ss:$0 sm:$0xff] }
 0x58b   :  { %v5587_v58 = vpack.c.bf16 %v5585_v49, %v5585_v49 }
 0x58c   :  { %10569 = vst.sshfl [vmem:[%s14280_s17] sm:$0x33 pattern:$0x76325410] %v5575_v52  ;;  %v5588_v56 = vpack.c.bf16 %v5586_v55, %v5586_v55 }
 0x58e   :  { %5756 = vmatprep.mubr.bf16.mxu1 %v5588_v56 }
 0x58f   :  { %5757 = vmatmul.mubr.bf16.vlgmr.msra.gmra.mrb[12].mxu1 %v5587_v58 }
 0x590   :  { %11362 = vmatpush3.bf16.msra.mxu1 %v12534_v27  ;;  %11377 = vmatprep.mubr.msk.bf16.mxu1 %vm13051_vm0, %v13050_v39  ;;  %v12556_v27 = vld [vmem:[#allocation19 + $0x10] sm:$0xff]  }
 0x591   :  { %11363 = vmatprep.subr.bf16.mxu1 %v13050_v39 }
 0x594   :  { %11364 = vmatpush3.bf16.msra.mxu1 %v12535_v30  ;;  %v12557_v30 = vld [vmem:[#allocation19 + $0x18] sm:$0xff]  }
 0x595   :  { %11365 = vmatprep.subr.bf16.mxu1 %v13050_v39 }
 0x598   :  { %11366 = vmatpush3.bf16.msra.mxu1 %v12536_v28  ;;  %v12558_v28 = vld [vmem:[%s14272_s9 + $0x80] sm:$0xff]  }
 0x599   :  { %11367 = vmatprep.subr.bf16.mxu1 %v13050_v39  ;;  %11434 = vmatpush3.bf16.msra.mxu0 %v12558_v28  ;;  %v10686_v28 = vld [vmem:[#allocation15 + $0x3] ss:$0 sm:$0xff] }
 0x59a   :  { %11435 = vmatprep.subr.bf16.mxu0 %v13050_v39 }
 0x59c   :  { %11368 = vmatpush3.bf16.msra.mxu1 %v12537_v60  ;;  %v12559_v60 = vld [vmem:[%s14272_s9 + $0x88] sm:$0xff]  }
 0x59d   :  { %11369 = vmatprep.subr.bf16.mxu1 %v13050_v39  ;;  %11436 = vmatpush3.bf16.msra.mxu0 %v12559_v60 }
 0x59e   :  { %11437 = vmatprep.subr.bf16.mxu0 %v13050_v39 }
 0x5a0   :  { %11370 = vmatpush3.bf16.msra.mxu1 %v12538_v61  ;;  %v12560_v61 = vld [vmem:[%s14272_s9 + $0x90] sm:$0xff]  }
 0x5a1   :  { %11371 = vmatprep.subr.bf16.mxu1 %v13050_v39  ;;  %11438 = vmatpush3.bf16.msra.mxu0 %v12560_v61 }
 0x5a2   :  { %11439 = vmatprep.subr.bf16.mxu0 %v13050_v39 }
 0x5a4   :  { %11372 = vmatpush3.bf16.msra.mxu1 %v12539_v43  ;;  %v12561_v43 = vld [vmem:[%s14272_s9 + $0x98] sm:$0xff]  }
 0x5a5   :  { %11373 = vmatprep.subr.bf16.mxu1 %v13050_v39  ;;  %11440 = vmatpush3.bf16.msra.mxu0 %v12561_v43 }
 0x5a6   :  { %11441 = vmatprep.subr.bf16.mxu0 %v13050_v39 }
 0x5a8   :  { %11374 = vmatpush3.bf16.msra.mxu1 %v12540_v33  ;;  %v12562_v33 = vld [vmem:[%s14272_s9 + $0xa0] sm:$0xff]  }
 0x5a9   :  { %11375 = vmatprep.subr.bf16.mxu1 %v13050_v39  ;;  %11442 = vmatpush3.bf16.msra.mxu0 %v12562_v33 }
 0x5aa   :  { %11443 = vmatprep.subr.bf16.mxu0 %v13050_v39 }
 0x5ac   :  { %11376 = vmatpush3.bf16.msra.mxu1 %v12541_v22  ;;  %v12563_v22 = vld [vmem:[%s14272_s9 + $0xa8] sm:$0xff]  }
 0x5ad   :  { %11381 = vmatprep.subr.bf16.mxu1 %v13050_v39  ;;  %11444 = vmatpush3.bf16.msra.mxu0 %v12563_v22 }
 0x5ae   :  { %11445 = vmatprep.subr.bf16.mxu0 %v13050_v39 }
 0x662   :  { %v11115_v48 = vpop.f32.mrb[12].mxu1 }
 0x663   :  { %v11116_v0 = vpop.f32.mrb[13].mxu1 }
 0x664   :  { %v11117_v57 = vadd.f32 %v11116_v0, %v11115_v48  ;;  %v11118_v1 = vpop.f32.mrb[14].mxu1  ;;  %v10629_v48 = vld [vmem:[#allocation18 + $0x1] ss:$0 sm:$0xff] }
 0x665   :  { %v11119_v2 = vpop.f32.mrb[15].mxu1 }
 0x666   :  { %v13515_v3 = vadd.f32 %v11117_v57, %v10570_v62 }
 0x668   :  { %v13518_v4 = vmax.f32 %v13515_v3, 0.0 }
 0x66a   :  { %v5765_v54 = vpack.c.bf16 %v13518_v4, %v13518_v4 }
 0x66c   :  { %11378 = vmatmul.mubr.bf16.vlgmr.msra.gmra.mrb[16].mxu1 %v5765_v54  ;;  %v12564_v54 = vld [vmem:[%s14272_s9 + $0xb0] sm:$0xff]  }
 0x66d   :  { %11382 = vmatpush3.bf16.msra.mxu1 %v12542_v5  ;;  %11385 = vmatprep.mubr.msk.bf16.mxu1 %vm13051_vm0, %v13050_v39 }
 0x66e   :  { %11383 = vmatprep.subr.bf16.mxu1 %v13050_v39  ;;  %11446 = vmatpush3.bf16.msra.mxu0 %v12564_v54 }
 0x66f   :  { %11447 = vmatprep.subr.bf16.mxu0 %v13050_v39 }
 0x671   :  { %11384 = vmatpush3.bf16.msra.mxu1 %v12543_v6  ;;  %v12565_v6 = vld [vmem:[%s14272_s9 + $0xb8] sm:$0xff]  }
 0x672   :  { %11389 = vmatprep.subr.bf16.mxu1 %v13050_v39  ;;  %11448 = vmatpush3.bf16.msra.mxu0 %v12565_v6 }
 0x673   :  { %11489 = vmatprep.subr.bf16.mxu0 %v13050_v39 }
 0x73f   :  { %v5871_v51 = vpop.f32.mrb[16].mxu1 }
 0x740   :  { %v5872_v8 = vadd.f32 %v10587_v7, %v5871_v51  ;;  %v11379_v10 = vpop.f32.mrb[17].mxu1  ;;  %v12566_v7 = vld [vmem:[#allocation16 + $0x20] sm:$0xff]   ;;  %v10633_v51 = vld [vmem:[#allocation21 + $0x1] ss:$0 sm:$0xff] }
 0x741   :  { %v5874_v11 = vpop.f32.mrb[18].mxu1 }
 0x742   :  { %v5877_v12 = vmax.f32 %v5872_v8, 0.0  ;;  %v11380_v13 = vpop.f32.mrb[19].mxu1 }
 0x744   :  { %v5878_v15 = vpack.c.bf16 %v5877_v12, %v5877_v12 }
 0x746   :  { %11386 = vmatmul.mubr.msk.bf16.vlgmr.msra.gmra.mrb[20].mxu1 %vm5902_vm1, %v5878_v15 }
 0x747   :  { %11390 = vmatpush3.bf16.msra.mxu1 %v12544_v14  ;;  %11393 = vmatprep.mubr.msk.bf16.mxu1 %vm13051_vm0, %v13050_v39 }
 0x748   :  { %11391 = vmatprep.subr.bf16.mxu1 %v13050_v39 }
 0x74b   :  { %11392 = vmatpush3.bf16.msra.mxu1 %v12545_v16  ;;  %v12567_v16 = vld [vmem:[#allocation16 + $0x28] sm:$0xff]  }
 0x74c   :  { %11397 = vmatprep.subr.bf16.mxu1 %v13050_v39 }
 0x819   :  { %v5940_v18 = vpop.f32.mrb[20].mxu1 }
 0x81a   :  { %v5941_v19 = vadd.f32 %v10596_v17, %v5940_v18  ;;  %v11387_v20 = vpop.f32.mrb[21].mxu1  ;;  %v10653_v17 = vld [vmem:[#allocation15 + $0x2] ss:$0 sm:$0xff] }
 0x81b   :  { %v5943_v21 = vpop.f32.mrb[22].mxu1 }
 0x81c   :  { %v5946_v23 = vmax.f32 %v5941_v19, 0.0  ;;  %v11388_v24 = vpop.f32.mrb[23].mxu1 }
 0x81e   :  { %v5947_v25 = vpack.c.bf16 %v5946_v23, %v5946_v23 }
 0x820   :  { %11394 = vmatmul.mubr.msk.bf16.vlgmr.msra.gmra.mrb[24].mxu1 %vm5902_vm1, %v5947_v25 }
 0x821   :  { %11398 = vmatpush3.bf16.msra.mxu1 %v12546_v9  ;;  %11413 = vmatprep.mubr.msk.bf16.mxu1 %vm13051_vm0, %v13050_v39  ;;  %v12568_v9 = vld [vmem:[#allocation19 + $0x20] sm:$0xff]  }
 0x822   :  { %11399 = vmatprep.subr.bf16.mxu1 %v13050_v39 }
 0x825   :  { %11400 = vmatpush3.bf16.msra.mxu1 %v12547_v26  ;;  %v12569_v26 = vld [vmem:[#allocation19 + $0x28] sm:$0xff]  }
 0x826   :  { %11401 = vmatprep.subr.bf16.mxu1 %v13050_v39 }
 0x829   :  { %11402 = vmatpush3.bf16.msra.mxu1 %v12548_v34  ;;  %v10662_v34 = vld [vmem:[#allocation18 + $0x2] ss:$0 sm:$0xff] }
 0x82a   :  { %11403 = vmatprep.subr.bf16.mxu1 %v13050_v39 }
 0x82d   :  { %11404 = vmatpush3.bf16.msra.mxu1 %v12549_v29 }
 0x82e   :  { %11405 = vmatprep.subr.bf16.mxu1 %v13050_v39 }
 0x831   :  { %11406 = vmatpush3.bf16.msra.mxu1 %v12550_v31 }
 0x832   :  { %11407 = vmatprep.subr.bf16.mxu1 %v13050_v39 }
 0x835   :  { %11408 = vmatpush3.bf16.msra.mxu1 %v12551_v42 }
 0x836   :  { %11409 = vmatprep.subr.bf16.mxu1 %v13050_v39 }
 0x839   :  { %11410 = vmatpush3.bf16.msra.mxu1 %v12552_v32 }
 0x83a   :  { %11411 = vmatprep.subr.bf16.mxu1 %v13050_v39 }
 0x83d   :  { %11412 = vmatpush3.bf16.msra.mxu1 %v12553_v35 }
 0x83e   :  { %11417 = vmatprep.subr.bf16.mxu1 %v13050_v39 }
 0x8f3   :  { %v6008_v59 = vpop.f32.mrb[24].mxu1 }
 0x8f4   :  { %v6009_v36 = vadd.f32 %v10600_v63, %v6008_v59  ;;  %v11395_v38 = vpop.f32.mrb[25].mxu1  ;;  %v12570_v59 = vld [vmem:[%s14272_s9 + $0xc0] sm:$0xff]  }
 0x8f5   :  { %v6011_v40 = vpop.f32.mrb[26].mxu1  ;;  %v12571_v38 = vld [vmem:[%s14272_s9 + $0xc8] sm:$0xff]  }
 0x8f6   :  { %v13567_v41 = vadd.f32 %v6009_v36, %v13518_v4  ;;  %v11396_v44 = vpop.f32.mrb[27].mxu1  ;;  %v12572_v40 = vld [vmem:[%s14272_s9 + $0xd0] sm:$0xff]  }
 0x8f7   :  { %v12574_v44 = vld [vmem:[%s14272_s9 + $0xe0] sm:$0xff]  }
 0x8f8   :  { %v6015_v45 = vpack.c.bf16 %v13567_v41, %v13567_v41 }
 0x8fa   :  { %11414 = vmatmul.mubr.bf16.vlgmr.msra.gmra.mrb[28].mxu1 %v6015_v45  ;;  %v12576_v45 = vld [vmem:[%s14272_s9 + $0xf0] sm:$0xff]  }
 0x8fb   :  { %11418 = vmatpush3.bf16.msra.mxu1 %v12554_v37  ;;  %11421 = vmatprep.mubr.msk.bf16.mxu1 %vm13051_vm0, %v13050_v39  ;;  %v12575_v37 = vld [vmem:[%s14272_s9 + $0xe8] sm:$0xff]  }
 0x8fc   :  { %11419 = vmatprep.subr.bf16.mxu1 %v13050_v39 }
 0x8ff   :  { %11420 = vmatpush3.bf16.msra.mxu1 %v12555_v46  ;;  %v12577_v46 = vld [vmem:[%s14272_s9 + $0xf8] sm:$0xff]  }
 0x900   :  { %11425 = vmatprep.subr.bf16.mxu1 %v13050_v39 }
 0x9cd   :  { %v6123_v47 = vpop.f32.mrb[28].mxu1 }
 0x9ce   :  { %v6124_v49 = vadd.f32 %v10620_v53, %v6123_v47  ;;  %v11415_v50 = vpop.f32.mrb[29].mxu1  ;;  %v12578_v53 = vld [vmem:[#allocation16 + $0x30] sm:$0xff]  }
 0x9cf   :  { %v6126_v52 = vpop.f32.mrb[30].mxu1  ;;  %v10666_v47 = vld [vmem:[#allocation21 + $0x2] ss:$0 sm:$0xff] }
 0x9d0   :  { %v6129_v55 = vmax.f32 %v6124_v49, 0.0  ;;  %v11416_v56 = vpop.f32.mrb[31].mxu1 }
 0x9d2   :  { %v6130_v58 = vpack.c.bf16 %v6129_v55, %v6129_v55 }
 0x9d4   :  { %11422 = vmatmul.mubr.msk.bf16.vlgmr.msra.gmra.mrb[32].mxu1 %vm5902_vm1, %v6130_v58 }
 0x9d5   :  { %11426 = vmatpush3.bf16.msra.mxu1 %v12556_v27  ;;  %11429 = vmatprep.mubr.msk.bf16.mxu1 %vm13051_vm0, %v13050_v39 }
 0x9d6   :  { %11427 = vmatprep.subr.bf16.mxu1 %v13050_v39 }
 0x9d9   :  { %11428 = vmatpush3.bf16.msra.mxu1 %v12557_v30  ;;  %v12579_v30 = vld [vmem:[#allocation16 + $0x38] sm:$0xff]  }
 0x9da   :  { %11453 = vmatprep.subr.bf16.mxu1 %v13050_v39 }
 0xaa7   :  { %v6193_v62 = vpop.f32.mrb[32].mxu1 }
 0xaa8   :  { %v6194_v0 = vadd.f32 %v10629_v48, %v6193_v62  ;;  %v11423_v57 = vpop.f32.mrb[33].mxu1  ;;  %v12580_v62 = vld [vmem:[#allocation19 + $0x30] sm:$0xff]  }
 0xaa9   :  { %v6196_v1 = vpop.f32.mrb[34].mxu1  ;;  %v12581_v57 = vld [vmem:[#allocation19 + $0x38] sm:$0xff]  }
 0xaaa   :  { %v6199_v2 = vmax.f32 %v6194_v0, 0.0  ;;  %v11424_v4 = vpop.f32.mrb[35].mxu1  ;;  %v10695_v1 = vld [vmem:[#allocation18 + $0x3] ss:$0 sm:$0xff] }
 0xaac   :  { %v6200_v5 = vpack.c.bf16 %v6199_v2, %v6199_v2 }
 0xaae   :  { %11430 = vmatmul.mubr.msk.bf16.vlgmr.msra.gmra.mrb[36].mxu1 %vm5902_vm1, %v6200_v5 }
 0xaaf   :  { %11457 = vmatprep.mubr.msk.bf16.mxu1 %vm13051_vm0, %v13050_v39  ;;  %11454 = vmatpush3.bf16.msra.mxu1 %v12566_v7 }
 0xab0   :  { %11455 = vmatprep.subr.bf16.mxu1 %v13050_v39 }
 0xab3   :  { %11456 = vmatpush3.bf16.msra.mxu1 %v12567_v16  ;;  %v12589_v16 = vld [vmem:[%s14272_s9 + $0x138] sm:$0xff]  }
 0xab4   :  { %11461 = vmatprep.subr.bf16.mxu1 %v13050_v39 }
 0xb81   :  { %v6263_v8 = vpop.f32.mrb[36].mxu1 }
 0xb82   :  { %v6264_v10 = vadd.f32 %v10633_v51, %v6263_v8  ;;  %v11431_v11 = vpop.f32.mrb[37].mxu1  ;;  %v12582_v51 = vld [vmem:[%s14272_s9 + $0x100] sm:$0xff]  }
 0xb83   :  { %v6266_v12 = vpop.f32.mrb[38].mxu1  ;;  %v12584_v11 = vld [vmem:[%s14272_s9 + $0x110] sm:$0xff]  }
 0xb84   :  { %v13617_v13 = vadd.f32 %v6264_v10, %v13567_v41  ;;  %v11432_v14 = vpop.f32.mrb[39].mxu1  ;;  %v12573_v41 = vld [vmem:[%s14272_s9 + $0xd8] sm:$0xff]   ;;  %v12583_v10 = vld [vmem:[%s14272_s9 + $0x108] sm:$0xff]  }
 0xb85   :  { %v12585_v12 = vld [vmem:[%s14272_s9 + $0x118] sm:$0xff]   ;;  %v12587_v14 = vld [vmem:[%s14272_s9 + $0x128] sm:$0xff]  }
 0xb86   :  { %v6270_v15 = vpack.c.bf16 %v13617_v13, %v13617_v13 }
 0xb88   :  { %11450 = vmatmul.mubr.bf16.vlgmr.msra.gmra.mrb[16].mxu0 %v6270_v15  ;;  %v12588_v15 = vld [vmem:[%s14272_s9 + $0x130] sm:$0xff]  }
 0xb89   :  { %11493 = vmatprep.mubr.msk.bf16.mxu0 %vm13051_vm0, %v13050_v39  ;;  %11490 = vmatpush3.bf16.msra.mxu0 %v12578_v53 }
 0xb8a   :  { %11491 = vmatprep.subr.bf16.mxu0 %v13050_v39 }
 0xb8d   :  { %11492 = vmatpush3.bf16.msra.mxu0 %v12579_v30  ;;  %v12601_v30 = vld [vmem:[%s14272_s9 + $0x178] sm:$0xff]  }
 0xb8e   :  { %11497 = vmatprep.subr.bf16.mxu0 %v13050_v39 }
 0xc5b   :  { %v6378_v18 = vpop.f32.mrb[16].mxu0 }
 0xc5c   :  { %v6379_v19 = vadd.f32 %v10653_v17, %v6378_v18  ;;  %v11451_v20 = vpop.f32.mrb[17].mxu0  ;;  %v12590_v17 = vld [vmem:[#allocation16 + $0x40] sm:$0xff]   ;;  %v10699_v18 = vld [vmem:[#allocation21 + $0x3] ss:$0 sm:$0xff] }
 0xc5d   :  { %v6381_v21 = vpop.f32.mrb[18].mxu0 }
 0xc5e   :  { %v6384_v23 = vmax.f32 %v6379_v19, 0.0  ;;  %v11452_v24 = vpop.f32.mrb[19].mxu0 }
 0xc60   :  { %v6385_v25 = vpack.c.bf16 %v6384_v23, %v6384_v23 }
 0xc62   :  { %11458 = vmatmul.mubr.msk.bf16.vlgmr.msra.gmra.mrb[40].mxu1 %vm5902_vm1, %v6385_v25 }
 0xc63   :  { %11462 = vmatpush3.bf16.msra.mxu1 %v12568_v9  ;;  %11465 = vmatprep.mubr.msk.bf16.mxu1 %vm13051_vm0, %v13050_v39 }
 0xc64   :  { %11463 = vmatprep.subr.bf16.mxu1 %v13050_v39 }
 0xc67   :  { %11464 = vmatpush3.bf16.msra.mxu1 %v12569_v26  ;;  %v12591_v26 = vld [vmem:[#allocation16 + $0x48] sm:$0xff]  }
 0xc68   :  { %11469 = vmatprep.subr.bf16.mxu1 %v13050_v39 }
 0xd35   :  { %v6448_v29 = vpop.f32.mrb[40].mxu1 }
 0xd36   :  { %v6449_v31 = vadd.f32 %v10662_v34, %v6448_v29  ;;  %v11459_v42 = vpop.f32.mrb[41].mxu1  ;;  %v10719_v34 = vld [vmem:[#allocation15 + $0x4] ss:$0 sm:$0xff] }
 0xd37   :  { %v6451_v32 = vpop.f32.mrb[42].mxu1 }
 0xd38   :  { %v6454_v35 = vmax.f32 %v6449_v31, 0.0  ;;  %v11460_v63 = vpop.f32.mrb[43].mxu1 }
 0xd3a   :  { %v6455_v36 = vpack.c.bf16 %v6454_v35, %v6454_v35 }
 0xd3c   :  { %11466 = vmatmul.mubr.msk.bf16.vlgmr.msra.gmra.mrb[44].mxu1 %vm5902_vm1, %v6455_v36 }
 0xd3d   :  { %11470 = vmatpush3.bf16.msra.mxu1 %v12570_v59  ;;  %11485 = vmatprep.mubr.msk.bf16.mxu1 %vm13051_vm0, %v13050_v39  ;;  %v12592_v59 = vld [vmem:[#allocation19 + $0x40] sm:$0xff]  }
 0xd3e   :  { %11471 = vmatprep.subr.bf16.mxu1 %v13050_v39 }
 0xd41   :  { %11472 = vmatpush3.bf16.msra.mxu1 %v12571_v38  ;;  %v12593_v38 = vld [vmem:[#allocation19 + $0x48] sm:$0xff]  }
 0xd42   :  { %11473 = vmatprep.subr.bf16.mxu1 %v13050_v39 }
 0xd45   :  { %11474 = vmatpush3.bf16.msra.mxu1 %v12572_v40  ;;  %v10728_v40 = vld [vmem:[#allocation18 + $0x4] ss:$0 sm:$0xff] }
 0xd46   :  { %11475 = vmatprep.subr.bf16.mxu1 %v13050_v39 }
 0xd49   :  { %11476 = vmatpush3.bf16.msra.mxu1 %v12573_v41 }
 0xd4a   :  { %11477 = vmatprep.subr.bf16.mxu1 %v13050_v39 }
 0xd4d   :  { %11478 = vmatpush3.bf16.msra.mxu1 %v12574_v44 }
 0xd4e   :  { %11479 = vmatprep.subr.bf16.mxu1 %v13050_v39 }
 0xd51   :  { %11480 = vmatpush3.bf16.msra.mxu1 %v12575_v37 }
 0xd52   :  { %11481 = vmatprep.subr.bf16.mxu1 %v13050_v39 }
 0xd55   :  { %11482 = vmatpush3.bf16.msra.mxu1 %v12576_v45 }
 0xd56   :  { %11483 = vmatprep.subr.bf16.mxu1 %v13050_v39 }
 0xd59   :  { %11484 = vmatpush3.bf16.msra.mxu1 %v12577_v46 }
 0xd5a   :  { %11525 = vmatprep.subr.bf16.mxu1 %v13050_v39 }
 0xe0f   :  { %v6518_v49 = vpop.f32.mrb[44].mxu1 }
 0xe10   :  { %v6519_v50 = vadd.f32 %v10666_v47, %v6518_v49  ;;  %v11467_v52 = vpop.f32.mrb[45].mxu1  ;;  %v12594_v47 = vld [vmem:[%s14272_s9 + $0x140] sm:$0xff]  }
 0xe11   :  { %v6521_v55 = vpop.f32.mrb[46].mxu1  ;;  %v12596_v52 = vld [vmem:[%s14272_s9 + $0x150] sm:$0xff]  }
 0xe12   :  { %v13666_v56 = vadd.f32 %v6519_v50, %v13617_v13  ;;  %v11468_v27 = vpop.f32.mrb[47].mxu1  ;;  %v12586_v13 = vld [vmem:[%s14272_s9 + $0x120] sm:$0xff]   ;;  %v12595_v50 = vld [vmem:[%s14272_s9 + $0x148] sm:$0xff]   ;;  %v12597_v55 = vld [vmem:[%s14272_s9 + $0x158] sm:$0xff]  }
 0xe13   :  { %v12599_v27 = vld [vmem:[%s14272_s9 + $0x168] sm:$0xff]  }
 0xe14   :  { %v6525_v58 = vpack.c.bf16 %v13666_v56, %v13666_v56 }
 0xe16   :  { %11486 = vmatmul.mubr.bf16.vlgmr.msra.gmra.mrb[48].mxu1 %v6525_v58  ;;  %v12600_v58 = vld [vmem:[%s14272_s9 + $0x170] sm:$0xff]  }
 0xe17   :  { %11529 = vmatprep.mubr.msk.bf16.mxu1 %vm13051_vm0, %v13050_v39  ;;  %11526 = vmatpush3.bf16.msra.mxu1 %v12590_v17 }
 0xe18   :  { %11527 = vmatprep.subr.bf16.mxu1 %v13050_v39 }
 0xe1b   :  { %11528 = vmatpush3.bf16.msra.mxu1 %v12591_v26  ;;  %v12613_v26 = vld [vmem:[%s14272_s9 + $0x1b8] sm:$0xff]  }
 0xe1c   :  { %11533 = vmatprep.subr.bf16.mxu1 %v13050_v39 }
 0xee9   :  { %v6633_v60 = vpop.f32.mrb[48].mxu1 }
 0xeea   :  { %v6634_v61 = vadd.f32 %v10686_v28, %v6633_v60  ;;  %v11487_v43 = vpop.f32.mrb[49].mxu1  ;;  %v12602_v28 = vld [vmem:[#allocation16 + $0x50] sm:$0xff]  }
 0xeeb   :  { %v6636_v33 = vpop.f32.mrb[50].mxu1  ;;  %v10732_v60 = vld [vmem:[#allocation21 + $0x4] ss:$0 sm:$0xff] }
 0xeec   :  { %v6639_v22 = vmax.f32 %v6634_v61, 0.0  ;;  %v11488_v48 = vpop.f32.mrb[51].mxu1 }
 0xeee   :  { %v6640_v0 = vpack.c.bf16 %v6639_v22, %v6639_v22 }
 0xef0   :  { %11494 = vmatmul.mubr.msk.bf16.vlgmr.msra.gmra.mrb[20].mxu0 %vm5902_vm1, %v6640_v0 }
 0xef1   :  { %11498 = vmatpush3.bf16.msra.mxu0 %v12580_v62  ;;  %11501 = vmatprep.mubr.msk.bf16.mxu0 %vm13051_vm0, %v13050_v39 }
 0xef2   :  { %11499 = vmatprep.subr.bf16.mxu0 %v13050_v39 }
 0xef5   :  { %11500 = vmatpush3.bf16.msra.mxu0 %v12581_v57  ;;  %v12603_v57 = vld [vmem:[#allocation16 + $0x58] sm:$0xff]  }
 0xef6   :  { %11505 = vmatprep.subr.bf16.mxu0 %v13050_v39 }
 0xfc3   :  { %v6703_v2 = vpop.f32.mrb[20].mxu0 }
 0xfc4   :  { %v6704_v4 = vadd.f32 %v10695_v1, %v6703_v2  ;;  %v11495_v5 = vpop.f32.mrb[21].mxu0  ;;  %v10752_v1 = vld [vmem:[#allocation15 + $0x5] ss:$0 sm:$0xff] }
 0xfc5   :  { %v6706_v54 = vpop.f32.mrb[22].mxu0 }
 0xfc6   :  { %v6709_v6 = vmax.f32 %v6704_v4, 0.0  ;;  %v11496_v7 = vpop.f32.mrb[23].mxu0 }
 0xfc8   :  { %v6710_v8 = vpack.c.bf16 %v6709_v6, %v6709_v6 }
 0xfca   :  { %11502 = vmatmul.mubr.msk.bf16.vlgmr.msra.gmra.mrb[24].mxu0 %vm5902_vm1, %v6710_v8 }
 0xfcb   :  { %11506 = vmatpush3.bf16.msra.mxu0 %v12582_v51  ;;  %11521 = vmatprep.mubr.msk.bf16.mxu0 %vm13051_vm0, %v13050_v39  ;;  %v12604_v51 = vld [vmem:[#allocation19 + $0x50] sm:$0xff]  }
 0xfcc   :  { %11507 = vmatprep.subr.bf16.mxu0 %v13050_v39 }
 0xfcf   :  { %11508 = vmatpush3.bf16.msra.mxu0 %v12583_v10  ;;  %v12605_v10 = vld [vmem:[#allocation19 + $0x58] sm:$0xff]  }
 0xfd0   :  { %11509 = vmatprep.subr.bf16.mxu0 %v13050_v39 }
 0xfd3   :  { %11510 = vmatpush3.bf16.msra.mxu0 %v12584_v11  ;;  %v10761_v11 = vld [vmem:[#allocation18 + $0x5] ss:$0 sm:$0xff] }
 0xfd4   :  { %11511 = vmatprep.subr.bf16.mxu0 %v13050_v39 }
 0xfd7   :  { %11512 = vmatpush3.bf16.msra.mxu0 %v12585_v12 }
 0xfd8   :  { %11513 = vmatprep.subr.bf16.mxu0 %v13050_v39 }
 0xfdb   :  { %11514 = vmatpush3.bf16.msra.mxu0 %v12586_v13 }
 0xfdc   :  { %11515 = vmatprep.subr.bf16.mxu0 %v13050_v39 }
 0xfdf   :  { %11516 = vmatpush3.bf16.msra.mxu0 %v12587_v14 }
 0xfe0   :  { %11517 = vmatprep.subr.bf16.mxu0 %v13050_v39 }
 0xfe3   :  { %11518 = vmatpush3.bf16.msra.mxu0 %v12588_v15 }
 0xfe4   :  { %11519 = vmatprep.subr.bf16.mxu0 %v13050_v39 }
 0xfe7   :  { %11520 = vmatpush3.bf16.msra.mxu0 %v12589_v16 }
 0xfe8   :  { %11561 = vmatprep.subr.bf16.mxu0 %v13050_v39 }
0x109d   :  { %v6773_v19 = vpop.f32.mrb[24].mxu0 }
0x109e   :  { %v6774_v20 = vadd.f32 %v10699_v18, %v6773_v19  ;;  %v11503_v21 = vpop.f32.mrb[25].mxu0  ;;  %v12606_v18 = vld [vmem:[%s14272_s9 + $0x180] sm:$0xff]  }
0x109f   :  { %v6776_v23 = vpop.f32.mrb[26].mxu0  ;;  %v12608_v21 = vld [vmem:[%s14272_s9 + $0x190] sm:$0xff]  }
0x10a0   :  { %v13715_v24 = vadd.f32 %v6774_v20, %v13666_v56  ;;  %v11504_v9 = vpop.f32.mrb[27].mxu0  ;;  %v12598_v56 = vld [vmem:[%s14272_s9 + $0x160] sm:$0xff]   ;;  %v12607_v20 = vld [vmem:[%s14272_s9 + $0x188] sm:$0xff]   ;;  %v12609_v23 = vld [vmem:[%s14272_s9 + $0x198] sm:$0xff]  }
0x10a1   :  { %v12611_v9 = vld [vmem:[%s14272_s9 + $0x1a8] sm:$0xff]  }
0x10a2   :  { %v6780_v25 = vpack.c.bf16 %v13715_v24, %v13715_v24 }
0x10a4   :  { %11522 = vmatmul.mubr.bf16.vlgmr.msra.gmra.mrb[28].mxu0 %v6780_v25  ;;  %v12612_v25 = vld [vmem:[%s14272_s9 + $0x1b0] sm:$0xff]  }
0x10a5   :  { %11565 = vmatprep.mubr.msk.bf16.mxu0 %vm13051_vm0, %v13050_v39  ;;  %11562 = vmatpush3.bf16.msra.mxu0 %v12602_v28 }
0x10a6   :  { %11563 = vmatprep.subr.bf16.mxu0 %v13050_v39 }
0x10a9   :  { %11564 = vmatpush3.bf16.msra.mxu0 %v12603_v57  ;;  %v12625_v57 = vld [vmem:[%s14272_s9 + $0x1f8] sm:$0xff]  }
0x10aa   :  { %11569 = vmatprep.subr.bf16.mxu0 %v13050_v39 }
0x1177   :  { %v6888_v29 = vpop.f32.mrb[28].mxu0 }
0x1178   :  { %v6889_v31 = vadd.f32 %v10719_v34, %v6888_v29  ;;  %v11523_v42 = vpop.f32.mrb[29].mxu0  ;;  %v12614_v34 = vld [vmem:[#allocation16 + $0x60] sm:$0xff]   ;;  %v10765_v29 = vld [vmem:[#allocation21 + $0x5] ss:$0 sm:$0xff] }
0x1179   :  { %v6891_v32 = vpop.f32.mrb[30].mxu0 }
0x117a   :  { %v6894_v35 = vmax.f32 %v6889_v31, 0.0  ;;  %v11524_v63 = vpop.f32.mrb[31].mxu0 }
0x117c   :  { %v6895_v36 = vpack.c.bf16 %v6894_v35, %v6894_v35 }
0x117e   :  { %11530 = vmatmul.mubr.msk.bf16.vlgmr.msra.gmra.mrb[52].mxu1 %vm5902_vm1, %v6895_v36 }
0x117f   :  { %11534 = vmatpush3.bf16.msra.mxu1 %v12592_v59  ;;  %11537 = vmatprep.mubr.msk.bf16.mxu1 %vm13051_vm0, %v13050_v39 }
0x1180   :  { %11535 = vmatprep.subr.bf16.mxu1 %v13050_v39 }
0x1183   :  { %11536 = vmatpush3.bf16.msra.mxu1 %v12593_v38  ;;  %v12615_v38 = vld [vmem:[#allocation16 + $0x68] sm:$0xff]  }
0x1184   :  { %11541 = vmatprep.subr.bf16.mxu1 %v13050_v39 }
0x1251   :  { %v6958_v41 = vpop.f32.mrb[52].mxu1 }
0x1252   :  { %v6959_v44 = vadd.f32 %v10728_v40, %v6958_v41  ;;  %v11531_v37 = vpop.f32.mrb[53].mxu1  ;;  %v10785_v40 = vld [vmem:[#allocation15 + $0x6] ss:$0 sm:$0xff] }
0x1253   :  { %v6961_v45 = vpop.f32.mrb[54].mxu1 }
0x1254   :  { %v6964_v46 = vmax.f32 %v6959_v44, 0.0  ;;  %v11532_v53 = vpop.f32.mrb[55].mxu1 }
0x1256   :  { %v6965_v49 = vpack.c.bf16 %v6964_v46, %v6964_v46 }
0x1258   :  { %11538 = vmatmul.mubr.msk.bf16.vlgmr.msra.gmra.mrb[56].mxu1 %vm5902_vm1, %v6965_v49 }
0x1259   :  { %11542 = vmatpush3.bf16.msra.mxu1 %v12594_v47  ;;  %11557 = vmatprep.mubr.msk.bf16.mxu1 %vm13051_vm0, %v13050_v39  ;;  %v12616_v47 = vld [vmem:[#allocation19 + $0x60] sm:$0xff]  }
0x125a   :  { %11543 = vmatprep.subr.bf16.mxu1 %v13050_v39 }
0x125d   :  { %11544 = vmatpush3.bf16.msra.mxu1 %v12595_v50  ;;  %v12617_v50 = vld [vmem:[#allocation19 + $0x68] sm:$0xff]  }
0x125e   :  { %11545 = vmatprep.subr.bf16.mxu1 %v13050_v39 }
0x1261   :  { %11546 = vmatpush3.bf16.msra.mxu1 %v12596_v52  ;;  %v10794_v52 = vld [vmem:[#allocation18 + $0x6] ss:$0 sm:$0xff] }
0x1262   :  { %11547 = vmatprep.subr.bf16.mxu1 %v13050_v39 }
0x1265   :  { %11548 = vmatpush3.bf16.msra.mxu1 %v12597_v55 }
0x1266   :  { %11549 = vmatprep.subr.bf16.mxu1 %v13050_v39 }
0x1269   :  { %11550 = vmatpush3.bf16.msra.mxu1 %v12598_v56 }
0x126a   :  { %11551 = vmatprep.subr.bf16.mxu1 %v13050_v39 }
0x126d   :  { %11552 = vmatpush3.bf16.msra.mxu1 %v12599_v27 }
0x126e   :  { %11553 = vmatprep.subr.bf16.mxu1 %v13050_v39 }
0x1271   :  { %11554 = vmatpush3.bf16.msra.mxu1 %v12600_v58 }
0x1272   :  { %11555 = vmatprep.subr.bf16.mxu1 %v13050_v39 }
0x1275   :  { %11556 = vmatpush3.bf16.msra.mxu1 %v12601_v30 }
0x1276   :  { %11597 = vmatprep.subr.bf16.mxu1 %v13050_v39 }
0x132b   :  { %v7028_v61 = vpop.f32.mrb[56].mxu1 }
0x132c   :  { %v7029_v43 = vadd.f32 %v10732_v60, %v7028_v61  ;;  %v11539_v33 = vpop.f32.mrb[57].mxu1  ;;  %v12618_v60 = vld [vmem:[%s14272_s9 + $0x1c0] sm:$0xff]  }
0x132d   :  { %v7031_v22 = vpop.f32.mrb[58].mxu1  ;;  %v12620_v33 = vld [vmem:[%s14272_s9 + $0x1d0] sm:$0xff]  }
0x132e   :  { %v13764_v48 = vadd.f32 %v7029_v43, %v13715_v24  ;;  %v11540_v62 = vpop.f32.mrb[59].mxu1  ;;  %v12610_v24 = vld [vmem:[%s14272_s9 + $0x1a0] sm:$0xff]   ;;  %v12619_v43 = vld [vmem:[%s14272_s9 + $0x1c8] sm:$0xff]   ;;  %v12621_v22 = vld [vmem:[%s14272_s9 + $0x1d8] sm:$0xff]  }
0x132f   :  { %v12623_v62 = vld [vmem:[%s14272_s9 + $0x1e8] sm:$0xff]  }
0x1330   :  { %v7035_v0 = vpack.c.bf16 %v13764_v48, %v13764_v48 }
0x1332   :  { %11558 = vmatmul.mubr.bf16.vlgmr.msra.gmra.mrb[60].mxu1 %v7035_v0  ;;  %v12624_v0 = vld [vmem:[%s14272_s9 + $0x1f0] sm:$0xff]  }
0x1333   :  { %11601 = vmatprep.mubr.msk.bf16.mxu1 %vm13051_vm0, %v13050_v39  ;;  %11598 = vmatpush3.bf16.msra.mxu1 %v12614_v34 }
0x1334   :  { %11599 = vmatprep.subr.bf16.mxu1 %v13050_v39 }
0x1337   :  { %11600 = vmatpush3.bf16.msra.mxu1 %v12615_v38  ;;  %v12637_v38 = vld [vmem:[%s14272_s9 + $0x238] sm:$0xff]  }
0x1338   :  { %11605 = vmatprep.subr.bf16.mxu1 %v13050_v39 }
0x1405   :  { %v7143_v2 = vpop.f32.mrb[60].mxu1 }
0x1406   :  { %v7144_v4 = vadd.f32 %v10752_v1, %v7143_v2  ;;  %v11559_v5 = vpop.f32.mrb[61].mxu1  ;;  %v12626_v1 = vld [vmem:[#allocation16 + $0x70] sm:$0xff]  }
0x1407   :  { %v7146_v54 = vpop.f32.mrb[62].mxu1  ;;  %v10798_v2 = vld [vmem:[#allocation21 + $0x6] ss:$0 sm:$0xff] }
0x1408   :  { %v7149_v6 = vmax.f32 %v7144_v4, 0.0  ;;  %v11560_v7 = vpop.f32.mrb[63].mxu1 }
0x140a   :  { %v7150_v8 = vpack.c.bf16 %v7149_v6, %v7149_v6 }
0x140c   :  { %11566 = vmatmul.mubr.msk.bf16.vlgmr.msra.gmra.mrb[32].mxu0 %vm5902_vm1, %v7150_v8 }
0x140d   :  { %11570 = vmatpush3.bf16.msra.mxu0 %v12604_v51  ;;  %11573 = vmatprep.mubr.msk.bf16.mxu0 %vm13051_vm0, %v13050_v39 }
0x140e   :  { %11571 = vmatprep.subr.bf16.mxu0 %v13050_v39 }
0x1411   :  { %11572 = vmatpush3.bf16.msra.mxu0 %v12605_v10  ;;  %v12627_v10 = vld [vmem:[#allocation16 + $0x78] sm:$0xff]  }
0x1412   :  { %11577 = vmatprep.subr.bf16.mxu0 %v13050_v39 }
0x14df   :  { %v7213_v12 = vpop.f32.mrb[32].mxu0 }
0x14e0   :  { %v7214_v13 = vadd.f32 %v10761_v11, %v7213_v12  ;;  %v11567_v14 = vpop.f32.mrb[33].mxu0  ;;  %v10818_v11 = vld [vmem:[#allocation15 + $0x7] ss:$0 sm:$0xff] }
0x14e1   :  { %v7216_v15 = vpop.f32.mrb[34].mxu0 }
0x14e2   :  { %v7219_v16 = vmax.f32 %v7214_v13, 0.0  ;;  %v11568_v17 = vpop.f32.mrb[35].mxu0 }
0x14e4   :  { %v7220_v19 = vpack.c.bf16 %v7219_v16, %v7219_v16 }
0x14e6   :  { %11574 = vmatmul.mubr.msk.bf16.vlgmr.msra.gmra.mrb[36].mxu0 %vm5902_vm1, %v7220_v19 }
0x14e7   :  { %11578 = vmatpush3.bf16.msra.mxu0 %v12606_v18  ;;  %11593 = vmatprep.mubr.msk.bf16.mxu0 %vm13051_vm0, %v13050_v39  ;;  %v12628_v18 = vld [vmem:[#allocation19 + $0x70] sm:$0xff]  }
0x14e8   :  { %11579 = vmatprep.subr.bf16.mxu0 %v13050_v39 }
0x14eb   :  { %11580 = vmatpush3.bf16.msra.mxu0 %v12607_v20  ;;  %v12629_v20 = vld [vmem:[#allocation19 + $0x78] sm:$0xff]  }
0x14ec   :  { %11581 = vmatprep.subr.bf16.mxu0 %v13050_v39 }
0x14ef   :  { %11582 = vmatpush3.bf16.msra.mxu0 %v12608_v21  ;;  %v10827_v21 = vld [vmem:[#allocation18 + $0x7] ss:$0 sm:$0xff] }
0x14f0   :  { %11583 = vmatprep.subr.bf16.mxu0 %v13050_v39 }
0x14f3   :  { %11584 = vmatpush3.bf16.msra.mxu0 %v12609_v23 }
0x14f4   :  { %11585 = vmatprep.subr.bf16.mxu0 %v13050_v39 }
0x14f7   :  { %11586 = vmatpush3.bf16.msra.mxu0 %v12610_v24 }
0x14f8   :  { %11587 = vmatprep.subr.bf16.mxu0 %v13050_v39 }
0x14fb   :  { %11588 = vmatpush3.bf16.msra.mxu0 %v12611_v9 }
0x14fc   :  { %11589 = vmatprep.subr.bf16.mxu0 %v13050_v39 }
0x14ff   :  { %11590 = vmatpush3.bf16.msra.mxu0 %v12612_v25 }
0x1500   :  { %11591 = vmatprep.subr.bf16.mxu0 %v13050_v39 }
0x1503   :  { %11592 = vmatpush3.bf16.msra.mxu0 %v12613_v26 }
0x1504   :  { %11633 = vmatprep.subr.bf16.mxu0 %v13050_v39 }
0x15b9   :  { %v7283_v31 = vpop.f32.mrb[36].mxu0 }
0x15ba   :  { %v7284_v42 = vadd.f32 %v10765_v29, %v7283_v31  ;;  %v11575_v32 = vpop.f32.mrb[37].mxu0  ;;  %v12630_v29 = vld [vmem:[%s14272_s9 + $0x200] sm:$0xff]  }
0x15bb   :  { %v7286_v35 = vpop.f32.mrb[38].mxu0  ;;  %v12632_v32 = vld [vmem:[%s14272_s9 + $0x210] sm:$0xff]  }
0x15bc   :  { %v13813_v63 = vadd.f32 %v7284_v42, %v13764_v48  ;;  %v11576_v59 = vpop.f32.mrb[39].mxu0  ;;  %v12622_v48 = vld [vmem:[%s14272_s9 + $0x1e0] sm:$0xff]   ;;  %v12631_v42 = vld [vmem:[%s14272_s9 + $0x208] sm:$0xff]   ;;  %v12633_v35 = vld [vmem:[%s14272_s9 + $0x218] sm:$0xff]  }
0x15bd   :  { %v12635_v59 = vld [vmem:[%s14272_s9 + $0x228] sm:$0xff]  }
0x15be   :  { %v7290_v36 = vpack.c.bf16 %v13813_v63, %v13813_v63 }
0x15c0   :  { %11594 = vmatmul.mubr.bf16.vlgmr.msra.gmra.mrb[40].mxu0 %v7290_v36  ;;  %v12636_v36 = vld [vmem:[%s14272_s9 + $0x230] sm:$0xff]  }
0x15c1   :  { %11637 = vmatprep.mubr.msk.bf16.mxu0 %vm13051_vm0, %v13050_v39  ;;  %11634 = vmatpush3.bf16.msra.mxu0 %v12626_v1 }
0x15c2   :  { %11635 = vmatprep.subr.bf16.mxu0 %v13050_v39 }
0x15c5   :  { %11636 = vmatpush3.bf16.msra.mxu0 %v12627_v10  ;;  %v12649_v10 = vld [vmem:[%s14272_s9 + $0x278] sm:$0xff]  }
0x15c6   :  { %11641 = vmatprep.subr.bf16.mxu0 %v13050_v39 }
0x1693   :  { %v7398_v41 = vpop.f32.mrb[40].mxu0 }
0x1694   :  { %v7399_v44 = vadd.f32 %v10785_v40, %v7398_v41  ;;  %v11595_v37 = vpop.f32.mrb[41].mxu0  ;;  %v12638_v40 = vld [vmem:[#allocation16 + $0x80] sm:$0xff]   ;;  %v10831_v41 = vld [vmem:[#allocation21 + $0x7] ss:$0 sm:$0xff] }
0x1695   :  { %v7401_v45 = vpop.f32.mrb[42].mxu0 }
0x1696   :  { %v7404_v46 = vmax.f32 %v7399_v44, 0.0  ;;  %v11596_v53 = vpop.f32.mrb[43].mxu0 }
0x1698   :  { %v7405_v49 = vpack.c.bf16 %v7404_v46, %v7404_v46 }
0x169a   :  { %11602 = vmatmul.mubr.msk.bf16.vlgmr.msra.gmra.mrb[64].mxu1 %vm5902_vm1, %v7405_v49 }
0x169b   :  { %11606 = vmatpush3.bf16.msra.mxu1 %v12616_v47  ;;  %11609 = vmatprep.mubr.msk.bf16.mxu1 %vm13051_vm0, %v13050_v39 }
0x169c   :  { %11607 = vmatprep.subr.bf16.mxu1 %v13050_v39 }
0x169f   :  { %11608 = vmatpush3.bf16.msra.mxu1 %v12617_v50  ;;  %v12639_v50 = vld [vmem:[#allocation16 + $0x88] sm:$0xff]  }
0x16a0   :  { %11613 = vmatprep.subr.bf16.mxu1 %v13050_v39 }
0x176d   :  { %v7468_v55 = vpop.f32.mrb[64].mxu1 }
0x176e   :  { %v7469_v56 = vadd.f32 %v10794_v52, %v7468_v55  ;;  %v11603_v27 = vpop.f32.mrb[65].mxu1  ;;  %v10851_v52 = vld [vmem:[#allocation15 + $0x8] ss:$0 sm:$0xff] }
0x176f   :  { %v7471_v58 = vpop.f32.mrb[66].mxu1 }
0x1770   :  { %v7474_v30 = vmax.f32 %v7469_v56, 0.0  ;;  %v11604_v28 = vpop.f32.mrb[67].mxu1 }
0x1772   :  { %v7475_v61 = vpack.c.bf16 %v7474_v30, %v7474_v30 }
0x1774   :  { %11610 = vmatmul.mubr.msk.bf16.vlgmr.msra.gmra.mrb[68].mxu1 %vm5902_vm1, %v7475_v61 }
0x1775   :  { %11614 = vmatpush3.bf16.msra.mxu1 %v12618_v60  ;;  %11629 = vmatprep.mubr.msk.bf16.mxu1 %vm13051_vm0, %v13050_v39  ;;  %v12640_v60 = vld [vmem:[#allocation19 + $0x80] sm:$0xff]  }
0x1776   :  { %11615 = vmatprep.subr.bf16.mxu1 %v13050_v39 }
0x1779   :  { %11616 = vmatpush3.bf16.msra.mxu1 %v12619_v43  ;;  %v12641_v43 = vld [vmem:[#allocation19 + $0x88] sm:$0xff]  }
0x177a   :  { %11617 = vmatprep.subr.bf16.mxu1 %v13050_v39 }
0x177d   :  { %11618 = vmatpush3.bf16.msra.mxu1 %v12620_v33  ;;  %v10860_v33 = vld [vmem:[#allocation18 + $0x8] ss:$0 sm:$0xff] }
0x177e   :  { %11619 = vmatprep.subr.bf16.mxu1 %v13050_v39 }
0x1781   :  { %11620 = vmatpush3.bf16.msra.mxu1 %v12621_v22 }
0x1782   :  { %11621 = vmatprep.subr.bf16.mxu1 %v13050_v39 }
0x1785   :  { %11622 = vmatpush3.bf16.msra.mxu1 %v12622_v48 }
0x1786   :  { %11623 = vmatprep.subr.bf16.mxu1 %v13050_v39 }
0x1789   :  { %11624 = vmatpush3.bf16.msra.mxu1 %v12623_v62 }
0x178a   :  { %11625 = vmatprep.subr.bf16.mxu1 %v13050_v39 }
0x178d   :  { %11626 = vmatpush3.bf16.msra.mxu1 %v12624_v0 }
0x178e   :  { %11627 = vmatprep.subr.bf16.mxu1 %v13050_v39 }
0x1791   :  { %11628 = vmatpush3.bf16.msra.mxu1 %v12625_v57 }
0x1792   :  { %11669 = vmatprep.subr.bf16.mxu1 %v13050_v39 }
0x1847   :  { %v7538_v4 = vpop.f32.mrb[68].mxu1 }
0x1848   :  { %v7539_v5 = vadd.f32 %v10798_v2, %v7538_v4  ;;  %v11611_v54 = vpop.f32.mrb[69].mxu1  ;;  %v12642_v2 = vld [vmem:[%s14272_s9 + $0x240] sm:$0xff]  }
0x1849   :  { %v7541_v6 = vpop.f32.mrb[70].mxu1  ;;  %v12644_v54 = vld [vmem:[%s14272_s9 + $0x250] sm:$0xff]  }
0x184a   :  { %v13862_v7 = vadd.f32 %v7539_v5, %v13813_v63  ;;  %v11612_v51 = vpop.f32.mrb[71].mxu1  ;;  %v12634_v63 = vld [vmem:[%s14272_s9 + $0x220] sm:$0xff]   ;;  %v12643_v5 = vld [vmem:[%s14272_s9 + $0x248] sm:$0xff]   ;;  %v12645_v6 = vld [vmem:[%s14272_s9 + $0x258] sm:$0xff]  }
0x184b   :  { %v12647_v51 = vld [vmem:[%s14272_s9 + $0x268] sm:$0xff]  }
0x184c   :  { %v7545_v8 = vpack.c.bf16 %v13862_v7, %v13862_v7 }
0x184e   :  { %11630 = vmatmul.mubr.bf16.vlgmr.msra.gmra.mrb[72].mxu1 %v7545_v8  ;;  %v12648_v8 = vld [vmem:[%s14272_s9 + $0x270] sm:$0xff]  }
0x184f   :  { %11673 = vmatprep.mubr.msk.bf16.mxu1 %vm13051_vm0, %v13050_v39  ;;  %11670 = vmatpush3.bf16.msra.mxu1 %v12638_v40 }
0x1850   :  { %11671 = vmatprep.subr.bf16.mxu1 %v13050_v39 }
0x1853   :  { %11672 = vmatpush3.bf16.msra.mxu1 %v12639_v50  ;;  %v12661_v50 = vld [vmem:[%s14272_s9 + $0x2b8] sm:$0xff]  }
0x1854   :  { %11677 = vmatprep.subr.bf16.mxu1 %v13050_v39 }
0x1921   :  { %v7653_v12 = vpop.f32.mrb[72].mxu1 }
0x1922   :  { %v7654_v13 = vadd.f32 %v10818_v11, %v7653_v12  ;;  %v11631_v14 = vpop.f32.mrb[73].mxu1  ;;  %v12650_v11 = vld [vmem:[#allocation16 + $0x90] sm:$0xff]   ;;  %v10864_v12 = vld [vmem:[#allocation21 + $0x8] ss:$0 sm:$0xff] }
0x1923   :  { %v7656_v15 = vpop.f32.mrb[74].mxu1 }
0x1924   :  { %v7659_v16 = vmax.f32 %v7654_v13, 0.0  ;;  %v11632_v17 = vpop.f32.mrb[75].mxu1 }
0x1926   :  { %v7660_v19 = vpack.c.bf16 %v7659_v16, %v7659_v16 }
0x1928   :  { %11638 = vmatmul.mubr.msk.bf16.vlgmr.msra.gmra.mrb[44].mxu0 %vm5902_vm1, %v7660_v19 }
0x1929   :  { %11642 = vmatpush3.bf16.msra.mxu0 %v12628_v18  ;;  %11645 = vmatprep.mubr.msk.bf16.mxu0 %vm13051_vm0, %v13050_v39 }
0x192a   :  { %11643 = vmatprep.subr.bf16.mxu0 %v13050_v39 }
0x192d   :  { %11644 = vmatpush3.bf16.msra.mxu0 %v12629_v20  ;;  %v12651_v20 = vld [vmem:[#allocation16 + $0x98] sm:$0xff]  }
0x192e   :  { %11649 = vmatprep.subr.bf16.mxu0 %v13050_v39 }
0x19fb   :  { %v7723_v23 = vpop.f32.mrb[44].mxu0 }
0x19fc   :  { %v7724_v24 = vadd.f32 %v10827_v21, %v7723_v23  ;;  %v11639_v9 = vpop.f32.mrb[45].mxu0  ;;  %v10884_v21 = vld [vmem:[#allocation15 + $0x9] ss:$0 sm:$0xff] }
0x19fd   :  { %v7726_v25 = vpop.f32.mrb[46].mxu0 }
0x19fe   :  { %v7729_v26 = vmax.f32 %v7724_v24, 0.0  ;;  %v11640_v34 = vpop.f32.mrb[47].mxu0 }
0x1a00   :  { %v7730_v31 = vpack.c.bf16 %v7729_v26, %v7729_v26 }
0x1a02   :  { %11646 = vmatmul.mubr.msk.bf16.vlgmr.msra.gmra.mrb[48].mxu0 %vm5902_vm1, %v7730_v31 }
0x1a03   :  { %11650 = vmatpush3.bf16.msra.mxu0 %v12630_v29  ;;  %11665 = vmatprep.mubr.msk.bf16.mxu0 %vm13051_vm0, %v13050_v39  ;;  %v12652_v29 = vld [vmem:[#allocation19 + $0x90] sm:$0xff]  }
0x1a04   :  { %11651 = vmatprep.subr.bf16.mxu0 %v13050_v39 }
0x1a07   :  { %11652 = vmatpush3.bf16.msra.mxu0 %v12631_v42  ;;  %v12653_v42 = vld [vmem:[#allocation19 + $0x98] sm:$0xff]  }
0x1a08   :  { %11653 = vmatprep.subr.bf16.mxu0 %v13050_v39 }
0x1a0b   :  { %11654 = vmatpush3.bf16.msra.mxu0 %v12632_v32  ;;  %v10893_v32 = vld [vmem:[#allocation18 + $0x9] ss:$0 sm:$0xff] }
0x1a0c   :  { %11655 = vmatprep.subr.bf16.mxu0 %v13050_v39 }
0x1a0f   :  { %11656 = vmatpush3.bf16.msra.mxu0 %v12633_v35 }
0x1a10   :  { %11657 = vmatprep.subr.bf16.mxu0 %v13050_v39 }
0x1a13   :  { %11658 = vmatpush3.bf16.msra.mxu0 %v12634_v63 }
0x1a14   :  { %11659 = vmatprep.subr.bf16.mxu0 %v13050_v39 }
0x1a17   :  { %11660 = vmatpush3.bf16.msra.mxu0 %v12635_v59 }
0x1a18   :  { %11661 = vmatprep.subr.bf16.mxu0 %v13050_v39 }
0x1a1b   :  { %11662 = vmatpush3.bf16.msra.mxu0 %v12636_v36 }
0x1a1c   :  { %11663 = vmatprep.subr.bf16.mxu0 %v13050_v39 }
0x1a1f   :  { %11664 = vmatpush3.bf16.msra.mxu0 %v12637_v38 }
0x1a20   :  { %11705 = vmatprep.subr.bf16.mxu0 %v13050_v39 }
0x1ad5   :  { %v7793_v44 = vpop.f32.mrb[48].mxu0 }
0x1ad6   :  { %v7794_v37 = vadd.f32 %v10831_v41, %v7793_v44  ;;  %v11647_v45 = vpop.f32.mrb[49].mxu0  ;;  %v12654_v41 = vld [vmem:[%s14272_s9 + $0x280] sm:$0xff]  }
0x1ad7   :  { %v7796_v46 = vpop.f32.mrb[50].mxu0  ;;  %v12656_v45 = vld [vmem:[%s14272_s9 + $0x290] sm:$0xff]  }
0x1ad8   :  { %v13911_v53 = vadd.f32 %v7794_v37, %v13862_v7  ;;  %v11648_v47 = vpop.f32.mrb[51].mxu0  ;;  %v12646_v7 = vld [vmem:[%s14272_s9 + $0x260] sm:$0xff]   ;;  %v12655_v37 = vld [vmem:[%s14272_s9 + $0x288] sm:$0xff]   ;;  %v12657_v46 = vld [vmem:[%s14272_s9 + $0x298] sm:$0xff]  }
0x1ad9   :  { %v12659_v47 = vld [vmem:[%s14272_s9 + $0x2a8] sm:$0xff]  }
0x1ada   :  { %v7800_v49 = vpack.c.bf16 %v13911_v53, %v13911_v53 }
0x1adc   :  { %11666 = vmatmul.mubr.bf16.vlgmr.msra.gmra.mrb[52].mxu0 %v7800_v49  ;;  %v12660_v49 = vld [vmem:[%s14272_s9 + $0x2b0] sm:$0xff]  }
0x1add   :  { %11709 = vmatprep.mubr.msk.bf16.mxu0 %vm13051_vm0, %v13050_v39  ;;  %11706 = vmatpush3.bf16.msra.mxu0 %v12650_v11 }
0x1ade   :  { %11707 = vmatprep.subr.bf16.mxu0 %v13050_v39 }
0x1ae1   :  { %11708 = vmatpush3.bf16.msra.mxu0 %v12651_v20  ;;  %v12673_v20 = vld [vmem:[%s14272_s9 + $0x2f8] sm:$0xff]  }
0x1ae2   :  { %11713 = vmatprep.subr.bf16.mxu0 %v13050_v39 }
0x1baf   :  { %v7908_v55 = vpop.f32.mrb[52].mxu0 }
0x1bb0   :  { %v7909_v56 = vadd.f32 %v10851_v52, %v7908_v55  ;;  %v11667_v27 = vpop.f32.mrb[53].mxu0  ;;  %v12662_v52 = vld [vmem:[#allocation16 + $0xa0] sm:$0xff]   ;;  %v10897_v55 = vld [vmem:[#allocation21 + $0x9] ss:$0 sm:$0xff] }
0x1bb1   :  { %v7911_v58 = vpop.f32.mrb[54].mxu0 }
0x1bb2   :  { %v7914_v30 = vmax.f32 %v7909_v56, 0.0  ;;  %v11668_v28 = vpop.f32.mrb[55].mxu0 }
0x1bb4   :  { %v7915_v61 = vpack.c.bf16 %v7914_v30, %v7914_v30 }
0x1bb6   :  { %11674 = vmatmul.mubr.msk.bf16.vlgmr.msra.gmra.mrb[76].mxu1 %vm5902_vm1, %v7915_v61 }
0x1bb7   :  { %11678 = vmatpush3.bf16.msra.mxu1 %v12640_v60  ;;  %11681 = vmatprep.mubr.msk.bf16.mxu1 %vm13051_vm0, %v13050_v39 }
0x1bb8   :  { %11679 = vmatprep.subr.bf16.mxu1 %v13050_v39 }
0x1bbb   :  { %11680 = vmatpush3.bf16.msra.mxu1 %v12641_v43  ;;  %v12663_v43 = vld [vmem:[#allocation16 + $0xa8] sm:$0xff]  }
0x1bbc   :  { %11685 = vmatprep.subr.bf16.mxu1 %v13050_v39 }
0x1c89   :  { %v7978_v22 = vpop.f32.mrb[76].mxu1 }
0x1c8a   :  { %v7979_v48 = vadd.f32 %v10860_v33, %v7978_v22  ;;  %v11675_v62 = vpop.f32.mrb[77].mxu1  ;;  %v10917_v33 = vld [vmem:[#allocation15 + $0xa] ss:$0 sm:$0xff] }
0x1c8b   :  { %v7981_v0 = vpop.f32.mrb[78].mxu1 }
0x1c8c   :  { %v7984_v57 = vmax.f32 %v7979_v48, 0.0  ;;  %v11676_v1 = vpop.f32.mrb[79].mxu1 }
0x1c8e   :  { %v7985_v4 = vpack.c.bf16 %v7984_v57, %v7984_v57 }
0x1c90   :  { %11682 = vmatmul.mubr.msk.bf16.vlgmr.msra.gmra.mrb[80].mxu1 %vm5902_vm1, %v7985_v4 }
0x1c91   :  { %11686 = vmatpush3.bf16.msra.mxu1 %v12642_v2  ;;  %11701 = vmatprep.mubr.msk.bf16.mxu1 %vm13051_vm0, %v13050_v39  ;;  %v12664_v2 = vld [vmem:[#allocation19 + $0xa0] sm:$0xff]  }
0x1c92   :  { %11687 = vmatprep.subr.bf16.mxu1 %v13050_v39 }
0x1c95   :  { %11688 = vmatpush3.bf16.msra.mxu1 %v12643_v5  ;;  %v12665_v5 = vld [vmem:[#allocation19 + $0xa8] sm:$0xff]  }
0x1c96   :  { %11689 = vmatprep.subr.bf16.mxu1 %v13050_v39 }
0x1c99   :  { %11690 = vmatpush3.bf16.msra.mxu1 %v12644_v54  ;;  %v10926_v54 = vld [vmem:[#allocation18 + $0xa] ss:$0 sm:$0xff] }
0x1c9a   :  { %11691 = vmatprep.subr.bf16.mxu1 %v13050_v39 }
0x1c9d   :  { %11692 = vmatpush3.bf16.msra.mxu1 %v12645_v6 }
0x1c9e   :  { %11693 = vmatprep.subr.bf16.mxu1 %v13050_v39 }
0x1ca1   :  { %11694 = vmatpush3.bf16.msra.mxu1 %v12646_v7 }
0x1ca2   :  { %11695 = vmatprep.subr.bf16.mxu1 %v13050_v39 }
0x1ca5   :  { %11696 = vmatpush3.bf16.msra.mxu1 %v12647_v51 }
0x1ca6   :  { %11697 = vmatprep.subr.bf16.mxu1 %v13050_v39 }
0x1ca9   :  { %11698 = vmatpush3.bf16.msra.mxu1 %v12648_v8 }
0x1caa   :  { %11699 = vmatprep.subr.bf16.mxu1 %v13050_v39 }
0x1cad   :  { %11700 = vmatpush3.bf16.msra.mxu1 %v12649_v10 }
0x1cae   :  { %11741 = vmatprep.subr.bf16.mxu1 %v13050_v39 }
0x1d63   :  { %v8048_v13 = vpop.f32.mrb[80].mxu1 }
0x1d64   :  { %v8049_v14 = vadd.f32 %v10864_v12, %v8048_v13  ;;  %v11683_v15 = vpop.f32.mrb[81].mxu1  ;;  %v12666_v12 = vld [vmem:[%s14272_s9 + $0x2c0] sm:$0xff]  }
0x1d65   :  { %v8051_v16 = vpop.f32.mrb[82].mxu1  ;;  %v12668_v15 = vld [vmem:[%s14272_s9 + $0x2d0] sm:$0xff]  }
0x1d66   :  { %v13960_v17 = vadd.f32 %v8049_v14, %v13911_v53  ;;  %v11684_v18 = vpop.f32.mrb[83].mxu1  ;;  %v12658_v53 = vld [vmem:[%s14272_s9 + $0x2a0] sm:$0xff]   ;;  %v12667_v14 = vld [vmem:[%s14272_s9 + $0x2c8] sm:$0xff]   ;;  %v12669_v16 = vld [vmem:[%s14272_s9 + $0x2d8] sm:$0xff]  }
0x1d67   :  { %v12671_v18 = vld [vmem:[%s14272_s9 + $0x2e8] sm:$0xff]  }
0x1d68   :  { %v8055_v19 = vpack.c.bf16 %v13960_v17, %v13960_v17 }
0x1d6a   :  { %11702 = vmatmul.mubr.bf16.vlgmr.msra.gmra.mrb[84].mxu1 %v8055_v19  ;;  %v12672_v19 = vld [vmem:[%s14272_s9 + $0x2f0] sm:$0xff]  }
0x1d6b   :  { %11745 = vmatprep.mubr.msk.bf16.mxu1 %vm13051_vm0, %v13050_v39  ;;  %11742 = vmatpush3.bf16.msra.mxu1 %v12662_v52 }
0x1d6c   :  { %11743 = vmatprep.subr.bf16.mxu1 %v13050_v39 }
0x1d6f   :  { %11744 = vmatpush3.bf16.msra.mxu1 %v12663_v43  ;;  %v12685_v43 = vld [vmem:[%s14272_s9 + $0x338] sm:$0xff]  }
0x1d70   :  { %11749 = vmatprep.subr.bf16.mxu1 %v13050_v39 }
0x1e3d   :  { %v8163_v23 = vpop.f32.mrb[84].mxu1 }
0x1e3e   :  { %v8164_v24 = vadd.f32 %v10884_v21, %v8163_v23  ;;  %v11703_v9 = vpop.f32.mrb[85].mxu1  ;;  %v12674_v21 = vld [vmem:[#allocation16 + $0xb0] sm:$0xff]   ;;  %v10930_v23 = vld [vmem:[#allocation21 + $0xa] ss:$0 sm:$0xff] }
0x1e3f   :  { %v8166_v25 = vpop.f32.mrb[86].mxu1 }
0x1e40   :  { %v8169_v26 = vmax.f32 %v8164_v24, 0.0  ;;  %v11704_v34 = vpop.f32.mrb[87].mxu1 }
0x1e42   :  { %v8170_v31 = vpack.c.bf16 %v8169_v26, %v8169_v26 }
0x1e44   :  { %11710 = vmatmul.mubr.msk.bf16.vlgmr.msra.gmra.mrb[56].mxu0 %vm5902_vm1, %v8170_v31 }
0x1e45   :  { %11714 = vmatpush3.bf16.msra.mxu0 %v12652_v29  ;;  %11717 = vmatprep.mubr.msk.bf16.mxu0 %vm13051_vm0, %v13050_v39 }
0x1e46   :  { %11715 = vmatprep.subr.bf16.mxu0 %v13050_v39 }
0x1e49   :  { %11716 = vmatpush3.bf16.msra.mxu0 %v12653_v42  ;;  %v12675_v42 = vld [vmem:[#allocation16 + $0xb8] sm:$0xff]  }
0x1e4a   :  { %11721 = vmatprep.subr.bf16.mxu0 %v13050_v39 }
0x1f17   :  { %v8233_v35 = vpop.f32.mrb[56].mxu0 }
0x1f18   :  { %v8234_v63 = vadd.f32 %v10893_v32, %v8233_v35  ;;  %v11711_v59 = vpop.f32.mrb[57].mxu0  ;;  %v10950_v32 = vld [vmem:[#allocation15 + $0xb] ss:$0 sm:$0xff] }
0x1f19   :  { %v8236_v36 = vpop.f32.mrb[58].mxu0 }
0x1f1a   :  { %v8239_v38 = vmax.f32 %v8234_v63, 0.0  ;;  %v11712_v40 = vpop.f32.mrb[59].mxu0 }
0x1f1c   :  { %v8240_v44 = vpack.c.bf16 %v8239_v38, %v8239_v38 }
0x1f1e   :  { %11718 = vmatmul.mubr.msk.bf16.vlgmr.msra.gmra.mrb[60].mxu0 %vm5902_vm1, %v8240_v44 }
0x1f1f   :  { %11722 = vmatpush3.bf16.msra.mxu0 %v12654_v41  ;;  %11737 = vmatprep.mubr.msk.bf16.mxu0 %vm13051_vm0, %v13050_v39  ;;  %v12676_v41 = vld [vmem:[#allocation19 + $0xb0] sm:$0xff]  }
0x1f20   :  { %11723 = vmatprep.subr.bf16.mxu0 %v13050_v39 }
0x1f23   :  { %11724 = vmatpush3.bf16.msra.mxu0 %v12655_v37  ;;  %v12677_v37 = vld [vmem:[#allocation19 + $0xb8] sm:$0xff]  }
0x1f24   :  { %11725 = vmatprep.subr.bf16.mxu0 %v13050_v39 }
0x1f27   :  { %11726 = vmatpush3.bf16.msra.mxu0 %v12656_v45  ;;  %v10959_v45 = vld [vmem:[#allocation18 + $0xb] ss:$0 sm:$0xff] }
0x1f28   :  { %11727 = vmatprep.subr.bf16.mxu0 %v13050_v39 }
0x1f2b   :  { %11728 = vmatpush3.bf16.msra.mxu0 %v12657_v46 }
0x1f2c   :  { %11729 = vmatprep.subr.bf16.mxu0 %v13050_v39 }
0x1f2f   :  { %11730 = vmatpush3.bf16.msra.mxu0 %v12658_v53 }
0x1f30   :  { %11731 = vmatprep.subr.bf16.mxu0 %v13050_v39 }
0x1f33   :  { %11732 = vmatpush3.bf16.msra.mxu0 %v12659_v47 }
0x1f34   :  { %11733 = vmatprep.subr.bf16.mxu0 %v13050_v39 }
0x1f37   :  { %11734 = vmatpush3.bf16.msra.mxu0 %v12660_v49 }
0x1f38   :  { %11735 = vmatprep.subr.bf16.mxu0 %v13050_v39 }
0x1f3b   :  { %11736 = vmatpush3.bf16.msra.mxu0 %v12661_v50 }
0x1f3c   :  { %11777 = vmatprep.subr.bf16.mxu0 %v13050_v39 }
0x1ff1   :  { %v8303_v56 = vpop.f32.mrb[60].mxu0 }
0x1ff2   :  { %v8304_v27 = vadd.f32 %v10897_v55, %v8303_v56  ;;  %v11719_v58 = vpop.f32.mrb[61].mxu0  ;;  %v12678_v55 = vld [vmem:[%s14272_s9 + $0x300] sm:$0xff]  }
0x1ff3   :  { %v8306_v30 = vpop.f32.mrb[62].mxu0  ;;  %v12680_v58 = vld [vmem:[%s14272_s9 + $0x310] sm:$0xff]  }
0x1ff4   :  { %v14009_v28 = vadd.f32 %v8304_v27, %v13960_v17  ;;  %v11720_v60 = vpop.f32.mrb[63].mxu0  ;;  %v12670_v17 = vld [vmem:[%s14272_s9 + $0x2e0] sm:$0xff]   ;;  %v12679_v27 = vld [vmem:[%s14272_s9 + $0x308] sm:$0xff]   ;;  %v12681_v30 = vld [vmem:[%s14272_s9 + $0x318] sm:$0xff]  }
0x1ff5   :  { %v12683_v60 = vld [vmem:[%s14272_s9 + $0x328] sm:$0xff]  }
0x1ff6   :  { %v8310_v61 = vpack.c.bf16 %v14009_v28, %v14009_v28 }
0x1ff8   :  { %11738 = vmatmul.mubr.bf16.vlgmr.msra.gmra.mrb[64].mxu0 %v8310_v61  ;;  %v12684_v61 = vld [vmem:[%s14272_s9 + $0x330] sm:$0xff]  }
0x1ff9   :  { %11781 = vmatprep.mubr.msk.bf16.mxu0 %vm13051_vm0, %v13050_v39  ;;  %11778 = vmatpush3.bf16.msra.mxu0 %v12674_v21 }
0x1ffa   :  { %11779 = vmatprep.subr.bf16.mxu0 %v13050_v39 }
0x1ffd   :  { %11780 = vmatpush3.bf16.msra.mxu0 %v12675_v42  ;;  %v12697_v42 = vld [vmem:[%s14272_s9 + $0x378] sm:$0xff]  }
0x1ffe   :  { %11785 = vmatprep.subr.bf16.mxu0 %v13050_v39 }
0x20cb   :  { %v8418_v22 = vpop.f32.mrb[64].mxu0 }
0x20cc   :  { %v8419_v48 = vadd.f32 %v10917_v33, %v8418_v22  ;;  %v11739_v62 = vpop.f32.mrb[65].mxu0  ;;  %v12686_v33 = vld [vmem:[#allocation16 + $0xc0] sm:$0xff]   ;;  %v10963_v22 = vld [vmem:[#allocation21 + $0xb] ss:$0 sm:$0xff] }
0x20cd   :  { %v8421_v0 = vpop.f32.mrb[66].mxu0 }
0x20ce   :  { %v8424_v57 = vmax.f32 %v8419_v48, 0.0  ;;  %v11740_v1 = vpop.f32.mrb[67].mxu0 }
0x20d0   :  { %v8425_v4 = vpack.c.bf16 %v8424_v57, %v8424_v57 }
0x20d2   :  { %11746 = vmatmul.mubr.msk.bf16.vlgmr.msra.gmra.mrb[88].mxu1 %vm5902_vm1, %v8425_v4 }
0x20d3   :  { %11750 = vmatpush3.bf16.msra.mxu1 %v12664_v2  ;;  %11753 = vmatprep.mubr.msk.bf16.mxu1 %vm13051_vm0, %v13050_v39 }
0x20d4   :  { %11751 = vmatprep.subr.bf16.mxu1 %v13050_v39 }
0x20d7   :  { %11752 = vmatpush3.bf16.msra.mxu1 %v12665_v5  ;;  %v12687_v5 = vld [vmem:[#allocation16 + $0xc8] sm:$0xff]  }
0x20d8   :  { %11757 = vmatprep.subr.bf16.mxu1 %v13050_v39 }
0x21a5   :  { %v8488_v6 = vpop.f32.mrb[88].mxu1 }
0x21a6   :  { %v8489_v7 = vadd.f32 %v10926_v54, %v8488_v6  ;;  %v11747_v51 = vpop.f32.mrb[89].mxu1  ;;  %v10983_v54 = vld [vmem:[#allocation15 + $0xc] ss:$0 sm:$0xff] }
0x21a7   :  { %v8491_v8 = vpop.f32.mrb[90].mxu1 }
0x21a8   :  { %v8494_v10 = vmax.f32 %v8489_v7, 0.0  ;;  %v11748_v11 = vpop.f32.mrb[91].mxu1 }
0x21aa   :  { %v8495_v13 = vpack.c.bf16 %v8494_v10, %v8494_v10 }
0x21ac   :  { %11754 = vmatmul.mubr.msk.bf16.vlgmr.msra.gmra.mrb[92].mxu1 %vm5902_vm1, %v8495_v13 }
0x21ad   :  { %11758 = vmatpush3.bf16.msra.mxu1 %v12666_v12  ;;  %11773 = vmatprep.mubr.msk.bf16.mxu1 %vm13051_vm0, %v13050_v39  ;;  %v12688_v12 = vld [vmem:[#allocation19 + $0xc0] sm:$0xff]  }
0x21ae   :  { %11759 = vmatprep.subr.bf16.mxu1 %v13050_v39 }
0x21b1   :  { %11760 = vmatpush3.bf16.msra.mxu1 %v12667_v14  ;;  %v12689_v14 = vld [vmem:[#allocation19 + $0xc8] sm:$0xff]  }
0x21b2   :  { %11761 = vmatprep.subr.bf16.mxu1 %v13050_v39 }
0x21b5   :  { %11762 = vmatpush3.bf16.msra.mxu1 %v12668_v15  ;;  %v10992_v15 = vld [vmem:[#allocation18 + $0xc] ss:$0 sm:$0xff] }
0x21b6   :  { %11763 = vmatprep.subr.bf16.mxu1 %v13050_v39 }
0x21b9   :  { %11764 = vmatpush3.bf16.msra.mxu1 %v12669_v16 }
0x21ba   :  { %11765 = vmatprep.subr.bf16.mxu1 %v13050_v39 }
0x21bd   :  { %11766 = vmatpush3.bf16.msra.mxu1 %v12670_v17 }
0x21be   :  { %11767 = vmatprep.subr.bf16.mxu1 %v13050_v39 }
0x21c1   :  { %11768 = vmatpush3.bf16.msra.mxu1 %v12671_v18 }
0x21c2   :  { %11769 = vmatprep.subr.bf16.mxu1 %v13050_v39 }
0x21c5   :  { %11770 = vmatpush3.bf16.msra.mxu1 %v12672_v19 }
0x21c6   :  { %11771 = vmatprep.subr.bf16.mxu1 %v13050_v39 }
0x21c9   :  { %11772 = vmatpush3.bf16.msra.mxu1 %v12673_v20 }
0x21ca   :  { %11813 = vmatprep.subr.bf16.mxu1 %v13050_v39 }
0x227f   :  { %v8558_v24 = vpop.f32.mrb[92].mxu1 }
0x2280   :  { %v8559_v9 = vadd.f32 %v10930_v23, %v8558_v24  ;;  %v11755_v25 = vpop.f32.mrb[93].mxu1  ;;  %v12690_v23 = vld [vmem:[%s14272_s9 + $0x340] sm:$0xff]  }
0x2281   :  { %v8561_v26 = vpop.f32.mrb[94].mxu1  ;;  %v12692_v25 = vld [vmem:[%s14272_s9 + $0x350] sm:$0xff]  }
0x2282   :  { %v14058_v34 = vadd.f32 %v8559_v9, %v14009_v28  ;;  %v11756_v29 = vpop.f32.mrb[95].mxu1  ;;  %v12682_v28 = vld [vmem:[%s14272_s9 + $0x320] sm:$0xff]   ;;  %v12691_v9 = vld [vmem:[%s14272_s9 + $0x348] sm:$0xff]   ;;  %v12693_v26 = vld [vmem:[%s14272_s9 + $0x358] sm:$0xff]  }
0x2283   :  { %v12695_v29 = vld [vmem:[%s14272_s9 + $0x368] sm:$0xff]  }
0x2284   :  { %v8565_v31 = vpack.c.bf16 %v14058_v34, %v14058_v34 }
0x2286   :  { %11774 = vmatmul.mubr.bf16.vlgmr.msra.gmra.mrb[96].mxu1 %v8565_v31  ;;  %v12696_v31 = vld [vmem:[%s14272_s9 + $0x370] sm:$0xff]  }
0x2287   :  { %11817 = vmatprep.mubr.msk.bf16.mxu1 %vm13051_vm0, %v13050_v39  ;;  %11814 = vmatpush3.bf16.msra.mxu1 %v12686_v33 }
0x2288   :  { %11815 = vmatprep.subr.bf16.mxu1 %v13050_v39 }
0x228b   :  { %11816 = vmatpush3.bf16.msra.mxu1 %v12687_v5  ;;  %v12709_v5 = vld [vmem:[%s14272_s9 + $0x3b8] sm:$0xff]  }
0x228c   :  { %11821 = vmatprep.subr.bf16.mxu1 %v13050_v39 }
0x2359   :  { %v8673_v35 = vpop.f32.mrb[96].mxu1 }
0x235a   :  { %v8674_v63 = vadd.f32 %v10950_v32, %v8673_v35  ;;  %v11775_v59 = vpop.f32.mrb[97].mxu1  ;;  %v12698_v32 = vld [vmem:[#allocation16 + $0xd0] sm:$0xff]   ;;  %v10996_v35 = vld [vmem:[#allocation21 + $0xc] ss:$0 sm:$0xff] }
0x235b   :  { %v8676_v36 = vpop.f32.mrb[98].mxu1 }
0x235c   :  { %v8679_v38 = vmax.f32 %v8674_v63, 0.0  ;;  %v11776_v40 = vpop.f32.mrb[99].mxu1 }
0x235e   :  { %v8680_v44 = vpack.c.bf16 %v8679_v38, %v8679_v38 }
0x2360   :  { %11782 = vmatmul.mubr.msk.bf16.vlgmr.msra.gmra.mrb[68].mxu0 %vm5902_vm1, %v8680_v44 }
0x2361   :  { %11786 = vmatpush3.bf16.msra.mxu0 %v12676_v41  ;;  %11789 = vmatprep.mubr.msk.bf16.mxu0 %vm13051_vm0, %v13050_v39 }
0x2362   :  { %11787 = vmatprep.subr.bf16.mxu0 %v13050_v39 }
0x2365   :  { %11788 = vmatpush3.bf16.msra.mxu0 %v12677_v37  ;;  %v12699_v37 = vld [vmem:[#allocation16 + $0xd8] sm:$0xff]  }
0x2366   :  { %11793 = vmatprep.subr.bf16.mxu0 %v13050_v39 }
0x2433   :  { %v8743_v46 = vpop.f32.mrb[68].mxu0 }
0x2434   :  { %v8744_v53 = vadd.f32 %v10959_v45, %v8743_v46  ;;  %v11783_v47 = vpop.f32.mrb[69].mxu0  ;;  %v11016_v45 = vld [vmem:[#allocation15 + $0xd] ss:$0 sm:$0xff] }
0x2435   :  { %v8746_v49 = vpop.f32.mrb[70].mxu0 }
0x2436   :  { %v8749_v50 = vmax.f32 %v8744_v53, 0.0  ;;  %v11784_v52 = vpop.f32.mrb[71].mxu0 }
0x2438   :  { %v8750_v56 = vpack.c.bf16 %v8749_v50, %v8749_v50 }
0x243a   :  { %11790 = vmatmul.mubr.msk.bf16.vlgmr.msra.gmra.mrb[72].mxu0 %vm5902_vm1, %v8750_v56 }
0x243b   :  { %11794 = vmatpush3.bf16.msra.mxu0 %v12678_v55  ;;  %11809 = vmatprep.mubr.msk.bf16.mxu0 %vm13051_vm0, %v13050_v39  ;;  %v12700_v55 = vld [vmem:[#allocation19 + $0xd0] sm:$0xff]  }
0x243c   :  { %11795 = vmatprep.subr.bf16.mxu0 %v13050_v39 }
0x243f   :  { %11796 = vmatpush3.bf16.msra.mxu0 %v12679_v27  ;;  %v12701_v27 = vld [vmem:[#allocation19 + $0xd8] sm:$0xff]  }
0x2440   :  { %11797 = vmatprep.subr.bf16.mxu0 %v13050_v39 }
0x2443   :  { %11798 = vmatpush3.bf16.msra.mxu0 %v12680_v58  ;;  %v11025_v58 = vld [vmem:[#allocation18 + $0xd] ss:$0 sm:$0xff] }
0x2444   :  { %11799 = vmatprep.subr.bf16.mxu0 %v13050_v39 }
0x2447   :  { %11800 = vmatpush3.bf16.msra.mxu0 %v12681_v30 }
0x2448   :  { %11801 = vmatprep.subr.bf16.mxu0 %v13050_v39 }
0x244b   :  { %11802 = vmatpush3.bf16.msra.mxu0 %v12682_v28 }
0x244c   :  { %11803 = vmatprep.subr.bf16.mxu0 %v13050_v39 }
0x244f   :  { %11804 = vmatpush3.bf16.msra.mxu0 %v12683_v60 }
0x2450   :  { %11805 = vmatprep.subr.bf16.mxu0 %v13050_v39 }
0x2453   :  { %11806 = vmatpush3.bf16.msra.mxu0 %v12684_v61 }
0x2454   :  { %11807 = vmatprep.subr.bf16.mxu0 %v13050_v39 }
0x2457   :  { %11808 = vmatpush3.bf16.msra.mxu0 %v12685_v43 }
0x2458   :  { %11849 = vmatprep.subr.bf16.mxu0 %v13050_v39 }
0x250d   :  { %v8813_v48 = vpop.f32.mrb[72].mxu0 }
0x250e   :  { %v8814_v62 = vadd.f32 %v10963_v22, %v8813_v48  ;;  %v11791_v0 = vpop.f32.mrb[73].mxu0  ;;  %v12702_v22 = vld [vmem:[%s14272_s9 + $0x380] sm:$0xff]  }
0x250f   :  { %v8816_v57 = vpop.f32.mrb[74].mxu0  ;;  %v12704_v0 = vld [vmem:[%s14272_s9 + $0x390] sm:$0xff]  }
0x2510   :  { %v14107_v1 = vadd.f32 %v8814_v62, %v14058_v34  ;;  %v11792_v2 = vpop.f32.mrb[75].mxu0  ;;  %v12694_v34 = vld [vmem:[%s14272_s9 + $0x360] sm:$0xff]   ;;  %v12703_v62 = vld [vmem:[%s14272_s9 + $0x388] sm:$0xff]   ;;  %v12705_v57 = vld [vmem:[%s14272_s9 + $0x398] sm:$0xff]  }
0x2511   :  { %v12707_v2 = vld [vmem:[%s14272_s9 + $0x3a8] sm:$0xff]  }
0x2512   :  { %v8820_v4 = vpack.c.bf16 %v14107_v1, %v14107_v1 }
0x2514   :  { %11810 = vmatmul.mubr.bf16.vlgmr.msra.gmra.mrb[76].mxu0 %v8820_v4  ;;  %v12708_v4 = vld [vmem:[%s14272_s9 + $0x3b0] sm:$0xff]  }
0x2515   :  { %11853 = vmatprep.mubr.msk.bf16.mxu0 %vm13051_vm0, %v13050_v39  ;;  %11850 = vmatpush3.bf16.msra.mxu0 %v12698_v32 }
0x2516   :  { %11851 = vmatprep.subr.bf16.mxu0 %v13050_v39 }
0x2519   :  { %11852 = vmatpush3.bf16.msra.mxu0 %v12699_v37  ;;  %v12721_v37 = vld [vmem:[%s14272_s9 + $0x3f8] sm:$0xff]  }
0x251a   :  { %11857 = vmatprep.subr.bf16.mxu0 %v13050_v39 }
0x25e7   :  { %v8928_v6 = vpop.f32.mrb[76].mxu0 }
0x25e8   :  { %v8929_v7 = vadd.f32 %v10983_v54, %v8928_v6  ;;  %v11811_v51 = vpop.f32.mrb[77].mxu0  ;;  %v12710_v54 = vld [vmem:[#allocation16 + $0xe0] sm:$0xff]   ;;  %v11029_v6 = vld [vmem:[#allocation21 + $0xd] ss:$0 sm:$0xff] }
0x25e9   :  { %v8931_v8 = vpop.f32.mrb[78].mxu0 }
0x25ea   :  { %v8934_v10 = vmax.f32 %v8929_v7, 0.0  ;;  %v11812_v11 = vpop.f32.mrb[79].mxu0 }
0x25ec   :  { %v8935_v13 = vpack.c.bf16 %v8934_v10, %v8934_v10 }
0x25ee   :  { %11818 = vmatmul.mubr.msk.bf16.vlgmr.msra.gmra.mrb[100].mxu1 %vm5902_vm1, %v8935_v13 }
0x25ef   :  { %11822 = vmatpush3.bf16.msra.mxu1 %v12688_v12  ;;  %11825 = vmatprep.mubr.msk.bf16.mxu1 %vm13051_vm0, %v13050_v39 }
0x25f0   :  { %11823 = vmatprep.subr.bf16.mxu1 %v13050_v39 }
0x25f3   :  { %11824 = vmatpush3.bf16.msra.mxu1 %v12689_v14  ;;  %v12711_v14 = vld [vmem:[#allocation16 + $0xe8] sm:$0xff]  }
0x25f4   :  { %11829 = vmatprep.subr.bf16.mxu1 %v13050_v39 }
0x26c1   :  { %v8998_v16 = vpop.f32.mrb[100].mxu1 }
0x26c2   :  { %v8999_v17 = vadd.f32 %v10992_v15, %v8998_v16  ;;  %v11819_v18 = vpop.f32.mrb[101].mxu1  ;;  %v11049_v15 = vld [vmem:[#allocation15 + $0xe] ss:$0 sm:$0xff] }
0x26c3   :  { %v9001_v19 = vpop.f32.mrb[102].mxu1 }
0x26c4   :  { %v9004_v20 = vmax.f32 %v8999_v17, 0.0  ;;  %v11820_v21 = vpop.f32.mrb[103].mxu1 }
0x26c6   :  { %v9005_v24 = vpack.c.bf16 %v9004_v20, %v9004_v20 }
0x26c8   :  { %11826 = vmatmul.mubr.msk.bf16.vlgmr.msra.gmra.mrb[104].mxu1 %vm5902_vm1, %v9005_v24 }
0x26c9   :  { %11830 = vmatpush3.bf16.msra.mxu1 %v12690_v23  ;;  %11845 = vmatprep.mubr.msk.bf16.mxu1 %vm13051_vm0, %v13050_v39  ;;  %v12712_v23 = vld [vmem:[#allocation19 + $0xe0] sm:$0xff]  }
0x26ca   :  { %11831 = vmatprep.subr.bf16.mxu1 %v13050_v39 }
0x26cd   :  { %11832 = vmatpush3.bf16.msra.mxu1 %v12691_v9  ;;  %v12713_v9 = vld [vmem:[#allocation19 + $0xe8] sm:$0xff]  }
0x26ce   :  { %11833 = vmatprep.subr.bf16.mxu1 %v13050_v39 }
0x26d1   :  { %11834 = vmatpush3.bf16.msra.mxu1 %v12692_v25  ;;  %v11058_v25 = vld [vmem:[#allocation18 + $0xe] ss:$0 sm:$0xff] }
0x26d2   :  { %11835 = vmatprep.subr.bf16.mxu1 %v13050_v39 }
0x26d5   :  { %11836 = vmatpush3.bf16.msra.mxu1 %v12693_v26 }
0x26d6   :  { %11837 = vmatprep.subr.bf16.mxu1 %v13050_v39 }
0x26d9   :  { %11838 = vmatpush3.bf16.msra.mxu1 %v12694_v34 }
0x26da   :  { %11839 = vmatprep.subr.bf16.mxu1 %v13050_v39 }
0x26dd   :  { %11840 = vmatpush3.bf16.msra.mxu1 %v12695_v29 }
0x26de   :  { %11841 = vmatprep.subr.bf16.mxu1 %v13050_v39 }
0x26e1   :  { %11842 = vmatpush3.bf16.msra.mxu1 %v12696_v31 }
0x26e2   :  { %11843 = vmatprep.subr.bf16.mxu1 %v13050_v39 }
0x26e5   :  { %11844 = vmatpush3.bf16.msra.mxu1 %v12697_v42 }
0x26e6   :  { %11885 = vmatprep.subr.bf16.mxu1 %v13050_v39 }
0x279b   :  { %v9068_v63 = vpop.f32.mrb[104].mxu1 }
0x279c   :  { %v9069_v59 = vadd.f32 %v10996_v35, %v9068_v63  ;;  %v11827_v36 = vpop.f32.mrb[105].mxu1  ;;  %v12714_v35 = vld [vmem:[%s14272_s9 + $0x3c0] sm:$0xff]  }
0x279d   :  { %v9071_v38 = vpop.f32.mrb[106].mxu1  ;;  %v12716_v36 = vld [vmem:[%s14272_s9 + $0x3d0] sm:$0xff]  }
0x279e   :  { %v14156_v40 = vadd.f32 %v9069_v59, %v14107_v1  ;;  %v11828_v41 = vpop.f32.mrb[107].mxu1  ;;  %v12706_v1 = vld [vmem:[%s14272_s9 + $0x3a0] sm:$0xff]   ;;  %v12715_v59 = vld [vmem:[%s14272_s9 + $0x3c8] sm:$0xff]   ;;  %v12717_v38 = vld [vmem:[%s14272_s9 + $0x3d8] sm:$0xff]  }
0x279f   :  { %v12719_v41 = vld [vmem:[%s14272_s9 + $0x3e8] sm:$0xff]  }
0x27a0   :  { %v9075_v44 = vpack.c.bf16 %v14156_v40, %v14156_v40 }
0x27a2   :  { %11846 = vmatmul.mubr.bf16.vlgmr.msra.gmra.mrb[108].mxu1 %v9075_v44  ;;  %v12720_v44 = vld [vmem:[%s14272_s9 + $0x3f0] sm:$0xff]  }
0x27a3   :  { %11889 = vmatprep.mubr.msk.bf16.mxu1 %vm13051_vm0, %v13050_v39  ;;  %11886 = vmatpush3.bf16.msra.mxu1 %v12710_v54 }
0x27a4   :  { %11887 = vmatprep.subr.bf16.mxu1 %v13050_v39 }
0x27a7   :  { %11888 = vmatpush3.bf16.msra.mxu1 %v12711_v14 }
0x27a8   :  { %11893 = vmatprep.subr.bf16.mxu1 %v13050_v39 }
0x2875   :  { %v9183_v46 = vpop.f32.mrb[108].mxu1 }
0x2876   :  { %v9184_v53 = vadd.f32 %v11016_v45, %v9183_v46  ;;  %v11847_v47 = vpop.f32.mrb[109].mxu1  ;;  %v12722_v45 = vld [vmem:[#allocation16 + $0xf0] sm:$0xff]   ;;  %v11062_v46 = vld [vmem:[#allocation21 + $0xe] ss:$0 sm:$0xff] }
0x2877   :  { %v9186_v49 = vpop.f32.mrb[110].mxu1 }
0x2878   :  { %v9189_v50 = vmax.f32 %v9184_v53, 0.0  ;;  %v11848_v52 = vpop.f32.mrb[111].mxu1 }
0x287a   :  { %v9190_v56 = vpack.c.bf16 %v9189_v50, %v9189_v50 }
0x287c   :  { %11854 = vmatmul.mubr.msk.bf16.vlgmr.msra.gmra.mrb[80].mxu0 %vm5902_vm1, %v9190_v56 }
0x287d   :  { %11858 = vmatpush3.bf16.msra.mxu0 %v12700_v55  ;;  %11861 = vmatprep.mubr.msk.bf16.mxu0 %vm13051_vm0, %v13050_v39 }
0x287e   :  { %11859 = vmatprep.subr.bf16.mxu0 %v13050_v39 }
0x2881   :  { %11860 = vmatpush3.bf16.msra.mxu0 %v12701_v27  ;;  %v12723_v27 = vld [vmem:[#allocation16 + $0xf8] sm:$0xff]  }
0x2882   :  { %11865 = vmatprep.subr.bf16.mxu0 %v13050_v39 }
0x294f   :  { %v9253_v30 = vpop.f32.mrb[80].mxu0 }
0x2950   :  { %v9254_v28 = vadd.f32 %v11025_v58, %v9253_v30  ;;  %v11855_v60 = vpop.f32.mrb[81].mxu0  ;;  %v11082_v58 = vld [vmem:[#allocation15 + $0xf] ss:$0 sm:$0xff] }
0x2951   :  { %v9256_v61 = vpop.f32.mrb[82].mxu0 }
0x2952   :  { %v9259_v43 = vmax.f32 %v9254_v28, 0.0  ;;  %v11856_v33 = vpop.f32.mrb[83].mxu0 }
0x2954   :  { %v9260_v48 = vpack.c.bf16 %v9259_v43, %v9259_v43 }
0x2956   :  { %11862 = vmatmul.mubr.msk.bf16.vlgmr.msra.gmra.mrb[84].mxu0 %vm5902_vm1, %v9260_v48 }
0x2957   :  { %11866 = vmatpush3.bf16.msra.mxu0 %v12702_v22  ;;  %11881 = vmatprep.mubr.msk.bf16.mxu0 %vm13051_vm0, %v13050_v39  ;;  %v12724_v22 = vld [vmem:[#allocation19 + $0xf0] sm:$0xff]  }
0x2958   :  { %11867 = vmatprep.subr.bf16.mxu0 %v13050_v39 }
0x295b   :  { %11868 = vmatpush3.bf16.msra.mxu0 %v12703_v62  ;;  %v12725_v62 = vld [vmem:[#allocation19 + $0xf8] sm:$0xff]  }
0x295c   :  { %11869 = vmatprep.subr.bf16.mxu0 %v13050_v39 }
0x295f   :  { %11870 = vmatpush3.bf16.msra.mxu0 %v12704_v0  ;;  %v11091_v0 = vld [vmem:[#allocation18 + $0xf] ss:$0 sm:$0xff] }
0x2960   :  { %11871 = vmatprep.subr.bf16.mxu0 %v13050_v39 }
0x2963   :  { %11872 = vmatpush3.bf16.msra.mxu0 %v12705_v57 }
0x2964   :  { %11873 = vmatprep.subr.bf16.mxu0 %v13050_v39 }
0x2967   :  { %11874 = vmatpush3.bf16.msra.mxu0 %v12706_v1 }
0x2968   :  { %11875 = vmatprep.subr.bf16.mxu0 %v13050_v39 }
0x296b   :  { %11876 = vmatpush3.bf16.msra.mxu0 %v12707_v2 }
0x296c   :  { %11877 = vmatprep.subr.bf16.mxu0 %v13050_v39 }
0x296f   :  { %11878 = vmatpush3.bf16.msra.mxu0 %v12708_v4 }
0x2970   :  { %11879 = vmatprep.subr.bf16.mxu0 %v13050_v39 }
0x2973   :  { %11880 = vmatpush3.bf16.msra.mxu0 %v12709_v5 }
0x2974   :  { %11921 = vmatprep.subr.bf16.mxu0 %v13050_v39 }
0x2a29   :  { %v9323_v7 = vpop.f32.mrb[84].mxu0 }
0x2a2a   :  { %v9324_v51 = vadd.f32 %v11029_v6, %v9323_v7  ;;  %v11863_v8 = vpop.f32.mrb[85].mxu0  ;;  %v11095_v7 = vld [vmem:[#allocation21 + $0xf] ss:$0 sm:$0xff] }
0x2a2b   :  { %v9326_v10 = vpop.f32.mrb[86].mxu0 }
0x2a2c   :  { %v14205_v11 = vadd.f32 %v9324_v51, %v14156_v40  ;;  %v11864_v12 = vpop.f32.mrb[87].mxu0  ;;  %v12718_v40 = vld [vmem:[%s14272_s9 + $0x3e0] sm:$0xff]  }
0x2a2e   :  { %v9330_v13 = vpack.c.bf16 %v14205_v11, %v14205_v11 }
0x2a30   :  { %11882 = vmatmul.mubr.bf16.vlgmr.msra.gmra.mrb[88].mxu0 %v9330_v13 }
0x2a31   :  { %11925 = vmatprep.mubr.msk.bf16.mxu0 %vm13051_vm0, %v13050_v39  ;;  %11922 = vmatpush3.bf16.msra.mxu0 %v12722_v45 }
0x2a32   :  { %11923 = vmatprep.subr.bf16.mxu0 %v13050_v39 }
0x2a35   :  { %11924 = vmatpush3.bf16.msra.mxu0 %v12723_v27 }
0x2a36   :  { %11929 = vmatprep.subr.bf16.mxu0 %v13050_v39 }
0x2b03   :  { %v9438_v16 = vpop.f32.mrb[88].mxu0 }
0x2b04   :  { %v9439_v17 = vadd.f32 %v11049_v15, %v9438_v16  ;;  %v11883_v18 = vpop.f32.mrb[89].mxu0 }
0x2b05   :  { %v9441_v19 = vpop.f32.mrb[90].mxu0 }
0x2b06   :  { %v9444_v20 = vmax.f32 %v9439_v17, 0.0  ;;  %v11884_v21 = vpop.f32.mrb[91].mxu0 }
0x2b08   :  { %v9445_v24 = vpack.c.bf16 %v9444_v20, %v9444_v20 }
0x2b0a   :  { %11890 = vmatmul.mubr.msk.bf16.vlgmr.msra.gmra.mrb[112].mxu1 %vm5902_vm1, %v9445_v24 }
0x2b0b   :  { %11894 = vmatpush3.bf16.msra.mxu1 %v12712_v23  ;;  %11897 = vmatprep.mubr.msk.bf16.mxu1 %vm13051_vm0, %v13050_v39 }
0x2b0c   :  { %11895 = vmatprep.subr.bf16.mxu1 %v13050_v39 }
0x2b0f   :  { %11896 = vmatpush3.bf16.msra.mxu1 %v12713_v9 }
0x2b10   :  { %11901 = vmatprep.subr.bf16.mxu1 %v13050_v39 }
0x2bdd   :  { %v9508_v26 = vpop.f32.mrb[112].mxu1 }
0x2bde   :  { %v9509_v34 = vadd.f32 %v11058_v25, %v9508_v26  ;;  %v11891_v29 = vpop.f32.mrb[113].mxu1 }
0x2bdf   :  { %v9511_v31 = vpop.f32.mrb[114].mxu1 }
0x2be0   :  { %v9514_v42 = vmax.f32 %v9509_v34, 0.0  ;;  %v11892_v32 = vpop.f32.mrb[115].mxu1 }
0x2be2   :  { %v9515_v63 = vpack.c.bf16 %v9514_v42, %v9514_v42 }
0x2be4   :  { %11898 = vmatmul.mubr.msk.bf16.vlgmr.msra.gmra.mrb[116].mxu1 %vm5902_vm1, %v9515_v63 }
0x2be5   :  { %11902 = vmatpush3.bf16.msra.mxu1 %v12714_v35  ;;  %11917 = vmatprep.mubr.msk.bf16.mxu1 %vm13051_vm0, %v13050_v39 }
0x2be6   :  { %11903 = vmatprep.subr.bf16.mxu1 %v13050_v39 }
0x2be9   :  { %11904 = vmatpush3.bf16.msra.mxu1 %v12715_v59 }
0x2bea   :  { %11905 = vmatprep.subr.bf16.mxu1 %v13050_v39 }
0x2bed   :  { %11906 = vmatpush3.bf16.msra.mxu1 %v12716_v36 }
0x2bee   :  { %11907 = vmatprep.subr.bf16.mxu1 %v13050_v39 }
0x2bf1   :  { %11908 = vmatpush3.bf16.msra.mxu1 %v12717_v38 }
0x2bf2   :  { %11909 = vmatprep.subr.bf16.mxu1 %v13050_v39 }
0x2bf5   :  { %11910 = vmatpush3.bf16.msra.mxu1 %v12718_v40 }
0x2bf6   :  { %11911 = vmatprep.subr.bf16.mxu1 %v13050_v39 }
0x2bf9   :  { %11912 = vmatpush3.bf16.msra.mxu1 %v12719_v41 }
0x2bfa   :  { %11913 = vmatprep.subr.bf16.mxu1 %v13050_v39 }
0x2bfd   :  { %11914 = vmatpush3.bf16.msra.mxu1 %v12720_v44 }
0x2bfe   :  { %11915 = vmatprep.subr.bf16.mxu1 %v13050_v39 }
0x2c01   :  { %11916 = vmatpush3.bf16.msra.mxu1 %v12721_v37 }
0x2cb7   :  { %v9578_v53 = vpop.f32.mrb[116].mxu1 }
0x2cb8   :  { %v9579_v47 = vadd.f32 %v11062_v46, %v9578_v53  ;;  %v11899_v49 = vpop.f32.mrb[117].mxu1 }
0x2cb9   :  { %v9581_v50 = vpop.f32.mrb[118].mxu1 }
0x2cba   :  { %v9584_v52 = vadd.f32 %v9579_v47, %v14205_v11  ;;  %v11900_v55 = vpop.f32.mrb[119].mxu1 }
0x2cbc   :  { %v9585_v56 = vpack.c.bf16 %v9584_v52, %v9584_v52 }
0x2cbe   :  { %11918 = vmatmul.mubr.bf16.vlgmr.msra.gmra.mrb[120].mxu1 %v9585_v56 }
0x2d91   :  { %v9693_v30 = vpop.f32.mrb[120].mxu1 }
0x2d92   :  { %v9694_v28 = vadd.f32 %v11082_v58, %v9693_v30  ;;  %v11919_v60 = vpop.f32.mrb[121].mxu1 }
0x2d93   :  { %v9696_v61 = vpop.f32.mrb[122].mxu1 }
0x2d94   :  { %v9699_v43 = vmax.f32 %v9694_v28, 0.0  ;;  %v11920_v33 = vpop.f32.mrb[123].mxu1 }
0x2d96   :  { %v9700_v48 = vpack.c.bf16 %v9699_v43, %v9699_v43 }
0x2d98   :  { %11926 = vmatmul.mubr.msk.bf16.vlgmr.msra.gmra.mrb[92].mxu0 %vm5902_vm1, %v9700_v48 }
0x2d99   :  { %11930 = vmatpush3.bf16.msra.mxu0 %v12724_v22  ;;  %11933 = vmatprep.mubr.msk.bf16.mxu0 %vm13051_vm0, %v13050_v39 }
0x2d9a   :  { %11931 = vmatprep.subr.bf16.mxu0 %v13050_v39 }
0x2d9d   :  { %11932 = vmatpush3.bf16.msra.mxu0 %v12725_v62 }
0x2e6b   :  { %v9763_v57 = vpop.f32.mrb[92].mxu0 }
0x2e6c   :  { %v9764_v1 = vadd.f32 %v11091_v0, %v9763_v57  ;;  %v11927_v2 = vpop.f32.mrb[93].mxu0 }
0x2e6d   :  { %v9766_v4 = vpop.f32.mrb[94].mxu0 }
0x2e6e   :  { %v9769_v5 = vmax.f32 %v9764_v1, 0.0  ;;  %v11928_v54 = vpop.f32.mrb[95].mxu0 }
0x2e70   :  { %v9770_v6 = vpack.c.bf16 %v9769_v5, %v9769_v5 }
0x2e72   :  { %11934 = vmatmul.mubr.msk.bf16.vlgmr.msra.gmra.mrb[96].mxu0 %vm5902_vm1, %v9770_v6 }
0x2f45   :  { %v9833_v51 = vpop.f32.mrb[96].mxu0 }
0x2f46   :  { %v9834_v8 = vadd.f32 %v11095_v7, %v9833_v51  ;;  %v11935_v10 = vpop.f32.mrb[97].mxu0 }
0x2f47   :  { %v9836_v11 = vpop.f32.mrb[98].mxu0 }
0x2f48   :  { %v9839_v12 = vadd.f32 %v9834_v8, %v9584_v52  ;;  %v11936_v13 = vpop.f32.mrb[99].mxu0 }
0x2f4a   :  { %v9840_v39 = vadd.f32 %v9839_v12, %v13515_v3 }
0x2f4c   :  { %9841 = vst [vmem:[%s14281_s18] sm:$0x3] %v9840_v39 }
0x2f4d   :  { %9858 = vsyncpa [#allocation3], 1 }
0x2f4e   :  { %9859 = vsyncpa [#allocation5], 1 }
0x2f4f   :  { %9860 = vsyncpa [#allocation8], 1 }
0x2f50   :  { %9861 = vsyncpa [#allocation11], 1 }
0x2f51   :  { %9862 = vsyncpa [#allocation14], 1 }
0x2f52   :  { %9863 = vsyncpa [#allocation17], 1 }
0x2f53   :  { %9864 = vsyncpa [#allocation20], 1 }

</bundles_post_ra>
